<compile_context>
chip_gen: v6e
topology: v6e:2x2x1
jax: 0.10.0
libtpu: 0.0.40
codegen_flags: <defaults>
</compile_context>

<pallas_src>
import functools

import numpy as np
import jax
import jax.numpy as jnp
from jax import lax
from jax.experimental import pallas as pl
from jax.experimental.pallas import tpu as pltpu

CHANNELS = (32, 64, 128, 256)      # conv output channels per layer (f_dim = 256)
KSIZE, STRIDE, PAD = 4, 2, 1
LN_EPS = 1e-5


def _round_up(x, m):
    return ((x + m - 1) // m) * m


def _plan(H, W, Cin):
    """Static per-layer geometry for the in-kernel im2col.

    Layer l: input (hin, win, cin) -> output (ho, wo, cout).  The layer's
    input lives in a zero-initialised VMEM scratch of shape
    (hin + 2, wpad, cin) with the real data at rows [1, hin] and columns
    [3, 3 + win); everything else is zero (the conv's zero padding).
    The layer evaluates `wt` column slots per output row (wt >= wo + 1,
    rounded to a multiple of 8); slot j corresponds to ow = j - 1, so slot 0
    and slots > wo are garbage that gets masked to zero (they land exactly on
    the next layer's zero-padding columns).
    """
    plan = []
    hin, win, cin = H, W, Cin
    wt_prev = None
    for cout in CHANNELS:
        ho, wo = hin // 2, win // 2
        wt = _round_up(wo + 1, 8)
        wpad = 2 * wt + 2                      # bound for the strided reads
        if wt_prev is not None:
            wpad = max(wpad, wt_prev + 2)      # bound for the previous store
        plan.append(dict(hin=hin, win=win, cin=cin, ho=ho, wo=wo,
                         cout=cout, wt=wt, wpad=wpad))
        hin, win, cin, wt_prev = ho, wo, cout, wt
    return tuple(plan)


# ------------------------------ Pallas kernel --------------------------------
def _encoder_kernel(plan, x_ref,
                    w1, b1, g1, e1, w2, b2, g2, e2,
                    w3, b3, g3, e3, w4, b4, g4, e4,
                    o_ref, a1, a2, a3, a4):
    scratches = (a1, a2, a3, a4)
    weights = ((w1, b1, g1, e1), (w2, b2, g2, e2),
               (w3, b3, g3, e3), (w4, b4, g4, e4))

    # Zero the scratches: their borders are the convs' zero padding.
    for a in scratches:
        a[...] = jnp.zeros(a.shape, a.dtype)

    # Raw image block -> scaled f32 activation at rows [1, H], cols [3, 3+W).
    p0 = plan[0]
    x = x_ref[0, 0].astype(jnp.float32) * (1.0 / 255.0) - 0.5
    a1[1:1 + p0['hin'], 3:3 + p0['win'], :] = x

    for l, p in enumerate(plan):
        a_in = scratches[l]
        w_ref, b_ref, g_ref, e_ref = weights[l]
        ho, wo, wt, cin = p['ho'], p['wo'], p['wt'], p['cin']

        # -------- in-kernel im2col for the 4x4 / stride-2 / pad-1 conv ------
        evens, odds = [], []
        for kw in range(KSIZE):
            cols = a_in[:, pl.ds(kw, wt, stride=2), :]     # (hin+2, wt, cin)
            cols = cols.reshape(ho + 1, 2, wt, cin)        # split leading dim
            evens.append(cols[:, 0])                       # stored rows 0,2,4,..
            odds.append(cols[:, 1])                        # stored rows 1,3,5,..
        taps = []
        for kh in range(KSIZE):
            off = kh // 2
            for kw in range(KSIZE):
                src = evens[kw] if kh % 2 == 0 else odds[kw]
                taps.append(src[off:off + ho])             # (ho, wt, cin)
        patch = jnp.concatenate(taps, axis=-1)             # (ho, wt, 16*cin)
        patch = jnp.concatenate([patch[i] for i in range(ho)],
                                axis=0)                    # (ho*wt, 16*cin)

        # ---------- one wide-K matmul + bias + channel-LayerNorm + SiLU -----
        y = jnp.dot(patch.astype(jnp.bfloat16), w_ref[0],
                    preferred_element_type=jnp.float32)    # (ho*wt, cout)
        y = y + b_ref[0]
        u = jnp.mean(y, axis=-1, keepdims=True)
        d = y - u
        s = jnp.mean(d * d, axis=-1, keepdims=True)
        y = d * lax.rsqrt(s + LN_EPS)
        y = g_ref[0] * y + e_ref[0]
        y = y * jax.nn.sigmoid(y)

        if l < len(plan) - 1:
            # Zero garbage column slots: slot 0 is the next layer's left
            # zero-pad column, slots > wo fall in its right pad / unused area.
            slot = lax.broadcasted_iota(jnp.int32, (ho * wt, 1), 0) % wt
            y = jnp.where((slot >= 1) & (slot <= wo), y, 0.0)
            a_out = scratches[l + 1]
            for i in range(ho):
                a_out[1 + i, 2:2 + wt, :] = y[i * wt:(i + 1) * wt, :]
        else:
            for i in range(ho):
                o_ref[0, 0, i, :, :] = y[i * wt + 1:i * wt + 1 + wo, :].astype(
                    o_ref.dtype)


# ------------------------------ parameters -----------------------------------
def init_params(key, num_views, cin, channels=CHANNELS):
    # Deterministic synthetic init; shapes match the PyTorch module.
    # TODO(synk): utils.weight_init from the original repo is not available;
    # a scaled-normal init with the same tensor shapes is used instead.
    p = {}
    c_prev = cin
    for l, cout in enumerate(channels, start=1):
        key, kw_, kb_, kg_, ke_ = jax.random.split(key, 5)
        fan_in = KSIZE * KSIZE * c_prev
        p[f'w{l}'] = jax.random.normal(
            kw_, (num_views, KSIZE, KSIZE, c_prev, cout),
            jnp.float32) / np.sqrt(float(fan_in))
        p[f'b{l}'] = 0.1 * jax.random.normal(kb_, (num_views, 1, cout), jnp.float32)
        p[f'g{l}'] = 1.0 + 0.1 * jax.random.normal(kg_, (num_views, 1, cout),
                                                   jnp.float32)
        p[f'e{l}'] = 0.1 * jax.random.normal(ke_, (num_views, 1, cout), jnp.float32)
        c_prev = cout
    return p


# ------------------------------ fused forward ---------------------------------
def multi_view_cnn_encoder(obs, params):
    """obs: (B, V, C, H, W) raw pixels -> (B, V * 256 * (H//16) * (W//16))."""
    B, V, Cin, H, W = obs.shape
    assert H % 16 == 0 and W % 16 == 0
    plan = _plan(H, W, Cin)
    H4, W4 = H // 16, W // 16
    C4 = CHANNELS[-1]

    # Raw image, channels-last, one (view, batch) block per grid step.
    # Scaling happens in-kernel, so only the raw bytes cross HBM once.
    x = jnp.transpose(obs, (1, 0, 3, 4, 2)).astype(jnp.float32)   # (V,B,H,W,C)

    args = [x]
    in_specs = [pl.BlockSpec((1, 1, H, W, Cin), lambda v, b: (v, b, 0, 0, 0))]
    for l, p in enumerate(plan, start=1):
        k = KSIZE * KSIZE * p['cin']
        w = params[f'w{l}'].reshape(V, k, p['cout']).astype(jnp.bfloat16)
        args += [w, params[f'b{l}'], params[f'g{l}'], params[f'e{l}']]
        in_specs += [
            pl.BlockSpec((1, k, p['cout']), lambda v, b: (v, 0, 0)),
            pl.BlockSpec((1, 1, p['cout']), lambda v, b: (v, 0, 0)),
            pl.BlockSpec((1, 1, p['cout']), lambda v, b: (v, 0, 0)),
            pl.BlockSpec((1, 1, p['cout']), lambda v, b: (v, 0, 0)),
        ]

    out = pl.pallas_call(
        functools.partial(_encoder_kernel, plan),
        out_shape=jax.ShapeDtypeStruct((V, B, H4, W4, C4), jnp.float32),
        grid=(V, B),
        in_specs=in_specs,
        out_specs=pl.BlockSpec((1, 1, H4, W4, C4),
                               lambda v, b: (v, b, 0, 0, 0)),
        scratch_shapes=[
            pltpu.VMEM((p['hin'] + 2, p['wpad'], p['cin']), jnp.float32)
            for p in plan
        ],
        compiler_params=pltpu.CompilerParams(
            dimension_semantics=("parallel", "parallel"),
            vmem_limit_bytes=32 * 1024 * 1024),
    )(*args)

    # Match PyTorch: per-view NCHW flatten, then concat over views.
    out = jnp.transpose(out, (1, 0, 4, 2, 3))          # (B, V, C4, H4, W4)
    return out.reshape(B, V * C4 * H4 * W4)


# ------------------------- pure-JAX reference (checks) ------------------------
def _im2col_ref(x, k=KSIZE, stride=STRIDE, pad=PAD):
    N, H, W, C = x.shape
    xp = jnp.pad(x, ((0, 0), (pad, pad), (pad, pad), (0, 0)))
    Ho = (H + 2 * pad - k) // stride + 1
    Wo = (W + 2 * pad - k) // stride + 1
    cols = []
    for kh in range(k):
        for kw in range(k):
            cols.append(xp[:, kh:kh + stride * Ho:stride,
                           kw:kw + stride * Wo:stride, :])
    patches = jnp.stack(cols, axis=3)                  # (N, Ho, Wo, k*k, C)
    return patches.reshape(N * Ho * Wo, k * k * C), Ho, Wo


def reference_encoder(obs, params):
    B, V, Cin, H, W = obs.shape
    hs = []
    for v in range(V):
        h = jnp.transpose(obs[:, v], (0, 2, 3, 1)).astype(jnp.float32) / 255.0 - 0.5
        c_prev = Cin
        for l, cout in enumerate(CHANNELS, start=1):
            patches, Ho, Wo = _im2col_ref(h)
            wflat = params[f'w{l}'][v].reshape(KSIZE * KSIZE * c_prev, cout)
            y = jnp.dot(patches.astype(jnp.bfloat16),
                        wflat.astype(jnp.bfloat16),
                        preferred_element_type=jnp.float32)
            y = y + params[f'b{l}'][v]
            u = jnp.mean(y, axis=-1, keepdims=True)
            d = y - u
            s = jnp.mean(d * d, axis=-1, keepdims=True)
            y = d * lax.rsqrt(s + LN_EPS)
            y = params[f'g{l}'][v] * y + params[f'e{l}'][v]
            y = y * jax.nn.sigmoid(y)
            h = y.reshape(B, Ho, Wo, cout)
            c_prev = cout
        hs.append(jnp.transpose(h, (0, 3, 1, 2)).reshape(B, -1))
    return jnp.concatenate(hs, axis=-1)


# --------------------------------- main ---------------------------------------
if __name__ == "__main__":
    B, V, Cin, H, W = 2, 2, 4, 16, 16          # small obs_shape = (V, C, H, W)
    key = jax.random.PRNGKey(0)
    obs = jax.random.uniform(key, (B, V, Cin, H, W), minval=0.0, maxval=255.0,
                             dtype=jnp.float32)
    params = init_params(jax.random.PRNGKey(1), num_views=V, cin=Cin)

    encoder = jax.jit(multi_view_cnn_encoder)
    out = jax.block_until_ready(encoder(obs, params))

    H4, W4 = H // 16, W // 16
    assert out.shape == (B, V * CHANNELS[-1] * H4 * W4), out.shape

    ref = jax.block_until_ready(reference_encoder(obs, params))
    err = float(jnp.max(jnp.abs(out - ref)))
    assert err < 5e-2, f"max abs err vs reference: {err}"

    print("KERNEL_OK")
</pallas_src>

<mosaic_0001>
module attributes {stable_mosaic.version = 11 : i64} {
  func.func @_encoder_kernel(%arg0: i32, %arg1: i32, %arg2: memref<1x1x16x16x4xf32, #tpu.memory_space<vmem>>, %arg3: memref<1x64x32xbf16, #tpu.memory_space<vmem>>, %arg4: memref<1x1x32xf32, #tpu.memory_space<vmem>>, %arg5: memref<1x1x32xf32, #tpu.memory_space<vmem>>, %arg6: memref<1x1x32xf32, #tpu.memory_space<vmem>>, %arg7: memref<1x512x64xbf16, #tpu.memory_space<vmem>>, %arg8: memref<1x1x64xf32, #tpu.memory_space<vmem>>, %arg9: memref<1x1x64xf32, #tpu.memory_space<vmem>>, %arg10: memref<1x1x64xf32, #tpu.memory_space<vmem>>, %arg11: memref<1x1024x128xbf16, #tpu.memory_space<vmem>>, %arg12: memref<1x1x128xf32, #tpu.memory_space<vmem>>, %arg13: memref<1x1x128xf32, #tpu.memory_space<vmem>>, %arg14: memref<1x1x128xf32, #tpu.memory_space<vmem>>, %arg15: memref<1x2048x256xbf16, #tpu.memory_space<vmem>>, %arg16: memref<1x1x256xf32, #tpu.memory_space<vmem>>, %arg17: memref<1x1x256xf32, #tpu.memory_space<vmem>>, %arg18: memref<1x1x256xf32, #tpu.memory_space<vmem>>, %arg19: memref<1x1x1x1x256xf32, #tpu.memory_space<vmem>>, %arg20: memref<18x34x4xf32, #tpu.memory_space<vmem>>, %arg21: memref<10x18x32xf32, #tpu.memory_space<vmem>>, %arg22: memref<6x18x64xf32, #tpu.memory_space<vmem>>, %arg23: memref<4x18x128xf32, #tpu.memory_space<vmem>>) attributes {dimension_semantics = [#tpu.dimension_semantics<parallel>, #tpu.dimension_semantics<parallel>], iteration_bounds = array<i64: 2, 2>, scalar_prefetch = 0 : i64, scratch_operands = 4 : i64, tpu.core_type = #tpu.core_type<tc>, window_params = [{transform_indices = @transform_0, window_bounds = array<i64: 1, 1, 16, 16, 4>}, {transform_indices = @transform_1, window_bounds = array<i64: 1, 64, 32>}, {transform_indices = @transform_2, window_bounds = array<i64: 1, 1, 32>}, {transform_indices = @transform_3, window_bounds = array<i64: 1, 1, 32>}, {transform_indices = @transform_4, window_bounds = array<i64: 1, 1, 32>}, {transform_indices = @transform_5, window_bounds = array<i64: 1, 512, 64>}, {transform_indices = @transform_6, window_bounds = array<i64: 1, 1, 64>}, {transform_indices = @transform_7, window_bounds = array<i64: 1, 1, 64>}, {transform_indices = @transform_8, window_bounds = array<i64: 1, 1, 64>}, {transform_indices = @transform_9, window_bounds = array<i64: 1, 1024, 128>}, {transform_indices = @transform_10, window_bounds = array<i64: 1, 1, 128>}, {transform_indices = @transform_11, window_bounds = array<i64: 1, 1, 128>}, {transform_indices = @transform_12, window_bounds = array<i64: 1, 1, 128>}, {transform_indices = @transform_13, window_bounds = array<i64: 1, 2048, 256>}, {transform_indices = @transform_14, window_bounds = array<i64: 1, 1, 256>}, {transform_indices = @transform_15, window_bounds = array<i64: 1, 1, 256>}, {transform_indices = @transform_16, window_bounds = array<i64: 1, 1, 256>}, {transform_indices = @transform_17, window_bounds = array<i64: 1, 1, 1, 1, 256>}]} {
    %cst = arith.constant 0.000000e+00 : f32
    %0 = vector.broadcast %cst : f32 to vector<18x34x4xf32>
    %c0 = arith.constant 0 : index
    %c0_0 = arith.constant 0 : index
    %c0_1 = arith.constant 0 : index
    %1 = vector.load %arg20[%c0, %c0_0, %c0_1] : memref<18x34x4xf32, #tpu.memory_space<vmem>>, vector<18x34x4xf32>
    tpu.vector_store %arg20[%c0, %c0_0, %c0_1], %0 {strides = array<i32>} : memref<18x34x4xf32, #tpu.memory_space<vmem>>, vector<18x34x4xf32>,
    %cst_2 = arith.constant 0.000000e+00 : f32
    %2 = vector.broadcast %cst_2 : f32 to vector<10x18x32xf32>
    %c0_3 = arith.constant 0 : index
    %c0_4 = arith.constant 0 : index
    %c0_5 = arith.constant 0 : index
    %3 = vector.load %arg21[%c0_3, %c0_4, %c0_5] : memref<10x18x32xf32, #tpu.memory_space<vmem>>, vector<10x18x32xf32>
    tpu.vector_store %arg21[%c0_3, %c0_4, %c0_5], %2 {strides = array<i32>} : memref<10x18x32xf32, #tpu.memory_space<vmem>>, vector<10x18x32xf32>,
    %cst_6 = arith.constant 0.000000e+00 : f32
    %4 = vector.broadcast %cst_6 : f32 to vector<6x18x64xf32>
    %c0_7 = arith.constant 0 : index
    %c0_8 = arith.constant 0 : index
    %c0_9 = arith.constant 0 : index
    %5 = vector.load %arg22[%c0_7, %c0_8, %c0_9] : memref<6x18x64xf32, #tpu.memory_space<vmem>>, vector<6x18x64xf32>
    tpu.vector_store %arg22[%c0_7, %c0_8, %c0_9], %4 {strides = array<i32>} : memref<6x18x64xf32, #tpu.memory_space<vmem>>, vector<6x18x64xf32>,
    %cst_10 = arith.constant 0.000000e+00 : f32
    %6 = vector.broadcast %cst_10 : f32 to vector<4x18x128xf32>
    %c0_11 = arith.constant 0 : index
    %c0_12 = arith.constant 0 : index
    %c0_13 = arith.constant 0 : index
    %7 = vector.load %arg23[%c0_11, %c0_12, %c0_13] : memref<4x18x128xf32, #tpu.memory_space<vmem>>, vector<4x18x128xf32>
    tpu.vector_store %arg23[%c0_11, %c0_12, %c0_13], %6 {strides = array<i32>} : memref<4x18x128xf32, #tpu.memory_space<vmem>>, vector<4x18x128xf32>,
    %c0_14 = arith.constant 0 : index
    %c0_15 = arith.constant 0 : index
    %c0_16 = arith.constant 0 : index
    %c0_17 = arith.constant 0 : index
    %c0_18 = arith.constant 0 : index
    %8 = vector.load %arg2[%c0_14, %c0_15, %c0_16, %c0_17, %c0_18] : memref<1x1x16x16x4xf32, #tpu.memory_space<vmem>>, vector<1x1x16x16x4xf32>
    %9 = vector.shape_cast %8 : vector<1x1x16x16x4xf32> to vector<16x16x4xf32>
    %cst_19 = arith.constant 0.00392156886 : f32
    %10 = vector.broadcast %cst_19 : f32 to vector<16x16x4xf32>
    %11 = arith.mulf %9, %10 : vector<16x16x4xf32>
    %cst_20 = arith.constant 5.000000e-01 : f32
    %12 = vector.broadcast %cst_20 : f32 to vector<16x16x4xf32>
    %13 = arith.subf %11, %12 : vector<16x16x4xf32>
    %c1 = arith.constant 1 : index
    %c3 = arith.constant 3 : index
    %c0_21 = arith.constant 0 : index
    %14 = vector.load %arg20[%c1, %c3, %c0_21] : memref<18x34x4xf32, #tpu.memory_space<vmem>>, vector<16x16x4xf32>
    tpu.vector_store %arg20[%c1, %c3, %c0_21], %13 {strides = array<i32>} : memref<18x34x4xf32, #tpu.memory_space<vmem>>, vector<16x16x4xf32>,
    %c0_22 = arith.constant 0 : index
    %c0_23 = arith.constant 0 : index
    %c0_24 = arith.constant 0 : index
    %15 = tpu.strided_load %arg20[%c0_22, %c0_23, %c0_24] {strides = array<i32: 1, 2, 1>} : memref<18x34x4xf32, #tpu.memory_space<vmem>>, vector<18x16x4xf32>
    %16 = vector.shape_cast %15 : vector<18x16x4xf32> to vector<9x2x16x4xf32>
    %17 = vector.extract_strided_slice %16 {offsets = [0, 0, 0, 0], sizes = [9, 1, 16, 4], strides = [1, 1, 1, 1]} : vector<9x2x16x4xf32> to vector<9x1x16x4xf32>
    %18 = vector.shape_cast %17 : vector<9x1x16x4xf32> to vector<9x16x4xf32>
    %19 = vector.extract_strided_slice %16 {offsets = [0, 1, 0, 0], sizes = [9, 1, 16, 4], strides = [1, 1, 1, 1]} : vector<9x2x16x4xf32> to vector<9x1x16x4xf32>
    %20 = vector.shape_cast %19 : vector<9x1x16x4xf32> to vector<9x16x4xf32>
    %c0_25 = arith.constant 0 : index
    %c1_26 = arith.constant 1 : index
    %c0_27 = arith.constant 0 : index
    %21 = tpu.strided_load %arg20[%c0_25, %c1_26, %c0_27] {strides = array<i32: 1, 2, 1>} : memref<18x34x4xf32, #tpu.memory_space<vmem>>, vector<18x16x4xf32>
    %22 = vector.shape_cast %21 : vector<18x16x4xf32> to vector<9x2x16x4xf32>
    %23 = vector.extract_strided_slice %22 {offsets = [0, 0, 0, 0], sizes = [9, 1, 16, 4], strides = [1, 1, 1, 1]} : vector<9x2x16x4xf32> to vector<9x1x16x4xf32>
    %24 = vector.shape_cast %23 : vector<9x1x16x4xf32> to vector<9x16x4xf32>
    %25 = vector.extract_strided_slice %22 {offsets = [0, 1, 0, 0], sizes = [9, 1, 16, 4], strides = [1, 1, 1, 1]} : vector<9x2x16x4xf32> to vector<9x1x16x4xf32>
    %26 = vector.shape_cast %25 : vector<9x1x16x4xf32> to vector<9x16x4xf32>
    %c0_28 = arith.constant 0 : index
    %c2 = arith.constant 2 : index
    %c0_29 = arith.constant 0 : index
    %27 = tpu.strided_load %arg20[%c0_28, %c2, %c0_29] {strides = array<i32: 1, 2, 1>} : memref<18x34x4xf32, #tpu.memory_space<vmem>>, vector<18x16x4xf32>
    %28 = vector.shape_cast %27 : vector<18x16x4xf32> to vector<9x2x16x4xf32>
    %29 = vector.extract_strided_slice %28 {offsets = [0, 0, 0, 0], sizes = [9, 1, 16, 4], strides = [1, 1, 1, 1]} : vector<9x2x16x4xf32> to vector<9x1x16x4xf32>
    %30 = vector.shape_cast %29 : vector<9x1x16x4xf32> to vector<9x16x4xf32>
    %31 = vector.extract_strided_slice %28 {offsets = [0, 1, 0, 0], sizes = [9, 1, 16, 4], strides = [1, 1, 1, 1]} : vector<9x2x16x4xf32> to vector<9x1x16x4xf32>
    %32 = vector.shape_cast %31 : vector<9x1x16x4xf32> to vector<9x16x4xf32>
    %c0_30 = arith.constant 0 : index
    %c3_31 = arith.constant 3 : index
    %c0_32 = arith.constant 0 : index
    %33 = tpu.strided_load %arg20[%c0_30, %c3_31, %c0_32] {strides = array<i32: 1, 2, 1>} : memref<18x34x4xf32, #tpu.memory_space<vmem>>, vector<18x16x4xf32>
    %34 = vector.shape_cast %33 : vector<18x16x4xf32> to vector<9x2x16x4xf32>
    %35 = vector.extract_strided_slice %34 {offsets = [0, 0, 0, 0], sizes = [9, 1, 16, 4], strides = [1, 1, 1, 1]} : vector<9x2x16x4xf32> to vector<9x1x16x4xf32>
    %36 = vector.shape_cast %35 : vector<9x1x16x4xf32> to vector<9x16x4xf32>
    %37 = vector.extract_strided_slice %34 {offsets = [0, 1, 0, 0], sizes = [9, 1, 16, 4], strides = [1, 1, 1, 1]} : vector<9x2x16x4xf32> to vector<9x1x16x4xf32>
    %38 = vector.shape_cast %37 : vector<9x1x16x4xf32> to vector<9x16x4xf32>
    %39 = vector.extract_strided_slice %18 {offsets = [0, 0, 0], sizes = [8, 16, 4], strides = [1, 1, 1]} : vector<9x16x4xf32> to vector<8x16x4xf32>
    %40 = vector.extract_strided_slice %24 {offsets = [0, 0, 0], sizes = [8, 16, 4], strides = [1, 1, 1]} : vector<9x16x4xf32> to vector<8x16x4xf32>
    %41 = vector.extract_strided_slice %30 {offsets = [0, 0, 0], sizes = [8, 16, 4], strides = [1, 1, 1]} : vector<9x16x4xf32> to vector<8x16x4xf32>
    %42 = vector.extract_strided_slice %36 {offsets = [0, 0, 0], sizes = [8, 16, 4], strides = [1, 1, 1]} : vector<9x16x4xf32> to vector<8x16x4xf32>
    %43 = vector.extract_strided_slice %20 {offsets = [0, 0, 0], sizes = [8, 16, 4], strides = [1, 1, 1]} : vector<9x16x4xf32> to vector<8x16x4xf32>
    %44 = vector.extract_strided_slice %26 {offsets = [0, 0, 0], sizes = [8, 16, 4], strides = [1, 1, 1]} : vector<9x16x4xf32> to vector<8x16x4xf32>
    %45 = vector.extract_strided_slice %32 {offsets = [0, 0, 0], sizes = [8, 16, 4], strides = [1, 1, 1]} : vector<9x16x4xf32> to vector<8x16x4xf32>
    %46 = vector.extract_strided_slice %38 {offsets = [0, 0, 0], sizes = [8, 16, 4], strides = [1, 1, 1]} : vector<9x16x4xf32> to vector<8x16x4xf32>
    %47 = vector.extract_strided_slice %18 {offsets = [1, 0, 0], sizes = [8, 16, 4], strides = [1, 1, 1]} : vector<9x16x4xf32> to vector<8x16x4xf32>
    %48 = vector.extract_strided_slice %24 {offsets = [1, 0, 0], sizes = [8, 16, 4], strides = [1, 1, 1]} : vector<9x16x4xf32> to vector<8x16x4xf32>
    %49 = vector.extract_strided_slice %30 {offsets = [1, 0, 0], sizes = [8, 16, 4], strides = [1, 1, 1]} : vector<9x16x4xf32> to vector<8x16x4xf32>
    %50 = vector.extract_strided_slice %36 {offsets = [1, 0, 0], sizes = [8, 16, 4], strides = [1, 1, 1]} : vector<9x16x4xf32> to vector<8x16x4xf32>
    %51 = vector.extract_strided_slice %20 {offsets = [1, 0, 0], sizes = [8, 16, 4], strides = [1, 1, 1]} : vector<9x16x4xf32> to vector<8x16x4xf32>
    %52 = vector.extract_strided_slice %26 {offsets = [1, 0, 0], sizes = [8, 16, 4], strides = [1, 1, 1]} : vector<9x16x4xf32> to vector<8x16x4xf32>
    %53 = vector.extract_strided_slice %32 {offsets = [1, 0, 0], sizes = [8, 16, 4], strides = [1, 1, 1]} : vector<9x16x4xf32> to vector<8x16x4xf32>
    %54 = vector.extract_strided_slice %38 {offsets = [1, 0, 0], sizes = [8, 16, 4], strides = [1, 1, 1]} : vector<9x16x4xf32> to vector<8x16x4xf32>
    %55 = tpu.concatenate %39, %40, %41, %42, %43, %44, %45, %46, %47, %48, %49, %50, %51, %52, %53, %54 in 2 : vector<8x16x4xf32>, vector<8x16x4xf32>, vector<8x16x4xf32>, vector<8x16x4xf32>, vector<8x16x4xf32>, vector<8x16x4xf32>, vector<8x16x4xf32>, vector<8x16x4xf32>, vector<8x16x4xf32>, vector<8x16x4xf32>, vector<8x16x4xf32>, vector<8x16x4xf32>, vector<8x16x4xf32>, vector<8x16x4xf32>, vector<8x16x4xf32>, vector<8x16x4xf32> -> vector<8x16x64xf32>
    %56 = vector.extract_strided_slice %55 {offsets = [0, 0, 0], sizes = [1, 16, 64], strides = [1, 1, 1]} : vector<8x16x64xf32> to vector<1x16x64xf32>
    %57 = vector.shape_cast %56 : vector<1x16x64xf32> to vector<16x64xf32>
    %58 = vector.extract_strided_slice %55 {offsets = [1, 0, 0], sizes = [1, 16, 64], strides = [1, 1, 1]} : vector<8x16x64xf32> to vector<1x16x64xf32>
    %59 = vector.shape_cast %58 : vector<1x16x64xf32> to vector<16x64xf32>
    %60 = vector.extract_strided_slice %55 {offsets = [2, 0, 0], sizes = [1, 16, 64], strides = [1, 1, 1]} : vector<8x16x64xf32> to vector<1x16x64xf32>
    %61 = vector.shape_cast %60 : vector<1x16x64xf32> to vector<16x64xf32>
    %62 = vector.extract_strided_slice %55 {offsets = [3, 0, 0], sizes = [1, 16, 64], strides = [1, 1, 1]} : vector<8x16x64xf32> to vector<1x16x64xf32>
    %63 = vector.shape_cast %62 : vector<1x16x64xf32> to vector<16x64xf32>
    %64 = vector.extract_strided_slice %55 {offsets = [4, 0, 0], sizes = [1, 16, 64], strides = [1, 1, 1]} : vector<8x16x64xf32> to vector<1x16x64xf32>
    %65 = vector.shape_cast %64 : vector<1x16x64xf32> to vector<16x64xf32>
    %66 = vector.extract_strided_slice %55 {offsets = [5, 0, 0], sizes = [1, 16, 64], strides = [1, 1, 1]} : vector<8x16x64xf32> to vector<1x16x64xf32>
    %67 = vector.shape_cast %66 : vector<1x16x64xf32> to vector<16x64xf32>
    %68 = vector.extract_strided_slice %55 {offsets = [6, 0, 0], sizes = [1, 16, 64], strides = [1, 1, 1]} : vector<8x16x64xf32> to vector<1x16x64xf32>
    %69 = vector.shape_cast %68 : vector<1x16x64xf32> to vector<16x64xf32>
    %70 = vector.extract_strided_slice %55 {offsets = [7, 0, 0], sizes = [1, 16, 64], strides = [1, 1, 1]} : vector<8x16x64xf32> to vector<1x16x64xf32>
    %71 = vector.shape_cast %70 : vector<1x16x64xf32> to vector<16x64xf32>
    %72 = tpu.concatenate %57, %59, %61, %63, %65, %67, %69, %71 in 0 : vector<16x64xf32>, vector<16x64xf32>, vector<16x64xf32>, vector<16x64xf32>, vector<16x64xf32>, vector<16x64xf32>, vector<16x64xf32>, vector<16x64xf32> -> vector<128x64xf32>
    %73 = arith.truncf %72 : vector<128x64xf32> to vector<128x64xbf16>
    %c0_33 = arith.constant 0 : index
    %c0_34 = arith.constant 0 : index
    %c0_35 = arith.constant 0 : index
    %74 = vector.load %arg3[%c0_33, %c0_34, %c0_35] : memref<1x64x32xbf16, #tpu.memory_space<vmem>>, vector<1x64x32xbf16>
    %75 = vector.shape_cast %74 : vector<1x64x32xbf16> to vector<64x32xbf16>
    %cst_36 = arith.constant dense<0.000000e+00> : vector<128x32xf32>
    %76 = tpu.matmul %73, %75, %cst_36 {dimension_numbers = #tpu.dot_dimension_numbers<[1], [0], [0], [1], [0, 0, 1, 1], [], []>} : vector<128x64xbf16>, vector<64x32xbf16>, vector<128x32xf32> -> vector<128x32xf32>
    %c0_37 = arith.constant 0 : index
    %c0_38 = arith.constant 0 : index
    %c0_39 = arith.constant 0 : index
    %77 = vector.load %arg4[%c0_37, %c0_38, %c0_39] : memref<1x1x32xf32, #tpu.memory_space<vmem>>, vector<1x1x32xf32>
    %78 = vector.shape_cast %77 : vector<1x1x32xf32> to vector<1x32xf32>
    %79 = vector.broadcast %78 : vector<1x32xf32> to vector<128x32xf32>
    %80 = arith.addf %76, %79 : vector<128x32xf32>
    %cst_40 = arith.constant dense<0.000000e+00> : vector<128xf32>
    %81 = vector.multi_reduction <add>, %80, %cst_40 [1] : vector<128x32xf32> to vector<128xf32>
    %82 = vector.shape_cast %81 : vector<128xf32> to vector<128x1xf32>
    %cst_41 = arith.constant 3.200000e+01 : f32
    %83 = vector.broadcast %cst_41 : f32 to vector<128x1xf32>
    %84 = arith.divf %82, %83 : vector<128x1xf32>
    %85 = vector.broadcast %84 : vector<128x1xf32> to vector<128x32xf32>
    %86 = arith.subf %80, %85 : vector<128x32xf32>
    %87 = arith.mulf %86, %86 : vector<128x32xf32>
    %cst_42 = arith.constant dense<0.000000e+00> : vector<128xf32>
    %88 = vector.multi_reduction <add>, %87, %cst_42 [1] : vector<128x32xf32> to vector<128xf32>
    %89 = vector.shape_cast %88 : vector<128xf32> to vector<128x1xf32>
    %cst_43 = arith.constant 3.200000e+01 : f32
    %90 = vector.broadcast %cst_43 : f32 to vector<128x1xf32>
    %91 = arith.divf %89, %90 : vector<128x1xf32>
    %cst_44 = arith.constant 9.99999974E-6 : f32
    %92 = vector.broadcast %cst_44 : f32 to vector<128x1xf32>
    %93 = arith.addf %91, %92 : vector<128x1xf32>
    %94 = math.rsqrt %93 : vector<128x1xf32>
    %95 = vector.broadcast %94 : vector<128x1xf32> to vector<128x32xf32>
    %96 = arith.mulf %86, %95 : vector<128x32xf32>
    %c0_45 = arith.constant 0 : index
    %c0_46 = arith.constant 0 : index
    %c0_47 = arith.constant 0 : index
    %97 = vector.load %arg5[%c0_45, %c0_46, %c0_47] : memref<1x1x32xf32, #tpu.memory_space<vmem>>, vector<1x1x32xf32>
    %98 = vector.shape_cast %97 : vector<1x1x32xf32> to vector<1x32xf32>
    %99 = vector.broadcast %98 : vector<1x32xf32> to vector<128x32xf32>
    %100 = arith.mulf %99, %96 : vector<128x32xf32>
    %c0_48 = arith.constant 0 : index
    %c0_49 = arith.constant 0 : index
    %c0_50 = arith.constant 0 : index
    %101 = vector.load %arg6[%c0_48, %c0_49, %c0_50] : memref<1x1x32xf32, #tpu.memory_space<vmem>>, vector<1x1x32xf32>
    %102 = vector.shape_cast %101 : vector<1x1x32xf32> to vector<1x32xf32>
    %103 = vector.broadcast %102 : vector<1x32xf32> to vector<128x32xf32>
    %104 = arith.addf %100, %103 : vector<128x32xf32>
    %105 = arith.negf %104 : vector<128x32xf32>
    %106 = math.exp %105 : vector<128x32xf32>
    %cst_51 = arith.constant 1.000000e+00 : f32
    %107 = vector.broadcast %cst_51 : f32 to vector<128x32xf32>
    %108 = arith.addf %107, %106 : vector<128x32xf32>
    %109 = arith.divf %107, %108 : vector<128x32xf32>
    %110 = arith.mulf %104, %109 : vector<128x32xf32>
    %111 = tpu.iota {dimensions = array<i32: 0>} : vector<128x1xi32>
    %c16_i32 = arith.constant 16 : i32
    %c0_i32 = arith.constant 0 : i32
    %112 = arith.cmpi eq, %c16_i32, %c0_i32 : i32
    %c1_i32 = arith.constant 1 : i32
    %113 = arith.select %112, %c1_i32, %c16_i32 : i32
    %114 = vector.broadcast %113 : i32 to vector<128x1xi32>
    %115 = arith.remsi %111, %114 : vector<128x1xi32>
    %c0_i32_52 = arith.constant 0 : i32
    %116 = vector.broadcast %c0_i32_52 : i32 to vector<128x1xi32>
    %117 = arith.cmpi ne, %115, %116 : vector<128x1xi32>
    %c0_i32_53 = arith.constant 0 : i32
    %118 = vector.broadcast %c0_i32_53 : i32 to vector<128x1xi32>
    %119 = arith.cmpi slt, %115, %118 : vector<128x1xi32>
    %c0_i32_54 = arith.constant 0 : i32
    %120 = arith.cmpi slt, %113, %c0_i32_54 : i32
    %121 = vector.broadcast %120 : i1 to vector<128x1xi1>
    %122 = vector.broadcast %121 : vector<128x1xi1> to vector<128x1xi1>
    %123 = arith.xori %119, %122 : vector<128x1xi1>
    %124 = arith.andi %123, %117 : vector<128x1xi1>
    %125 = vector.broadcast %113 : i32 to vector<128x1xi32>
    %126 = arith.addi %115, %125 : vector<128x1xi32>
    %127 = arith.select %124, %126, %115 : vector<128x1xi1>, vector<128x1xi32>
    %c1_i32_55 = arith.constant 1 : i32
    %128 = vector.broadcast %c1_i32_55 : i32 to vector<128x1xi32>
    %129 = arith.cmpi sge, %127, %128 : vector<128x1xi32>
    %c8_i32 = arith.constant 8 : i32
    %130 = vector.broadcast %c8_i32 : i32 to vector<128x1xi32>
    %131 = arith.cmpi sle, %127, %130 : vector<128x1xi32>
    %132 = arith.andi %129, %131 : vector<128x1xi1>
    %cst_56 = arith.constant 0.000000e+00 : f32
    %133 = vector.shape_cast %132 : vector<128x1xi1> to vector<128x1xi1>
    %134 = vector.broadcast %133 : vector<128x1xi1> to vector<128x32xi1>
    %135 = vector.broadcast %cst_56 : f32 to vector<128x32xf32>
    %136 = arith.select %134, %110, %135 : vector<128x32xi1>, vector<128x32xf32>
    %137 = vector.extract_strided_slice %136 {offsets = [0, 0], sizes = [16, 32], strides = [1, 1]} : vector<128x32xf32> to vector<16x32xf32>
    %c1_57 = arith.constant 1 : index
    %c2_58 = arith.constant 2 : index
    %c0_59 = arith.constant 0 : index
    %138 = vector.load %arg21[%c1_57, %c2_58, %c0_59] : memref<10x18x32xf32, #tpu.memory_space<vmem>>, vector<1x16x32xf32>
    %139 = vector.shape_cast %138 : vector<1x16x32xf32> to vector<16x32xf32>
    %140 = vector.shape_cast %137 : vector<16x32xf32> to vector<1x16x32xf32>
    tpu.vector_store %arg21[%c1_57, %c2_58, %c0_59], %140 {strides = array<i32>} : memref<10x18x32xf32, #tpu.memory_space<vmem>>, vector<1x16x32xf32>,
    %141 = vector.extract_strided_slice %136 {offsets = [16, 0], sizes = [16, 32], strides = [1, 1]} : vector<128x32xf32> to vector<16x32xf32>
    %c2_60 = arith.constant 2 : index
    %c2_61 = arith.constant 2 : index
    %c0_62 = arith.constant 0 : index
    %142 = vector.load %arg21[%c2_60, %c2_61, %c0_62] : memref<10x18x32xf32, #tpu.memory_space<vmem>>, vector<1x16x32xf32>
    %143 = vector.shape_cast %142 : vector<1x16x32xf32> to vector<16x32xf32>
    %144 = vector.shape_cast %141 : vector<16x32xf32> to vector<1x16x32xf32>
    tpu.vector_store %arg21[%c2_60, %c2_61, %c0_62], %144 {strides = array<i32>} : memref<10x18x32xf32, #tpu.memory_space<vmem>>, vector<1x16x32xf32>,
    %145 = vector.extract_strided_slice %136 {offsets = [32, 0], sizes = [16, 32], strides = [1, 1]} : vector<128x32xf32> to vector<16x32xf32>
    %c3_63 = arith.constant 3 : index
    %c2_64 = arith.constant 2 : index
    %c0_65 = arith.constant 0 : index
    %146 = vector.load %arg21[%c3_63, %c2_64, %c0_65] : memref<10x18x32xf32, #tpu.memory_space<vmem>>, vector<1x16x32xf32>
    %147 = vector.shape_cast %146 : vector<1x16x32xf32> to vector<16x32xf32>
    %148 = vector.shape_cast %145 : vector<16x32xf32> to vector<1x16x32xf32>
    tpu.vector_store %arg21[%c3_63, %c2_64, %c0_65], %148 {strides = array<i32>} : memref<10x18x32xf32, #tpu.memory_space<vmem>>, vector<1x16x32xf32>,
    %149 = vector.extract_strided_slice %136 {offsets = [48, 0], sizes = [16, 32], strides = [1, 1]} : vector<128x32xf32> to vector<16x32xf32>
    %c4 = arith.constant 4 : index
    %c2_66 = arith.constant 2 : index
    %c0_67 = arith.constant 0 : index
    %150 = vector.load %arg21[%c4, %c2_66, %c0_67] : memref<10x18x32xf32, #tpu.memory_space<vmem>>, vector<1x16x32xf32>
    %151 = vector.shape_cast %150 : vector<1x16x32xf32> to vector<16x32xf32>
    %152 = vector.shape_cast %149 : vector<16x32xf32> to vector<1x16x32xf32>
    tpu.vector_store %arg21[%c4, %c2_66, %c0_67], %152 {strides = array<i32>} : memref<10x18x32xf32, #tpu.memory_space<vmem>>, vector<1x16x32xf32>,
    %153 = vector.extract_strided_slice %136 {offsets = [64, 0], sizes = [16, 32], strides = [1, 1]} : vector<128x32xf32> to vector<16x32xf32>
    %c5 = arith.constant 5 : index
    %c2_68 = arith.constant 2 : index
    %c0_69 = arith.constant 0 : index
    %154 = vector.load %arg21[%c5, %c2_68, %c0_69] : memref<10x18x32xf32, #tpu.memory_space<vmem>>, vector<1x16x32xf32>
    %155 = vector.shape_cast %154 : vector<1x16x32xf32> to vector<16x32xf32>
    %156 = vector.shape_cast %153 : vector<16x32xf32> to vector<1x16x32xf32>
    tpu.vector_store %arg21[%c5, %c2_68, %c0_69], %156 {strides = array<i32>} : memref<10x18x32xf32, #tpu.memory_space<vmem>>, vector<1x16x32xf32>,
    %157 = vector.extract_strided_slice %136 {offsets = [80, 0], sizes = [16, 32], strides = [1, 1]} : vector<128x32xf32> to vector<16x32xf32>
    %c6 = arith.constant 6 : index
    %c2_70 = arith.constant 2 : index
    %c0_71 = arith.constant 0 : index
    %158 = vector.load %arg21[%c6, %c2_70, %c0_71] : memref<10x18x32xf32, #tpu.memory_space<vmem>>, vector<1x16x32xf32>
    %159 = vector.shape_cast %158 : vector<1x16x32xf32> to vector<16x32xf32>
    %160 = vector.shape_cast %157 : vector<16x32xf32> to vector<1x16x32xf32>
    tpu.vector_store %arg21[%c6, %c2_70, %c0_71], %160 {strides = array<i32>} : memref<10x18x32xf32, #tpu.memory_space<vmem>>, vector<1x16x32xf32>,
    %161 = vector.extract_strided_slice %136 {offsets = [96, 0], sizes = [16, 32], strides = [1, 1]} : vector<128x32xf32> to vector<16x32xf32>
    %c7 = arith.constant 7 : index
    %c2_72 = arith.constant 2 : index
    %c0_73 = arith.constant 0 : index
    %162 = vector.load %arg21[%c7, %c2_72, %c0_73] : memref<10x18x32xf32, #tpu.memory_space<vmem>>, vector<1x16x32xf32>
    %163 = vector.shape_cast %162 : vector<1x16x32xf32> to vector<16x32xf32>
    %164 = vector.shape_cast %161 : vector<16x32xf32> to vector<1x16x32xf32>
    tpu.vector_store %arg21[%c7, %c2_72, %c0_73], %164 {strides = array<i32>} : memref<10x18x32xf32, #tpu.memory_space<vmem>>, vector<1x16x32xf32>,
    %165 = vector.extract_strided_slice %136 {offsets = [112, 0], sizes = [16, 32], strides = [1, 1]} : vector<128x32xf32> to vector<16x32xf32>
    %c8 = arith.constant 8 : index
    %c2_74 = arith.constant 2 : index
    %c0_75 = arith.constant 0 : index
    %166 = vector.load %arg21[%c8, %c2_74, %c0_75] : memref<10x18x32xf32, #tpu.memory_space<vmem>>, vector<1x16x32xf32>
    %167 = vector.shape_cast %166 : vector<1x16x32xf32> to vector<16x32xf32>
    %168 = vector.shape_cast %165 : vector<16x32xf32> to vector<1x16x32xf32>
    tpu.vector_store %arg21[%c8, %c2_74, %c0_75], %168 {strides = array<i32>} : memref<10x18x32xf32, #tpu.memory_space<vmem>>, vector<1x16x32xf32>,
    %c0_76 = arith.constant 0 : index
    %c0_77 = arith.constant 0 : index
    %c0_78 = arith.constant 0 : index
    %169 = tpu.strided_load %arg21[%c0_76, %c0_77, %c0_78] {strides = array<i32: 1, 2, 1>} : memref<10x18x32xf32, #tpu.memory_space<vmem>>, vector<10x8x32xf32>
    %170 = vector.shape_cast %169 : vector<10x8x32xf32> to vector<5x2x8x32xf32>
    %171 = vector.extract_strided_slice %170 {offsets = [0, 0, 0, 0], sizes = [5, 1, 8, 32], strides = [1, 1, 1, 1]} : vector<5x2x8x32xf32> to vector<5x1x8x32xf32>
    %172 = vector.shape_cast %171 : vector<5x1x8x32xf32> to vector<5x8x32xf32>
    %173 = vector.extract_strided_slice %170 {offsets = [0, 1, 0, 0], sizes = [5, 1, 8, 32], strides = [1, 1, 1, 1]} : vector<5x2x8x32xf32> to vector<5x1x8x32xf32>
    %174 = vector.shape_cast %173 : vector<5x1x8x32xf32> to vector<5x8x32xf32>
    %c0_79 = arith.constant 0 : index
    %c1_80 = arith.constant 1 : index
    %c0_81 = arith.constant 0 : index
    %175 = tpu.strided_load %arg21[%c0_79, %c1_80, %c0_81] {strides = array<i32: 1, 2, 1>} : memref<10x18x32xf32, #tpu.memory_space<vmem>>, vector<10x8x32xf32>
    %176 = vector.shape_cast %175 : vector<10x8x32xf32> to vector<5x2x8x32xf32>
    %177 = vector.extract_strided_slice %176 {offsets = [0, 0, 0, 0], sizes = [5, 1, 8, 32], strides = [1, 1, 1, 1]} : vector<5x2x8x32xf32> to vector<5x1x8x32xf32>
    %178 = vector.shape_cast %177 : vector<5x1x8x32xf32> to vector<5x8x32xf32>
    %179 = vector.extract_strided_slice %176 {offsets = [0, 1, 0, 0], sizes = [5, 1, 8, 32], strides = [1, 1, 1, 1]} : vector<5x2x8x32xf32> to vector<5x1x8x32xf32>
    %180 = vector.shape_cast %179 : vector<5x1x8x32xf32> to vector<5x8x32xf32>
    %c0_82 = arith.constant 0 : index
    %c2_83 = arith.constant 2 : index
    %c0_84 = arith.constant 0 : index
    %181 = tpu.strided_load %arg21[%c0_82, %c2_83, %c0_84] {strides = array<i32: 1, 2, 1>} : memref<10x18x32xf32, #tpu.memory_space<vmem>>, vector<10x8x32xf32>
    %182 = vector.shape_cast %181 : vector<10x8x32xf32> to vector<5x2x8x32xf32>
    %183 = vector.extract_strided_slice %182 {offsets = [0, 0, 0, 0], sizes = [5, 1, 8, 32], strides = [1, 1, 1, 1]} : vector<5x2x8x32xf32> to vector<5x1x8x32xf32>
    %184 = vector.shape_cast %183 : vector<5x1x8x32xf32> to vector<5x8x32xf32>
    %185 = vector.extract_strided_slice %182 {offsets = [0, 1, 0, 0], sizes = [5, 1, 8, 32], strides = [1, 1, 1, 1]} : vector<5x2x8x32xf32> to vector<5x1x8x32xf32>
    %186 = vector.shape_cast %185 : vector<5x1x8x32xf32> to vector<5x8x32xf32>
    %c0_85 = arith.constant 0 : index
    %c3_86 = arith.constant 3 : index
    %c0_87 = arith.constant 0 : index
    %187 = tpu.strided_load %arg21[%c0_85, %c3_86, %c0_87] {strides = array<i32: 1, 2, 1>} : memref<10x18x32xf32, #tpu.memory_space<vmem>>, vector<10x8x32xf32>
    %188 = vector.shape_cast %187 : vector<10x8x32xf32> to vector<5x2x8x32xf32>
    %189 = vector.extract_strided_slice %188 {offsets = [0, 0, 0, 0], sizes = [5, 1, 8, 32], strides = [1, 1, 1, 1]} : vector<5x2x8x32xf32> to vector<5x1x8x32xf32>
    %190 = vector.shape_cast %189 : vector<5x1x8x32xf32> to vector<5x8x32xf32>
    %191 = vector.extract_strided_slice %188 {offsets = [0, 1, 0, 0], sizes = [5, 1, 8, 32], strides = [1, 1, 1, 1]} : vector<5x2x8x32xf32> to vector<5x1x8x32xf32>
    %192 = vector.shape_cast %191 : vector<5x1x8x32xf32> to vector<5x8x32xf32>
    %193 = vector.extract_strided_slice %172 {offsets = [0, 0, 0], sizes = [4, 8, 32], strides = [1, 1, 1]} : vector<5x8x32xf32> to vector<4x8x32xf32>
    %194 = vector.extract_strided_slice %178 {offsets = [0, 0, 0], sizes = [4, 8, 32], strides = [1, 1, 1]} : vector<5x8x32xf32> to vector<4x8x32xf32>
    %195 = vector.extract_strided_slice %184 {offsets = [0, 0, 0], sizes = [4, 8, 32], strides = [1, 1, 1]} : vector<5x8x32xf32> to vector<4x8x32xf32>
    %196 = vector.extract_strided_slice %190 {offsets = [0, 0, 0], sizes = [4, 8, 32], strides = [1, 1, 1]} : vector<5x8x32xf32> to vector<4x8x32xf32>
    %197 = vector.extract_strided_slice %174 {offsets = [0, 0, 0], sizes = [4, 8, 32], strides = [1, 1, 1]} : vector<5x8x32xf32> to vector<4x8x32xf32>
    %198 = vector.extract_strided_slice %180 {offsets = [0, 0, 0], sizes = [4, 8, 32], strides = [1, 1, 1]} : vector<5x8x32xf32> to vector<4x8x32xf32>
    %199 = vector.extract_strided_slice %186 {offsets = [0, 0, 0], sizes = [4, 8, 32], strides = [1, 1, 1]} : vector<5x8x32xf32> to vector<4x8x32xf32>
    %200 = vector.extract_strided_slice %192 {offsets = [0, 0, 0], sizes = [4, 8, 32], strides = [1, 1, 1]} : vector<5x8x32xf32> to vector<4x8x32xf32>
    %201 = vector.extract_strided_slice %172 {offsets = [1, 0, 0], sizes = [4, 8, 32], strides = [1, 1, 1]} : vector<5x8x32xf32> to vector<4x8x32xf32>
    %202 = vector.extract_strided_slice %178 {offsets = [1, 0, 0], sizes = [4, 8, 32], strides = [1, 1, 1]} : vector<5x8x32xf32> to vector<4x8x32xf32>
    %203 = vector.extract_strided_slice %184 {offsets = [1, 0, 0], sizes = [4, 8, 32], strides = [1, 1, 1]} : vector<5x8x32xf32> to vector<4x8x32xf32>
    %204 = vector.extract_strided_slice %190 {offsets = [1, 0, 0], sizes = [4, 8, 32], strides = [1, 1, 1]} : vector<5x8x32xf32> to vector<4x8x32xf32>
    %205 = vector.extract_strided_slice %174 {offsets = [1, 0, 0], sizes = [4, 8, 32], strides = [1, 1, 1]} : vector<5x8x32xf32> to vector<4x8x32xf32>
    %206 = vector.extract_strided_slice %180 {offsets = [1, 0, 0], sizes = [4, 8, 32], strides = [1, 1, 1]} : vector<5x8x32xf32> to vector<4x8x32xf32>
    %207 = vector.extract_strided_slice %186 {offsets = [1, 0, 0], sizes = [4, 8, 32], strides = [1, 1, 1]} : vector<5x8x32xf32> to vector<4x8x32xf32>
    %208 = vector.extract_strided_slice %192 {offsets = [1, 0, 0], sizes = [4, 8, 32], strides = [1, 1, 1]} : vector<5x8x32xf32> to vector<4x8x32xf32>
    %209 = tpu.concatenate %193, %194, %195, %196, %197, %198, %199, %200, %201, %202, %203, %204, %205, %206, %207, %208 in 2 : vector<4x8x32xf32>, vector<4x8x32xf32>, vector<4x8x32xf32>, vector<4x8x32xf32>, vector<4x8x32xf32>, vector<4x8x32xf32>, vector<4x8x32xf32>, vector<4x8x32xf32>, vector<4x8x32xf32>, vector<4x8x32xf32>, vector<4x8x32xf32>, vector<4x8x32xf32>, vector<4x8x32xf32>, vector<4x8x32xf32>, vector<4x8x32xf32>, vector<4x8x32xf32> -> vector<4x8x512xf32>
    %210 = vector.extract_strided_slice %209 {offsets = [0, 0, 0], sizes = [1, 8, 512], strides = [1, 1, 1]} : vector<4x8x512xf32> to vector<1x8x512xf32>
    %211 = vector.shape_cast %210 : vector<1x8x512xf32> to vector<8x512xf32>
    %212 = vector.extract_strided_slice %209 {offsets = [1, 0, 0], sizes = [1, 8, 512], strides = [1, 1, 1]} : vector<4x8x512xf32> to vector<1x8x512xf32>
    %213 = vector.shape_cast %212 : vector<1x8x512xf32> to vector<8x512xf32>
    %214 = vector.extract_strided_slice %209 {offsets = [2, 0, 0], sizes = [1, 8, 512], strides = [1, 1, 1]} : vector<4x8x512xf32> to vector<1x8x512xf32>
    %215 = vector.shape_cast %214 : vector<1x8x512xf32> to vector<8x512xf32>
    %216 = vector.extract_strided_slice %209 {offsets = [3, 0, 0], sizes = [1, 8, 512], strides = [1, 1, 1]} : vector<4x8x512xf32> to vector<1x8x512xf32>
    %217 = vector.shape_cast %216 : vector<1x8x512xf32> to vector<8x512xf32>
    %218 = tpu.concatenate %211, %213, %215, %217 in 0 : vector<8x512xf32>, vector<8x512xf32>, vector<8x512xf32>, vector<8x512xf32> -> vector<32x512xf32>
    %219 = arith.truncf %218 : vector<32x512xf32> to vector<32x512xbf16>
    %c0_88 = arith.constant 0 : index
    %c0_89 = arith.constant 0 : index
    %c0_90 = arith.constant 0 : index
    %220 = vector.load %arg7[%c0_88, %c0_89, %c0_90] : memref<1x512x64xbf16, #tpu.memory_space<vmem>>, vector<1x512x64xbf16>
    %221 = vector.shape_cast %220 : vector<1x512x64xbf16> to vector<512x64xbf16>
    %cst_91 = arith.constant dense<0.000000e+00> : vector<32x64xf32>
    %222 = tpu.matmul %219, %221, %cst_91 {dimension_numbers = #tpu.dot_dimension_numbers<[1], [0], [0], [1], [0, 0, 1, 1], [], []>} : vector<32x512xbf16>, vector<512x64xbf16>, vector<32x64xf32> -> vector<32x64xf32>
    %c0_92 = arith.constant 0 : index
    %c0_93 = arith.constant 0 : index
    %c0_94 = arith.constant 0 : index
    %223 = vector.load %arg8[%c0_92, %c0_93, %c0_94] : memref<1x1x64xf32, #tpu.memory_space<vmem>>, vector<1x1x64xf32>
    %224 = vector.shape_cast %223 : vector<1x1x64xf32> to vector<1x64xf32>
    %225 = vector.broadcast %224 : vector<1x64xf32> to vector<32x64xf32>
    %226 = arith.addf %222, %225 : vector<32x64xf32>
    %cst_95 = arith.constant dense<0.000000e+00> : vector<32xf32>
    %227 = vector.multi_reduction <add>, %226, %cst_95 [1] : vector<32x64xf32> to vector<32xf32>
    %228 = vector.shape_cast %227 : vector<32xf32> to vector<32x1xf32>
    %cst_96 = arith.constant 6.400000e+01 : f32
    %229 = vector.broadcast %cst_96 : f32 to vector<32x1xf32>
    %230 = arith.divf %228, %229 : vector<32x1xf32>
    %231 = vector.broadcast %230 : vector<32x1xf32> to vector<32x64xf32>
    %232 = arith.subf %226, %231 : vector<32x64xf32>
    %233 = arith.mulf %232, %232 : vector<32x64xf32>
    %cst_97 = arith.constant dense<0.000000e+00> : vector<32xf32>
    %234 = vector.multi_reduction <add>, %233, %cst_97 [1] : vector<32x64xf32> to vector<32xf32>
    %235 = vector.shape_cast %234 : vector<32xf32> to vector<32x1xf32>
    %cst_98 = arith.constant 6.400000e+01 : f32
    %236 = vector.broadcast %cst_98 : f32 to vector<32x1xf32>
    %237 = arith.divf %235, %236 : vector<32x1xf32>
    %cst_99 = arith.constant 9.99999974E-6 : f32
    %238 = vector.broadcast %cst_99 : f32 to vector<32x1xf32>
    %239 = arith.addf %237, %238 : vector<32x1xf32>
    %240 = math.rsqrt %239 : vector<32x1xf32>
    %241 = vector.broadcast %240 : vector<32x1xf32> to vector<32x64xf32>
    %242 = arith.mulf %232, %241 : vector<32x64xf32>
    %c0_100 = arith.constant 0 : index
    %c0_101 = arith.constant 0 : index
    %c0_102 = arith.constant 0 : index
    %243 = vector.load %arg9[%c0_100, %c0_101, %c0_102] : memref<1x1x64xf32, #tpu.memory_space<vmem>>, vector<1x1x64xf32>
    %244 = vector.shape_cast %243 : vector<1x1x64xf32> to vector<1x64xf32>
    %245 = vector.broadcast %244 : vector<1x64xf32> to vector<32x64xf32>
    %246 = arith.mulf %245, %242 : vector<32x64xf32>
    %c0_103 = arith.constant 0 : index
    %c0_104 = arith.constant 0 : index
    %c0_105 = arith.constant 0 : index
    %247 = vector.load %arg10[%c0_103, %c0_104, %c0_105] : memref<1x1x64xf32, #tpu.memory_space<vmem>>, vector<1x1x64xf32>
    %248 = vector.shape_cast %247 : vector<1x1x64xf32> to vector<1x64xf32>
    %249 = vector.broadcast %248 : vector<1x64xf32> to vector<32x64xf32>
    %250 = arith.addf %246, %249 : vector<32x64xf32>
    %251 = arith.negf %250 : vector<32x64xf32>
    %252 = math.exp %251 : vector<32x64xf32>
    %cst_106 = arith.constant 1.000000e+00 : f32
    %253 = vector.broadcast %cst_106 : f32 to vector<32x64xf32>
    %254 = arith.addf %253, %252 : vector<32x64xf32>
    %255 = arith.divf %253, %254 : vector<32x64xf32>
    %256 = arith.mulf %250, %255 : vector<32x64xf32>
    %257 = tpu.iota {dimensions = array<i32: 0>} : vector<32x1xi32>
    %c8_i32_107 = arith.constant 8 : i32
    %c0_i32_108 = arith.constant 0 : i32
    %258 = arith.cmpi eq, %c8_i32_107, %c0_i32_108 : i32
    %c1_i32_109 = arith.constant 1 : i32
    %259 = arith.select %258, %c1_i32_109, %c8_i32_107 : i32
    %260 = vector.broadcast %259 : i32 to vector<32x1xi32>
    %261 = arith.remsi %257, %260 : vector<32x1xi32>
    %c0_i32_110 = arith.constant 0 : i32
    %262 = vector.broadcast %c0_i32_110 : i32 to vector<32x1xi32>
    %263 = arith.cmpi ne, %261, %262 : vector<32x1xi32>
    %c0_i32_111 = arith.constant 0 : i32
    %264 = vector.broadcast %c0_i32_111 : i32 to vector<32x1xi32>
    %265 = arith.cmpi slt, %261, %264 : vector<32x1xi32>
    %c0_i32_112 = arith.constant 0 : i32
    %266 = arith.cmpi slt, %259, %c0_i32_112 : i32
    %267 = vector.broadcast %266 : i1 to vector<32x1xi1>
    %268 = vector.broadcast %267 : vector<32x1xi1> to vector<32x1xi1>
    %269 = arith.xori %265, %268 : vector<32x1xi1>
    %270 = arith.andi %269, %263 : vector<32x1xi1>
    %271 = vector.broadcast %259 : i32 to vector<32x1xi32>
    %272 = arith.addi %261, %271 : vector<32x1xi32>
    %273 = arith.select %270, %272, %261 : vector<32x1xi1>, vector<32x1xi32>
    %c1_i32_113 = arith.constant 1 : i32
    %274 = vector.broadcast %c1_i32_113 : i32 to vector<32x1xi32>
    %275 = arith.cmpi sge, %273, %274 : vector<32x1xi32>
    %c4_i32 = arith.constant 4 : i32
    %276 = vector.broadcast %c4_i32 : i32 to vector<32x1xi32>
    %277 = arith.cmpi sle, %273, %276 : vector<32x1xi32>
    %278 = arith.andi %275, %277 : vector<32x1xi1>
    %cst_114 = arith.constant 0.000000e+00 : f32
    %279 = vector.shape_cast %278 : vector<32x1xi1> to vector<32x1xi1>
    %280 = vector.broadcast %279 : vector<32x1xi1> to vector<32x64xi1>
    %281 = vector.broadcast %cst_114 : f32 to vector<32x64xf32>
    %282 = arith.select %280, %256, %281 : vector<32x64xi1>, vector<32x64xf32>
    %283 = vector.extract_strided_slice %282 {offsets = [0, 0], sizes = [8, 64], strides = [1, 1]} : vector<32x64xf32> to vector<8x64xf32>
    %c1_115 = arith.constant 1 : index
    %c2_116 = arith.constant 2 : index
    %c0_117 = arith.constant 0 : index
    %284 = vector.load %arg22[%c1_115, %c2_116, %c0_117] : memref<6x18x64xf32, #tpu.memory_space<vmem>>, vector<1x8x64xf32>
    %285 = vector.shape_cast %284 : vector<1x8x64xf32> to vector<8x64xf32>
    %286 = vector.shape_cast %283 : vector<8x64xf32> to vector<1x8x64xf32>
    tpu.vector_store %arg22[%c1_115, %c2_116, %c0_117], %286 {strides = array<i32>} : memref<6x18x64xf32, #tpu.memory_space<vmem>>, vector<1x8x64xf32>,
    %287 = vector.extract_strided_slice %282 {offsets = [8, 0], sizes = [8, 64], strides = [1, 1]} : vector<32x64xf32> to vector<8x64xf32>
    %c2_118 = arith.constant 2 : index
    %c2_119 = arith.constant 2 : index
    %c0_120 = arith.constant 0 : index
    %288 = vector.load %arg22[%c2_118, %c2_119, %c0_120] : memref<6x18x64xf32, #tpu.memory_space<vmem>>, vector<1x8x64xf32>
    %289 = vector.shape_cast %288 : vector<1x8x64xf32> to vector<8x64xf32>
    %290 = vector.shape_cast %287 : vector<8x64xf32> to vector<1x8x64xf32>
    tpu.vector_store %arg22[%c2_118, %c2_119, %c0_120], %290 {strides = array<i32>} : memref<6x18x64xf32, #tpu.memory_space<vmem>>, vector<1x8x64xf32>,
    %291 = vector.extract_strided_slice %282 {offsets = [16, 0], sizes = [8, 64], strides = [1, 1]} : vector<32x64xf32> to vector<8x64xf32>
    %c3_121 = arith.constant 3 : index
    %c2_122 = arith.constant 2 : index
    %c0_123 = arith.constant 0 : index
    %292 = vector.load %arg22[%c3_121, %c2_122, %c0_123] : memref<6x18x64xf32, #tpu.memory_space<vmem>>, vector<1x8x64xf32>
    %293 = vector.shape_cast %292 : vector<1x8x64xf32> to vector<8x64xf32>
    %294 = vector.shape_cast %291 : vector<8x64xf32> to vector<1x8x64xf32>
    tpu.vector_store %arg22[%c3_121, %c2_122, %c0_123], %294 {strides = array<i32>} : memref<6x18x64xf32, #tpu.memory_space<vmem>>, vector<1x8x64xf32>,
    %295 = vector.extract_strided_slice %282 {offsets = [24, 0], sizes = [8, 64], strides = [1, 1]} : vector<32x64xf32> to vector<8x64xf32>
    %c4_124 = arith.constant 4 : index
    %c2_125 = arith.constant 2 : index
    %c0_126 = arith.constant 0 : index
    %296 = vector.load %arg22[%c4_124, %c2_125, %c0_126] : memref<6x18x64xf32, #tpu.memory_space<vmem>>, vector<1x8x64xf32>
    %297 = vector.shape_cast %296 : vector<1x8x64xf32> to vector<8x64xf32>
    %298 = vector.shape_cast %295 : vector<8x64xf32> to vector<1x8x64xf32>
    tpu.vector_store %arg22[%c4_124, %c2_125, %c0_126], %298 {strides = array<i32>} : memref<6x18x64xf32, #tpu.memory_space<vmem>>, vector<1x8x64xf32>,
    %c0_127 = arith.constant 0 : index
    %c0_128 = arith.constant 0 : index
    %c0_129 = arith.constant 0 : index
    %299 = tpu.strided_load %arg22[%c0_127, %c0_128, %c0_129] {strides = array<i32: 1, 2, 1>} : memref<6x18x64xf32, #tpu.memory_space<vmem>>, vector<6x8x64xf32>
    %300 = vector.shape_cast %299 : vector<6x8x64xf32> to vector<3x2x8x64xf32>
    %301 = vector.extract_strided_slice %300 {offsets = [0, 0, 0, 0], sizes = [3, 1, 8, 64], strides = [1, 1, 1, 1]} : vector<3x2x8x64xf32> to vector<3x1x8x64xf32>
    %302 = vector.shape_cast %301 : vector<3x1x8x64xf32> to vector<3x8x64xf32>
    %303 = vector.extract_strided_slice %300 {offsets = [0, 1, 0, 0], sizes = [3, 1, 8, 64], strides = [1, 1, 1, 1]} : vector<3x2x8x64xf32> to vector<3x1x8x64xf32>
    %304 = vector.shape_cast %303 : vector<3x1x8x64xf32> to vector<3x8x64xf32>
    %c0_130 = arith.constant 0 : index
    %c1_131 = arith.constant 1 : index
    %c0_132 = arith.constant 0 : index
    %305 = tpu.strided_load %arg22[%c0_130, %c1_131, %c0_132] {strides = array<i32: 1, 2, 1>} : memref<6x18x64xf32, #tpu.memory_space<vmem>>, vector<6x8x64xf32>
    %306 = vector.shape_cast %305 : vector<6x8x64xf32> to vector<3x2x8x64xf32>
    %307 = vector.extract_strided_slice %306 {offsets = [0, 0, 0, 0], sizes = [3, 1, 8, 64], strides = [1, 1, 1, 1]} : vector<3x2x8x64xf32> to vector<3x1x8x64xf32>
    %308 = vector.shape_cast %307 : vector<3x1x8x64xf32> to vector<3x8x64xf32>
    %309 = vector.extract_strided_slice %306 {offsets = [0, 1, 0, 0], sizes = [3, 1, 8, 64], strides = [1, 1, 1, 1]} : vector<3x2x8x64xf32> to vector<3x1x8x64xf32>
    %310 = vector.shape_cast %309 : vector<3x1x8x64xf32> to vector<3x8x64xf32>
    %c0_133 = arith.constant 0 : index
    %c2_134 = arith.constant 2 : index
    %c0_135 = arith.constant 0 : index
    %311 = tpu.strided_load %arg22[%c0_133, %c2_134, %c0_135] {strides = array<i32: 1, 2, 1>} : memref<6x18x64xf32, #tpu.memory_space<vmem>>, vector<6x8x64xf32>
    %312 = vector.shape_cast %311 : vector<6x8x64xf32> to vector<3x2x8x64xf32>
    %313 = vector.extract_strided_slice %312 {offsets = [0, 0, 0, 0], sizes = [3, 1, 8, 64], strides = [1, 1, 1, 1]} : vector<3x2x8x64xf32> to vector<3x1x8x64xf32>
    %314 = vector.shape_cast %313 : vector<3x1x8x64xf32> to vector<3x8x64xf32>
    %315 = vector.extract_strided_slice %312 {offsets = [0, 1, 0, 0], sizes = [3, 1, 8, 64], strides = [1, 1, 1, 1]} : vector<3x2x8x64xf32> to vector<3x1x8x64xf32>
    %316 = vector.shape_cast %315 : vector<3x1x8x64xf32> to vector<3x8x64xf32>
    %c0_136 = arith.constant 0 : index
    %c3_137 = arith.constant 3 : index
    %c0_138 = arith.constant 0 : index
    %317 = tpu.strided_load %arg22[%c0_136, %c3_137, %c0_138] {strides = array<i32: 1, 2, 1>} : memref<6x18x64xf32, #tpu.memory_space<vmem>>, vector<6x8x64xf32>
    %318 = vector.shape_cast %317 : vector<6x8x64xf32> to vector<3x2x8x64xf32>
    %319 = vector.extract_strided_slice %318 {offsets = [0, 0, 0, 0], sizes = [3, 1, 8, 64], strides = [1, 1, 1, 1]} : vector<3x2x8x64xf32> to vector<3x1x8x64xf32>
    %320 = vector.shape_cast %319 : vector<3x1x8x64xf32> to vector<3x8x64xf32>
    %321 = vector.extract_strided_slice %318 {offsets = [0, 1, 0, 0], sizes = [3, 1, 8, 64], strides = [1, 1, 1, 1]} : vector<3x2x8x64xf32> to vector<3x1x8x64xf32>
    %322 = vector.shape_cast %321 : vector<3x1x8x64xf32> to vector<3x8x64xf32>
    %323 = vector.extract_strided_slice %302 {offsets = [0, 0, 0], sizes = [2, 8, 64], strides = [1, 1, 1]} : vector<3x8x64xf32> to vector<2x8x64xf32>
    %324 = vector.extract_strided_slice %308 {offsets = [0, 0, 0], sizes = [2, 8, 64], strides = [1, 1, 1]} : vector<3x8x64xf32> to vector<2x8x64xf32>
    %325 = vector.extract_strided_slice %314 {offsets = [0, 0, 0], sizes = [2, 8, 64], strides = [1, 1, 1]} : vector<3x8x64xf32> to vector<2x8x64xf32>
    %326 = vector.extract_strided_slice %320 {offsets = [0, 0, 0], sizes = [2, 8, 64], strides = [1, 1, 1]} : vector<3x8x64xf32> to vector<2x8x64xf32>
    %327 = vector.extract_strided_slice %304 {offsets = [0, 0, 0], sizes = [2, 8, 64], strides = [1, 1, 1]} : vector<3x8x64xf32> to vector<2x8x64xf32>
    %328 = vector.extract_strided_slice %310 {offsets = [0, 0, 0], sizes = [2, 8, 64], strides = [1, 1, 1]} : vector<3x8x64xf32> to vector<2x8x64xf32>
    %329 = vector.extract_strided_slice %316 {offsets = [0, 0, 0], sizes = [2, 8, 64], strides = [1, 1, 1]} : vector<3x8x64xf32> to vector<2x8x64xf32>
    %330 = vector.extract_strided_slice %322 {offsets = [0, 0, 0], sizes = [2, 8, 64], strides = [1, 1, 1]} : vector<3x8x64xf32> to vector<2x8x64xf32>
    %331 = vector.extract_strided_slice %302 {offsets = [1, 0, 0], sizes = [2, 8, 64], strides = [1, 1, 1]} : vector<3x8x64xf32> to vector<2x8x64xf32>
    %332 = vector.extract_strided_slice %308 {offsets = [1, 0, 0], sizes = [2, 8, 64], strides = [1, 1, 1]} : vector<3x8x64xf32> to vector<2x8x64xf32>
    %333 = vector.extract_strided_slice %314 {offsets = [1, 0, 0], sizes = [2, 8, 64], strides = [1, 1, 1]} : vector<3x8x64xf32> to vector<2x8x64xf32>
    %334 = vector.extract_strided_slice %320 {offsets = [1, 0, 0], sizes = [2, 8, 64], strides = [1, 1, 1]} : vector<3x8x64xf32> to vector<2x8x64xf32>
    %335 = vector.extract_strided_slice %304 {offsets = [1, 0, 0], sizes = [2, 8, 64], strides = [1, 1, 1]} : vector<3x8x64xf32> to vector<2x8x64xf32>
    %336 = vector.extract_strided_slice %310 {offsets = [1, 0, 0], sizes = [2, 8, 64], strides = [1, 1, 1]} : vector<3x8x64xf32> to vector<2x8x64xf32>
    %337 = vector.extract_strided_slice %316 {offsets = [1, 0, 0], sizes = [2, 8, 64], strides = [1, 1, 1]} : vector<3x8x64xf32> to vector<2x8x64xf32>
    %338 = vector.extract_strided_slice %322 {offsets = [1, 0, 0], sizes = [2, 8, 64], strides = [1, 1, 1]} : vector<3x8x64xf32> to vector<2x8x64xf32>
    %339 = tpu.concatenate %323, %324, %325, %326, %327, %328, %329, %330, %331, %332, %333, %334, %335, %336, %337, %338 in 2 : vector<2x8x64xf32>, vector<2x8x64xf32>, vector<2x8x64xf32>, vector<2x8x64xf32>, vector<2x8x64xf32>, vector<2x8x64xf32>, vector<2x8x64xf32>, vector<2x8x64xf32>, vector<2x8x64xf32>, vector<2x8x64xf32>, vector<2x8x64xf32>, vector<2x8x64xf32>, vector<2x8x64xf32>, vector<2x8x64xf32>, vector<2x8x64xf32>, vector<2x8x64xf32> -> vector<2x8x1024xf32>
    %340 = vector.extract_strided_slice %339 {offsets = [0, 0, 0], sizes = [1, 8, 1024], strides = [1, 1, 1]} : vector<2x8x1024xf32> to vector<1x8x1024xf32>
    %341 = vector.shape_cast %340 : vector<1x8x1024xf32> to vector<8x1024xf32>
    %342 = vector.extract_strided_slice %339 {offsets = [1, 0, 0], sizes = [1, 8, 1024], strides = [1, 1, 1]} : vector<2x8x1024xf32> to vector<1x8x1024xf32>
    %343 = vector.shape_cast %342 : vector<1x8x1024xf32> to vector<8x1024xf32>
    %344 = tpu.concatenate %341, %343 in 0 : vector<8x1024xf32>, vector<8x1024xf32> -> vector<16x1024xf32>
    %345 = arith.truncf %344 : vector<16x1024xf32> to vector<16x1024xbf16>
    %c0_139 = arith.constant 0 : index
    %c0_140 = arith.constant 0 : index
    %c0_141 = arith.constant 0 : index
    %346 = vector.load %arg11[%c0_139, %c0_140, %c0_141] : memref<1x1024x128xbf16, #tpu.memory_space<vmem>>, vector<1x1024x128xbf16>
    %347 = vector.shape_cast %346 : vector<1x1024x128xbf16> to vector<1024x128xbf16>
    %cst_142 = arith.constant dense<0.000000e+00> : vector<16x128xf32>
    %348 = tpu.matmul %345, %347, %cst_142 {dimension_numbers = #tpu.dot_dimension_numbers<[1], [0], [0], [1], [0, 0, 1, 1], [], []>} : vector<16x1024xbf16>, vector<1024x128xbf16>, vector<16x128xf32> -> vector<16x128xf32>
    %c0_143 = arith.constant 0 : index
    %c0_144 = arith.constant 0 : index
    %c0_145 = arith.constant 0 : index
    %349 = vector.load %arg12[%c0_143, %c0_144, %c0_145] : memref<1x1x128xf32, #tpu.memory_space<vmem>>, vector<1x1x128xf32>
    %350 = vector.shape_cast %349 : vector<1x1x128xf32> to vector<1x128xf32>
    %351 = vector.broadcast %350 : vector<1x128xf32> to vector<16x128xf32>
    %352 = arith.addf %348, %351 : vector<16x128xf32>
    %cst_146 = arith.constant dense<0.000000e+00> : vector<16xf32>
    %353 = vector.multi_reduction <add>, %352, %cst_146 [1] : vector<16x128xf32> to vector<16xf32>
    %354 = vector.shape_cast %353 : vector<16xf32> to vector<16x1xf32>
    %cst_147 = arith.constant 1.280000e+02 : f32
    %355 = vector.broadcast %cst_147 : f32 to vector<16x1xf32>
    %356 = arith.divf %354, %355 : vector<16x1xf32>
    %357 = vector.broadcast %356 : vector<16x1xf32> to vector<16x128xf32>
    %358 = arith.subf %352, %357 : vector<16x128xf32>
    %359 = arith.mulf %358, %358 : vector<16x128xf32>
    %cst_148 = arith.constant dense<0.000000e+00> : vector<16xf32>
    %360 = vector.multi_reduction <add>, %359, %cst_148 [1] : vector<16x128xf32> to vector<16xf32>
    %361 = vector.shape_cast %360 : vector<16xf32> to vector<16x1xf32>
    %cst_149 = arith.constant 1.280000e+02 : f32
    %362 = vector.broadcast %cst_149 : f32 to vector<16x1xf32>
    %363 = arith.divf %361, %362 : vector<16x1xf32>
    %cst_150 = arith.constant 9.99999974E-6 : f32
    %364 = vector.broadcast %cst_150 : f32 to vector<16x1xf32>
    %365 = arith.addf %363, %364 : vector<16x1xf32>
    %366 = math.rsqrt %365 : vector<16x1xf32>
    %367 = vector.broadcast %366 : vector<16x1xf32> to vector<16x128xf32>
    %368 = arith.mulf %358, %367 : vector<16x128xf32>
    %c0_151 = arith.constant 0 : index
    %c0_152 = arith.constant 0 : index
    %c0_153 = arith.constant 0 : index
    %369 = vector.load %arg13[%c0_151, %c0_152, %c0_153] : memref<1x1x128xf32, #tpu.memory_space<vmem>>, vector<1x1x128xf32>
    %370 = vector.shape_cast %369 : vector<1x1x128xf32> to vector<1x128xf32>
    %371 = vector.broadcast %370 : vector<1x128xf32> to vector<16x128xf32>
    %372 = arith.mulf %371, %368 : vector<16x128xf32>
    %c0_154 = arith.constant 0 : index
    %c0_155 = arith.constant 0 : index
    %c0_156 = arith.constant 0 : index
    %373 = vector.load %arg14[%c0_154, %c0_155, %c0_156] : memref<1x1x128xf32, #tpu.memory_space<vmem>>, vector<1x1x128xf32>
    %374 = vector.shape_cast %373 : vector<1x1x128xf32> to vector<1x128xf32>
    %375 = vector.broadcast %374 : vector<1x128xf32> to vector<16x128xf32>
    %376 = arith.addf %372, %375 : vector<16x128xf32>
    %377 = arith.negf %376 : vector<16x128xf32>
    %378 = math.exp %377 : vector<16x128xf32>
    %cst_157 = arith.constant 1.000000e+00 : f32
    %379 = vector.broadcast %cst_157 : f32 to vector<16x128xf32>
    %380 = arith.addf %379, %378 : vector<16x128xf32>
    %381 = arith.divf %379, %380 : vector<16x128xf32>
    %382 = arith.mulf %376, %381 : vector<16x128xf32>
    %383 = tpu.iota {dimensions = array<i32: 0>} : vector<16x1xi32>
    %c8_i32_158 = arith.constant 8 : i32
    %c0_i32_159 = arith.constant 0 : i32
    %384 = arith.cmpi eq, %c8_i32_158, %c0_i32_159 : i32
    %c1_i32_160 = arith.constant 1 : i32
    %385 = arith.select %384, %c1_i32_160, %c8_i32_158 : i32
    %386 = vector.broadcast %385 : i32 to vector<16x1xi32>
    %387 = arith.remsi %383, %386 : vector<16x1xi32>
    %c0_i32_161 = arith.constant 0 : i32
    %388 = vector.broadcast %c0_i32_161 : i32 to vector<16x1xi32>
    %389 = arith.cmpi ne, %387, %388 : vector<16x1xi32>
    %c0_i32_162 = arith.constant 0 : i32
    %390 = vector.broadcast %c0_i32_162 : i32 to vector<16x1xi32>
    %391 = arith.cmpi slt, %387, %390 : vector<16x1xi32>
    %c0_i32_163 = arith.constant 0 : i32
    %392 = arith.cmpi slt, %385, %c0_i32_163 : i32
    %393 = vector.broadcast %392 : i1 to vector<16x1xi1>
    %394 = vector.broadcast %393 : vector<16x1xi1> to vector<16x1xi1>
    %395 = arith.xori %391, %394 : vector<16x1xi1>
    %396 = arith.andi %395, %389 : vector<16x1xi1>
    %397 = vector.broadcast %385 : i32 to vector<16x1xi32>
    %398 = arith.addi %387, %397 : vector<16x1xi32>
    %399 = arith.select %396, %398, %387 : vector<16x1xi1>, vector<16x1xi32>
    %c1_i32_164 = arith.constant 1 : i32
    %400 = vector.broadcast %c1_i32_164 : i32 to vector<16x1xi32>
    %401 = arith.cmpi sge, %399, %400 : vector<16x1xi32>
    %c2_i32 = arith.constant 2 : i32
    %402 = vector.broadcast %c2_i32 : i32 to vector<16x1xi32>
    %403 = arith.cmpi sle, %399, %402 : vector<16x1xi32>
    %404 = arith.andi %401, %403 : vector<16x1xi1>
    %cst_165 = arith.constant 0.000000e+00 : f32
    %405 = vector.shape_cast %404 : vector<16x1xi1> to vector<16x1xi1>
    %406 = vector.broadcast %405 : vector<16x1xi1> to vector<16x128xi1>
    %407 = vector.broadcast %cst_165 : f32 to vector<16x128xf32>
    %408 = arith.select %406, %382, %407 : vector<16x128xi1>, vector<16x128xf32>
    %409 = vector.extract_strided_slice %408 {offsets = [0, 0], sizes = [8, 128], strides = [1, 1]} : vector<16x128xf32> to vector<8x128xf32>
    %c1_166 = arith.constant 1 : index
    %c2_167 = arith.constant 2 : index
    %c0_168 = arith.constant 0 : index
    %410 = vector.load %arg23[%c1_166, %c2_167, %c0_168] : memref<4x18x128xf32, #tpu.memory_space<vmem>>, vector<1x8x128xf32>
    %411 = vector.shape_cast %410 : vector<1x8x128xf32> to vector<8x128xf32>
    %412 = vector.shape_cast %409 : vector<8x128xf32> to vector<1x8x128xf32>
    tpu.vector_store %arg23[%c1_166, %c2_167, %c0_168], %412 {strides = array<i32>} : memref<4x18x128xf32, #tpu.memory_space<vmem>>, vector<1x8x128xf32>,
    %413 = vector.extract_strided_slice %408 {offsets = [8, 0], sizes = [8, 128], strides = [1, 1]} : vector<16x128xf32> to vector<8x128xf32>
    %c2_169 = arith.constant 2 : index
    %c2_170 = arith.constant 2 : index
    %c0_171 = arith.constant 0 : index
    %414 = vector.load %arg23[%c2_169, %c2_170, %c0_171] : memref<4x18x128xf32, #tpu.memory_space<vmem>>, vector<1x8x128xf32>
    %415 = vector.shape_cast %414 : vector<1x8x128xf32> to vector<8x128xf32>
    %416 = vector.shape_cast %413 : vector<8x128xf32> to vector<1x8x128xf32>
    tpu.vector_store %arg23[%c2_169, %c2_170, %c0_171], %416 {strides = array<i32>} : memref<4x18x128xf32, #tpu.memory_space<vmem>>, vector<1x8x128xf32>,
    %c0_172 = arith.constant 0 : index
    %c0_173 = arith.constant 0 : index
    %c0_174 = arith.constant 0 : index
    %417 = tpu.strided_load %arg23[%c0_172, %c0_173, %c0_174] {strides = array<i32: 1, 2, 1>} : memref<4x18x128xf32, #tpu.memory_space<vmem>>, vector<4x8x128xf32>
    %418 = vector.shape_cast %417 : vector<4x8x128xf32> to vector<2x2x8x128xf32>
    %419 = vector.extract_strided_slice %418 {offsets = [0, 0, 0, 0], sizes = [2, 1, 8, 128], strides = [1, 1, 1, 1]} : vector<2x2x8x128xf32> to vector<2x1x8x128xf32>
    %420 = vector.shape_cast %419 : vector<2x1x8x128xf32> to vector<2x8x128xf32>
    %421 = vector.extract_strided_slice %418 {offsets = [0, 1, 0, 0], sizes = [2, 1, 8, 128], strides = [1, 1, 1, 1]} : vector<2x2x8x128xf32> to vector<2x1x8x128xf32>
    %422 = vector.shape_cast %421 : vector<2x1x8x128xf32> to vector<2x8x128xf32>
    %c0_175 = arith.constant 0 : index
    %c1_176 = arith.constant 1 : index
    %c0_177 = arith.constant 0 : index
    %423 = tpu.strided_load %arg23[%c0_175, %c1_176, %c0_177] {strides = array<i32: 1, 2, 1>} : memref<4x18x128xf32, #tpu.memory_space<vmem>>, vector<4x8x128xf32>
    %424 = vector.shape_cast %423 : vector<4x8x128xf32> to vector<2x2x8x128xf32>
    %425 = vector.extract_strided_slice %424 {offsets = [0, 0, 0, 0], sizes = [2, 1, 8, 128], strides = [1, 1, 1, 1]} : vector<2x2x8x128xf32> to vector<2x1x8x128xf32>
    %426 = vector.shape_cast %425 : vector<2x1x8x128xf32> to vector<2x8x128xf32>
    %427 = vector.extract_strided_slice %424 {offsets = [0, 1, 0, 0], sizes = [2, 1, 8, 128], strides = [1, 1, 1, 1]} : vector<2x2x8x128xf32> to vector<2x1x8x128xf32>
    %428 = vector.shape_cast %427 : vector<2x1x8x128xf32> to vector<2x8x128xf32>
    %c0_178 = arith.constant 0 : index
    %c2_179 = arith.constant 2 : index
    %c0_180 = arith.constant 0 : index
    %429 = tpu.strided_load %arg23[%c0_178, %c2_179, %c0_180] {strides = array<i32: 1, 2, 1>} : memref<4x18x128xf32, #tpu.memory_space<vmem>>, vector<4x8x128xf32>
    %430 = vector.shape_cast %429 : vector<4x8x128xf32> to vector<2x2x8x128xf32>
    %431 = vector.extract_strided_slice %430 {offsets = [0, 0, 0, 0], sizes = [2, 1, 8, 128], strides = [1, 1, 1, 1]} : vector<2x2x8x128xf32> to vector<2x1x8x128xf32>
    %432 = vector.shape_cast %431 : vector<2x1x8x128xf32> to vector<2x8x128xf32>
    %433 = vector.extract_strided_slice %430 {offsets = [0, 1, 0, 0], sizes = [2, 1, 8, 128], strides = [1, 1, 1, 1]} : vector<2x2x8x128xf32> to vector<2x1x8x128xf32>
    %434 = vector.shape_cast %433 : vector<2x1x8x128xf32> to vector<2x8x128xf32>
    %c0_181 = arith.constant 0 : index
    %c3_182 = arith.constant 3 : index
    %c0_183 = arith.constant 0 : index
    %435 = tpu.strided_load %arg23[%c0_181, %c3_182, %c0_183] {strides = array<i32: 1, 2, 1>} : memref<4x18x128xf32, #tpu.memory_space<vmem>>, vector<4x8x128xf32>
    %436 = vector.shape_cast %435 : vector<4x8x128xf32> to vector<2x2x8x128xf32>
    %437 = vector.extract_strided_slice %436 {offsets = [0, 0, 0, 0], sizes = [2, 1, 8, 128], strides = [1, 1, 1, 1]} : vector<2x2x8x128xf32> to vector<2x1x8x128xf32>
    %438 = vector.shape_cast %437 : vector<2x1x8x128xf32> to vector<2x8x128xf32>
    %439 = vector.extract_strided_slice %436 {offsets = [0, 1, 0, 0], sizes = [2, 1, 8, 128], strides = [1, 1, 1, 1]} : vector<2x2x8x128xf32> to vector<2x1x8x128xf32>
    %440 = vector.shape_cast %439 : vector<2x1x8x128xf32> to vector<2x8x128xf32>
    %441 = vector.extract_strided_slice %420 {offsets = [0, 0, 0], sizes = [1, 8, 128], strides = [1, 1, 1]} : vector<2x8x128xf32> to vector<1x8x128xf32>
    %442 = vector.extract_strided_slice %426 {offsets = [0, 0, 0], sizes = [1, 8, 128], strides = [1, 1, 1]} : vector<2x8x128xf32> to vector<1x8x128xf32>
    %443 = vector.extract_strided_slice %432 {offsets = [0, 0, 0], sizes = [1, 8, 128], strides = [1, 1, 1]} : vector<2x8x128xf32> to vector<1x8x128xf32>
    %444 = vector.extract_strided_slice %438 {offsets = [0, 0, 0], sizes = [1, 8, 128], strides = [1, 1, 1]} : vector<2x8x128xf32> to vector<1x8x128xf32>
    %445 = vector.extract_strided_slice %422 {offsets = [0, 0, 0], sizes = [1, 8, 128], strides = [1, 1, 1]} : vector<2x8x128xf32> to vector<1x8x128xf32>
    %446 = vector.extract_strided_slice %428 {offsets = [0, 0, 0], sizes = [1, 8, 128], strides = [1, 1, 1]} : vector<2x8x128xf32> to vector<1x8x128xf32>
    %447 = vector.extract_strided_slice %434 {offsets = [0, 0, 0], sizes = [1, 8, 128], strides = [1, 1, 1]} : vector<2x8x128xf32> to vector<1x8x128xf32>
    %448 = vector.extract_strided_slice %440 {offsets = [0, 0, 0], sizes = [1, 8, 128], strides = [1, 1, 1]} : vector<2x8x128xf32> to vector<1x8x128xf32>
    %449 = vector.extract_strided_slice %420 {offsets = [1, 0, 0], sizes = [1, 8, 128], strides = [1, 1, 1]} : vector<2x8x128xf32> to vector<1x8x128xf32>
    %450 = vector.extract_strided_slice %426 {offsets = [1, 0, 0], sizes = [1, 8, 128], strides = [1, 1, 1]} : vector<2x8x128xf32> to vector<1x8x128xf32>
    %451 = vector.extract_strided_slice %432 {offsets = [1, 0, 0], sizes = [1, 8, 128], strides = [1, 1, 1]} : vector<2x8x128xf32> to vector<1x8x128xf32>
    %452 = vector.extract_strided_slice %438 {offsets = [1, 0, 0], sizes = [1, 8, 128], strides = [1, 1, 1]} : vector<2x8x128xf32> to vector<1x8x128xf32>
    %453 = vector.extract_strided_slice %422 {offsets = [1, 0, 0], sizes = [1, 8, 128], strides = [1, 1, 1]} : vector<2x8x128xf32> to vector<1x8x128xf32>
    %454 = vector.extract_strided_slice %428 {offsets = [1, 0, 0], sizes = [1, 8, 128], strides = [1, 1, 1]} : vector<2x8x128xf32> to vector<1x8x128xf32>
    %455 = vector.extract_strided_slice %434 {offsets = [1, 0, 0], sizes = [1, 8, 128], strides = [1, 1, 1]} : vector<2x8x128xf32> to vector<1x8x128xf32>
    %456 = vector.extract_strided_slice %440 {offsets = [1, 0, 0], sizes = [1, 8, 128], strides = [1, 1, 1]} : vector<2x8x128xf32> to vector<1x8x128xf32>
    %457 = tpu.concatenate %441, %442, %443, %444, %445, %446, %447, %448, %449, %450, %451, %452, %453, %454, %455, %456 in 2 : vector<1x8x128xf32>, vector<1x8x128xf32>, vector<1x8x128xf32>, vector<1x8x128xf32>, vector<1x8x128xf32>, vector<1x8x128xf32>, vector<1x8x128xf32>, vector<1x8x128xf32>, vector<1x8x128xf32>, vector<1x8x128xf32>, vector<1x8x128xf32>, vector<1x8x128xf32>, vector<1x8x128xf32>, vector<1x8x128xf32>, vector<1x8x128xf32>, vector<1x8x128xf32> -> vector<1x8x2048xf32>
    %458 = vector.shape_cast %457 : vector<1x8x2048xf32> to vector<8x2048xf32>
    %459 = arith.truncf %458 : vector<8x2048xf32> to vector<8x2048xbf16>
    %c0_184 = arith.constant 0 : index
    %c0_185 = arith.constant 0 : index
    %c0_186 = arith.constant 0 : index
    %460 = vector.load %arg15[%c0_184, %c0_185, %c0_186] : memref<1x2048x256xbf16, #tpu.memory_space<vmem>>, vector<1x2048x256xbf16>
    %461 = vector.shape_cast %460 : vector<1x2048x256xbf16> to vector<2048x256xbf16>
    %cst_187 = arith.constant dense<0.000000e+00> : vector<8x256xf32>
    %462 = tpu.matmul %459, %461, %cst_187 {dimension_numbers = #tpu.dot_dimension_numbers<[1], [0], [0], [1], [0, 0, 1, 1], [], []>} : vector<8x2048xbf16>, vector<2048x256xbf16>, vector<8x256xf32> -> vector<8x256xf32>
    %c0_188 = arith.constant 0 : index
    %c0_189 = arith.constant 0 : index
    %c0_190 = arith.constant 0 : index
    %463 = vector.load %arg16[%c0_188, %c0_189, %c0_190] : memref<1x1x256xf32, #tpu.memory_space<vmem>>, vector<1x1x256xf32>
    %464 = vector.shape_cast %463 : vector<1x1x256xf32> to vector<1x256xf32>
    %465 = vector.broadcast %464 : vector<1x256xf32> to vector<8x256xf32>
    %466 = arith.addf %462, %465 : vector<8x256xf32>
    %cst_191 = arith.constant dense<0.000000e+00> : vector<8xf32>
    %467 = vector.multi_reduction <add>, %466, %cst_191 [1] : vector<8x256xf32> to vector<8xf32>
    %468 = vector.shape_cast %467 : vector<8xf32> to vector<8x1xf32>
    %cst_192 = arith.constant 2.560000e+02 : f32
    %469 = vector.broadcast %cst_192 : f32 to vector<8x1xf32>
    %470 = arith.divf %468, %469 : vector<8x1xf32>
    %471 = vector.broadcast %470 : vector<8x1xf32> to vector<8x256xf32>
    %472 = arith.subf %466, %471 : vector<8x256xf32>
    %473 = arith.mulf %472, %472 : vector<8x256xf32>
    %cst_193 = arith.constant dense<0.000000e+00> : vector<8xf32>
    %474 = vector.multi_reduction <add>, %473, %cst_193 [1] : vector<8x256xf32> to vector<8xf32>
    %475 = vector.shape_cast %474 : vector<8xf32> to vector<8x1xf32>
    %cst_194 = arith.constant 2.560000e+02 : f32
    %476 = vector.broadcast %cst_194 : f32 to vector<8x1xf32>
    %477 = arith.divf %475, %476 : vector<8x1xf32>
    %cst_195 = arith.constant 9.99999974E-6 : f32
    %478 = vector.broadcast %cst_195 : f32 to vector<8x1xf32>
    %479 = arith.addf %477, %478 : vector<8x1xf32>
    %480 = math.rsqrt %479 : vector<8x1xf32>
    %481 = vector.broadcast %480 : vector<8x1xf32> to vector<8x256xf32>
    %482 = arith.mulf %472, %481 : vector<8x256xf32>
    %c0_196 = arith.constant 0 : index
    %c0_197 = arith.constant 0 : index
    %c0_198 = arith.constant 0 : index
    %483 = vector.load %arg17[%c0_196, %c0_197, %c0_198] : memref<1x1x256xf32, #tpu.memory_space<vmem>>, vector<1x1x256xf32>
    %484 = vector.shape_cast %483 : vector<1x1x256xf32> to vector<1x256xf32>
    %485 = vector.broadcast %484 : vector<1x256xf32> to vector<8x256xf32>
    %486 = arith.mulf %485, %482 : vector<8x256xf32>
    %c0_199 = arith.constant 0 : index
    %c0_200 = arith.constant 0 : index
    %c0_201 = arith.constant 0 : index
    %487 = vector.load %arg18[%c0_199, %c0_200, %c0_201] : memref<1x1x256xf32, #tpu.memory_space<vmem>>, vector<1x1x256xf32>
    %488 = vector.shape_cast %487 : vector<1x1x256xf32> to vector<1x256xf32>
    %489 = vector.broadcast %488 : vector<1x256xf32> to vector<8x256xf32>
    %490 = arith.addf %486, %489 : vector<8x256xf32>
    %491 = arith.negf %490 : vector<8x256xf32>
    %492 = math.exp %491 : vector<8x256xf32>
    %cst_202 = arith.constant 1.000000e+00 : f32
    %493 = vector.broadcast %cst_202 : f32 to vector<8x256xf32>
    %494 = arith.addf %493, %492 : vector<8x256xf32>
    %495 = arith.divf %493, %494 : vector<8x256xf32>
    %496 = arith.mulf %490, %495 : vector<8x256xf32>
    %497 = vector.extract_strided_slice %496 {offsets = [1, 0], sizes = [1, 256], strides = [1, 1]} : vector<8x256xf32> to vector<1x256xf32>
    %c0_203 = arith.constant 0 : index
    %c0_204 = arith.constant 0 : index
    %c0_205 = arith.constant 0 : index
    %c0_206 = arith.constant 0 : index
    %c0_207 = arith.constant 0 : index
    %498 = vector.load %arg19[%c0_203, %c0_204, %c0_205, %c0_206, %c0_207] : memref<1x1x1x1x256xf32, #tpu.memory_space<vmem>>, vector<1x1x1x1x256xf32>
    %499 = vector.shape_cast %498 : vector<1x1x1x1x256xf32> to vector<1x256xf32>
    %500 = vector.shape_cast %497 : vector<1x256xf32> to vector<1x1x1x1x256xf32>
    tpu.vector_store %arg19[%c0_203, %c0_204, %c0_205, %c0_206, %c0_207], %500 {strides = array<i32>} : memref<1x1x1x1x256xf32, #tpu.memory_space<vmem>>, vector<1x1x1x1x256xf32>,
    return
  }
  func.func @transform_0(%arg0: i32, %arg1: i32) -> (i32, i32, i32, i32, i32) {
    %c0_i32 = arith.constant 0 : i32
    %c0_i32_0 = arith.constant 0 : i32
    %c0_i32_1 = arith.constant 0 : i32
    %c0_i32_2 = arith.constant 0 : i32
    return %arg0, %arg1, %c0_i32, %c0_i32_0, %c0_i32_1 : i32, i32, i32, i32, i32
  }
  func.func @transform_1(%arg0: i32, %arg1: i32) -> (i32, i32, i32) {
    %c0_i32 = arith.constant 0 : i32
    %c0_i32_0 = arith.constant 0 : i32
    %c0_i32_1 = arith.constant 0 : i32
    return %arg0, %c0_i32, %c0_i32_0 : i32, i32, i32
  }
  func.func @transform_2(%arg0: i32, %arg1: i32) -> (i32, i32, i32) {
    %c0_i32 = arith.constant 0 : i32
    %c0_i32_0 = arith.constant 0 : i32
    %c0_i32_1 = arith.constant 0 : i32
    return %arg0, %c0_i32, %c0_i32_0 : i32, i32, i32
  }
  func.func @transform_3(%arg0: i32, %arg1: i32) -> (i32, i32, i32) {
    %c0_i32 = arith.constant 0 : i32
    %c0_i32_0 = arith.constant 0 : i32
    %c0_i32_1 = arith.constant 0 : i32
    return %arg0, %c0_i32, %c0_i32_0 : i32, i32, i32
  }
  func.func @transform_4(%arg0: i32, %arg1: i32) -> (i32, i32, i32) {
    %c0_i32 = arith.constant 0 : i32
    %c0_i32_0 = arith.constant 0 : i32
    %c0_i32_1 = arith.constant 0 : i32
    return %arg0, %c0_i32, %c0_i32_0 : i32, i32, i32
  }
  func.func @transform_5(%arg0: i32, %arg1: i32) -> (i32, i32, i32) {
    %c0_i32 = arith.constant 0 : i32
    %c0_i32_0 = arith.constant 0 : i32
    %c0_i32_1 = arith.constant 0 : i32
    return %arg0, %c0_i32, %c0_i32_0 : i32, i32, i32
  }
  func.func @transform_6(%arg0: i32, %arg1: i32) -> (i32, i32, i32) {
    %c0_i32 = arith.constant 0 : i32
    %c0_i32_0 = arith.constant 0 : i32
    %c0_i32_1 = arith.constant 0 : i32
    return %arg0, %c0_i32, %c0_i32_0 : i32, i32, i32
  }
  func.func @transform_7(%arg0: i32, %arg1: i32) -> (i32, i32, i32) {
    %c0_i32 = arith.constant 0 : i32
    %c0_i32_0 = arith.constant 0 : i32
    %c0_i32_1 = arith.constant 0 : i32
    return %arg0, %c0_i32, %c0_i32_0 : i32, i32, i32
  }
  func.func @transform_8(%arg0: i32, %arg1: i32) -> (i32, i32, i32) {
    %c0_i32 = arith.constant 0 : i32
    %c0_i32_0 = arith.constant 0 : i32
    %c0_i32_1 = arith.constant 0 : i32
    return %arg0, %c0_i32, %c0_i32_0 : i32, i32, i32
  }
  func.func @transform_9(%arg0: i32, %arg1: i32) -> (i32, i32, i32) {
    %c0_i32 = arith.constant 0 : i32
    %c0_i32_0 = arith.constant 0 : i32
    %c0_i32_1 = arith.constant 0 : i32
    return %arg0, %c0_i32, %c0_i32_0 : i32, i32, i32
  }
  func.func @transform_10(%arg0: i32, %arg1: i32) -> (i32, i32, i32) {
    %c0_i32 = arith.constant 0 : i32
    %c0_i32_0 = arith.constant 0 : i32
    %c0_i32_1 = arith.constant 0 : i32
    return %arg0, %c0_i32, %c0_i32_0 : i32, i32, i32
  }
  func.func @transform_11(%arg0: i32, %arg1: i32) -> (i32, i32, i32) {
    %c0_i32 = arith.constant 0 : i32
    %c0_i32_0 = arith.constant 0 : i32
    %c0_i32_1 = arith.constant 0 : i32
    return %arg0, %c0_i32, %c0_i32_0 : i32, i32, i32
  }
  func.func @transform_12(%arg0: i32, %arg1: i32) -> (i32, i32, i32) {
    %c0_i32 = arith.constant 0 : i32
    %c0_i32_0 = arith.constant 0 : i32
    %c0_i32_1 = arith.constant 0 : i32
    return %arg0, %c0_i32, %c0_i32_0 : i32, i32, i32
  }
  func.func @transform_13(%arg0: i32, %arg1: i32) -> (i32, i32, i32) {
    %c0_i32 = arith.constant 0 : i32
    %c0_i32_0 = arith.constant 0 : i32
    %c0_i32_1 = arith.constant 0 : i32
    return %arg0, %c0_i32, %c0_i32_0 : i32, i32, i32
  }
  func.func @transform_14(%arg0: i32, %arg1: i32) -> (i32, i32, i32) {
    %c0_i32 = arith.constant 0 : i32
    %c0_i32_0 = arith.constant 0 : i32
    %c0_i32_1 = arith.constant 0 : i32
    return %arg0, %c0_i32, %c0_i32_0 : i32, i32, i32
  }
  func.func @transform_15(%arg0: i32, %arg1: i32) -> (i32, i32, i32) {
    %c0_i32 = arith.constant 0 : i32
    %c0_i32_0 = arith.constant 0 : i32
    %c0_i32_1 = arith.constant 0 : i32
    return %arg0, %c0_i32, %c0_i32_0 : i32, i32, i32
  }
  func.func @transform_16(%arg0: i32, %arg1: i32) -> (i32, i32, i32) {
    %c0_i32 = arith.constant 0 : i32
    %c0_i32_0 = arith.constant 0 : i32
    %c0_i32_1 = arith.constant 0 : i32
    return %arg0, %c0_i32, %c0_i32_0 : i32, i32, i32
  }
  func.func @transform_17(%arg0: i32, %arg1: i32) -> (i32, i32, i32, i32, i32) {
    %c0_i32 = arith.constant 0 : i32
    %c0_i32_0 = arith.constant 0 : i32
    %c0_i32_1 = arith.constant 0 : i32
    %c0_i32_2 = arith.constant 0 : i32
    return %arg0, %arg1, %c0_i32, %c0_i32_0, %c0_i32_1 : i32, i32, i32, i32, i32
  }
}

</mosaic_0001>

<bundles_post_ra>
// kernel: multi_view_cnn_encoder.1
= control target key start
LH: loop header
LB: loop body
LE: loop exit
PB: predicated region body
PF: predicated region fallthrough
CT: control target
= control target key end

     0   :  { %s9484_s24 = smov 0   ;;  %s9486_s25 = smov 0   ;;  %s11748_s0 = inlined_call_operand.vmem [shape: f32[2,2,16,16,4], index: 0, kind: input, shape index: {}]   ;;  %s11749_s1 = inlined_call_operand.vmem [shape: bf16[2,64,32], index: 1, kind: input, shape index: {}]   ;;  %s11750_s2 = inlined_call_operand.vmem [shape: f32[2,1,32], index: 2, kind: input, shape index: {}]   ;;  %s11751_s3 = inlined_call_operand.vmem [shape: f32[2,1,32], index: 3, kind: input, shape index: {}]   ;;  %s11752_s4 = inlined_call_operand.vmem [shape: f32[2,1,32], index: 4, kind: input, shape index: {}]   ;;  %s11753_s5 = inlined_call_operand.vmem [shape: bf16[2,512,64], index: 5, kind: input, shape index: {}]   ;;  %s11754_s6 = inlined_call_operand.vmem [shape: f32[2,1,64], index: 6, kind: input, shape index: {}]   ;;  %s11755_s7 = inlined_call_operand.vmem [shape: f32[2,1,64], index: 7, kind: input, shape index: {}]   ;;  %s11756_s8 = inlined_call_operand.vmem [shape: f32[2,1,64], index: 8, kind: input, shape index: {}]   ;;  %s11757_s9 = inlined_call_operand.vmem [shape: bf16[2,1024,128], index: 9, kind: input, shape index: {}]   ;;  %s11758_s10 = inlined_call_operand.vmem [shape: f32[2,1,128], index: 10, kind: input, shape index: {}]   ;;  %s11759_s11 = inlined_call_operand.vmem [shape: f32[2,1,128], index: 11, kind: input, shape index: {}]   ;;  %s11760_s12 = inlined_call_operand.vmem [shape: f32[2,1,128], index: 12, kind: input, shape index: {}]   ;;  %s11761_s13 = inlined_call_operand.vmem [shape: bf16[2,2048,256], index: 13, kind: input, shape index: {}]   ;;  %s11762_s14 = inlined_call_operand.vmem [shape: f32[2,1,256], index: 14, kind: input, shape index: {}]   ;;  %s11763_s15 = inlined_call_operand.vmem [shape: f32[2,1,256], index: 15, kind: input, shape index: {}]   ;;  %s11764_s16 = inlined_call_operand.vmem [shape: f32[2,1,256], index: 16, kind: input, shape index: {}]   ;;  %s11765_s17 = inlined_call_operand.vmem [shape: f32[2,2,1,1,256], index: 17, kind: output, shape index: {}]  }
   0x1   :  { %11803 = sst [smem:[#allocation15_spill]] %s11748_s0  ;;  %s9488_s26 = smov 0  }
   0x2   :  { %11804 = sst [smem:[#allocation16_spill]] %s11749_s1  ;;  %s9490_s27 = smov 0  }
   0x3   :  { %11805 = sst [smem:[#allocation17_spill]] %s11765_s17  ;;  %s9492_s28 = smov 0  }
   0x4 LB: > { %11806 = sst [smem:[#allocation6_spill]] %s9365_s26  ;;  %s36_s29 = sadd.s32 1, %s9365_s26  ;;  %s9373_s28 = sphi %s9492_s28, %s27_s28   ;;  %s9369_s27 = sphi %s9490_s27, %s11849_s27   ;;  %s9365_s26 = sphi %s9488_s26, %s11848_s26   ;;  %s9361_s25 = sphi %s9486_s25, %s11847_s25   ;;  %s9357_s24 = sphi %s9484_s24, %s11846_s24  }
   0x5   : > { %11807 = sst [smem:[#allocation7_spill]] %s9369_s27  ;;  %s39_s0 = sadd.s32 1, %s9369_s27 }
   0x6   : > { %11808 = sst [smem:[#allocation8_spill]] %s9373_s28  ;;  %p37_p0 = scmp.ge.s32.totalorder %s36_s29, 2 }
   0x7   : > { %p7305_p1 = scmp.ge.s32.totalorder %s9373_s28, 1  ;;  %p646_p2 = scmp.lt.s32.totalorder %s9373_s28, 5 }
   0x8   : > { %s11851_s29 = smov (%p37_p0, %s36_s29), 0  ;;  %s11853_s0 = smov (!%p37_p0, %s39_s0), %s9369_s27 }
   0x9   : > { %11809 = sst [smem:[#allocation9_spill]] %s11851_s29  ;;  %p647_p3 = pnand %p7305_p1, %p646_p2 }
   0xa   : > { %p41_p4 = scmp.ge.s32.totalorder %s11853_s0, 2 }
   0xb   : > { %650 = sbr.rel (%p647_p3) target bundleno = 3055 (0xbef), region = 88 }
   0xc   : > { %s11855_s0 = smov (%p41_p4, %s11853_s0), 0 }
   0xd   : > { %11810 = sst [smem:[#allocation10_spill]] %s11855_s0 }
  0x10   : > { %vm841_vm0 = vcmask 31744   ;;  %vm846_vm1 = vcmask 25600   ;;  %v9375_v0 = vmov 0.0   ;;  %p764_p5 = scmp.lt.s32.totalorder %s9361_s25, 1  ;;  %p766_p6 = scmp.lt.s32.totalorder %s9357_s24, 1  ;;  %vm933_vm2 = vcmask 261120  }
  0x11   : > { %842 = vst.msk [vmem:[#allocation2] sm:$0xff] %vm841_vm0, %v9375_v0  ;;  %843 = vst.msk [vmem:[#allocation2 + $0x8] sm:$0xff] %vm841_vm0, %v9375_v0  ;;  %s11778_s20 = smov 4   ;;  %s11812_s23 = sld [smem:[#allocation15_spill]]  ;;  %vm965_vm3 = vcmask 523264   ;;  %vm2291_vm4 = vcmask 64512  }
  0x12   : > { %844 = vst.msk [vmem:[#allocation2 + $0x10] sm:$0xff] %vm841_vm0, %v9375_v0  ;;  %845 = vst.msk [vmem:[#allocation2 + $0x18] sm:$0xff] %vm841_vm0, %v9375_v0  ;;  %s11857_s25 = smov (!%p764_p5, %s9361_s25), 1  ;;  %s11859_s24 = smov (!%p766_p6, %s9357_s24), 1  ;;  %vm2308_vm5 = vcmask 97280   ;;  %vm2325_vm6 = vcmask 130048  }
  0x13   : > { %848 = vst.msk [vmem:[#allocation2 + $0x28] sm:$0xff] %vm841_vm0, %v9375_v0  ;;  %849 = vst.msk [vmem:[#allocation2 + $0x30] sm:$0xff] %vm841_vm0, %v9375_v0  ;;  %11811 = sst [smem:[#allocation11_spill]] %s11859_s24  ;;  %s7307_s30 = sshll.u32 %s11857_s25, 6  ;;  %vm2342_vm7 = vcmask 162816   ;;  %vm2359_vm8 = vcmask 195584  }
  0x14   : > { %850 = vst.msk [vmem:[#allocation2 + $0x38] sm:$0xff] %vm841_vm0, %v9375_v0  ;;  %851 = vst.msk [vmem:[#allocation2 + $0x40] sm:$0xff] %vm841_vm0, %v9375_v0  ;;  %s7306_s18 = sshll.u32 %s11859_s24, 5  ;;  %s11780_s21 = smov 24   ;;  %vm2376_vm9 = vcmask 228352   ;;  %vm2409_vm10 = vcmask 293888  }
  0x15   : > { %853 = vst.msk [vmem:[#allocation2 + $0x50] sm:$0xff] %vm841_vm0, %v9375_v0  ;;  %854 = vst.msk [vmem:[#allocation2 + $0x58] sm:$0xff] %vm841_vm0, %v9375_v0  ;;  %s770_s19 = sadd.s32 %s7307_s30, %s7306_s18  ;;  %s11770_s30 = smov 8   ;;  %vm2426_vm11 = vcmask 326656   ;;  %vm2443_vm12 = vcmask 359424   ;;  %vm2460_vm13 = vcmask 392192  }
  0x16   : > { %855 = vst.msk [vmem:[#allocation2 + $0x60] sm:$0xff] %vm841_vm0, %v9375_v0  ;;  %856 = vst.msk [vmem:[#allocation2 + $0x68] sm:$0xff] %vm841_vm0, %v9375_v0  ;;  %s7308_s1 = sshll.u32 %s770_s19, 3  ;;  %s11776_s18 = smov 12   ;;  %vm2477_vm14 = vcmask 424960   ;;  %vm2494_vm15 = vcmask 457728  }
  0x17   : > { %858 = vst.msk [vmem:[#allocation2 + $0x78] sm:$0xff] %vm841_vm0, %v9375_v0  ;;  %859 = vst.msk [vmem:[#allocation2 + $0x80] sm:$0xff] %vm841_vm0, %v9375_v0  ;;  %s9724_s0 = scalar_lea.vmem %s11812_s23, %s7308_s1  ;;  %s11794_s19 = smov 16  }
  0x18   : > { %860 = vst.msk [vmem:[#allocation2 + $0x88] sm:$0xff] %vm841_vm0, %v9375_v0  ;;  %861 = vst.msk [vmem:[#allocation2 + $0x90] sm:$0xff] %vm841_vm0, %v9375_v0  ;;  %v1198_v1 = vld [vmem:[#allocation2 + $0x1] ss:$2 sm:$0xff]  ;;  %v999_v10 = vld [vmem:[%s9724_s0 + $0x10] sm:$0xff]  ;;  %s11782_s1 = smov 20  }
  0x19   : > { %863 = vst.msk [vmem:[#allocation2 + $0xa0] sm:$0xff] %vm841_vm0, %v9375_v0  ;;  %864 = vst.msk [vmem:[#allocation2 + $0xa8] sm:$0xff] %vm841_vm0, %v9375_v0  ;;  %v1200_v2 = vld [vmem:[#allocation2 + $0x11] ss:$2 sm:$0xff]  ;;  %v1270_v3 = vld [vmem:[#allocation2 + $0x2] ss:$2 sm:$0xff] }
  0x1a   : > { %865 = vst.msk [vmem:[#allocation2 + $0xb0] sm:$0xff] %vm841_vm0, %v9375_v0  ;;  %866 = vst.msk [vmem:[#allocation2 + $0xb8] sm:$0xff] %vm841_vm0, %v9375_v0  ;;  %v7996_v4 = vpack.i.bf16 %v1200_v2, %v1198_v1  ;;  %v1342_v6 = vld [vmem:[#allocation2 + $0x3] ss:$2 sm:$0xff]  ;;  %v1000_v11 = vld [vmem:[%s9724_s0 + $0x18] sm:$0xff]  ;;  %s11766_s22 = smov 28  }
  0x1b   : > { %868 = vst.msk [vmem:[#allocation2 + $0xc8] sm:$0xff] %vm841_vm0, %v9375_v0  ;;  %869 = vst.msk [vmem:[#allocation2 + $0xd0] sm:$0xff] %vm841_vm0, %v9375_v0  ;;  %v997_v12 = vld [vmem:[%s9724_s0] sm:$0xff]  ;;  %v1031_v13 = vmul.f32 0.003921569, %v999_v10  ;;  %v998_v15 = vld [vmem:[%s9724_s0 + $0x8] sm:$0xff] }
  0x1c   : > { %870 = vst.msk [vmem:[#allocation2 + $0xd8] sm:$0xff] %vm841_vm0, %v9375_v0  ;;  %871 = vst.msk [vmem:[#allocation2 + $0xe0] sm:$0xff] %vm841_vm0, %v9375_v0  ;;  %7997 = vrot.lane.b32.xlu0 %v7996_v4, %s11778_s20  ;;  %v1032_v14 = vmul.f32 0.003921569, %v1000_v11  ;;  %v1001_v16 = vld [vmem:[%s9724_s0 + $0x20] sm:$0xff]  ;;  %v1002_v19 = vld [vmem:[%s9724_s0 + $0x28] sm:$0xff] }
  0x1d   : > { %873 = vst.msk [vmem:[#allocation2 + $0xf0] sm:$0xff] %vm841_vm0, %v9375_v0  ;;  %874 = vst.msk [vmem:[#allocation2 + $0xf8] sm:$0xff] %vm841_vm0, %v9375_v0  ;;  %v1029_v17 = vmul.f32 0.003921569, %v997_v12  ;;  %v1030_v18 = vmul.f32 0.003921569, %v998_v15 }
  0x1e   : > { %875 = vst.msk [vmem:[#allocation2 + $0x100] sm:$0xff] %vm841_vm0, %v9375_v0  ;;  %876 = vst.msk [vmem:[#allocation2 + $0x108] sm:$0xff] %vm841_vm0, %v9375_v0  ;;  %v1003_v20 = vld [vmem:[%s9724_s0 + $0x30] sm:$0xff]  ;;  %v7324_v21 = vadd.f32 -0.5, %v1031_v13  ;;  %v7325_v22 = vadd.f32 -0.5, %v1032_v14  ;;  %v1004_v27 = vld [vmem:[%s9724_s0 + $0x38] sm:$0xff] }
  0x1f   : > { %878 = vst.msk [vmem:[#allocation2 + $0x118] sm:$0xff] %vm841_vm0, %v9375_v0  ;;  %879 = vst.msk [vmem:[#allocation2 + $0x120] sm:$0xff] %vm841_vm0, %v9375_v0  ;;  %v1033_v23 = vmul.f32 0.003921569, %v1001_v16  ;;  %v1034_v24 = vmul.f32 0.003921569, %v1002_v19 }
  0x20   : > { %880 = vst.msk [vmem:[#allocation2 + $0x128] sm:$0xff] %vm841_vm0, %v9375_v0  ;;  %881 = vst.msk [vmem:[#allocation2 + $0x130] sm:$0xff] %vm841_vm0, %v9375_v0  ;;  %v7322_v25 = vadd.f32 -0.5, %v1029_v17  ;;  %v7323_v26 = vadd.f32 -0.5, %v1030_v18  ;;  %v1035_v28 = vmul.f32 0.003921569, %v1003_v20 }
  0x21   : > { %883 = vst.msk [vmem:[#allocation2 + $0x140] sm:$0xff] %vm841_vm0, %v9375_v0  ;;  %884 = vst.msk [vmem:[#allocation2 + $0x148] sm:$0xff] %vm841_vm0, %v9375_v0  ;;  %v1007_v29 = vld [vmem:[%s9724_s0 + $0x50] sm:$0xff]  ;;  %v7326_v30 = vadd.f32 -0.5, %v1033_v23  ;;  %v7327_v31 = vadd.f32 -0.5, %v1034_v24  ;;  %v1008_v33 = vld [vmem:[%s9724_s0 + $0x58] sm:$0xff] }
  0x22   : > { %885 = vst.msk [vmem:[#allocation2 + $0x150] sm:$0xff] %vm841_vm0, %v9375_v0  ;;  %886 = vst.msk [vmem:[#allocation2 + $0x158] sm:$0xff] %vm841_vm0, %v9375_v0  ;;  %v1036_v32 = vmul.f32 0.003921569, %v1004_v27  ;;  %v1005_v34 = vld [vmem:[%s9724_s0 + $0x40] sm:$0xff]  ;;  %v7328_v35 = vadd.f32 -0.5, %v1035_v28 }
  0x23   : > { %888 = vst.msk [vmem:[#allocation2 + $0x168] sm:$0xff] %vm841_vm0, %v9375_v0  ;;  %889 = vst.msk [vmem:[#allocation2 + $0x170] sm:$0xff] %vm841_vm0, %v9375_v0  ;;  %v1039_v36 = vmul.f32 0.003921569, %v1007_v29  ;;  %v1040_v37 = vmul.f32 0.003921569, %v1008_v33 }
  0x24   : > { %890 = vst.msk [vmem:[#allocation2 + $0x178] sm:$0xff] %vm841_vm0, %v9375_v0  ;;  %891 = vst.msk [vmem:[#allocation2 + $0x180] sm:$0xff] %vm841_vm0, %v9375_v0  ;;  %v1006_v38 = vld [vmem:[%s9724_s0 + $0x48] sm:$0xff]  ;;  %v7329_v39 = vadd.f32 -0.5, %v1036_v32  ;;  %v1037_v40 = vmul.f32 0.003921569, %v1005_v34 }
  0x25   : > { %893 = vst.msk [vmem:[#allocation2 + $0x190] sm:$0xff] %vm841_vm0, %v9375_v0  ;;  %894 = vst.msk [vmem:[#allocation2 + $0x198] sm:$0xff] %vm841_vm0, %v9375_v0  ;;  %v7332_v41 = vadd.f32 -0.5, %v1039_v36  ;;  %v7333_v42 = vadd.f32 -0.5, %v1040_v37  ;;  %v1038_v43 = vmul.f32 0.003921569, %v1006_v38 }
  0x26   : > { %895 = vst.msk [vmem:[#allocation2 + $0x1a0] sm:$0xff] %vm841_vm0, %v9375_v0  ;;  %896 = vst.msk [vmem:[#allocation2 + $0x1a8] sm:$0xff] %vm841_vm0, %v9375_v0  ;;  %v1009_v44 = vld [vmem:[%s9724_s0 + $0x60] sm:$0xff]  ;;  %v1010_v45 = vld [vmem:[%s9724_s0 + $0x68] sm:$0xff]  ;;  %v7330_v46 = vadd.f32 -0.5, %v1037_v40  ;;  %s11768_s23 = smov 32  }
  0x27   : > { %898 = vst.msk [vmem:[#allocation2 + $0x1b8] sm:$0xff] %vm841_vm0, %v9375_v0  ;;  %899 = vst.msk [vmem:[#allocation2 + $0x1c0] sm:$0xff] %vm841_vm0, %v9375_v0  ;;  %v1041_v47 = vmul.f32 0.003921569, %v1009_v44  ;;  %v1042_v48 = vmul.f32 0.003921569, %v1010_v45 }
  0x28   : > { %900 = vst.msk [vmem:[#allocation2 + $0x1c8] sm:$0xff] %vm841_vm0, %v9375_v0  ;;  %901 = vst.msk [vmem:[#allocation2 + $0x1d0] sm:$0xff] %vm841_vm0, %v9375_v0  ;;  %v7331_v49 = vadd.f32 -0.5, %v1038_v43  ;;  %v1011_v17 = vld [vmem:[%s9724_s0 + $0x70] sm:$0xff]  ;;  %v1012_v18 = vld [vmem:[%s9724_s0 + $0x78] sm:$0xff]  ;;  %s11823_s29 = smov 44  }
  0x29   : > { %903 = vst.msk [vmem:[#allocation2 + $0x1e0] sm:$0xff] %vm841_vm0, %v9375_v0  ;;  %904 = vst.msk [vmem:[#allocation2 + $0x1e8] sm:$0xff] %vm841_vm0, %v9375_v0  ;;  %v7334_v51 = vadd.f32 -0.5, %v1041_v47  ;;  %v7335_v52 = vadd.f32 -0.5, %v1042_v48  ;;  %v1015_v19 = vld [vmem:[%s9724_s0 + $0x90] sm:$0xff]  ;;  %v1016_v27 = vld [vmem:[%s9724_s0 + $0x98] sm:$0xff] }
  0x2a   : > { %905 = vst.msk [vmem:[#allocation2 + $0x1f0] sm:$0xff] %vm841_vm0, %v9375_v0  ;;  %906 = vst.msk [vmem:[#allocation2 + $0x1f8] sm:$0xff] %vm841_vm0, %v9375_v0  ;;  %v1013_v28 = vld [vmem:[%s9724_s0 + $0x80] sm:$0xff]  ;;  %v1044_v29 = vmul.f32 0.003921569, %v1012_v18  ;;  %v1014_v34 = vld [vmem:[%s9724_s0 + $0x88] sm:$0xff] }
  0x2b   : > { %908 = vst.msk [vmem:[#allocation2 + $0x208] sm:$0xff] %vm841_vm0, %v9375_v0  ;;  %909 = vst.msk [vmem:[#allocation2 + $0x210] sm:$0xff] %vm841_vm0, %v9375_v0  ;;  %v1017_v40 = vld [vmem:[%s9724_s0 + $0xa0] sm:$0xff]  ;;  %v1045_v43 = vmul.f32 0.003921569, %v1013_v28  ;;  %s11824_s27 = smov 16  }
  0x2c   : > { %910 = vst.msk [vmem:[#allocation2 + $0x218] sm:$0xff] %vm841_vm0, %v9375_v0  ;;  %911 = vst.msk [vmem:[#allocation2 + $0x220] sm:$0xff] %vm841_vm0, %v9375_v0  ;;  %v7337_v37 = vadd.f32 -0.5, %v1044_v29  ;;  %v1046_v44 = vmul.f32 0.003921569, %v1014_v34  ;;  %v1025_v29 = vld [vmem:[%s9724_s0 + $0xe0] sm:$0xff] }
  0x2d   : > { %913 = vst.msk [vmem:[#allocation2 + $0x230] sm:$0xff] %vm841_vm0, %v9375_v0  ;;  %914 = vst.msk [vmem:[#allocation2 + $0x238] sm:$0xff] %vm841_vm0, %v9375_v0  ;;  %v1049_v47 = vmul.f32 0.003921569, %v1017_v40  ;;  %v7338_v48 = vadd.f32 -0.5, %v1045_v43  ;;  %s11825_s26 = smov 48  }
  0x2e   : > { %915 = vst.msk [vmem:[#allocation2 + $0x240] sm:$0xff] %vm841_vm0, %v9375_v0  ;;  %916 = vst.msk [vmem:[#allocation2 + $0x248] sm:$0xff] %vm841_vm0, %v9375_v0  ;;  %s11826_s28 = smov 52   ;;  %s11827_s17 = smov 56  }
  0x2f   : > { %918 = vst.msk [vmem:[#allocation2 + $0x258] sm:$0xff] %vm841_vm0, %v9375_v0  ;;  %919 = vst.msk [vmem:[#allocation2 + $0x260] sm:$0xff] %vm841_vm0, %v9375_v0  ;;  %s11830_s24 = smov 60  }
  0x30   : > { %920 = vst.msk [vmem:[#allocation2 + $0x268] sm:$0xff] %vm841_vm0, %v9375_v0  ;;  %921 = vst.msk [vmem:[#allocation2 + $0x270] sm:$0xff] %vm841_vm0, %v9375_v0 }
  0x31   : > { %923 = vst.msk [vmem:[#allocation2 + $0x280] sm:$0xff] %vm841_vm0, %v9375_v0  ;;  %924 = vst.msk [vmem:[#allocation2 + $0x288] sm:$0xff] %vm841_vm0, %v9375_v0 }
  0x32   : > { %925 = vst.msk [vmem:[#allocation2 + $0x290] sm:$0xff] %vm841_vm0, %v9375_v0  ;;  %926 = vst.msk [vmem:[#allocation2 + $0x298] sm:$0xff] %vm841_vm0, %v9375_v0 }
  0x33   : > { %928 = vst.msk [vmem:[#allocation2 + $0x2a8] sm:$0xff] %vm841_vm0, %v9375_v0  ;;  %929 = vst.msk [vmem:[#allocation2 + $0x2b0] sm:$0xff] %vm841_vm0, %v9375_v0 }
  0x34   : > { %930 = vst.msk [vmem:[#allocation2 + $0x2b8] sm:$0xff] %vm841_vm0, %v9375_v0  ;;  %931 = vst.msk [vmem:[#allocation2 + $0x2c0] sm:$0xff] %vm841_vm0, %v9375_v0 }
  0x35   : > { %985 = vst [vmem:[#allocation5] sm:$0xff] %v9375_v0  ;;  %986 = vst [vmem:[#allocation5 + $0x8] sm:$0xff] %v9375_v0 }
  0x36   : > { %987 = vst [vmem:[#allocation5 + $0x10] sm:$0x3] %v9375_v0  ;;  %988 = vst [vmem:[#allocation5 + $0x18] sm:$0xff] %v9375_v0 }
  0x37   : > { %989 = vst [vmem:[#allocation5 + $0x20] sm:$0xff] %v9375_v0  ;;  %990 = vst [vmem:[#allocation5 + $0x28] sm:$0x3] %v9375_v0 }
  0x38   : > { %991 = vst [vmem:[#allocation5 + $0x30] sm:$0xff] %v9375_v0  ;;  %992 = vst [vmem:[#allocation5 + $0x38] sm:$0xff] %v9375_v0 }
  0x39   : > { %993 = vst [vmem:[#allocation5 + $0x40] sm:$0x3] %v9375_v0  ;;  %994 = vst [vmem:[#allocation5 + $0x48] sm:$0xff] %v9375_v0 }
  0x3a   : > { %995 = vst [vmem:[#allocation5 + $0x50] sm:$0xff] %v9375_v0  ;;  %996 = vst [vmem:[#allocation5 + $0x58] sm:$0x3] %v9375_v0 }
  0x3b   : > { %847 = vst.msk [vmem:[#allocation2 + $0x20] sm:$0x3] %vm846_vm1, %v9375_v0  ;;  %852 = vst.msk [vmem:[#allocation2 + $0x48] sm:$0x3] %vm846_vm1, %v9375_v0 }
  0x3c   : > { %857 = vst.msk [vmem:[#allocation2 + $0x70] sm:$0x3] %vm846_vm1, %v9375_v0  ;;  %862 = vst.msk [vmem:[#allocation2 + $0x98] sm:$0x3] %vm846_vm1, %v9375_v0 }
  0x3d   : > { %867 = vst.msk [vmem:[#allocation2 + $0xc0] sm:$0x3] %vm846_vm1, %v9375_v0  ;;  %872 = vst.msk [vmem:[#allocation2 + $0xe8] sm:$0x3] %vm846_vm1, %v9375_v0 }
  0x3e   : > { %877 = vst.msk [vmem:[#allocation2 + $0x110] sm:$0x3] %vm846_vm1, %v9375_v0  ;;  %882 = vst.msk [vmem:[#allocation2 + $0x138] sm:$0x3] %vm846_vm1, %v9375_v0 }
  0x3f   : > { %887 = vst.msk [vmem:[#allocation2 + $0x160] sm:$0x3] %vm846_vm1, %v9375_v0  ;;  %892 = vst.msk [vmem:[#allocation2 + $0x188] sm:$0x3] %vm846_vm1, %v9375_v0 }
  0x40   : > { %897 = vst.msk [vmem:[#allocation2 + $0x1b0] sm:$0x3] %vm846_vm1, %v9375_v0  ;;  %902 = vst.msk [vmem:[#allocation2 + $0x1d8] sm:$0x3] %vm846_vm1, %v9375_v0 }
  0x41   : > { %907 = vst.msk [vmem:[#allocation2 + $0x200] sm:$0x3] %vm846_vm1, %v9375_v0  ;;  %912 = vst.msk [vmem:[#allocation2 + $0x228] sm:$0x3] %vm846_vm1, %v9375_v0 }
  0x42   : > { %917 = vst.msk [vmem:[#allocation2 + $0x250] sm:$0x3] %vm846_vm1, %v9375_v0  ;;  %922 = vst.msk [vmem:[#allocation2 + $0x278] sm:$0x3] %vm846_vm1, %v9375_v0  ;;  %v1272_v5 = vld [vmem:[#allocation2 + $0x12] ss:$2 sm:$0xff] }
  0x43   : > { %927 = vst.msk [vmem:[#allocation2 + $0x2a0] sm:$0x3] %vm846_vm1, %v9375_v0  ;;  %932 = vst.msk [vmem:[#allocation2 + $0x2c8] sm:$0x3] %vm846_vm1, %v9375_v0  ;;  %v1344_v7 = vld [vmem:[#allocation2 + $0x13] ss:$2 sm:$0xff]  ;;  %v8001_v8 = vpack.i.bf16 %v1272_v5, %v1270_v3 }
  0x44   : > { %v8006_v9 = vpack.i.bf16 %v1344_v7, %v1342_v6  ;;  %1096 = vst.msk [vmem:[#allocation2 + $0x53] sm:$0xff] %vm841_vm0, %v7324_v21  ;;  %1097 = vst.msk [vmem:[#allocation2 + $0x5b] sm:$0xff] %vm841_vm0, %v7325_v22  ;;  %v1352_v50 = vld [vmem:[#allocation2 + $0x63] ss:$2 sm:$0xff]  ;;  %v1360_v18 = vld [vmem:[#allocation2 + $0xb3] ss:$2 sm:$0xff] }
  0x45   : > { %8002 = vrot.lane.b32.xlu1 %v8001_v8, %s11770_s30  ;;  %1094 = vst.msk [vmem:[#allocation2 + $0x2b] sm:$0xff] %vm841_vm0, %v7322_v25  ;;  %1095 = vst.msk [vmem:[#allocation2 + $0x33] sm:$0xff] %vm841_vm0, %v7323_v26  ;;  %v1348_v16 = vld [vmem:[#allocation2 + $0x3b] ss:$2 sm:$0xff]  ;;  %v1356_v22 = vld [vmem:[#allocation2 + $0x8b] ss:$2 sm:$0xff] }
  0x46   : > { %8007 = vrot.lane.b32.xlu0 %v8006_v9, %s11776_s18  ;;  %1098 = vst.msk [vmem:[#allocation2 + $0x7b] sm:$0xff] %vm841_vm0, %v7326_v30  ;;  %1099 = vst.msk [vmem:[#allocation2 + $0x83] sm:$0xff] %vm841_vm0, %v7327_v31  ;;  %v1043_v26 = vmul.f32 0.003921569, %v1011_v17  ;;  %v1047_v30 = vmul.f32 0.003921569, %v1015_v19 }
  0x47   : > { %1100 = vst.msk [vmem:[#allocation2 + $0xa3] sm:$0xff] %vm841_vm0, %v7328_v35  ;;  %1101 = vst.msk [vmem:[#allocation2 + $0xab] sm:$0xff] %vm841_vm0, %v7329_v39  ;;  %v1048_v31 = vmul.f32 0.003921569, %v1016_v27  ;;  %v1021_v19 = vld [vmem:[%s9724_s0 + $0xc0] sm:$0xff]  ;;  %vm2511_vm1 = vcmask 490496  }
  0x48   : > { %1104 = vst.msk [vmem:[#allocation2 + $0xf3] sm:$0xff] %vm841_vm0, %v7332_v41  ;;  %1105 = vst.msk [vmem:[#allocation2 + $0xfb] sm:$0xff] %vm841_vm0, %v7333_v42  ;;  %v7336_v33 = vadd.f32 -0.5, %v1043_v26  ;;  %v7340_v38 = vadd.f32 -0.5, %v1047_v30  ;;  %v1368_v26 = vld [vmem:[#allocation2 + $0x103] ss:$2 sm:$0xff] }
  0x49   : > { %1102 = vst.msk [vmem:[#allocation2 + $0xcb] sm:$0xff] %vm841_vm0, %v7330_v46  ;;  %1103 = vst.msk [vmem:[#allocation2 + $0xd3] sm:$0xff] %vm841_vm0, %v7331_v49  ;;  %v7341_v39 = vadd.f32 -0.5, %v1048_v31  ;;  %v1018_v46 = vld [vmem:[%s9724_s0 + $0xa8] sm:$0xff]  ;;  %v7339_v49 = vadd.f32 -0.5, %v1046_v44 }
  0x4a   : > { %1106 = vst.msk [vmem:[#allocation2 + $0x11b] sm:$0xff] %vm841_vm0, %v7334_v51  ;;  %1107 = vst.msk [vmem:[#allocation2 + $0x123] sm:$0xff] %vm841_vm0, %v7335_v52  ;;  %v1019_v51 = vld [vmem:[%s9724_s0 + $0xb0] sm:$0xff]  ;;  %v1053_v27 = vmul.f32 0.003921569, %v1021_v19  ;;  %v1026_v30 = vld [vmem:[%s9724_s0 + $0xe8] sm:$0xff] }
  0x4b   : > { %v1278_v53 = vld [vmem:[#allocation2 + $0x52] ss:$2 sm:$0xff]  ;;  %v1280_v54 = vld [vmem:[#allocation2 + $0x62] ss:$2 sm:$0xff]  ;;  %v1206_v55 = vld [vmem:[#allocation2 + $0x51] ss:$2 sm:$0xff] }
  0x4c   : > { %v9754_v56 = vpack.i.bf16 %v1280_v54, %v1278_v53  ;;  %v1208_v57 = vld [vmem:[#allocation2 + $0x61] ss:$2 sm:$0xff]  ;;  %v1130_v59 = vld [vmem:[#allocation2 + $0x28] ss:$2 sm:$0xff]  ;;  %v1132_v61 = vld [vmem:[#allocation2 + $0x38] ss:$2 sm:$0xff] }
  0x4d   : > { %v1350_v58 = vld [vmem:[#allocation2 + $0x53] ss:$2 sm:$0xff]  ;;  %v9758_v60 = vpack.i.bf16 %v1208_v57, %v1206_v55  ;;  %v8026_v63 = vpack.i.bf16 %v1132_v61, %v1130_v59  ;;  %v1138_v1 = vld [vmem:[#allocation2 + $0x78] ss:$2 sm:$0xff]  ;;  %v1140_v2 = vld [vmem:[#allocation2 + $0x88] ss:$2 sm:$0xff] }
  0x4e   : > { %8017 = vrot.lane.b32.xlu1 %v9754_v56, %s11770_s30  ;;  %v9762_v62 = vpack.i.bf16 %v1352_v50, %v1350_v58  ;;  %v1202_v3 = vld [vmem:[#allocation2 + $0x29] ss:$2 sm:$0xff]  ;;  %v1204_v4 = vld [vmem:[#allocation2 + $0x39] ss:$2 sm:$0xff]  ;;  %v9768_v5 = vpack.i.bf16 %v1140_v2, %v1138_v1  ;;  %v1274_v9 = vld [vmem:[#allocation2 + $0x2a] ss:$2 sm:$0xff] }
  0x4f   : > { %8012 = vrot.lane.b32.xlu0 %v9758_v60, %s11778_s20  ;;  %v8036_v6 = vpack.i.bf16 %v1204_v4, %v1202_v3  ;;  %v1210_v7 = vld [vmem:[#allocation2 + $0x79] ss:$2 sm:$0xff]  ;;  %v1212_v8 = vld [vmem:[#allocation2 + $0x89] ss:$2 sm:$0xff]  ;;  %v1276_v10 = vld [vmem:[#allocation2 + $0x3a] ss:$2 sm:$0xff] }
  0x50   : > { %v9773_v11 = vpack.i.bf16 %v1212_v8, %v1210_v7  ;;  %v8046_v12 = vpack.i.bf16 %v1276_v10, %v1274_v9  ;;  %v1282_v13 = vld [vmem:[#allocation2 + $0x7a] ss:$2 sm:$0xff]  ;;  %v1284_v14 = vld [vmem:[#allocation2 + $0x8a] ss:$2 sm:$0xff]  ;;  %v1346_v15 = vld [vmem:[#allocation2 + $0x2b] ss:$2 sm:$0xff] }
  0x51   : > { %v9781_v20 = vpack.i.bf16 %v1284_v14, %v1282_v13  ;;  %v1354_v21 = vld [vmem:[#allocation2 + $0x7b] ss:$2 sm:$0xff]  ;;  %v9783_v23 = vld [vmem:[#allocation2 + $0x50] ss:$2 sm:$0xff]  ;;  %v8056_v24 = vpack.i.bf16 %v1348_v16, %v1346_v15  ;;  %v9786_v25 = vld [vmem:[#allocation2 + $0x60] ss:$2 sm:$0xff] }
  0x52   : > { %8022 = vrot.lane.b32.xlu1 %v9762_v62, %s11776_s18  ;;  %v1214_v32 = vld [vmem:[#allocation2 + $0xa1] ss:$2 sm:$0xff]  ;;  %v9793_v35 = vpack.i.bf16 %v1356_v22, %v1354_v21  ;;  %v1216_v36 = vld [vmem:[#allocation2 + $0xb1] ss:$2 sm:$0xff]  ;;  %v8066_v41 = vpack.i.bf16 %v9786_v25, %v9783_v23  ;;  %v1142_v42 = vld [vmem:[#allocation2 + $0xa0] ss:$2 sm:$0xff] }
  0x53   : > { %8027 = vrot.lane.b32.xlu0 %v8026_v63, %s11794_s19  ;;  %1108 = vst.msk [vmem:[#allocation2 + $0x143] sm:$0xff] %vm841_vm0, %v7336_v33  ;;  %v1144_v45 = vld [vmem:[#allocation2 + $0xb0] ss:$2 sm:$0xff]  ;;  %1109 = vst.msk [vmem:[#allocation2 + $0x14b] sm:$0xff] %vm841_vm0, %v7337_v37  ;;  %v1050_v50 = vmul.f32 0.003921569, %v1018_v46  ;;  %v8071_v52 = vpack.i.bf16 %v1216_v36, %v1214_v32 }
  0x54   : > { %1112 = vst.msk [vmem:[#allocation2 + $0x193] sm:$0xff] %vm841_vm0, %v7340_v38  ;;  %1113 = vst.msk [vmem:[#allocation2 + $0x19b] sm:$0xff] %vm841_vm0, %v7341_v39  ;;  %v1222_v53 = vld [vmem:[#allocation2 + $0xf1] ss:$2 sm:$0xff]  ;;  %v7342_v54 = vadd.f32 -0.5, %v1049_v47  ;;  %v8076_v55 = vpack.i.bf16 %v1144_v45, %v1142_v42  ;;  %v1022_v22 = vld [vmem:[%s9724_s0 + $0xc8] sm:$0xff] }
  0x55   : > { %1110 = vst.msk [vmem:[#allocation2 + $0x16b] sm:$0xff] %vm841_vm0, %v7338_v48  ;;  %1111 = vst.msk [vmem:[#allocation2 + $0x173] sm:$0xff] %vm841_vm0, %v7339_v49  ;;  %v7343_v57 = vadd.f32 -0.5, %v1050_v50  ;;  %v1020_v58 = vld [vmem:[%s9724_s0 + $0xb8] sm:$0xff]  ;;  %v1051_v59 = vmul.f32 0.003921569, %v1019_v51 }
  0x56   : > { %8032 = vrot.lane.b32.xlu1 %v9768_v5, %s11794_s19  ;;  %934 = vst.msk [vmem:[#allocation3] sm:$0xff] %vm933_vm2, %v9375_v0  ;;  %935 = vst.msk [vmem:[#allocation3 + $0x8] sm:$0xff] %vm933_vm2, %v9375_v0  ;;  %v1023_v61 = vld [vmem:[%s9724_s0 + $0xd0] sm:$0xff]  ;;  %v1224_v63 = vld [vmem:[#allocation2 + $0x101] ss:$2 sm:$0xff]  ;;  %v7346_v32 = vadd.f32 -0.5, %v1053_v27 }
  0x57   : > { %8037 = vrot.lane.b32.xlu0 %v8036_v6, %s11782_s1  ;;  %938 = vst.msk [vmem:[#allocation3 + $0x18] sm:$0xff] %vm933_vm2, %v9375_v0  ;;  %939 = vst.msk [vmem:[#allocation3 + $0x20] sm:$0xff] %vm933_vm2, %v9375_v0  ;;  %v1052_v1 = vmul.f32 0.003921569, %v1020_v58  ;;  %v1055_v2 = vmul.f32 0.003921569, %v1023_v61  ;;  %v9856_v7 = vpack.i.bf16 %v1224_v63, %v1222_v53 }
  0x58   : > { %941 = vst.msk [vmem:[#allocation3 + $0x30] sm:$0xff] %vm933_vm2, %v9375_v0  ;;  %942 = vst.msk [vmem:[#allocation3 + $0x38] sm:$0xff] %vm933_vm2, %v9375_v0  ;;  %v7344_v3 = vadd.f32 -0.5, %v1051_v59  ;;  %v1286_v8 = vld [vmem:[#allocation2 + $0xa2] ss:$2 sm:$0xff]  ;;  %v1028_v58 = vld [vmem:[%s9724_s0 + $0xf8] sm:$0xff] }
  0x59   : > { %944 = vst.msk [vmem:[#allocation3 + $0x48] sm:$0xff] %vm933_vm2, %v9375_v0  ;;  %945 = vst.msk [vmem:[#allocation3 + $0x50] sm:$0xff] %vm933_vm2, %v9375_v0  ;;  %v7345_v4 = vadd.f32 -0.5, %v1052_v1  ;;  %v7348_v6 = vadd.f32 -0.5, %v1055_v2  ;;  %v1288_v9 = vld [vmem:[#allocation2 + $0xb2] ss:$2 sm:$0xff] }
  0x5a   : > { %8042 = vrot.lane.b32.xlu1 %v9773_v11, %s11782_s1  ;;  %947 = vst.msk [vmem:[#allocation3 + $0x60] sm:$0xff] %vm933_vm2, %v9375_v0  ;;  %948 = vst.msk [vmem:[#allocation3 + $0x68] sm:$0xff] %vm933_vm2, %v9375_v0  ;;  %v8091_v10 = vpack.i.bf16 %v1288_v9, %v1286_v8  ;;  %v1294_v13 = vld [vmem:[#allocation2 + $0xf2] ss:$2 sm:$0xff]  ;;  %v1296_v14 = vld [vmem:[#allocation2 + $0x102] ss:$2 sm:$0xff] }
  0x5b   : > { %8047 = vrot.lane.b32.xlu0 %v8046_v12, %s11780_s21  ;;  %950 = vst.msk [vmem:[#allocation3 + $0x78] sm:$0xff] %vm933_vm2, %v9375_v0  ;;  %951 = vst.msk [vmem:[#allocation3 + $0x80] sm:$0xff] %vm933_vm2, %v9375_v0  ;;  %v1024_v12 = vld [vmem:[%s9724_s0 + $0xd8] sm:$0xff]  ;;  %v9868_v16 = vpack.i.bf16 %v1296_v14, %v1294_v13  ;;  %v1358_v17 = vld [vmem:[#allocation2 + $0xa3] ss:$2 sm:$0xff] }
  0x5c   : > { %953 = vst.msk [vmem:[#allocation3 + $0x90] sm:$0xff] %vm933_vm2, %v9375_v0  ;;  %954 = vst.msk [vmem:[#allocation3 + $0x98] sm:$0xff] %vm933_vm2, %v9375_v0  ;;  %v1056_v15 = vmul.f32 0.003921569, %v1024_v12  ;;  %v8111_v21 = vpack.i.bf16 %v1360_v18, %v1358_v17  ;;  %v1054_v28 = vmul.f32 0.003921569, %v1022_v22 }
  0x5d   : > { %956 = vst.msk [vmem:[#allocation3 + $0xa8] sm:$0xff] %vm933_vm2, %v9375_v0  ;;  %957 = vst.msk [vmem:[#allocation3 + $0xb0] sm:$0xff] %vm933_vm2, %v9375_v0  ;;  %v1057_v31 = vmul.f32 0.003921569, %v1025_v29  ;;  %v1058_v34 = vmul.f32 0.003921569, %v1026_v30 }
  0x5e   : > { %8052 = vrot.lane.b32.xlu1 %v9781_v20, %s11780_s21  ;;  %959 = vst.msk [vmem:[#allocation3 + $0xc0] sm:$0xff] %vm933_vm2, %v9375_v0  ;;  %960 = vst.msk [vmem:[#allocation3 + $0xc8] sm:$0xff] %vm933_vm2, %v9375_v0  ;;  %v7347_v33 = vadd.f32 -0.5, %v1054_v28  ;;  %v1146_v36 = vld [vmem:[#allocation2 + $0xc8] ss:$2 sm:$0xff]  ;;  %s11813_s21 = sld [smem:[#allocation16_spill]] }
  0x5f   : > { %8057 = vrot.lane.b32.xlu0 %v8056_v24, %s11766_s22  ;;  %962 = vst.msk [vmem:[#allocation3 + $0xd8] sm:$0xff] %vm933_vm2, %v9375_v0  ;;  %963 = vst.msk [vmem:[#allocation3 + $0xe0] sm:$0xff] %vm933_vm2, %v9375_v0  ;;  %v1366_v24 = vld [vmem:[#allocation2 + $0xf3] ss:$2 sm:$0xff]  ;;  %v1148_v37 = vld [vmem:[#allocation2 + $0xd8] ss:$2 sm:$0xff] }
  0x60   : > { %1114 = vst.msk [vmem:[#allocation2 + $0x1bb] sm:$0xff] %vm841_vm0, %v7342_v54  ;;  %1115 = vst.msk [vmem:[#allocation2 + $0x1c3] sm:$0xff] %vm841_vm0, %v7343_v57  ;;  %v7350_v38 = vadd.f32 -0.5, %v1057_v31  ;;  %v7351_v39 = vadd.f32 -0.5, %v1058_v34  ;;  %v8131_v40 = vpack.i.bf16 %v1148_v37, %v1146_v36  ;;  %v1156_v42 = vld [vmem:[#allocation2 + $0x128] ss:$2 sm:$0xff] }
  0x61   : > { %1116 = vst.msk [vmem:[#allocation2 + $0x1e3] sm:$0xff] %vm841_vm0, %v7344_v3  ;;  %1117 = vst.msk [vmem:[#allocation2 + $0x1eb] sm:$0xff] %vm841_vm0, %v7345_v4  ;;  %v1218_v44 = vld [vmem:[#allocation2 + $0xc9] ss:$2 sm:$0xff]  ;;  %v1220_v45 = vld [vmem:[#allocation2 + $0xd9] ss:$2 sm:$0xff] }
  0x62   : > { %8062 = vrot.lane.b32.xlu1 %v9793_v35, %s11766_s22  ;;  %1120 = vst.msk [vmem:[#allocation2 + $0x233] sm:$0xff] %vm841_vm0, %v7348_v6  ;;  %s11774_s22 = smov 36   ;;  %1118 = vst.msk [vmem:[#allocation2 + $0x20b] sm:$0xff] %vm841_vm0, %v7346_v32  ;;  %v1226_v46 = vld [vmem:[#allocation2 + $0x119] ss:$2 sm:$0xff] }
  0x63   : > { %8067 = vrot.lane.b32.xlu0 %v8066_v41, %s11768_s23  ;;  %1119 = vst.msk [vmem:[#allocation2 + $0x213] sm:$0xff] %vm841_vm0, %v7347_v33  ;;  %1122 = vst.msk [vmem:[#allocation2 + $0x25b] sm:$0xff] %vm841_vm0, %v7350_v38  ;;  %v1154_v41 = vld [vmem:[#allocation2 + $0x118] ss:$2 sm:$0xff]  ;;  %v1228_v47 = vld [vmem:[#allocation2 + $0x129] ss:$2 sm:$0xff] }
  0x64   : > { %1123 = vst.msk [vmem:[#allocation2 + $0x263] sm:$0xff] %vm841_vm0, %v7351_v39  ;;  %v9893_v43 = vpack.i.bf16 %v1156_v42, %v1154_v41  ;;  %v1290_v48 = vld [vmem:[#allocation2 + $0xca] ss:$2 sm:$0xff]  ;;  %v1292_v50 = vld [vmem:[#allocation2 + $0xda] ss:$2 sm:$0xff] }
  0x65   : > { %v1298_v53 = vld [vmem:[#allocation2 + $0x11a] ss:$2 sm:$0xff]  ;;  %v1300_v54 = vld [vmem:[#allocation2 + $0x12a] ss:$2 sm:$0xff]  ;;  %v1060_v61 = vmul.f32 0.003921569, %v1028_v58 }
  0x66   : > { %8072 = vrot.lane.b32.xlu1 %v8071_v52, %s11778_s20  ;;  %v9920_v63 = vpack.i.bf16 %v1300_v54, %v1298_v53  ;;  %v1364_v1 = vld [vmem:[#allocation2 + $0xdb] ss:$2 sm:$0xff]  ;;  %966 = vst.msk [vmem:[#allocation4] sm:$0xff] %vm965_vm3, %v9375_v0  ;;  %967 = vst.msk [vmem:[#allocation4 + $0x8] sm:$0xff] %vm965_vm3, %v9375_v0  ;;  %v1372_v8 = vld [vmem:[#allocation2 + $0x12b] ss:$2 sm:$0xff] }
  0x67   : > { %8077 = vrot.lane.b32.xlu0 %v8076_v55, %s11768_s23  ;;  %s11772_s23 = smov 40   ;;  %v1027_v55 = vld [vmem:[%s9724_s0 + $0xf0] sm:$0xff]  ;;  %v7353_v3 = vadd.f32 -0.5, %v1060_v61  ;;  %970 = vst.msk [vmem:[#allocation4 + $0x18] sm:$0xff] %vm965_vm3, %v9375_v0  ;;  %971 = vst.msk [vmem:[#allocation4 + $0x20] sm:$0xff] %vm965_vm3, %v9375_v0  ;;  %s11816_s0 = smov 28  }
  0x68   : > { %v1059_v59 = vmul.f32 0.003921569, %v1027_v55  ;;  %973 = vst.msk [vmem:[#allocation4 + $0x30] sm:$0xff] %vm965_vm3, %v9375_v0  ;;  %974 = vst.msk [vmem:[#allocation4 + $0x38] sm:$0xff] %vm965_vm3, %v9375_v0  ;;  %v9959_v12 = vld [vmem:[#allocation2 + $0x100] ss:$2 sm:$0xff] }
  0x69   : > { %1125 = vst.msk [vmem:[#allocation2 + $0x28b] sm:$0xff] %vm841_vm0, %v7353_v3  ;;  %v1230_v13 = vld [vmem:[#allocation2 + $0x141] ss:$2 sm:$0xff]  ;;  %v1232_v14 = vld [vmem:[#allocation2 + $0x151] ss:$2 sm:$0xff] }
  0x6a   : > { %8082 = vrot.lane.b32.xlu1 %v9758_v60, %s11774_s22  ;;  %v7349_v60 = vadd.f32 -0.5, %v1056_v15  ;;  %v7352_v2 = vadd.f32 -0.5, %v1059_v59  ;;  %976 = vst.msk [vmem:[#allocation4 + $0x48] sm:$0xff] %vm965_vm3, %v9375_v0  ;;  %977 = vst.msk [vmem:[#allocation4 + $0x50] sm:$0xff] %vm965_vm3, %v9375_v0  ;;  %v1158_v15 = vld [vmem:[#allocation2 + $0x140] ss:$2 sm:$0xff]  ;;  %v8221_v18 = vpack.i.bf16 %v1232_v14, %v1230_v13 }
  0x6b   : > { %8087 = vrot.lane.b32.xlu0 %v9856_v7, %s11778_s20  ;;  %s11788_s20 = smov 52   ;;  %979 = vst.msk [vmem:[#allocation4 + $0x60] sm:$0xff] %vm965_vm3, %v9375_v0  ;;  %980 = vst.msk [vmem:[#allocation4 + $0x68] sm:$0xff] %vm965_vm3, %v9375_v0  ;;  %v1160_v17 = vld [vmem:[#allocation2 + $0x150] ss:$2 sm:$0xff] }
  0x6c   : > { %1121 = vst.msk [vmem:[#allocation2 + $0x23b] sm:$0xff] %vm841_vm0, %v7349_v60  ;;  %1124 = vst.msk [vmem:[#allocation2 + $0x283] sm:$0xff] %vm841_vm0, %v7352_v2  ;;  %v8226_v60 = vpack.i.bf16 %v1160_v17, %v1158_v15  ;;  %v1238_v19 = vld [vmem:[#allocation2 + $0x191] ss:$2 sm:$0xff]  ;;  %v1302_v22 = vld [vmem:[#allocation2 + $0x142] ss:$2 sm:$0xff] }
  0x6d   : > { %982 = vst.msk [vmem:[#allocation4 + $0x78] sm:$0xff] %vm965_vm3, %v9375_v0  ;;  %983 = vst.msk [vmem:[#allocation4 + $0x80] sm:$0xff] %vm965_vm3, %v9375_v0  ;;  %v1310_v27 = vld [vmem:[#allocation2 + $0x192] ss:$2 sm:$0xff]  ;;  %v1312_v28 = vld [vmem:[#allocation2 + $0x1a2] ss:$2 sm:$0xff] }
  0x6e   : > { %8092 = vrot.lane.b32.xlu1 %v8091_v10, %s11770_s30  ;;  %v9979_v29 = vpack.i.bf16 %v1312_v28, %v1310_v27  ;;  %v1374_v30 = vld [vmem:[#allocation2 + $0x143] ss:$2 sm:$0xff]  ;;  %v1376_v31 = vld [vmem:[#allocation2 + $0x153] ss:$2 sm:$0xff]  ;;  %v1162_v36 = vld [vmem:[#allocation2 + $0x168] ss:$2 sm:$0xff] }
  0x6f   : > { %8097 = vrot.lane.b32.xlu0 %v8071_v52, %s11774_s22  ;;  %s7753_s22 = sshll.u32 %s11857_s25, 5  ;;  %v8171_v52 = vpack.i.bf16 %v1292_v50, %v1290_v48  ;;  %v8261_v32 = vpack.i.bf16 %v1376_v31, %v1374_v30  ;;  %v1384_v33 = vld [vmem:[#allocation2 + $0x1a3] ss:$2 sm:$0xff]  ;;  %v1164_v37 = vld [vmem:[#allocation2 + $0x178] ss:$2 sm:$0xff] }
  0x70   : > { %s9903_s1 = scalar_lea.vmem %s11813_s21, %s7753_s22  ;;  %s11786_s21 = smov 56   ;;  %v1170_v39 = vld [vmem:[#allocation2 + $0x1b8] ss:$2 sm:$0xff]  ;;  %v1244_v48 = vld [vmem:[#allocation2 + $0x1c9] ss:$2 sm:$0xff] }
  0x71   : > { %v8701_v49 = vld [vmem:[%s9903_s1 + $0x18] sm:$0xff]   ;;  %v8702_v51 = vld [vmem:[%s9903_s1 + $0x10] sm:$0xff]   ;;  %v8703_v57 = vld [vmem:[%s9903_s1 + $0x8] sm:$0xff]   ;;  %s11817_s22 = smov 32  }
  0x72   : > { %8102 = vrot.lane.b32.xlu1 %v9754_v56, %s11772_s23  ;;  %v9881_v56 = vpack.i.bf16 %v1368_v26, %v1366_v24  ;;  %7913 = vmatprep.subr.bf16.mxu0 %v8701_v49  ;;  %v8704_v4 = vld [vmem:[%s9903_s1] sm:$0xff]   ;;  %s11790_s1 = smov 60   ;;  %v1316_v58 = vld [vmem:[#allocation2 + $0x1ca] ss:$2 sm:$0xff] }
  0x73   : > { %8107 = vrot.lane.b32.xlu0 %v9868_v16, %s11770_s30  ;;  %s11784_s30 = smov 44   ;;  %7914 = vmatpush3.bf16.msra.mxu0 %v8701_v49  ;;  %v1304_v24 = vld [vmem:[#allocation2 + $0x152] ss:$2 sm:$0xff]  ;;  %v1254_v28 = vld [vmem:[#allocation2 + $0x231] ss:$2 sm:$0xff] }
  0x74   : > { %7915 = vmatprep.subr.bf16.mxu0 %v8702_v51  ;;  %v8241_v26 = vpack.i.bf16 %v1304_v24, %v1302_v22  ;;  %v10047_v13 = vld [vmem:[#allocation2 + $0x190] ss:$2 sm:$0xff]  ;;  %v10049_v14 = vld [vmem:[#allocation2 + $0x1a0] ss:$2 sm:$0xff]  ;;  %v1256_v30 = vld [vmem:[#allocation2 + $0x241] ss:$2 sm:$0xff] }
  0x75   : > { %11828 = vst [vmem:[#allocation12_spill] sm:$0xff] %v10047_v13  ;;  %11829 = vst [vmem:[#allocation13_spill] sm:$0xff] %v10049_v14  ;;  %v8361_v17 = vpack.i.bf16 %v10049_v14, %v10047_v13  ;;  %v1176_v22 = vld [vmem:[#allocation2 + $0x1f0] ss:$2 sm:$0xff] }
  0x76   : > { %8112 = vrot.lane.b32.xlu1 %v8111_v21, %s11776_s18 }
  0x77   : > { %8117 = vrot.lane.b32.xlu0 %v8091_v10, %s11772_s23  ;;  %s11792_s23 = smov 48   ;;  %7916 = vmatpush3.bf16.msra.mxu0 %v8702_v51  ;;  %v9957_v10 = vld [vmem:[#allocation2 + $0xf0] ss:$2 sm:$0xff] }
  0x78   : > { %7917 = vmatprep.subr.bf16.mxu0 %v8703_v57  ;;  %v8211_v0 = vpack.i.bf16 %v9959_v12, %v9957_v10  ;;  %v1306_v51 = vld [vmem:[#allocation2 + $0x16a] ss:$2 sm:$0xff] }
  0x7a   : > { %8122 = vrot.lane.b32.xlu1 %v9762_v62, %s11784_s30  ;;  %v8151_v62 = vpack.i.bf16 %v1220_v45, %v1218_v44  ;;  %v1234_v45 = vld [vmem:[#allocation2 + $0x169] ss:$2 sm:$0xff] }
  0x7b   : > { %8127 = vrot.lane.b32.xlu0 %v9881_v56, %s11776_s18  ;;  %s11815_s18 = smov 24   ;;  %7918 = vmatpush3.bf16.msra.mxu0 %v8703_v57  ;;  %v1314_v57 = vld [vmem:[#allocation2 + $0x1ba] ss:$2 sm:$0xff] }
  0x7c   : > { %7919 = vmatprep.subr.bf16.mxu0 %v8704_v4  ;;  %v10029_v61 = vpack.i.bf16 %v1316_v58, %v1314_v57  ;;  %v1398_v57 = vld [vmem:[#allocation2 + $0x233] ss:$2 sm:$0xff]  ;;  %v1400_v58 = vld [vmem:[#allocation2 + $0x243] ss:$2 sm:$0xff] }
  0x7e   : > { %8132 = vrot.lane.b32.xlu1 %v8131_v40, %s11794_s19 }
  0x7f   : > { %8137 = vrot.lane.b32.xlu0 %v8111_v21, %s11784_s30  ;;  %s11814_s30 = smov 20   ;;  %7920 = vmatpush3.bf16.msra.mxu0 %v8704_v4  ;;  %v1240_v21 = vld [vmem:[#allocation2 + $0x1a1] ss:$2 sm:$0xff] }
  0x82   : > { %8142 = vrot.lane.b32.xlu1 %v9768_v5, %s11792_s23  ;;  %v9908_v5 = vpack.i.bf16 %v1228_v47, %v1226_v46  ;;  %v1242_v47 = vld [vmem:[#allocation2 + $0x1b9] ss:$2 sm:$0xff] }
  0x83   : > { %8147 = vrot.lane.b32.xlu0 %v9893_v43, %s11794_s19  ;;  %s11822_s19 = smov 12   ;;  %v10013_v50 = vpack.i.bf16 %v1244_v48, %v1242_v47  ;;  %v1390_v47 = vld [vmem:[#allocation2 + $0x1e3] ss:$2 sm:$0xff]  ;;  %v1392_v48 = vld [vmem:[#allocation2 + $0x1f3] ss:$2 sm:$0xff] }
  0x86   : > { %8152 = vrot.lane.b32.xlu1 %v8151_v62, %s11814_s30 }
  0x87   : > { %8157 = vrot.lane.b32.xlu0 %v8131_v40, %s11792_s23  ;;  %s11821_s23 = smov 40   ;;  %v1172_v40 = vld [vmem:[#allocation2 + $0x1c8] ss:$2 sm:$0xff] }
  0x88   : > { %v10001_v44 = vpack.i.bf16 %v1172_v40, %v1170_v39  ;;  %v1326_v40 = vld [vmem:[#allocation2 + $0x232] ss:$2 sm:$0xff] }
  0x8a   : > { %8162 = vrot.lane.b32.xlu1 %v9773_v11, %s11788_s20  ;;  %v1362_v11 = vld [vmem:[#allocation2 + $0xcb] ss:$2 sm:$0xff] }
  0x8b   : > { %8167 = vrot.lane.b32.xlu0 %v9908_v5, %s11814_s30  ;;  %v8191_v6 = vpack.i.bf16 %v1364_v1, %v1362_v11  ;;  %v1378_v11 = vld [vmem:[#allocation2 + $0x16b] ss:$2 sm:$0xff]  ;;  %v1380_v1 = vld [vmem:[#allocation2 + $0x17b] ss:$2 sm:$0xff] }
  0x8c   : > { %v8341_v3 = vpack.i.bf16 %v1380_v1, %v1378_v11  ;;  %v1178_v1 = vld [vmem:[#allocation2 + $0x208] ss:$2 sm:$0xff] }
  0x8e   : > { %8172 = vrot.lane.b32.xlu1 %v8171_v52, %s11815_s18  ;;  %v9989_v38 = vpop.permute.xlu0 %7997 }
  0x8f   : > { %8177 = vrot.lane.b32.xlu0 %v8151_v62, %s11788_s20  ;;  %s11819_s20 = smov 36   ;;  %v1236_v62 = vld [vmem:[#allocation2 + $0x179] ss:$2 sm:$0xff] }
  0x92   : > { %8182 = vrot.lane.b32.xlu1 %v9781_v20, %s11786_s21  ;;  %v1370_v20 = vld [vmem:[#allocation2 + $0x11b] ss:$2 sm:$0xff] }
  0x93   : > { %8187 = vrot.lane.b32.xlu0 %v9920_v63, %s11815_s18  ;;  %v9955_v9 = vpack.i.bf16 %v1372_v8, %v1370_v20  ;;  %v1388_v20 = vld [vmem:[#allocation2 + $0x1cb] ss:$2 sm:$0xff] }
  0x96   : > { %8192 = vrot.lane.b32.xlu1 %v8191_v6, %s11816_s0 }
  0x97   : > { %8197 = vrot.lane.b32.xlu0 %v8171_v52, %s11786_s21  ;;  %s11818_s21 = smov 4   ;;  %v1308_v52 = vld [vmem:[#allocation2 + $0x17a] ss:$2 sm:$0xff] }
  0x98   : > { %v8321_v54 = vpack.i.bf16 %v1308_v52, %v1306_v51  ;;  %v8411_v52 = vpack.i.bf16 %v1392_v48, %v1390_v47 }
  0x9a   : > { %8202 = vrot.lane.b32.xlu1 %v9793_v35, %s11790_s1  ;;  %v9971_v35 = vpack.i.bf16 %v1240_v21, %v1238_v19  ;;  %v1174_v21 = vld [vmem:[#allocation2 + $0x1e0] ss:$2 sm:$0xff] }
  0x9b   : > { %8207 = vrot.lane.b32.xlu0 %v9955_v9, %s11816_s0 }
  0x9e   : > { %8212 = vrot.lane.b32.xlu1 %v8211_v0, %s11817_s22 }
  0x9f   : > { %8217 = vrot.lane.b32.xlu0 %v8191_v6, %s11790_s1  ;;  %s11820_s1 = smov 8   ;;  %v1386_v6 = vld [vmem:[#allocation2 + $0x1bb] ss:$2 sm:$0xff] }
  0xa0   : > { %v10045_v0 = vpack.i.bf16 %v1388_v20, %v1386_v6  ;;  %v1180_v6 = vld [vmem:[#allocation2 + $0x218] ss:$2 sm:$0xff]  ;;  %v1250_v20 = vld [vmem:[#allocation2 + $0x209] ss:$2 sm:$0xff] }
  0xa2   : > { %8222 = vrot.lane.b32.xlu1 %v8221_v18, %s11818_s21 }
  0xa3   : > { %8227 = vrot.lane.b32.xlu0 %v8226_v60, %s11817_s22  ;;  %v1248_v60 = vld [vmem:[#allocation2 + $0x1f1] ss:$2 sm:$0xff] }
  0xa6   : > { %8232 = vrot.lane.b32.xlu1 %v9856_v7, %s11819_s20  ;;  %v1382_v7 = vld [vmem:[#allocation2 + $0x193] ss:$2 sm:$0xff] }
  0xa7   : > { %8237 = vrot.lane.b32.xlu0 %v9971_v35, %s11818_s21  ;;  %v9987_v34 = vpack.i.bf16 %v1384_v33, %v1382_v7  ;;  %v1318_v7 = vld [vmem:[#allocation2 + $0x1e2] ss:$2 sm:$0xff]  ;;  %v1320_v33 = vld [vmem:[#allocation2 + $0x1f2] ss:$2 sm:$0xff] }
  0xaa   : > { %8242 = vrot.lane.b32.xlu1 %v8241_v26, %s11820_s1 }
  0xab   : > { %8247 = vrot.lane.b32.xlu0 %v8221_v18, %s11819_s20  ;;  %v1246_v18 = vld [vmem:[#allocation2 + $0x1e1] ss:$2 sm:$0xff] }
  0xae   : > { %8252 = vrot.lane.b32.xlu1 %v9868_v16, %s11821_s23  ;;  %v8281_v16 = vpack.i.bf16 %v1164_v37, %v1162_v36 }
  0xaf   : > { %8257 = vrot.lane.b32.xlu0 %v9979_v29, %s11820_s1 }
  0xb2   : > { %8262 = vrot.lane.b32.xlu1 %v8261_v32, %s11822_s19 }
  0xb3   : > { %8267 = vrot.lane.b32.xlu0 %v8241_v26, %s11821_s23  ;;  %v8371_v26 = vpack.i.bf16 %v1248_v60, %v1246_v18  ;;  %v7999_v18 = vunpack.i.l.bf16 %v9989_v38 }
  0xb6   : > { %8272 = vrot.lane.b32.xlu1 %v9881_v56, %s11823_s29  ;;  %v8301_v56 = vpack.i.bf16 %v1236_v62, %v1234_v45  ;;  %v1328_v45 = vld [vmem:[#allocation2 + $0x242] ss:$2 sm:$0xff] }
  0xb7   : > { %8277 = vrot.lane.b32.xlu0 %v9987_v34, %s11822_s19  ;;  %v9996_v41 = vpop.permute.xlu1 %8002 }
  0xb8   : > { %v9999_v42 = vpop.permute.xlu0 %8007  ;;  %v8004_v47 = vunpack.i.l.bf16 %v9996_v41 }
  0xba   : > { %8282 = vrot.lane.b32.xlu1 %v8281_v16, %s11824_s27 }
  0xbb   : > { %8287 = vrot.lane.b32.xlu0 %v8261_v32, %s11823_s29  ;;  %v10073_v32 = vpack.i.bf16 %v1256_v30, %v1254_v28  ;;  %v1258_v30 = vld [vmem:[#allocation2 + $0x259] ss:$2 sm:$0xff] }
  0xbe   : > { %8292 = vrot.lane.b32.xlu1 %v9893_v43, %s11825_s26 }
  0xbf   : > { %8297 = vrot.lane.b32.xlu0 %v10001_v44, %s11824_s27 }
  0xc0   : > { %v10007_v46 = vpop.permute.xlu1 %8017 }
  0xc1   : > { %v10009_v49 = vpop.permute.xlu0 %8012 }
  0xc2   : > { %8302 = vrot.lane.b32.xlu1 %v8301_v56, %s11814_s30 }
  0xc3   : > { %8307 = vrot.lane.b32.xlu0 %v8281_v16, %s11825_s26  ;;  %v8391_v16 = vpack.i.bf16 %v1320_v33, %v1318_v7  ;;  %v10115_v7 = vpack.i.bf16 %v1180_v6, %v1178_v1  ;;  %v8015_v6 = vunpack.i.h.bf16 %v10009_v49 }
  0xc4   : > { %v10015_v53 = vpop.permute.xlu1 %8022 }
  0xc5   : > { %v10017_v43 = vpop.permute.xlu0 %8027 }
  0xc6   : > { %8312 = vrot.lane.b32.xlu1 %v9908_v5, %s11826_s28 }
  0xc7   : > { %8317 = vrot.lane.b32.xlu0 %v10013_v50, %s11814_s30 }
  0xc8   : > { %v10023_v55 = vpop.permute.xlu1 %8032 }
  0xc9   : > { %v10025_v59 = vpop.permute.xlu0 %8037 }
  0xca   : > { %8322 = vrot.lane.b32.xlu1 %v8321_v54, %s11815_s18 }
  0xcb   : > { %8327 = vrot.lane.b32.xlu0 %v8301_v56, %s11826_s28  ;;  %v10089_v56 = vpack.i.bf16 %v1328_v45, %v1326_v40  ;;  %v1324_v40 = vld [vmem:[#allocation2 + $0x21a] ss:$2 sm:$0xff]  ;;  %v8005_v45 = vunpack.i.h.bf16 %v9996_v41 }
  0xcc   : > { %v10031_v2 = vpop.permute.xlu1 %8042 }
  0xcd   : > { %v10033_v5 = vpop.permute.xlu0 %8047 }
  0xce   : > { %8332 = vrot.lane.b32.xlu1 %v9920_v63, %s11827_s17 }
  0xcf   : > { %8337 = vrot.lane.b32.xlu0 %v10029_v61, %s11815_s18 }
  0xd0   : > { %v10039_v4 = vpop.permute.xlu1 %8052 }
  0xd1   : > { %v10041_v8 = vpop.permute.xlu0 %8057 }
  0xd2   : > { %8342 = vrot.lane.b32.xlu1 %v8341_v3, %s11816_s0 }
  0xd3   : > { %8347 = vrot.lane.b32.xlu0 %v8321_v54, %s11827_s17 }
  0xd4   : > { %v10051_v63 = vpop.permute.xlu1 %8062 }
  0xd5   : > { %v10053_v15 = vpop.permute.xlu0 %8067 }
  0xd6   : > { %8352 = vrot.lane.b32.xlu1 %v9955_v9, %s11830_s24  ;;  %v8376_v9 = vpack.i.bf16 %v1176_v22, %v1174_v21  ;;  %v1186_v21 = vld [vmem:[#allocation2 + $0x258] ss:$2 sm:$0xff]  ;;  %v1188_v22 = vld [vmem:[#allocation2 + $0x268] ss:$2 sm:$0xff] }
  0xd7   : > { %8357 = vrot.lane.b32.xlu0 %v10045_v0, %s11816_s0  ;;  %v10123_v48 = vpack.i.bf16 %v1188_v22, %v1186_v21  ;;  %v1394_v21 = vld [vmem:[#allocation2 + $0x20b] ss:$2 sm:$0xff]  ;;  %v8010_v22 = vunpack.i.h.bf16 %v9999_v42 }
  0xd8   : > { %v10061_v19 = vpop.permute.xlu1 %8072 }
  0xd9   : > { %v10063_v24 = vpop.permute.xlu0 %8077 }
  0xda   : > { %8362 = vrot.lane.b32.xlu1 %v8361_v17, %s11817_s22  ;;  %v8000_v17 = vunpack.i.h.bf16 %v9989_v38  ;;  %v1260_v38 = vld [vmem:[#allocation2 + $0x269] ss:$2 sm:$0xff] }
  0xdb   : > { %8367 = vrot.lane.b32.xlu0 %v8341_v3, %s11830_s24  ;;  %v10105_v3 = vpack.i.bf16 %v1400_v58, %v1398_v57  ;;  %v1330_v57 = vld [vmem:[#allocation2 + $0x25a] ss:$2 sm:$0xff]  ;;  %v1332_v58 = vld [vmem:[#allocation2 + $0x26a] ss:$2 sm:$0xff]  ;;  %v10133_v41 = vpack.i.bf16 %v1260_v38, %v1258_v30  ;;  %v8020_v38 = vunpack.i.h.bf16 %v10007_v46 }
  0xdc   : > { %v10067_v27 = vpop.permute.xlu1 %8082 }
  0xdd   : > { %v10069_v31 = vpop.permute.xlu0 %8087 }
  0xde   : > { %8372 = vrot.lane.b32.xlu1 %v8371_v26, %s11818_s21 }
  0xdf   : > { %8377 = vrot.lane.b32.xlu0 %v8376_v9, %s11817_s22  ;;  %v1126_v9 = vld [vmem:[#allocation2] ss:$2 sm:$0xff] }
  0xe0   : > { %v10075_v36 = vpop.permute.xlu1 %8092  ;;  %v2275_v1 = vsel %vm841_vm0, %v1126_v9, %v7999_v18  ;;  %v10141_v18 = vpack.i.bf16 %v1332_v58, %v1330_v57  ;;  %v1404_v9 = vld [vmem:[#allocation2 + $0x26b] ss:$2 sm:$0xff]  ;;  %v8025_v57 = vunpack.i.h.bf16 %v10015_v53  ;;  %v8024_v58 = vunpack.i.l.bf16 %v10015_v53 }
  0xe1   : > { %v10077_v37 = vpop.permute.xlu0 %8097  ;;  %v8034_v53 = vunpack.i.l.bf16 %v10023_v55 }
  0xe2   : > { %8382 = vrot.lane.b32.xlu1 %v9971_v35, %s11819_s20 }
  0xe3   : > { %8387 = vrot.lane.b32.xlu0 %v10073_v32, %s11818_s21  ;;  %s7754_s21 = sshll.u32 %s11857_s25, 8 }
  0xe4   : > { %v10083_v39 = vpop.permute.xlu1 %8102 }
  0xe5   : > { %v10085_v62 = vpop.permute.xlu0 %8107 }
  0xe6   : > { %8392 = vrot.lane.b32.xlu1 %v8391_v16, %s11820_s1 }
  0xe7   : > { %8397 = vrot.lane.b32.xlu0 %v8371_v26, %s11819_s20  ;;  %v1128_v26 = vld [vmem:[#allocation2 + $0x10] ss:$2 sm:$0xff] }
  0xe8   : > { %v10091_v51 = vpop.permute.xlu1 %8112 }
  0xe9   : > { %v10093_v35 = vpop.permute.xlu0 %8117 }
  0xea   : > { %8402 = vrot.lane.b32.xlu1 %v9979_v29, %s11821_s23  ;;  %v1252_v29 = vld [vmem:[#allocation2 + $0x219] ss:$2 sm:$0xff] }
  0xeb   : > { %8407 = vrot.lane.b32.xlu0 %v10089_v56, %s11820_s1  ;;  %v10117_v33 = vpack.i.bf16 %v1252_v29, %v1250_v20  ;;  %v8014_v20 = vunpack.i.l.bf16 %v10009_v49  ;;  %v1396_v49 = vld [vmem:[#allocation2 + $0x21b] ss:$2 sm:$0xff]  ;;  %s800_s1 = scalar_lea.vmem %s11756_s8, %s11857_s25 }
  0xec   : > { %v10099_v54 = vpop.permute.xlu1 %8122 }
  0xed   : > { %v10101_v11 = vpop.permute.xlu0 %8127 }
  0xee   : > { %8412 = vrot.lane.b32.xlu1 %v8411_v52, %s11822_s19 }
  0xef   : > { %8417 = vrot.lane.b32.xlu0 %v8391_v16, %s11821_s23  ;;  %v1322_v16 = vld [vmem:[#allocation2 + $0x20a] ss:$2 sm:$0xff] }
  0xf0   : > { %v10109_v60 = vpop.permute.xlu1 %8132  ;;  %v10135_v14 = vpack.i.bf16 %v1324_v40, %v1322_v16  ;;  %v8019_v16 = vunpack.i.l.bf16 %v10007_v46  ;;  %v2277_v40 = vsel %vm841_vm0, %v9783_v23, %v8014_v20 }
  0xf1   : > { %v10111_v28 = vpop.permute.xlu0 %8137 }
  0xf2   : > { %8422 = vrot.lane.b32.xlu1 %v9987_v34, %s11823_s29  ;;  %v2276_v34 = vsel %vm841_vm0, %v1128_v26, %v8000_v17  ;;  %v8009_v17 = vunpack.i.l.bf16 %v9999_v42  ;;  %v1402_v26 = vld [vmem:[#allocation2 + $0x25b] ss:$2 sm:$0xff]  ;;  %v2278_v42 = vsel %vm841_vm0, %v9786_v25, %v8015_v6  ;;  %v8035_v6 = vunpack.i.h.bf16 %v10023_v55 }
  0xf3   : > { %8427 = vrot.lane.b32.xlu0 %v10105_v3, %s11822_s19  ;;  %v2293_v30 = vsel %vm2291_vm4, %v2276_v34, %v8005_v45  ;;  %v8030_v45 = vunpack.i.h.bf16 %v10017_v43  ;;  %v8029_v34 = vunpack.i.l.bf16 %v10017_v43  ;;  %v2294_v20 = vsel %vm2291_vm4, %v2277_v40, %v8019_v16  ;;  %s811_s19 = scalar_lea.vmem %s11759_s11, %s11857_s25 }
  0xf4   : > { %v10129_v29 = vpop.permute.xlu1 %8142  ;;  %v2310_v23 = vsel %vm2308_vm5, %v2293_v30, %v8010_v22  ;;  %v2295_v43 = vsel %vm2291_vm4, %v2278_v42, %v8020_v38  ;;  %v8045_v55 = vunpack.i.h.bf16 %v10031_v2  ;;  %v8049_v30 = vunpack.i.l.bf16 %v10033_v5 }
  0xf5   : > { %v10131_v13 = vpop.permute.xlu0 %8147  ;;  %v2312_v22 = vsel %vm2308_vm5, %v2295_v43, %v8025_v57  ;;  %v8055_v40 = vunpack.i.h.bf16 %v10039_v4  ;;  %v8069_v43 = vunpack.i.l.bf16 %v10053_v15 }
  0xf6   : > { %11831 = vst [vmem:[#allocation14_spill] sm:$0xff] %v10131_v13  ;;  %8432 = vrot.lane.b32.xlu1 %v10115_v7, %s11824_s27  ;;  %v2292_v13 = vsel %vm2291_vm4, %v2275_v1, %v8004_v47  ;;  %v10162_v1 = vpack.i.bf16 %v1404_v9, %v1402_v26  ;;  %v2327_v26 = vsel %vm2325_vm6, %v2310_v23, %v8030_v45  ;;  %v8059_v45 = vunpack.i.l.bf16 %v10041_v8 }
  0xf7   : > { %8437 = vrot.lane.b32.xlu0 %v8411_v52, %s11823_s29  ;;  %v10160_v52 = vpack.i.bf16 %v1396_v49, %v1394_v21  ;;  %v2309_v25 = vsel %vm2308_vm5, %v2292_v13, %v8009_v17  ;;  %v8040_v21 = vunpack.i.h.bf16 %v10025_v59  ;;  %v8039_v49 = vunpack.i.l.bf16 %v10025_v59 }
  0xf8   : > { %v10154_v47 = vpop.permute.xlu1 %8152  ;;  %v2311_v13 = vsel %vm2308_vm5, %v2294_v20, %v8024_v58  ;;  %v8044_v17 = vunpack.i.l.bf16 %v10031_v2  ;;  %v2326_v9 = vsel %vm2325_vm6, %v2309_v25, %v8029_v34  ;;  %v8050_v59 = vunpack.i.h.bf16 %v10033_v5 }
  0xf9   : > { %v10158_v46 = vpop.permute.xlu0 %8157  ;;  %v2328_v16 = vsel %vm2325_vm6, %v2311_v13, %v8034_v53  ;;  %v2329_v42 = vsel %vm2325_vm6, %v2312_v22, %v8035_v6  ;;  %v8054_v2 = vunpack.i.l.bf16 %v10039_v4  ;;  %v2343_v57 = vsel %vm2342_vm7, %v2326_v9, %v8039_v49 }
  0xfa   : > { %8442 = vrot.lane.b32.xlu1 %v10001_v44, %s11825_s26  ;;  %v2344_v58 = vsel %vm2342_vm7, %v2327_v26, %v8040_v21  ;;  %v8060_v5 = vunpack.i.h.bf16 %v10041_v8  ;;  %v2345_v34 = vsel %vm2342_vm7, %v2328_v16, %v8044_v17  ;;  %v2346_v25 = vsel %vm2342_vm7, %v2329_v42, %v8045_v55 }
  0xfb   : > { %8447 = vrot.lane.b32.xlu0 %v10123_v48, %s11824_s27  ;;  %v8065_v4 = vunpack.i.h.bf16 %v10051_v63  ;;  %v8064_v23 = vunpack.i.l.bf16 %v10051_v63  ;;  %v2360_v53 = vsel %vm2359_vm8, %v2343_v57, %v8049_v30  ;;  %v2361_v20 = vsel %vm2359_vm8, %v2344_v58, %v8050_v59  ;;  %s7755_s27 = sshll.u32 %s11857_s25, 9 }
  0xfc   : > { %v10180_v44 = vpop.permute.xlu1 %8162  ;;  %v8070_v8 = vunpack.i.h.bf16 %v10053_v15  ;;  %v2362_v21 = vsel %vm2359_vm8, %v2345_v34, %v8054_v2  ;;  %v2363_v49 = vsel %vm2359_vm8, %v2346_v25, %v8055_v40  ;;  %v8080_v63 = vunpack.i.h.bf16 %v10063_v24 }
  0xfd   : > { %v10186_v38 = vpop.permute.xlu0 %8167  ;;  %v8079_v13 = vunpack.i.l.bf16 %v10063_v24  ;;  %v2377_v22 = vsel %vm2376_vm9, %v2360_v53, %v8059_v45  ;;  %v2378_v55 = vsel %vm2376_vm9, %v2361_v20, %v8060_v5  ;;  %v8085_v15 = vunpack.i.h.bf16 %v10067_v27 }
  0xfe   : > { %8452 = vrot.lane.b32.xlu1 %v10117_v33, %s11814_s30  ;;  %v8084_v17 = vunpack.i.l.bf16 %v10067_v27  ;;  %v2379_v26 = vsel %vm2376_vm9, %v2362_v21, %v8064_v23  ;;  %v2380_v24 = vsel %vm2376_vm9, %v2363_v49, %v8065_v4  ;;  %v8100_v9 = vunpack.i.h.bf16 %v10077_v37 }
  0xff   : > { %8457 = vrot.lane.b32.xlu0 %v10115_v7, %s11825_s26  ;;  %v2393_v30 = vsel %vm933_vm2, %v2377_v22, %v8069_v43  ;;  %v2394_v16 = vsel %vm933_vm2, %v2378_v55, %v8070_v8  ;;  %v8105_v27 = vunpack.i.h.bf16 %v10083_v39  ;;  %v8104_v42 = vunpack.i.l.bf16 %v10083_v39 }
 0x100   : > { %v10204_v6 = vpop.permute.xlu1 %8172  ;;  %v2396_v2 = vsel %vm933_vm2, %v2380_v24, %v8080_v63  ;;  %v2395_v57 = vsel %vm933_vm2, %v2379_v26, %v8079_v13  ;;  %v8120_v58 = vunpack.i.h.bf16 %v10093_v35  ;;  %v2410_v5 = vsel %vm2409_vm10, %v2393_v30, %v8084_v17 }
 0x101   : > { %v10210_v7 = vpop.permute.xlu0 %8177  ;;  %v2411_v45 = vsel %vm2409_vm10, %v2394_v16, %v8085_v15  ;;  %v8125_v34 = vunpack.i.h.bf16 %v10099_v54  ;;  %v8124_v39 = vunpack.i.l.bf16 %v10099_v54  ;;  %v2413_v4 = vsel %vm2409_vm10, %v2396_v2, %v8100_v9  ;;  %v10280_v2 = vld [vmem:[#allocation2 + $0x230] ss:$2 sm:$0xff] }
 0x102   : > { %8462 = vrot.lane.b32.xlu1 %v10013_v50, %s11826_s28  ;;  %v8099_v50 = vunpack.i.l.bf16 %v10077_v37  ;;  %v8119_v37 = vunpack.i.l.bf16 %v10093_v35  ;;  %v8145_v35 = vunpack.i.h.bf16 %v10129_v29  ;;  %v8144_v23 = vunpack.i.l.bf16 %v10129_v29 }
 0x103   : > { %8467 = vrot.lane.b32.xlu0 %v10133_v41, %s11814_s30  ;;  %v2427_v20 = vsel %vm2426_vm11, %v2410_v5, %v8104_v42  ;;  %v2428_v8 = vsel %vm2426_vm11, %v2411_v45, %v8105_v27  ;;  %v8165_v43 = vunpack.i.h.bf16 %v10180_v44  ;;  %v8164_v54 = vunpack.i.l.bf16 %v10180_v44  ;;  %s11248_s30 = scalar_lea.vmem %s11757_s9, %s7755_s27 }
 0x104   : > { %v8183_v59 = vpop.permute.xlu1 %8182  ;;  %v2412_v25 = vsel %vm2409_vm10, %v2395_v57, %v8099_v50  ;;  %v2430_v49 = vsel %vm2426_vm11, %v2413_v4, %v8120_v58  ;;  %v2444_v29 = vsel %vm2443_vm12, %v2427_v20, %v8124_v39  ;;  %v2445_v22 = vsel %vm2443_vm12, %v2428_v8, %v8125_v34  ;;  %v10282_v57 = vld [vmem:[#allocation2 + $0x240] ss:$2 sm:$0xff] }
 0x105   : > { %v10232_v40 = vpop.permute.xlu0 %8187  ;;  %v8185_v63 = vunpack.i.h.bf16 %v8183_v59  ;;  %v8184_v13 = vunpack.i.l.bf16 %v8183_v59  ;;  %v8140_v55 = vunpack.i.h.bf16 %v10111_v28  ;;  %v8139_v15 = vunpack.i.l.bf16 %v10111_v28 }
 0x106   : > { %8472 = vrot.lane.b32.xlu1 %v10135_v14, %s11815_s18  ;;  %v2461_v44 = vsel %vm2460_vm13, %v2444_v29, %v8144_v23  ;;  %v2462_v17 = vsel %vm2460_vm13, %v2445_v22, %v8145_v35  ;;  %v8160_v26 = vunpack.i.h.bf16 %v10158_v46  ;;  %v8159_v24 = vunpack.i.l.bf16 %v10158_v46 }
 0x107   : > { %8477 = vrot.lane.b32.xlu0 %v10117_v33, %s11826_s28  ;;  %v2429_v33 = vsel %vm2426_vm11, %v2412_v25, %v8119_v37  ;;  %v2478_v30 = vsel %vm2477_vm14, %v2461_v44, %v8164_v54  ;;  %v2479_v28 = vsel %vm2477_vm14, %v2462_v17, %v8165_v43  ;;  %v8180_v16 = vunpack.i.h.bf16 %v10210_v7  ;;  %v1262_v44 = vld [vmem:[#allocation2 + $0x281] ss:$2 sm:$0xff]  ;;  %v1264_v17 = vld [vmem:[#allocation2 + $0x291] ss:$2 sm:$0xff] }
 0x108   : > { %v10250_v53 = vpop.permute.xlu1 %8192  ;;  %v8179_v27 = vunpack.i.l.bf16 %v10210_v7  ;;  %v2495_v42 = vsel %vm2494_vm15, %v2478_v30, %v8184_v13  ;;  %v2496_v46 = vsel %vm2494_vm15, %v2479_v28, %v8185_v63  ;;  %v2446_v45 = vsel %vm2443_vm12, %v2429_v33, %v8139_v15  ;;  %v1192_v63 = vld [vmem:[#allocation2 + $0x290] ss:$2 sm:$0xff] }
 0x109   : > { %v8198_v21 = vpop.permute.xlu0 %8197  ;;  %v2447_v34 = vsel %vm2443_vm12, %v2430_v49, %v8140_v55  ;;  %v2463_v4 = vsel %vm2460_vm13, %v2446_v45, %v8159_v24  ;;  %v8511_v20 = vpack.i.bf16 %v10282_v57, %v10280_v2  ;;  %v1190_v49 = vld [vmem:[#allocation2 + $0x280] ss:$2 sm:$0xff]  ;;  %v1266_v45 = vld [vmem:[#allocation2 + $0x2a9] ss:$2 sm:$0xff] }
 0x10a   : > { %8482 = vrot.lane.b32.xlu1 %v10029_v61, %s11827_s17  ;;  %v8200_v58 = vunpack.i.h.bf16 %v8198_v21  ;;  %v8199_v37 = vunpack.i.l.bf16 %v8198_v21  ;;  %v2464_v35 = vsel %vm2460_vm13, %v2447_v34, %v8160_v26  ;;  %v8521_v15 = vpack.i.bf16 %v1192_v63, %v1190_v49  ;;  %v1268_v34 = vld [vmem:[#allocation2 + $0x2b9] ss:$2 sm:$0xff] }
 0x10b   : > { %8487 = vrot.lane.b32.xlu0 %v10141_v18, %s11815_s18  ;;  %v2481_v8 = vsel %vm2477_vm14, %v2464_v35, %v8180_v16  ;;  %v1406_v16 = vld [vmem:[#allocation2 + $0x283] ss:$2 sm:$0xff]  ;;  %v1338_v35 = vld [vmem:[#allocation2 + $0x2aa] ss:$2 sm:$0xff]  ;;  %v8095_v63 = vunpack.i.h.bf16 %v10075_v36  ;;  %s9392_s18 = smov 96  }
 0x10c   : > { %v8203_v61 = vpop.permute.xlu1 %8202  ;;  %v2498_v33 = vsel %vm2494_vm15, %v2481_v8, %v8200_v58  ;;  %v1194_v58 = vld [vmem:[#allocation2 + $0x2a8] ss:$2 sm:$0xff]  ;;  %v8075_v8 = vunpack.i.h.bf16 %v10061_v19 }
 0x10d   : > { %v8205_v9 = vunpack.i.h.bf16 %v8203_v61  ;;  %v8204_v50 = vunpack.i.l.bf16 %v8203_v61  ;;  %v10270_v59 = vpop.permute.xlu0 %8207  ;;  %v8531_v61 = vpack.i.bf16 %v1264_v17, %v1262_v44  ;;  %v9328_v17 = vld [vmem:[#allocation2 + $0xa0] ss:$2 sm:$0xff] }
 0x10e   : > { %8492 = vrot.lane.b32.xlu1 %v10160_v52, %s11816_s0 }
 0x10f   : > { %8497 = vrot.lane.b32.xlu0 %v10135_v14, %s11827_s17  ;;  %v2512_v5 = vsel %vm2511_vm1, %v2495_v42, %v8204_v50  ;;  %v2513_v7 = vsel %vm2511_vm1, %v2496_v46, %v8205_v9  ;;  %v2480_v14 = vsel %vm2477_vm14, %v2463_v4, %v8179_v27  ;;  %v1334_v9 = vld [vmem:[#allocation2 + $0x282] ss:$2 sm:$0xff]  ;;  %v1336_v50 = vld [vmem:[#allocation2 + $0x292] ss:$2 sm:$0xff]  ;;  %v1408_v27 = vld [vmem:[#allocation2 + $0x293] ss:$2 sm:$0xff] }
 0x110   : > { %v10290_v39 = vpop.permute.xlu1 %8212  ;;  %v2528_v25 = vpack.c.bf16 %v2513_v7, %v2512_v5  ;;  %v2497_v21 = vsel %vm2494_vm15, %v2480_v14, %v8199_v37  ;;  %v1196_v37 = vld [vmem:[#allocation2 + $0x2b8] ss:$2 sm:$0xff] }
 0x111   : > { %v8218_v23 = vpop.permute.xlu0 %8217 }
 0x112   : > { %v8220_v43 = vunpack.i.h.bf16 %v8218_v23  ;;  %v8219_v54 = vunpack.i.l.bf16 %v8218_v23  ;;  %8502 = vrot.lane.b32.xlu1 %v10045_v0, %s11830_s24  ;;  %7921 = vmatprep.mubr.msk.bf16.mxu0 %vm965_vm3, %v2528_v25  ;;  %v1340_v23 = vld [vmem:[#allocation2 + $0x2ba] ss:$2 sm:$0xff] }
 0x113   : > { %8507 = vrot.lane.b32.xlu0 %v10162_v1, %s11816_s0  ;;  %s7317_s0 = sshll.u32 %s11857_s25, 1 }
 0x114   : > { %v2514_v13 = vsel %vm2511_vm1, %v2497_v21, %v8219_v54  ;;  %v2515_v29 = vsel %vm2511_vm1, %v2498_v33, %v8220_v43  ;;  %v10307_v22 = vpop.permute.xlu1 %8222  ;;  %v8074_v43 = vunpack.i.l.bf16 %v10061_v19  ;;  %v1410_v54 = vld [vmem:[#allocation2 + $0x2ab] ss:$2 sm:$0xff]  ;;  %v1412_v21 = vld [vmem:[#allocation2 + $0x2bb] ss:$2 sm:$0xff]  ;;  %v8089_v33 = vunpack.i.l.bf16 %v10069_v31 }
 0x115   : > { %v10309_v55 = vpop.permute.xlu0 %8227  ;;  %v2529_v0 = vpack.c.bf16 %v2515_v29, %v2514_v13  ;;  %v8094_v13 = vunpack.i.l.bf16 %v10075_v36  ;;  %v8109_v19 = vunpack.i.l.bf16 %v10085_v62 }
 0x116   : > { %8512 = vrot.lane.b32.xlu1 %v8511_v20, %s11817_s22 }
 0x117   : > { %8517 = vrot.lane.b32.xlu0 %v10160_v52, %s11830_s24  ;;  %7922 = vmatmul.mubr.msk.bf16.vlgmr.msra.gmra.mxu0 %vm965_vm3, %v2529_v0  ;;  %v8541_v52 = vpack.i.bf16 %v1336_v50, %v1334_v9  ;;  %v8110_v0 = vunpack.i.h.bf16 %v10085_v62  ;;  %v8114_v9 = vunpack.i.l.bf16 %v10091_v51  ;;  %v2281_v62 = vsel %vm841_vm0, %v9957_v10, %v8089_v33 }
 0x118   : > { %v10315_v26 = vpop.permute.xlu1 %8232  ;;  %v8130_v50 = vunpack.i.h.bf16 %v10101_v11  ;;  %v8174_v33 = vunpack.i.l.bf16 %v10204_v6 }
 0x119   : > { %v10317_v24 = vpop.permute.xlu0 %8237 }
 0x11a   : > { %8522 = vrot.lane.b32.xlu1 %v8521_v15, %s11817_s22  ;;  %v9327_v15 = vld [vmem:[#allocation2 + $0xb0] ss:$2 sm:$0xff] }
 0x11b   : > { %8527 = vrot.lane.b32.xlu0 %v10073_v32, %s11819_s20  ;;  %v8551_v32 = vpack.i.bf16 %v1408_v27, %v1406_v16  ;;  %v2280_v44 = vsel %vm841_vm0, %v9327_v15, %v8075_v8  ;;  %v8169_v8 = vunpack.i.l.bf16 %v10186_v38  ;;  %v8195_v15 = vunpack.i.h.bf16 %v10250_v53 }
 0x11c   : > { %v10322_v30 = vpop.permute.xlu1 %8242  ;;  %v2297_v27 = vsel %vm2291_vm4, %v2280_v44, %v8095_v63  ;;  %v8194_v44 = vunpack.i.l.bf16 %v10250_v53 }
 0x11d   : > { %v10324_v28 = vpop.permute.xlu0 %8247 }
 0x11e   : > { %8532 = vrot.lane.b32.xlu1 %v8531_v61, %s11819_s20  ;;  %v8115_v61 = vunpack.i.h.bf16 %v10091_v51  ;;  %v8135_v51 = vunpack.i.h.bf16 %v10109_v60  ;;  %s9391_s20 = smov 64  }
 0x11f   : > { %8537 = vrot.lane.b32.xlu0 %v10089_v56, %s11821_s23  ;;  %v8561_v56 = vpack.i.bf16 %v1196_v37, %v1194_v58  ;;  %v11832_v37 = vld [vmem:[#allocation14_spill] sm:$0xff] }
 0x120   : > { %v10329_v42 = vpop.permute.xlu1 %8252 }
 0x121   : > { %v10331_v46 = vpop.permute.xlu0 %8257 }
 0x122   : > { %8542 = vrot.lane.b32.xlu1 %v8541_v52, %s11821_s23  ;;  %v8129_v52 = vunpack.i.l.bf16 %v10101_v11  ;;  %v8149_v11 = vunpack.i.l.bf16 %v11832_v37  ;;  %s786_s23 = scalar_lea.vmem %s11752_s4, %s11857_s25 }
 0x123   : > { %8547 = vrot.lane.b32.xlu0 %v10105_v3, %s11823_s29  ;;  %v8571_v3 = vpack.i.bf16 %v1268_v34, %v1266_v45  ;;  %v2314_v34 = vsel %vm2308_vm5, %v2297_v27, %v8115_v61  ;;  %v8209_v61 = vunpack.i.l.bf16 %v10270_v59 }
 0x124   : > { %v10336_v5 = vpop.permute.xlu1 %8262 }
 0x125   : > { %v10338_v7 = vpop.permute.xlu0 %8267 }
 0x126   : > { %8552 = vrot.lane.b32.xlu1 %v8551_v32, %s11823_s29  ;;  %s783_s29 = scalar_lea.vmem %s11751_s3, %s11857_s25 }
 0x127   : > { %8557 = vrot.lane.b32.xlu0 %v10123_v48, %s11825_s26  ;;  %v8581_v48 = vpack.i.bf16 %v1340_v23, %v1338_v35 }
 0x128   : > { %v10343_v25 = vpop.permute.xlu1 %8272 }
 0x129   : > { %v10345_v4 = vpop.permute.xlu0 %8277 }
 0x12a   : > { %8562 = vrot.lane.b32.xlu1 %v8561_v56, %s11825_s26  ;;  %v8150_v56 = vunpack.i.h.bf16 %v11832_v37  ;;  %s780_s26 = scalar_lea.vmem %s11750_s2, %s11857_s25 }
 0x12b   : > { %8567 = vrot.lane.b32.xlu0 %v10133_v41, %s11826_s28  ;;  %v8090_v41 = vunpack.i.h.bf16 %v10069_v31  ;;  %v2279_v31 = vsel %vm841_vm0, %v9328_v17, %v8074_v43 }
 0x12c   : > { %v10350_v20 = vpop.permute.xlu1 %8282  ;;  %v2296_v32 = vsel %vm2291_vm4, %v2279_v31, %v8094_v13  ;;  %v8210_v31 = vunpack.i.h.bf16 %v10270_v59  ;;  %v8229_v59 = vunpack.i.l.bf16 %v10309_v55 }
 0x12d   : > { %v10352_v14 = vpop.permute.xlu0 %8287  ;;  %v2282_v36 = vsel %vm841_vm0, %v9959_v12, %v8090_v41  ;;  %v2298_v12 = vsel %vm2291_vm4, %v2281_v62, %v8109_v19  ;;  %v2313_v45 = vsel %vm2308_vm5, %v2296_v32, %v8114_v9  ;;  %v8175_v41 = vunpack.i.h.bf16 %v10204_v6 }
 0x12e   : > { %8572 = vrot.lane.b32.xlu1 %v8571_v3, %s11826_s28  ;;  %v2299_v10 = vsel %vm2291_vm4, %v2282_v36, %v8110_v0  ;;  %v8155_v3 = vunpack.i.h.bf16 %v10154_v47  ;;  %v2315_v35 = vsel %vm2308_vm5, %v2298_v12, %v8129_v52  ;;  %v8190_v0 = vunpack.i.h.bf16 %v10232_v40 }
 0x12f   : > { %8577 = vrot.lane.b32.xlu0 %v10141_v18, %s11827_s17  ;;  %v8591_v18 = vpack.i.bf16 %v1412_v21, %v1410_v54  ;;  %v2316_v23 = vsel %vm2308_vm5, %v2299_v10, %v8130_v50  ;;  %v2331_v21 = vsel %vm2325_vm6, %v2314_v34, %v8135_v51  ;;  %v8215_v62 = vunpack.i.h.bf16 %v10290_v39 }
 0x130   : > { %v10361_v49 = vpop.permute.xlu1 %8292  ;;  %v2333_v13 = vsel %vm2325_vm6, %v2316_v23, %v8150_v56  ;;  %v8214_v50 = vunpack.i.l.bf16 %v10290_v39  ;;  %v8230_v32 = vunpack.i.h.bf16 %v10309_v55  ;;  %v8235_v12 = vunpack.i.h.bf16 %v10315_v26 }
 0x131   : > { %v10365_v29 = vpop.permute.xlu0 %8297  ;;  %v8234_v10 = vunpack.i.l.bf16 %v10315_v26  ;;  %v8250_v56 = vunpack.i.h.bf16 %v10324_v28 }
 0x132   : > { %8582 = vrot.lane.b32.xlu1 %v8581_v48, %s11827_s17  ;;  %v8170_v48 = vunpack.i.h.bf16 %v10186_v38  ;;  %v8189_v38 = vunpack.i.l.bf16 %v10232_v40  ;;  %s11034_s17 = scalar_lea.vmem %s11753_s5, %s7754_s21  ;;  %s814_s21 = scalar_lea.vmem %s11760_s12, %s11857_s25 }
 0x133   : > { %8587 = vrot.lane.b32.xlu0 %v10162_v1, %s11830_s24  ;;  %v8134_v1 = vunpack.i.l.bf16 %v10109_v60  ;;  %v8154_v60 = vunpack.i.l.bf16 %v10154_v47  ;;  %v2332_v47 = vsel %vm2325_vm6, %v2315_v35, %v8149_v11  ;;  %v8249_v11 = vunpack.i.l.bf16 %v10324_v28 }
 0x134   : > { %v10382_v16 = vpop.permute.xlu1 %8302  ;;  %v2349_v6 = vsel %vm2342_vm7, %v2332_v47, %v8169_v8  ;;  %v2350_v17 = vsel %vm2342_vm7, %v2333_v13, %v8170_v48  ;;  %v8270_v48 = vunpack.i.h.bf16 %v10338_v7  ;;  %v8269_v8 = vunpack.i.l.bf16 %v10338_v7 }
 0x135   : > { %v10388_v58 = vpop.permute.xlu0 %8307  ;;  %v2330_v54 = vsel %vm2325_vm6, %v2313_v45, %v8134_v1  ;;  %v2366_v53 = vsel %vm2359_vm8, %v2349_v6, %v8189_v38  ;;  %v2367_v27 = vsel %vm2359_vm8, %v2350_v17, %v8190_v0  ;;  %v8295_v47 = vunpack.i.h.bf16 %v10361_v49 }
 0x136   : > { %8592 = vrot.lane.b32.xlu1 %v8591_v18, %s11830_s24  ;;  %v2347_v19 = vsel %vm2342_vm7, %v2330_v54, %v8154_v60  ;;  %v2348_v18 = vsel %vm2342_vm7, %v2331_v21, %v8155_v3  ;;  %v2383_v39 = vsel %vm2376_vm9, %v2366_v53, %v8209_v61  ;;  %v2384_v37 = vsel %vm2376_vm9, %v2367_v27, %v8210_v31  ;;  %s7756_s24 = sshll.u32 %s11857_s25, 11 }
 0x137   : > { %v2364_v40 = vsel %vm2359_vm8, %v2347_v19, %v8174_v33  ;;  %v2365_v36 = vsel %vm2359_vm8, %v2348_v18, %v8175_v41  ;;  %v8255_v3 = vunpack.i.h.bf16 %v10329_v42  ;;  %v8254_v60 = vunpack.i.l.bf16 %v10329_v42  ;;  %s11394_s28 = scalar_lea.vmem %s11761_s13, %s7756_s24 }
 0x138   : > { %v10403_v43 = vpop.permute.xlu1 %8312  ;;  %v2381_v51 = vsel %vm2376_vm9, %v2364_v40, %v8194_v44  ;;  %v2382_v1 = vsel %vm2376_vm9, %v2365_v36, %v8195_v15  ;;  %v2399_v26 = vsel %vm933_vm2, %v2383_v39, %v8229_v59  ;;  %v2400_v23 = vsel %vm933_vm2, %v2384_v37, %v8230_v32 }
 0x139   : > { %v10409_v63 = vpop.permute.xlu0 %8317  ;;  %v2397_v34 = vsel %vm933_vm2, %v2381_v51, %v8214_v50  ;;  %v2398_v55 = vsel %vm933_vm2, %v2382_v1, %v8215_v62  ;;  %v8275_v21 = vunpack.i.h.bf16 %v10343_v25  ;;  %v8274_v41 = vunpack.i.l.bf16 %v10343_v25 }
 0x13a   : > { %v2414_v28 = vsel %vm2409_vm10, %v2397_v34, %v8234_v10  ;;  %v2415_v54 = vsel %vm2409_vm10, %v2398_v55, %v8235_v12  ;;  %v2416_v42 = vsel %vm2409_vm10, %v2399_v26, %v8249_v11  ;;  %v2417_v33 = vsel %vm2409_vm10, %v2400_v23, %v8250_v56 }
 0x13b   : > { %v8294_v13 = vunpack.i.l.bf16 %v10361_v49  ;;  %v2431_v7 = vsel %vm2426_vm11, %v2414_v28, %v8254_v60  ;;  %v2432_v38 = vsel %vm2426_vm11, %v2415_v54, %v8255_v3  ;;  %v8315_v19 = vunpack.i.h.bf16 %v10403_v43 }
 0x13c   : > { %v10423_v9 = vpop.permute.xlu1 %8322  ;;  %v8314_v18 = vunpack.i.l.bf16 %v10403_v43  ;;  %v2433_v25 = vsel %vm2426_vm11, %v2416_v42, %v8269_v8  ;;  %v2434_v44 = vsel %vm2426_vm11, %v2417_v33, %v8270_v48  ;;  %v2448_v31 = vsel %vm2443_vm12, %v2431_v7, %v8274_v41 }
 0x13d   : > { %v10429_v52 = vpop.permute.xlu0 %8327  ;;  %v2449_v49 = vsel %vm2443_vm12, %v2432_v38, %v8275_v21  ;;  %v8290_v61 = vunpack.i.h.bf16 %v10352_v14  ;;  %v8289_v40 = vunpack.i.l.bf16 %v10352_v14  ;;  %v2465_v36 = vsel %vm2460_vm13, %v2448_v31, %v8294_v13 }
 0x13e   : > { %v2466_v62 = vsel %vm2460_vm13, %v2449_v49, %v8295_v47  ;;  %v8310_v43 = vunpack.i.h.bf16 %v10388_v58  ;;  %v8309_v50 = vunpack.i.l.bf16 %v10388_v58  ;;  %v2482_v27 = vsel %vm2477_vm14, %v2465_v36, %v8314_v18 }
 0x13f   : > { %v2483_v32 = vsel %vm2477_vm14, %v2466_v62, %v8315_v19  ;;  %v8330_v12 = vunpack.i.h.bf16 %v10429_v52  ;;  %v8329_v14 = vunpack.i.l.bf16 %v10429_v52  ;;  %v2451_v34 = vsel %vm2443_vm12, %v2434_v44, %v8290_v61 }
 0x140   : > { %v8333_v45 = vpop.permute.xlu1 %8332  ;;  %v2468_v52 = vsel %vm2460_vm13, %v2451_v34, %v8310_v43  ;;  %v8224_v36 = vunpack.i.l.bf16 %v10307_v22  ;;  %v8240_v62 = vunpack.i.h.bf16 %v10317_v24  ;;  %v8239_v43 = vunpack.i.l.bf16 %v10317_v24 }
 0x141   : > { %v10447_v35 = vpop.permute.xlu0 %8337  ;;  %v8335_v6 = vunpack.i.h.bf16 %v8333_v45  ;;  %v8334_v17 = vunpack.i.l.bf16 %v8333_v45  ;;  %v2450_v45 = vsel %vm2443_vm12, %v2433_v25, %v8289_v40  ;;  %v2485_v48 = vsel %vm2477_vm14, %v2468_v52, %v8330_v12  ;;  %v9329_v12 = vld [vmem:[#allocation2 + $0x150] ss:$2 sm:$0xff] }
 0x142   : > { %v2467_v60 = vsel %vm2460_vm13, %v2450_v45, %v8309_v50  ;;  %v8225_v40 = vunpack.i.h.bf16 %v10307_v22  ;;  %v9330_v22 = vld [vmem:[#allocation2 + $0x140] ss:$2 sm:$0xff]  ;;  %v8265_v24 = vunpack.i.h.bf16 %v10336_v5 }
 0x143   : > { %v2499_v10 = vsel %vm2494_vm15, %v2482_v27, %v8334_v17  ;;  %v2500_v39 = vsel %vm2494_vm15, %v2483_v32, %v8335_v6  ;;  %v2484_v23 = vsel %vm2477_vm14, %v2467_v60, %v8329_v14  ;;  %v8244_v27 = vunpack.i.l.bf16 %v10322_v30 }
 0x144   : > { %v10461_v0 = vpop.permute.xlu1 %8342  ;;  %v2284_v14 = vsel %vm841_vm0, %v9329_v12, %v8225_v40  ;;  %v8285_v60 = vunpack.i.h.bf16 %v10350_v20 }
 0x145   : > { %v8348_v15 = vpop.permute.xlu0 %8347 }
 0x146   : > { %v8350_v37 = vunpack.i.h.bf16 %v8348_v15  ;;  %v8349_v56 = vunpack.i.l.bf16 %v8348_v15 }
 0x148   : > { %v8353_v53 = vpop.permute.xlu1 %8352  ;;  %v2501_v54 = vsel %vm2494_vm15, %v2484_v23, %v8349_v56  ;;  %v2502_v21 = vsel %vm2494_vm15, %v2485_v48, %v8350_v37  ;;  %v11833_v37 = vld [vmem:[#allocation13_spill] sm:$0xff]  ;;  %v8300_v48 = vunpack.i.h.bf16 %v10365_v29 }
 0x149   : > { %v8355_v59 = vunpack.i.h.bf16 %v8353_v53  ;;  %v8354_v51 = vunpack.i.l.bf16 %v8353_v53  ;;  %v10479_v1 = vpop.permute.xlu0 %8357  ;;  %v8245_v53 = vunpack.i.h.bf16 %v10322_v30  ;;  %v2286_v56 = vsel %vm841_vm0, %v11833_v37, %v8240_v62  ;;  %v11834_v30 = vld [vmem:[#allocation12_spill] sm:$0xff] }
 0x14a   : > { %v8325_v62 = vunpack.i.h.bf16 %v10423_v9 }
 0x14b   : > { %v2516_v58 = vsel %vm2511_vm1, %v2499_v10, %v8354_v51  ;;  %v2517_v11 = vsel %vm2511_vm1, %v2500_v39, %v8355_v59  ;;  %v8260_v59 = vunpack.i.h.bf16 %v10331_v46  ;;  %v8259_v51 = vunpack.i.l.bf16 %v10331_v46 }
 0x14c   : > { %v10489_v55 = vpop.permute.xlu1 %8362  ;;  %v2530_v3 = vpack.c.bf16 %v2517_v11, %v2516_v58  ;;  %v2283_v10 = vsel %vm841_vm0, %v9330_v22, %v8224_v36  ;;  %v8264_v39 = vunpack.i.l.bf16 %v10336_v5  ;;  %v2285_v58 = vsel %vm841_vm0, %v11834_v30, %v8239_v43 }
 0x14d   : > { %v8368_v26 = vpop.permute.xlu0 %8367  ;;  %v8280_v11 = vunpack.i.h.bf16 %v10345_v4  ;;  %v8279_v46 = vunpack.i.l.bf16 %v10345_v4  ;;  %v2300_v34 = vsel %vm2291_vm4, %v2283_v10, %v8244_v27  ;;  %v8284_v5 = vunpack.i.l.bf16 %v10350_v20 }
 0x14e   : > { %v8370_v8 = vunpack.i.h.bf16 %v8368_v26  ;;  %v8369_v28 = vunpack.i.l.bf16 %v8368_v26  ;;  %7925 = vmatprep.mubr.msk.bf16.mxu0 %vm965_vm3, %v2530_v3  ;;  %v2301_v3 = vsel %vm2291_vm4, %v2284_v14, %v8245_v53  ;;  %v2302_v26 = vsel %vm2291_vm4, %v2285_v58, %v8259_v51 }
 0x14f   : > { %v2303_v23 = vsel %vm2291_vm4, %v2286_v56, %v8260_v59  ;;  %v8299_v4 = vunpack.i.l.bf16 %v10365_v29  ;;  %v2319_v20 = vsel %vm2308_vm5, %v2302_v26, %v8279_v46  ;;  %v8324_v43 = vunpack.i.l.bf16 %v10423_v9 }
 0x150   : > { %v2518_v41 = vsel %vm2511_vm1, %v2501_v54, %v8369_v28  ;;  %v2519_v42 = vsel %vm2511_vm1, %v2502_v21, %v8370_v8  ;;  %v10500_v33 = vpop.permute.xlu1 %8372  ;;  %v2317_v8 = vsel %vm2308_vm5, %v2300_v34, %v8264_v39  ;;  %v2318_v28 = vsel %vm2308_vm5, %v2301_v3, %v8265_v24 }
 0x151   : > { %v10502_v47 = vpop.permute.xlu0 %8377  ;;  %v2531_v13 = vpack.c.bf16 %v2519_v42, %v2518_v41  ;;  %v8305_v54 = vunpack.i.h.bf16 %v10382_v16  ;;  %v8304_v21 = vunpack.i.l.bf16 %v10382_v16  ;;  %v2320_v41 = vsel %vm2308_vm5, %v2303_v23, %v8280_v11 }
 0x152   : > { %v8320_v42 = vunpack.i.h.bf16 %v10409_v63  ;;  %v2334_v29 = vsel %vm2325_vm6, %v2317_v8, %v8284_v5  ;;  %v2335_v36 = vsel %vm2325_vm6, %v2318_v28, %v8285_v60  ;;  %v2336_v16 = vsel %vm2325_vm6, %v2319_v20, %v8299_v4 }
 0x153   : > { %7926 = vmatmul.mubr.msk.bf16.gmra.mxu0 %vm965_vm3, %v2531_v13  ;;  %v8319_v13 = vunpack.i.l.bf16 %v10409_v63  ;;  %v2337_v27 = vsel %vm2325_vm6, %v2320_v41, %v8300_v48  ;;  %v8340_v59 = vunpack.i.h.bf16 %v10447_v35  ;;  %v8339_v63 = vunpack.i.l.bf16 %v10447_v35 }
 0x154   : > { %v10505_v7 = vpop.permute.xlu1 %8382  ;;  %v2351_v51 = vsel %vm2342_vm7, %v2334_v29, %v8304_v21  ;;  %v2352_v12 = vsel %vm2342_vm7, %v2335_v36, %v8305_v54  ;;  %v8345_v14 = vunpack.i.h.bf16 %v10461_v0  ;;  %v8344_v22 = vunpack.i.l.bf16 %v10461_v0 }
 0x155   : > { %v10507_v38 = vpop.permute.xlu0 %8387  ;;  %v2353_v9 = vsel %vm2342_vm7, %v2336_v16, %v8319_v13  ;;  %v2354_v10 = vsel %vm2342_vm7, %v2337_v27, %v8320_v42  ;;  %v8360_v24 = vunpack.i.h.bf16 %v10479_v1  ;;  %v8359_v39 = vunpack.i.l.bf16 %v10479_v1 }
 0x156   : > { %v2368_v35 = vsel %vm2359_vm8, %v2351_v51, %v8324_v43  ;;  %v2369_v56 = vsel %vm2359_vm8, %v2352_v12, %v8325_v62  ;;  %v8365_v30 = vunpack.i.h.bf16 %v10489_v55  ;;  %v8364_v58 = vunpack.i.l.bf16 %v10489_v55 }
 0x157   : > { %v2370_v0 = vsel %vm2359_vm8, %v2353_v9, %v8339_v63  ;;  %v2371_v46 = vsel %vm2359_vm8, %v2354_v10, %v8340_v59  ;;  %v8380_v34 = vunpack.i.h.bf16 %v10502_v47  ;;  %v8379_v1 = vunpack.i.l.bf16 %v10502_v47 }
 0x158   : > { %v10509_v19 = vpop.permute.xlu1 %8392  ;;  %v2385_v3 = vsel %vm2376_vm9, %v2368_v35, %v8344_v22  ;;  %v2386_v60 = vsel %vm2376_vm9, %v2369_v56, %v8345_v14  ;;  %v8385_v5 = vunpack.i.h.bf16 %v10505_v7  ;;  %v8384_v26 = vunpack.i.l.bf16 %v10505_v7 }
 0x159   : > { %v10511_v18 = vpop.permute.xlu0 %8397  ;;  %v2387_v55 = vsel %vm2376_vm9, %v2370_v0, %v8359_v39  ;;  %v2388_v23 = vsel %vm2376_vm9, %v2371_v46, %v8360_v24  ;;  %v2401_v28 = vsel %vm933_vm2, %v2385_v3, %v8364_v58  ;;  %v2402_v47 = vsel %vm933_vm2, %v2386_v60, %v8365_v30 }
 0x15a   : > { %v8400_v48 = vunpack.i.h.bf16 %v10511_v18  ;;  %v8399_v4 = vunpack.i.l.bf16 %v10511_v18  ;;  %v2403_v7 = vsel %vm933_vm2, %v2387_v55, %v8379_v1  ;;  %v2404_v41 = vsel %vm933_vm2, %v2388_v23, %v8380_v34 }
 0x15b   : > { %v2418_v18 = vsel %vm2409_vm10, %v2401_v28, %v8384_v26  ;;  %v2419_v29 = vsel %vm2409_vm10, %v2402_v47, %v8385_v5 }
 0x15c   : > { %v10513_v15 = vpop.permute.xlu1 %8402  ;;  %v2421_v43 = vsel %vm2409_vm10, %v2404_v41, %v8400_v48 }
 0x15d   : > { %v10515_v25 = vpop.permute.xlu0 %8407  ;;  %v8405_v54 = vunpack.i.h.bf16 %v10513_v15  ;;  %v8404_v21 = vunpack.i.l.bf16 %v10513_v15  ;;  %v2420_v15 = vsel %vm2409_vm10, %v2403_v7, %v8399_v4 }
 0x15f   : > { %v2436_v63 = vsel %vm2426_vm11, %v2419_v29, %v8405_v54 }
 0x160   : > { %v10517_v44 = vpop.permute.xlu1 %8412 }
 0x161   : > { %v10519_v6 = vpop.permute.xlu0 %8417 }
 0x162   : > { %v8420_v42 = vunpack.i.h.bf16 %v10519_v6  ;;  %v8419_v13 = vunpack.i.l.bf16 %v10519_v6  ;;  %v2435_v6 = vsel %vm2426_vm11, %v2418_v18, %v8404_v21  ;;  %v8375_v21 = vunpack.i.h.bf16 %v10500_v33 }
 0x164   : > { %v10521_v17 = vpop.permute.xlu1 %8422  ;;  %v2438_v22 = vsel %vm2426_vm11, %v2421_v43, %v8420_v42 }
 0x165   : > { %v10523_v31 = vpop.permute.xlu0 %8427  ;;  %v8425_v36 = vunpack.i.h.bf16 %v10521_v17  ;;  %v8424_v62 = vunpack.i.l.bf16 %v10521_v17  ;;  %v2437_v17 = vsel %vm2426_vm11, %v2420_v15, %v8419_v13 }
 0x167   : > { %v2452_v24 = vsel %vm2443_vm12, %v2435_v6, %v8424_v62  ;;  %v8390_v62 = vunpack.i.h.bf16 %v10507_v38 }
 0x168   : > { %v10525_v49 = vpop.permute.xlu1 %8432 }
 0x169   : > { %v10527_v61 = vpop.permute.xlu0 %8437 }
 0x16a   : > { %v8440_v39 = vunpack.i.h.bf16 %v10527_v61  ;;  %v8439_v35 = vunpack.i.l.bf16 %v10527_v61 }
 0x16c   : > { %v10533_v50 = vpop.permute.xlu1 %8442  ;;  %v2455_v28 = vsel %vm2443_vm12, %v2438_v22, %v8440_v39  ;;  %v8409_v22 = vunpack.i.l.bf16 %v10515_v25 }
 0x16d   : > { %v10537_v32 = vpop.permute.xlu0 %8447  ;;  %v8445_v16 = vunpack.i.h.bf16 %v10533_v50  ;;  %v8444_v27 = vunpack.i.l.bf16 %v10533_v50  ;;  %v2453_v50 = vsel %vm2443_vm12, %v2436_v63, %v8425_v36  ;;  %v8374_v36 = vunpack.i.l.bf16 %v10500_v33 }
 0x16f   : > { %v2469_v56 = vsel %vm2460_vm13, %v2452_v24, %v8444_v27  ;;  %v2470_v30 = vsel %vm2460_vm13, %v2453_v50, %v8445_v16  ;;  %v8389_v16 = vunpack.i.l.bf16 %v10507_v38  ;;  %v8394_v27 = vunpack.i.l.bf16 %v10509_v19  ;;  %v9332_v50 = vld [vmem:[#allocation2 + $0x1e0] ss:$2 sm:$0xff] }
 0x170   : > { %v10551_v45 = vpop.permute.xlu1 %8452  ;;  %v8414_v38 = vunpack.i.l.bf16 %v10517_v44  ;;  %v2287_v39 = vsel %vm841_vm0, %v9332_v50, %v8374_v36 }
 0x171   : > { %v10557_v52 = vpop.permute.xlu0 %8457 }
 0x172   : > { %v8459_v58 = vunpack.i.l.bf16 %v10557_v52 }
 0x174   : > { %v10571_v40 = vpop.permute.xlu1 %8462 }
 0x175   : > { %v10577_v53 = vpop.permute.xlu0 %8467  ;;  %v8465_v51 = vunpack.i.h.bf16 %v10571_v40  ;;  %v8464_v12 = vunpack.i.l.bf16 %v10571_v40  ;;  %v8460_v40 = vunpack.i.h.bf16 %v10557_v52 }
 0x177   : > { %v2486_v46 = vsel %vm2477_vm14, %v2469_v56, %v8464_v12  ;;  %v2487_v34 = vsel %vm2477_vm14, %v2470_v30, %v8465_v51  ;;  %v2472_v7 = vsel %vm2460_vm13, %v2455_v28, %v8460_v40  ;;  %v8395_v12 = vunpack.i.h.bf16 %v10509_v19 }
 0x178   : > { %v10591_v37 = vpop.permute.xlu1 %8472  ;;  %v2290_v19 = vsel %vm841_vm0, %v10282_v57, %v8390_v62  ;;  %v8430_v56 = vunpack.i.h.bf16 %v10523_v31  ;;  %v8449_v57 = vunpack.i.l.bf16 %v10537_v32 }
 0x179   : > { %v10597_v11 = vpop.permute.xlu0 %8477 }
 0x17a   : > { %v8480_v5 = vunpack.i.h.bf16 %v10597_v11  ;;  %v8479_v61 = vunpack.i.l.bf16 %v10597_v11 }
 0x17c   : > { %v8483_v8 = vpop.permute.xlu1 %8482  ;;  %v2489_v13 = vsel %vm2477_vm14, %v2472_v7, %v8480_v5  ;;  %v8455_v5 = vunpack.i.h.bf16 %v10551_v45 }
 0x17d   : > { %v10615_v20 = vpop.permute.xlu0 %8487  ;;  %v8485_v9 = vunpack.i.h.bf16 %v8483_v8  ;;  %v8484_v10 = vunpack.i.l.bf16 %v8483_v8  ;;  %v2454_v8 = vsel %vm2443_vm12, %v2437_v17, %v8439_v35  ;;  %v8410_v17 = vunpack.i.h.bf16 %v10515_v25 }
 0x17e   : > { %v2471_v11 = vsel %vm2460_vm13, %v2454_v8, %v8459_v58  ;;  %v2289_v35 = vsel %vm841_vm0, %v10280_v2, %v8389_v16  ;;  %v2304_v25 = vsel %vm2291_vm4, %v2287_v39, %v8394_v27  ;;  %v8435_v58 = vunpack.i.h.bf16 %v10525_v49 }
 0x17f   : > { %v2503_v26 = vsel %vm2494_vm15, %v2486_v46, %v8484_v10  ;;  %v2504_v55 = vsel %vm2494_vm15, %v2487_v34, %v8485_v9  ;;  %v2488_v42 = vsel %vm2477_vm14, %v2471_v11, %v8479_v61  ;;  %v8415_v9 = vunpack.i.h.bf16 %v10517_v44  ;;  %v9331_v10 = vld [vmem:[#allocation2 + $0x1f0] ss:$2 sm:$0xff] }
 0x180   : > { %v10629_v59 = vpop.permute.xlu1 %8492  ;;  %v2288_v24 = vsel %vm841_vm0, %v9331_v10, %v8375_v21  ;;  %v8429_v44 = vunpack.i.l.bf16 %v10523_v31  ;;  %v2306_v2 = vsel %vm2291_vm4, %v2289_v35, %v8409_v22  ;;  %v2307_v34 = vsel %vm2291_vm4, %v2290_v19, %v8410_v17 }
 0x181   : > { %v8498_v14 = vpop.permute.xlu0 %8497  ;;  %v2305_v40 = vsel %vm2291_vm4, %v2288_v24, %v8395_v12  ;;  %v8454_v61 = vunpack.i.l.bf16 %v10551_v45  ;;  %v8475_v45 = vunpack.i.h.bf16 %v10591_v37  ;;  %v8489_v21 = vunpack.i.l.bf16 %v10615_v20 }
 0x182   : > { %v8500_v23 = vunpack.i.h.bf16 %v8498_v14  ;;  %v8499_v48 = vunpack.i.l.bf16 %v8498_v14  ;;  %v2322_v31 = vsel %vm2308_vm5, %v2305_v40, %v8415_v9  ;;  %v8495_v11 = vunpack.i.h.bf16 %v10629_v59 }
 0x183   : > { %vm936_vm0 = vcmask 254976  }
 0x184   : > { %v8503_v0 = vpop.permute.xlu1 %8502  ;;  %v2505_v15 = vsel %vm2494_vm15, %v2488_v42, %v8499_v48  ;;  %v2506_v43 = vsel %vm2494_vm15, %v2489_v13, %v8500_v23  ;;  %v8470_v23 = vunpack.i.h.bf16 %v10577_v53  ;;  %v8474_v48 = vunpack.i.l.bf16 %v10591_v37 }
 0x185   : > { %v8505_v1 = vunpack.i.h.bf16 %v8503_v0  ;;  %v8504_v3 = vunpack.i.l.bf16 %v8503_v0  ;;  %v10647_v60 = vpop.permute.xlu0 %8507  ;;  %v8434_v0 = vunpack.i.l.bf16 %v10525_v49  ;;  %v8469_v49 = vunpack.i.l.bf16 %v10577_v53 }
 0x186   : > { %v8494_v53 = vunpack.i.l.bf16 %v10629_v59 }
 0x187   : > { %v2520_v52 = vsel %vm2511_vm1, %v2503_v26, %v8504_v3  ;;  %v2521_v4 = vsel %vm2511_vm1, %v2504_v55, %v8505_v1  ;;  %v2321_v1 = vsel %vm2308_vm5, %v2304_v25, %v8414_v38  ;;  %v8450_v3 = vunpack.i.h.bf16 %v10537_v32 }
 0x188   : > { %v2532_v47 = vpack.c.bf16 %v2521_v4, %v2520_v52  ;;  %v10657_v54 = vpop.permute.xlu1 %8512  ;;  %v2323_v26 = vsel %vm2308_vm5, %v2306_v2, %v8429_v44  ;;  %v2324_v55 = vsel %vm2308_vm5, %v2307_v34, %v8430_v56  ;;  %v2338_v4 = vsel %vm2325_vm6, %v2321_v1, %v8434_v0 }
 0x189   : > { %v8518_v41 = vpop.permute.xlu0 %8517  ;;  %v2339_v32 = vsel %vm2325_vm6, %v2322_v31, %v8435_v58  ;;  %v2340_v8 = vsel %vm2325_vm6, %v2323_v26, %v8449_v57  ;;  %v2341_v7 = vsel %vm2325_vm6, %v2324_v55, %v8450_v3  ;;  %v8515_v62 = vunpack.i.h.bf16 %v10657_v54 }
 0x18a   : > { %v8520_v18 = vunpack.i.h.bf16 %v8518_v41  ;;  %v8519_v29 = vunpack.i.l.bf16 %v8518_v41  ;;  %7929 = vmatprep.mubr.msk.bf16.mxu0 %vm965_vm3, %v2532_v47  ;;  %v8490_v47 = vunpack.i.h.bf16 %v10615_v20  ;;  %v2355_v41 = vsel %vm2342_vm7, %v2338_v4, %v8454_v61 }
 0x18b   : > { %v2356_v42 = vsel %vm2342_vm7, %v2339_v32, %v8455_v5  ;;  %v2357_v13 = vsel %vm2342_vm7, %v2340_v8, %v8469_v49  ;;  %v2372_v37 = vsel %vm2359_vm8, %v2355_v41, %v8474_v48  ;;  %v8509_v20 = vunpack.i.l.bf16 %v10647_v60 }
 0x18c   : > { %v2522_v6 = vsel %vm2511_vm1, %v2505_v15, %v8519_v29  ;;  %v2523_v63 = vsel %vm2511_vm1, %v2506_v43, %v8520_v18  ;;  %v10673_v51 = vpop.permute.xlu1 %8522  ;;  %v2358_v18 = vsel %vm2342_vm7, %v2341_v7, %v8470_v23  ;;  %v8510_v29 = vunpack.i.h.bf16 %v10647_v60 }
 0x18d   : > { %v2533_v14 = vpack.c.bf16 %v2523_v63, %v2522_v6  ;;  %v10676_v33 = vpop.permute.xlu0 %8527  ;;  %v2373_v59 = vsel %vm2359_vm8, %v2356_v42, %v8475_v45  ;;  %v8514_v15 = vunpack.i.l.bf16 %v10657_v54  ;;  %v8524_v43 = vunpack.i.l.bf16 %v10673_v51 }
 0x18e   : > { %v2374_v27 = vsel %vm2359_vm8, %v2357_v13, %v8489_v21  ;;  %v2375_v6 = vsel %vm2359_vm8, %v2358_v18, %v8490_v47  ;;  %v2389_v63 = vsel %vm2376_vm9, %v2372_v37, %v8494_v53  ;;  %v2390_v12 = vsel %vm2376_vm9, %v2373_v59, %v8495_v11 }
 0x18f   : > { %7930 = vmatmul.mubr.msk.bf16.gmra.mxu0 %vm965_vm3, %v2533_v14  ;;  %v8525_v60 = vunpack.i.h.bf16 %v10673_v51  ;;  %v8530_v14 = vunpack.i.h.bf16 %v10676_v33  ;;  %v8529_v17 = vunpack.i.l.bf16 %v10676_v33  ;;  %v2391_v54 = vsel %vm2376_vm9, %v2374_v27, %v8509_v20 }
 0x190   : > { %v10692_v30 = vpop.permute.xlu1 %8532  ;;  %v2392_v9 = vsel %vm2376_vm9, %v2375_v6, %v8510_v29  ;;  %v2405_v50 = vsel %vm933_vm2, %v2389_v63, %v8514_v15  ;;  %v2406_v39 = vsel %vm933_vm2, %v2390_v12, %v8515_v62  ;;  %v2407_v51 = vsel %vm933_vm2, %v2391_v54, %v8524_v43 }
 0x191   : > { %v10698_v46 = vpop.permute.xlu0 %8537  ;;  %v8534_v22 = vunpack.i.l.bf16 %v10692_v30  ;;  %v8535_v38 = vunpack.i.h.bf16 %v10692_v30  ;;  %v2408_v30 = vsel %vm933_vm2, %v2392_v9, %v8525_v60  ;;  %v2423_v40 = vsel %vm2409_vm10, %v2406_v39, %v8530_v14 }
 0x192   : > { %v8539_v10 = vunpack.i.l.bf16 %v10698_v46  ;;  %v8540_v19 = vunpack.i.h.bf16 %v10698_v46  ;;  %v2422_v58 = vsel %vm2409_vm10, %v2405_v50, %v8529_v17 }
 0x193   : > { %v2424_v0 = vsel %vm2409_vm10, %v2407_v51, %v8534_v22  ;;  %v2425_v57 = vsel %vm2409_vm10, %v2408_v30, %v8535_v38 }
 0x194   : > { %v10712_v52 = vpop.permute.xlu1 %8542  ;;  %v2439_v2 = vsel %vm2426_vm11, %v2422_v58, %v8539_v10  ;;  %v2440_v31 = vsel %vm2426_vm11, %v2423_v40, %v8540_v19 }
 0x195   : > { %v8548_v28 = vpop.permute.xlu0 %8547  ;;  %v8545_v35 = vunpack.i.h.bf16 %v10712_v52  ;;  %v8544_v25 = vunpack.i.l.bf16 %v10712_v52 }
 0x196   : > { %v8550_v56 = vunpack.i.h.bf16 %v8548_v28  ;;  %v8549_v44 = vunpack.i.l.bf16 %v8548_v28 }
 0x197   : > { %v2441_v26 = vsel %vm2426_vm11, %v2424_v0, %v8544_v25  ;;  %v2442_v55 = vsel %vm2426_vm11, %v2425_v57, %v8545_v35 }
 0x198   : > { %v10730_v36 = vpop.permute.xlu1 %8552  ;;  %v2456_v23 = vsel %vm2443_vm12, %v2439_v2, %v8549_v44  ;;  %v2457_v48 = vsel %vm2443_vm12, %v2440_v31, %v8550_v56 }
 0x199   : > { %v8558_v16 = vpop.permute.xlu0 %8557  ;;  %v8554_v3 = vunpack.i.l.bf16 %v10730_v36  ;;  %v8555_v52 = vunpack.i.h.bf16 %v10730_v36 }
 0x19a   : > { %v8560_v46 = vunpack.i.h.bf16 %v8558_v16  ;;  %v8559_v34 = vunpack.i.l.bf16 %v8558_v16 }
 0x19b   : > { %v2458_v53 = vsel %vm2443_vm12, %v2441_v26, %v8554_v3  ;;  %v2459_v36 = vsel %vm2443_vm12, %v2442_v55, %v8555_v52 }
 0x19c   : > { %v8563_v24 = vpop.permute.xlu1 %8562  ;;  %v2473_v45 = vsel %vm2460_vm13, %v2456_v23, %v8559_v34  ;;  %v2474_v28 = vsel %vm2460_vm13, %v2457_v48, %v8560_v46 }
 0x19d   : > { %v8568_v33 = vpop.permute.xlu0 %8567  ;;  %v8564_v4 = vunpack.i.l.bf16 %v8563_v24  ;;  %v8565_v47 = vunpack.i.h.bf16 %v8563_v24  ;;  %v10791_v24 = vld [vmem:[%s780_s26] ss:$0 sm:$0xff]  ;;  %s794_s26 = scalar_lea.vmem %s11754_s6, %s11857_s25 }
 0x19e   : > { %v8570_v5 = vunpack.i.h.bf16 %v8568_v33  ;;  %v8569_v61 = vunpack.i.l.bf16 %v8568_v33 }
 0x19f   : > { %v2475_v59 = vsel %vm2460_vm13, %v2458_v53, %v8564_v4  ;;  %v2476_v43 = vsel %vm2460_vm13, %v2459_v36, %v8565_v47 }
 0x1a0   : > { %v8573_v1 = vpop.permute.xlu1 %8572  ;;  %v2490_v7 = vsel %vm2477_vm14, %v2473_v45, %v8569_v61  ;;  %v2491_v41 = vsel %vm2477_vm14, %v2474_v28, %v8570_v5 }
 0x1a1   : > { %v8578_v49 = vpop.permute.xlu0 %8577  ;;  %v8574_v21 = vunpack.i.l.bf16 %v8573_v1  ;;  %v8575_v42 = vunpack.i.h.bf16 %v8573_v1 }
 0x1a2   : > { %v8580_v32 = vunpack.i.h.bf16 %v8578_v49  ;;  %v8579_v8 = vunpack.i.l.bf16 %v8578_v49 }
 0x1a3   : > { %v2492_v16 = vsel %vm2477_vm14, %v2475_v59, %v8574_v21  ;;  %v2493_v12 = vsel %vm2477_vm14, %v2476_v43, %v8575_v42 }
 0x1a4   : > { %v8583_v11 = vpop.permute.xlu1 %8582  ;;  %v2507_v62 = vsel %vm2494_vm15, %v2490_v7, %v8579_v8  ;;  %v2508_v15 = vsel %vm2494_vm15, %v2491_v41, %v8580_v32 }
 0x1a5   : > { %v8588_v13 = vpop.permute.xlu0 %8587  ;;  %v8585_v18 = vunpack.i.h.bf16 %v8583_v11  ;;  %v8584_v37 = vunpack.i.l.bf16 %v8583_v11 }
 0x1a6   : > { %v8590_v29 = vunpack.i.h.bf16 %v8588_v13  ;;  %v8589_v20 = vunpack.i.l.bf16 %v8588_v13 }
 0x1a7   : > { %v2509_v22 = vsel %vm2494_vm15, %v2492_v16, %v8584_v37  ;;  %v2510_v54 = vsel %vm2494_vm15, %v2493_v12, %v8585_v18 }
 0x1a8   : > { %v2524_v27 = vsel %vm2511_vm1, %v2507_v62, %v8589_v20  ;;  %v2525_v6 = vsel %vm2511_vm1, %v2508_v15, %v8590_v29  ;;  %v8593_v63 = vpop.permute.xlu1 %8592 }
 0x1a9   : > { %v2534_v60 = vpack.c.bf16 %v2525_v6, %v2524_v27  ;;  %v8595_v14 = vunpack.i.h.bf16 %v8593_v63  ;;  %v8594_v17 = vunpack.i.l.bf16 %v8593_v63 }
 0x1ab   : > { %v2526_v9 = vsel %vm2511_vm1, %v2509_v22, %v8594_v17  ;;  %v2527_v38 = vsel %vm2511_vm1, %v2510_v54, %v8595_v14  ;;  %7933 = vmatprep.mubr.msk.bf16.mxu0 %vm965_vm3, %v2534_v60 }
 0x1ac   : > { %v2535_v10 = vpack.c.bf16 %v2527_v38, %v2526_v9 }
 0x1ae   : > { %7934 = vmatmul.mubr.msk.bf16.gmra.mxu0 %vm965_vm3, %v2535_v10 }
 0x1d7   : > { %v7923_v50 = vpop.f32.mrf.mxu0 }
 0x1d8   : > { %v2642_v39 = vadd.f32 %v7923_v50, %v10791_v24 }
 0x1d9   : > { %v2633_v51 = vpop.f32.mrf.mxu0 }
 0x1da   : > { %v2634_v19 = vadd.f32 %v10791_v24, %v2633_v51  ;;  %v2702_v33 = vsel %vm933_vm2, %v2642_v39, 0.0 }
 0x1db   : > { %2703 = vadd.xlane.f32.xlu1 %v2702_v33  ;;  %v7924_v35 = vpop.f32.mrf.mxu0 }
 0x1dc   : > { %v2645_v25 = vadd.f32 %v7924_v35, %v10791_v24  ;;  %v2696_v56 = vsel %vm933_vm2, %v2634_v19, 0.0 }
 0x1dd   : > { %v2636_v44 = vpop.f32.mrf.mxu0  ;;  %2697 = vadd.xlane.f32.xlu0 %v2696_v56 }
 0x1de   : > { %v10799_v30 = vadd.f32 %v10791_v24, %v2636_v44  ;;  %v2705_v58 = vsel %vm933_vm2, %v2645_v25, 0.0 }
 0x1e0   : > { %v2699_v40 = vsel %vm933_vm2, %v10799_v30, 0.0 }
 0x1e1   : > { %2700 = vadd.xlane.f32.xlu1 %v2699_v40  ;;  %2706 = vadd.xlane.f32.xlu0 %v2705_v58 }
 0x213   : > { %v7927_v0 = vpop.f32.mrf.mxu0 }
 0x214   : > { %v10805_v57 = vadd.f32 %v7927_v0, %v10791_v24 }
 0x215   : > { %v2649_v2 = vpop.f32.mrf.mxu0 }
 0x216   : > { %v10808_v46 = vadd.f32 %v10791_v24, %v2649_v2  ;;  %v2714_v34 = vsel %vm933_vm2, %v10805_v57, 0.0 }
 0x217   : > { %v7928_v1 = vpop.f32.mrf.mxu0  ;;  %2715 = vadd.xlane.f32.xlu1 %v2714_v34 }
 0x218   : > { %v10813_v31 = vadd.f32 %v7928_v1, %v10791_v24  ;;  %v2708_v3 = vsel %vm933_vm2, %v10808_v46, 0.0 }
 0x219   : > { %v2652_v5 = vpop.f32.mrf.mxu0  ;;  %2709 = vadd.xlane.f32.xlu0 %v2708_v3 }
 0x21a   : > { %v10818_v61 = vadd.f32 %v10791_v24, %v2652_v5  ;;  %v2717_v49 = vsel %vm933_vm2, %v10813_v31, 0.0 }
 0x21c   : > { %v2711_v26 = vsel %vm933_vm2, %v10818_v61, 0.0 }
 0x21d   : > { %2718 = vadd.xlane.f32.xlu0 %v2717_v49 }
 0x221   : > { %2712 = vadd.xlane.f32.xlu0 %v2711_v26 }
 0x24f   : > { %v7931_v55 = vpop.f32.mrf.mxu0 }
 0x250   : > { %v10828_v4 = vadd.f32 %v7931_v55, %v10791_v24 }
 0x251   : > { %v2665_v23 = vpop.f32.mrf.mxu0 }
 0x252   : > { %v10825_v48 = vadd.f32 %v10791_v24, %v2665_v23  ;;  %v2726_v47 = vsel %vm933_vm2, %v10828_v4, 0.0  ;;  %v9333_v23 = vld [vmem:[#allocation5] sm:$0xff] }
 0x253   : > { %v7932_v52 = vpop.f32.mrf.mxu0  ;;  %943 = vst.msk [vmem:[#allocation3 + $0x40] sm:$0x3] %vm936_vm0, %v9333_v23  ;;  %937 = vst.msk [vmem:[#allocation3 + $0x10] sm:$0x3] %vm936_vm0, %v9333_v23 }
 0x254   : > { %v2720_v32 = vsel %vm933_vm2, %v10825_v48, 0.0  ;;  %v10836_v28 = vadd.f32 %v7932_v52, %v10791_v24  ;;  %940 = vst.msk [vmem:[#allocation3 + $0x28] sm:$0x3] %vm936_vm0, %v9333_v23  ;;  %946 = vst.msk [vmem:[#allocation3 + $0x58] sm:$0x3] %vm936_vm0, %v9333_v23 }
 0x255   : > { %v2668_v8 = vpop.f32.mrf.mxu0  ;;  %2721 = vadd.xlane.f32.xlu1 %v2720_v32  ;;  %949 = vst.msk [vmem:[#allocation3 + $0x70] sm:$0x3] %vm936_vm0, %v9333_v23  ;;  %952 = vst.msk [vmem:[#allocation3 + $0x88] sm:$0x3] %vm936_vm0, %v9333_v23 }
 0x256   : > { %v10833_v45 = vadd.f32 %v10791_v24, %v2668_v8  ;;  %v2729_v11 = vsel %vm933_vm2, %v10836_v28, 0.0  ;;  %955 = vst.msk [vmem:[#allocation3 + $0xa0] sm:$0x3] %vm936_vm0, %v9333_v23  ;;  %958 = vst.msk [vmem:[#allocation3 + $0xb8] sm:$0x3] %vm936_vm0, %v9333_v23 }
 0x257   : > { %961 = vst.msk [vmem:[#allocation3 + $0xd0] sm:$0x3] %vm936_vm0, %v9333_v23  ;;  %964 = vst.msk [vmem:[#allocation3 + $0xe8] sm:$0x3] %vm936_vm0, %v9333_v23  ;;  %v10968_v23 = vld [vmem:[%s786_s23] ss:$0 sm:$0xff] }
 0x258   : > { %v2723_v21 = vsel %vm933_vm2, %v10833_v45, 0.0  ;;  %s7321_s23 = sshll.u32 %s11857_s25, 2 }
 0x259   : > { %2727 = vadd.xlane.f32.xlu1 %v2726_v47  ;;  %2724 = vadd.xlane.f32.xlu0 %v2723_v21 }
 0x25d   : > { %2730 = vadd.xlane.f32.xlu0 %v2729_v11 }
 0x264   : > { %v2704_v7 = vpop.xlane.xlu1 %2703 }
 0x265   : > { %v2747_v41 = vmul.f32 0.03125, %v2704_v7 }
 0x266   : > { %v2698_v53 = vpop.xlane.xlu0 %2697 }
 0x267   : > { %v10847_v29 = vsub.f32 %v2642_v39, %v2747_v41  ;;  %v2745_v20 = vmul.f32 0.03125, %v2698_v53 }
 0x269   : > { %v10857_v6 = vsub.f32 %v2634_v19, %v2745_v20  ;;  %v2779_v12 = vmul.f32 %v10847_v29, %v10847_v29 }
 0x26a   : > { %v2707_v13 = vpop.xlane.xlu0 %2706  ;;  %v2701_v59 = vpop.xlane.xlu1 %2700 }
 0x26b   : > { %v2748_v62 = vmul.f32 0.03125, %v2707_v13  ;;  %v2746_v63 = vmul.f32 0.03125, %v2701_v59  ;;  %v2799_v54 = vsel %vm933_vm2, %v2779_v12, 0.0  ;;  %v2777_v10 = vmul.f32 %v10857_v6, %v10857_v6 }
 0x26d   : > { %v10861_v60 = vsub.f32 %v2645_v25, %v2748_v62  ;;  %v10872_v9 = vsub.f32 %v10799_v30, %v2746_v63  ;;  %v2793_v50 = vsel %vm933_vm2, %v2777_v10, 0.0 }
 0x26e   : > { %v7935_v42 = vpop.f32.mrf.mxu0 }
 0x26f   : > { %v10850_v15 = vadd.f32 %v7935_v42, %v10791_v24  ;;  %v2778_v51 = vmul.f32 %v10872_v9, %v10872_v9 }
 0x270   : > { %v2681_v18 = vpop.f32.mrf.mxu0 }
 0x271   : > { %v10845_v37 = vadd.f32 %v10791_v24, %v2681_v18  ;;  %v2738_v17 = vsel %vm933_vm2, %v10850_v15, 0.0  ;;  %v2796_v19 = vsel %vm933_vm2, %v2778_v51, 0.0 }
 0x272   : > { %v7936_v36 = vpop.f32.mrf.mxu0 }
 0x273   : > { %v2732_v43 = vsel %vm933_vm2, %v10845_v37, 0.0  ;;  %v10864_v14 = vadd.f32 %v7936_v36, %v10791_v24 }
 0x274   : > { %v2684_v16 = vpop.f32.mrf.mxu0  ;;  %2733 = vadd.xlane.f32.xlu1 %v2732_v43 }
 0x275   : > { %v10855_v27 = vadd.f32 %v10791_v24, %v2684_v16  ;;  %v2741_v38 = vsel %vm933_vm2, %v10864_v14, 0.0  ;;  %v2780_v24 = vmul.f32 %v10861_v60, %v10861_v60 }
 0x277   : > { %v2735_v22 = vsel %vm933_vm2, %v10855_v27, 0.0  ;;  %v2802_v39 = vsel %vm933_vm2, %v2780_v24, 0.0 }
 0x278   : > { %2739 = vadd.xlane.f32.xlu1 %v2738_v17  ;;  %2736 = vadd.xlane.f32.xlu0 %v2735_v22 }
 0x27c   : > { %2800 = vadd.xlane.f32.xlu1 %v2799_v54  ;;  %2742 = vadd.xlane.f32.xlu0 %v2741_v38 }
 0x280   : > { %2794 = vadd.xlane.f32.xlu1 %v2793_v50  ;;  %2803 = vadd.xlane.f32.xlu0 %v2802_v39 }
 0x284   : > { %2797 = vadd.xlane.f32.xlu0 %v2796_v19 }
 0x2a0   : > { %v2716_v33 = vpop.xlane.xlu1 %2715 }
 0x2a1   : > { %v2751_v35 = vmul.f32 0.03125, %v2716_v33 }
 0x2a2   : > { %v2710_v25 = vpop.xlane.xlu0 %2709 }
 0x2a3   : > { %v10886_v56 = vsub.f32 %v10805_v57, %v2751_v35  ;;  %v2749_v44 = vmul.f32 0.03125, %v2710_v25 }
 0x2a5   : > { %v10889_v30 = vsub.f32 %v10808_v46, %v2749_v44  ;;  %v2783_v40 = vmul.f32 %v10886_v56, %v10886_v56 }
 0x2a6   : > { %v2719_v58 = vpop.xlane.xlu0 %2718 }
 0x2a7   : > { %v2752_v0 = vmul.f32 0.03125, %v2719_v58  ;;  %v2811_v2 = vsel %vm933_vm2, %v2783_v40, 0.0  ;;  %v2781_v34 = vmul.f32 %v10889_v30, %v10889_v30 }
 0x2a8   : > { %2812 = vadd.xlane.f32.xlu1 %v2811_v2 }
 0x2a9   : > { %v10897_v1 = vsub.f32 %v10813_v31, %v2752_v0  ;;  %v2805_v5 = vsel %vm933_vm2, %v2781_v34, 0.0 }
 0x2aa   : > { %v2713_v57 = vpop.xlane.xlu0 %2712 }
 0x2ab   : > { %v2750_v3 = vmul.f32 0.03125, %v2713_v57  ;;  %v2784_v46 = vmul.f32 %v10897_v1, %v10897_v1 }
 0x2ac   : > { %2806 = vadd.xlane.f32.xlu1 %v2805_v5 }
 0x2ad   : > { %v10903_v49 = vsub.f32 %v10818_v61, %v2750_v3  ;;  %v2814_v26 = vsel %vm933_vm2, %v2784_v46, 0.0 }
 0x2ae   : > { %2815 = vadd.xlane.f32.xlu0 %v2814_v26 }
 0x2af   : > { %v2782_v55 = vmul.f32 %v10903_v49, %v10903_v49 }
 0x2b1   : > { %v2808_v31 = vsel %vm933_vm2, %v2782_v55, 0.0  ;;  %v10965_v55 = vld [vmem:[%s783_s29] ss:$0 sm:$0xff] }
 0x2b2   : > { %2809 = vadd.xlane.f32.xlu0 %v2808_v31 }
 0x2de   : > { %v2722_v61 = vpop.xlane.xlu1 %2721 }
 0x2df   : > { %v2753_v52 = vmul.f32 0.03125, %v2722_v61 }
 0x2e1   : > { %v10910_v32 = vsub.f32 %v10825_v48, %v2753_v52 }
 0x2e2   : > { %v2728_v8 = vpop.xlane.xlu1 %2727  ;;  %v2725_v47 = vpop.xlane.xlu0 %2724 }
 0x2e3   : > { %v2755_v21 = vmul.f32 0.03125, %v2728_v8  ;;  %v2754_v11 = vmul.f32 0.03125, %v2725_v47  ;;  %v2785_v53 = vmul.f32 %v10910_v32, %v10910_v32 }
 0x2e5   : > { %v10915_v7 = vsub.f32 %v10828_v4, %v2755_v21  ;;  %v10918_v41 = vsub.f32 %v10833_v45, %v2754_v11  ;;  %v2817_v42 = vsel %vm933_vm2, %v2785_v53, 0.0 }
 0x2e6   : > { %2818 = vadd.xlane.f32.xlu1 %v2817_v42  ;;  %v2731_v13 = vpop.xlane.xlu0 %2730 }
 0x2e7   : > { %v2756_v18 = vmul.f32 0.03125, %v2731_v13  ;;  %v2787_v48 = vmul.f32 %v10915_v7, %v10915_v7  ;;  %v2786_v20 = vmul.f32 %v10918_v41, %v10918_v41 }
 0x2e9   : > { %v10926_v36 = vsub.f32 %v10836_v28, %v2756_v18  ;;  %v2823_v4 = vsel %vm933_vm2, %v2787_v48, 0.0  ;;  %v2820_v59 = vsel %vm933_vm2, %v2786_v20, 0.0 }
 0x2ea   : > { %2824 = vadd.xlane.f32.xlu1 %v2823_v4  ;;  %2821 = vadd.xlane.f32.xlu0 %v2820_v59 }
 0x2eb   : > { %v2788_v45 = vmul.f32 %v10926_v36, %v10926_v36 }
 0x2ed   : > { %v2826_v62 = vsel %vm933_vm2, %v2788_v45, 0.0 }
 0x2ee   : > { %2827 = vadd.xlane.f32.xlu0 %v2826_v62 }
 0x2fd   : > { %v2734_v43 = vpop.xlane.xlu1 %2733 }
 0x2fe   : > { %v2757_v16 = vmul.f32 0.03125, %v2734_v43  ;;  %v3063_v43 = vlaneseq }
 0x300   : > { %v10934_v63 = vsub.f32 %v10845_v37, %v2757_v16 }
 0x301   : > { %v2740_v12 = vpop.xlane.xlu1 %2739  ;;  %v2737_v28 = vpop.xlane.xlu0 %2736 }
 0x302   : > { %v2759_v17 = vmul.f32 0.03125, %v2740_v12  ;;  %v2758_v22 = vmul.f32 0.03125, %v2737_v28  ;;  %v2789_v54 = vmul.f32 %v10934_v63, %v10934_v63  ;;  %v10982_v28 = vshrl.u32 %v3063_v43, 7 }
 0x304   : > { %v10939_v38 = vsub.f32 %v10850_v15, %v2759_v17  ;;  %v10942_v10 = vsub.f32 %v10855_v27, %v2758_v22  ;;  %v2829_v24 = vsel %vm933_vm2, %v2789_v54, 0.0 }
 0x305   : > { %v2801_v50 = vpop.xlane.xlu1 %2800  ;;  %2830 = vadd.xlane.f32.xlu1 %v2829_v24  ;;  %v2743_v39 = vpop.xlane.xlu0 %2742 }
 0x306   : > { %v2843_v37 = vmul.f32 0.03125, %v2801_v50  ;;  %v2760_v51 = vmul.f32 0.03125, %v2743_v39  ;;  %v2791_v19 = vmul.f32 %v10939_v38, %v10939_v38  ;;  %v2790_v33 = vmul.f32 %v10942_v10, %v10942_v10 }
 0x308   : > { %v2859_v35 = vadd.f32 1e-05, %v2843_v37  ;;  %v10950_v15 = vsub.f32 %v10864_v14, %v2760_v51  ;;  %v2835_v27 = vsel %vm933_vm2, %v2791_v19, 0.0  ;;  %v2832_v25 = vsel %vm933_vm2, %v2790_v33, 0.0 }
 0x309   : > { %v2795_v44 = vpop.xlane.xlu1 %2794  ;;  %2836 = vadd.xlane.f32.xlu1 %v2835_v27  ;;  %2833 = vadd.xlane.f32.xlu0 %v2832_v25  ;;  %v2804_v40 = vpop.xlane.xlu0 %2803  ;;  %v10985_v37 = vadd.s32 16, %v10982_v28 }
 0x30a   : > { %9185 = vrsqrt.f32 %v2859_v35  ;;  %v2841_v58 = vmul.f32 0.03125, %v2795_v44  ;;  %v2844_v0 = vmul.f32 0.03125, %v2804_v40  ;;  %v2792_v2 = vmul.f32 %v10950_v15, %v10950_v15 }
 0x30b   : > { %v3098_v44 = vand.u32 15, %v10985_v37  ;;  %v10989_v40 = vadd.s32 24, %v10982_v28 }
 0x30c   : > { %v2857_v34 = vadd.f32 1e-05, %v2841_v58  ;;  %v2860_v57 = vadd.f32 1e-05, %v2844_v0  ;;  %v2838_v14 = vsel %vm933_vm2, %v2792_v2, 0.0 }
 0x30d   : > { %2839 = vadd.xlane.f32.xlu0 %v2838_v14  ;;  %v2798_v3 = vpop.xlane.xlu0 %2797  ;;  %vm3274_vm4 = vcmp.ge.s32.totalorder %v3098_v44, 1  ;;  %v10993_v14 = vadd.s32 8, %v10982_v28 }
 0x30e   : > { %9187 = vrsqrt.f32 %v2857_v34  ;;  %v2842_v5 = vmul.f32 0.03125, %v2798_v3 }
 0x30f   : > { %9189 = vrsqrt.f32 %v2860_v57  ;;  %v3084_v57 = vand.u32 15, %v10982_v28 }
 0x310   : > { %v2858_v46 = vadd.f32 1e-05, %v2842_v5  ;;  %v3105_v5 = vand.u32 15, %v10989_v40 }
 0x311   : > { %vm3272_vm5 = vcmp.ge.s32.totalorder %v3084_v57, 1  ;;  %v3070_v57 = vadd.s32 48, %v10982_v28 }
 0x312   : > { %9191 = vrsqrt.f32 %v2858_v46  ;;  %vm3291_vm6 = vcmp.le.s32.totalorder %v3105_v5, 8  ;;  %v3068_v5 = vadd.s32 32, %v10982_v28 }
 0x317   : > { %v9186_v26 = vpop.eup %9185 }
 0x318   : > { %v2891_v31 = vmul.f32 %v9186_v26, %v10847_v29 }
 0x31a   : > { %v2914_v61 = vmul.f32 %v10965_v55, %v2891_v31 }
 0x31b   : > { %v9188_v52 = vpop.eup %9187 }
 0x31c   : > { %v9190_v8 = vpop.eup %9189  ;;  %v2937_v47 = vadd.f32 %v10968_v23, %v2914_v61  ;;  %v2889_v21 = vmul.f32 %v9188_v52, %v10857_v6  ;;  %v3091_v61 = vand.u32 15, %v10993_v14 }
 0x31d   : > { %v2892_v11 = vmul.f32 %v9190_v8, %v10861_v60 }
 0x31e   : > { %v7371_v53 = vmul.f32 -1.442695, %v2937_v47  ;;  %v2912_v42 = vmul.f32 %v10965_v55, %v2889_v21  ;;  %vm3289_vm7 = vcmp.le.s32.totalorder %v3091_v61, 8  ;;  %v3126_v61 = vand.u32 15, %v3070_v57  ;;  %v8717_v57 = vld [vmem:[%s11034_s17 + $0x48] sm:$0xff]  }
 0x31f   : > { %v9192_v13 = vpop.eup %9191  ;;  %v2915_v18 = vmul.f32 %v10965_v55, %v2892_v11 }
 0x320   : > { %9193 = vpow2.f32 %v7371_v53  ;;  %v2935_v29 = vadd.f32 %v10968_v23, %v2912_v42  ;;  %v2890_v48 = vmul.f32 %v9192_v13, %v10872_v9  ;;  %vm3278_vm8 = vcmp.ge.s32.totalorder %v3126_v61, 1 }
 0x321   : > { %v2938_v20 = vadd.f32 %v10968_v23, %v2915_v18 }
 0x322   : > { %v7369_v4 = vmul.f32 -1.442695, %v2935_v29  ;;  %v2913_v59 = vmul.f32 %v10965_v55, %v2890_v48 }
 0x323   : > { %v7372_v45 = vmul.f32 -1.442695, %v2938_v20 }
 0x324   : > { %9195 = vpow2.f32 %v7369_v4  ;;  %v2936_v6 = vadd.f32 %v10968_v23, %v2913_v59 }
 0x325   : > { %9197 = vpow2.f32 %v7372_v45 }
 0x326   : > { %v7370_v60 = vmul.f32 -1.442695, %v2936_v6 }
 0x328   : > { %9199 = vpow2.f32 %v7370_v60 }
 0x32d   : > { %v9194_v62 = vpop.eup %9193 }
 0x32e   : > { %v3001_v16 = vadd.f32 1.0, %v9194_v62 }
 0x330   : > { %9201 = vrcp.f32 %v3001_v16  ;;  %v3432_v16 = vld [vmem:[#allocation3 + $0x2] ss:$2 sm:$0xff] }
 0x331   : > { %v9196_v12 = vpop.eup %9195  ;;  %v2813_v9 = vpop.xlane.xlu1 %2812 }
 0x332   : > { %v9198_v17 = vpop.eup %9197  ;;  %v2999_v22 = vadd.f32 1.0, %v9196_v12  ;;  %v2847_v54 = vmul.f32 0.03125, %v2813_v9  ;;  %v3412_v9 = vld [vmem:[#allocation3 + $0x1] ss:$2 sm:$0xff] }
 0x333   : > { %v3002_v24 = vadd.f32 1.0, %v9198_v17 }
 0x334   : > { %9203 = vrcp.f32 %v2999_v22  ;;  %v2863_v50 = vadd.f32 1e-05, %v2847_v54 }
 0x335   : > { %v9200_v39 = vpop.eup %9199  ;;  %9205 = vrcp.f32 %v3002_v24  ;;  %v2807_v51 = vpop.xlane.xlu1 %2806 }
 0x336   : > { %v3000_v19 = vadd.f32 1.0, %v9200_v39  ;;  %9207 = vrsqrt.f32 %v2863_v50  ;;  %v2845_v33 = vmul.f32 0.03125, %v2807_v51 }
 0x337   : > { %v2816_v35 = vpop.xlane.xlu0 %2815 }
 0x338   : > { %9209 = vrcp.f32 %v3000_v19  ;;  %v2861_v27 = vadd.f32 1e-05, %v2845_v33  ;;  %v2848_v25 = vmul.f32 0.03125, %v2816_v35  ;;  %v3452_v33 = vld [vmem:[#allocation3 + $0x3] ss:$2 sm:$0xff] }
 0x33a   : > { %9211 = vrsqrt.f32 %v2861_v27  ;;  %v2864_v58 = vadd.f32 1e-05, %v2848_v25 }
 0x33b   : > { %v2810_v0 = vpop.xlane.xlu0 %2809 }
 0x33c   : > { %9213 = vrsqrt.f32 %v2864_v58  ;;  %v2846_v2 = vmul.f32 0.03125, %v2810_v0 }
 0x33d   : > { %v9202_v34 = vpop.eup %9201 }
 0x33e   : > { %v3049_v3 = vmul.f32 %v9202_v34, %v2937_v47  ;;  %v2862_v46 = vadd.f32 1e-05, %v2846_v2 }
 0x340   : > { %v3354_v26 = vsel %vm3274_vm4, %v3049_v3, 0.0  ;;  %9215 = vrsqrt.f32 %v2862_v46  ;;  %v3071_v46 = vadd.s32 56, %v10982_v28 }
 0x341   : > { %v9204_v31 = vpop.eup %9203  ;;  %3372 = vst.msk [vmem:[#allocation3 + $0x32] sm:$0xff] %vm933_vm2, %v3354_v26  ;;  %v8705_v26 = vld [vmem:[%s11034_s17 + $0x78] sm:$0xff]  }
 0x342   : > { %v9206_v52 = vpop.eup %9205  ;;  %v3047_v8 = vmul.f32 %v9204_v31, %v2935_v29  ;;  %7769 = vmatprep.subr.bf16.mxu1 %v8705_v26  ;;  %v8720_v26 = vld [vmem:[%s11034_s17] sm:$0xff]  }
 0x343   : > { %v9208_v21 = vpop.eup %9207  ;;  %v3050_v11 = vmul.f32 %v9206_v52, %v2938_v20  ;;  %v8706_v52 = vld [vmem:[%s11034_s17 + $0x38] sm:$0xff]  }
 0x344   : > { %v3352_v53 = vsel %vm3272_vm5, %v3047_v8, 0.0  ;;  %v2895_v42 = vmul.f32 %v9208_v21, %v10886_v56  ;;  %v8707_v21 = vld [vmem:[%s11034_s17 + $0x70] sm:$0xff]   ;;  %7770 = vmatpush3.bf16.msra.mxu1 %v8706_v52 }
 0x345   : > { %v9210_v47 = vpop.eup %9209  ;;  %3369 = vst.msk [vmem:[#allocation3 + $0x1a] sm:$0xff] %vm933_vm2, %v3352_v53  ;;  %v3355_v13 = vsel %vm3291_vm6, %v3050_v11, 0.0  ;;  %v3112_v11 = vand.u32 15, %v3068_v5  ;;  %v8708_v53 = vld [vmem:[%s11034_s17 + $0x30] sm:$0xff]   ;;  %7771 = vmatprep.subr.bf16.mxu1 %v8707_v21  ;;  %vm3599_vm6 = vcmask 785408  }
 0x346   : > { %3373 = vst.msk [vmem:[#allocation3 + $0x3a] sm:$0xff] %vm933_vm2, %v3355_v13  ;;  %v3048_v18 = vmul.f32 %v9210_v47, %v2936_v6  ;;  %v2918_v48 = vmul.f32 %v10965_v55, %v2895_v42  ;;  %v3133_v42 = vand.u32 15, %v3071_v46  ;;  %v8709_v47 = vld [vmem:[%s11034_s17 + $0x68] sm:$0xff]   ;;  %v3069_v13 = vadd.s32 40, %v10982_v28  ;;  %v8719_v46 = vld [vmem:[%s11034_s17 + $0x40] sm:$0xff]  }
 0x347   : > { %v9212_v4 = vpop.eup %9211  ;;  %vm11043_vm9 = vcmp.ge.s32.totalorder %v3112_v11, 1 }
 0x348   : > { %v3353_v59 = vsel %vm3289_vm7, %v3048_v18, 0.0  ;;  %v11003_v29 = vadd.f32 %v10968_v23, %v2918_v48  ;;  %v2893_v20 = vmul.f32 %v9212_v4, %v10889_v30  ;;  %7772 = vmatpush3.bf16.msra.mxu1 %v8708_v53  ;;  %v8710_v4 = vld [vmem:[%s11034_s17 + $0x28] sm:$0xff]   ;;  %vm11049_vm10 = vcmp.le.s32.totalorder %v3133_v42, 8  ;;  %v8721_v42 = vld [vmem:[%s11034_s17 + $0xf8] sm:$0xff]  }
 0x349   : > { %v9214_v45 = vpop.eup %9213  ;;  %3370 = vst.msk [vmem:[#allocation3 + $0x22] sm:$0xff] %vm933_vm2, %v3353_v59  ;;  %7773 = vmatprep.subr.bf16.mxu1 %v8709_v47  ;;  %v8722_v47 = vld [vmem:[%s11034_s17 + $0xb8] sm:$0xff]   ;;  %7797 = vmatprep.subr.bf16.mxu0 %v8721_v42 }
 0x34a   : > { %v7375_v56 = vmul.f32 -1.442695, %v11003_v29  ;;  %v2916_v60 = vmul.f32 %v10965_v55, %v2893_v20  ;;  %v2896_v62 = vmul.f32 %v9214_v45, %v10897_v1  ;;  %v8711_v45 = vld [vmem:[%s11034_s17 + $0x60] sm:$0xff]   ;;  %7798 = vmatpush3.bf16.msra.mxu0 %v8722_v47  ;;  %v8724_v20 = vld [vmem:[%s11034_s17 + $0xb0] sm:$0xff]  }
 0x34c   : > { %9217 = vpow2.f32 %v7375_v56  ;;  %v11011_v6 = vadd.f32 %v10968_v23, %v2916_v60  ;;  %v2919_v12 = vmul.f32 %v10965_v55, %v2896_v62  ;;  %v3119_v56 = vand.u32 15, %v3069_v13  ;;  %v8712_v60 = vld [vmem:[%s11034_s17 + $0x20] sm:$0xff]   ;;  %7774 = vmatpush3.bf16.msra.mxu1 %v8710_v4  ;;  %v8723_v13 = vld [vmem:[%s11034_s17 + $0xf0] sm:$0xff]  }
 0x34d   : > { %v9216_v17 = vpop.eup %9215  ;;  %v3436_v22 = vld [vmem:[#allocation3 + $0x32] ss:$2 sm:$0xff]  ;;  %v3416_v30 = vld [vmem:[#allocation3 + $0x31] ss:$2 sm:$0xff]  ;;  %7775 = vmatprep.subr.bf16.mxu1 %v8711_v45  ;;  %7799 = vmatprep.subr.bf16.mxu0 %v8723_v13 }
 0x34e   : > { %v7373_v54 = vmul.f32 -1.442695, %v11011_v6  ;;  %v11016_v24 = vadd.f32 %v10968_v23, %v2919_v12  ;;  %v2894_v50 = vmul.f32 %v9216_v17, %v10903_v49  ;;  %v8601_v39 = vpack.i.bf16 %v3436_v22, %v3432_v16  ;;  %v3456_v35 = vld [vmem:[#allocation3 + $0x33] ss:$2 sm:$0xff]  ;;  %v8713_v16 = vld [vmem:[%s11034_s17 + $0x58] sm:$0xff]   ;;  %7800 = vmatpush3.bf16.msra.mxu0 %v8724_v20 }
 0x34f   : > { %v8596_v1 = vpack.i.bf16 %v3416_v30, %v3412_v9  ;;  %v8606_v49 = vpack.i.bf16 %v3456_v35, %v3452_v33  ;;  %vm11065_vm11 = vcmp.le.s32.totalorder %v3119_v56, 8 }
 0x350   : > { %9219 = vpow2.f32 %v7373_v54  ;;  %v7376_v51 = vmul.f32 -1.442695, %v11016_v24  ;;  %v2917_v19 = vmul.f32 %v10965_v55, %v2894_v50  ;;  %8602 = vrot.lane.b32.xlu1 %v8601_v39, %s9391_s20  ;;  %7776 = vmatpush3.bf16.msra.mxu1 %v8712_v60  ;;  %v3434_v21 = vld [vmem:[#allocation3 + $0x1a] ss:$2 sm:$0xff]  ;;  %v3454_v60 = vld [vmem:[#allocation3 + $0x1b] ss:$2 sm:$0xff] }
 0x351   : > { %8597 = vrot.lane.b32.xlu0 %v8596_v1, %s11817_s22  ;;  %7777 = vmatprep.subr.bf16.mxu1 %v8713_v16 }
 0x352   : > { %9221 = vpow2.f32 %v7376_v51  ;;  %v11024_v27 = vadd.f32 %v10968_v23, %v2917_v19 }
 0x354   : > { %v7374_v25 = vmul.f32 -1.442695, %v11024_v27 }
 0x355   : > { %8607 = vrot.lane.b32.xlu0 %v8606_v49, %s9392_s18 }
 0x356   : > { %9223 = vpow2.f32 %v7374_v25  ;;  %v8715_v25 = vld [vmem:[%s11034_s17 + $0x50] sm:$0xff]  }
 0x359   : > { %v9218_v44 = vpop.eup %9217 }
 0x35a   : > { %v3005_v58 = vadd.f32 1.0, %v9218_v44  ;;  %v8716_v44 = vld [vmem:[%s11034_s17 + $0x10] sm:$0xff]  }
 0x35c   : > { %9225 = vrcp.f32 %v3005_v58 }
 0x35d   : > { %v9220_v0 = vpop.eup %9219 }
 0x35e   : > { %v3003_v2 = vadd.f32 1.0, %v9220_v0 }
 0x35f   : > { %v9222_v34 = vpop.eup %9221 }
 0x360   : > { %9227 = vrcp.f32 %v3003_v2  ;;  %v3006_v3 = vadd.f32 1.0, %v9222_v34 }
 0x362   : > { %9229 = vrcp.f32 %v3006_v3  ;;  %v8718_v3 = vld [vmem:[%s11034_s17 + $0x8] sm:$0xff]  }
 0x363   : > { %v9224_v31 = vpop.eup %9223 }
 0x364   : > { %v3004_v8 = vadd.f32 1.0, %v9224_v31  ;;  %v3414_v31 = vld [vmem:[#allocation3 + $0x19] ss:$2 sm:$0xff] }
 0x366   : > { %9231 = vrcp.f32 %v3004_v8 }
 0x369   : > { %v9226_v18 = vpop.eup %9225 }
 0x36a   : > { %v3053_v59 = vmul.f32 %v9226_v18, %v11003_v29  ;;  %v8714_v29 = vld [vmem:[%s11034_s17 + $0x18] sm:$0xff]  }
 0x36b   : > { %7778 = vmatpush3.bf16.msra.mxu1 %v8714_v29 }
 0x36c   : > { %v3358_v62 = vsel %vm3278_vm8, %v3053_v59, 0.0  ;;  %7779 = vmatprep.subr.bf16.mxu1 %v8715_v25  ;;  %v8730_v25 = vld [vmem:[%s11034_s17 + $0x98] sm:$0xff]  }
 0x36d   : > { %v9228_v12 = vpop.eup %9227  ;;  %3378 = vst.msk [vmem:[#allocation3 + $0x62] sm:$0xff] %vm933_vm2, %v3358_v62  ;;  %v8725_v62 = vld [vmem:[%s11034_s17 + $0xe8] sm:$0xff]  }
 0x36e   : > { %v3051_v9 = vmul.f32 %v9228_v12, %v11011_v6  ;;  %7801 = vmatprep.subr.bf16.mxu0 %v8725_v62 }
 0x36f   : > { %v9230_v17 = vpop.eup %9229  ;;  %v2819_v22 = vpop.xlane.xlu1 %2818  ;;  %7780 = vmatpush3.bf16.msra.mxu1 %v8716_v44 }
 0x370   : > { %v3356_v30 = vsel %vm11043_vm9, %v3051_v9, 0.0  ;;  %v3054_v54 = vmul.f32 %v9230_v17, %v11016_v24  ;;  %v2849_v50 = vmul.f32 0.03125, %v2819_v22  ;;  %7781 = vmatprep.subr.bf16.mxu1 %v8717_v57 }
 0x371   : > { %3375 = vst.msk [vmem:[#allocation3 + $0x4a] sm:$0xff] %vm933_vm2, %v3356_v30  ;;  %v8726_v30 = vld [vmem:[%s11034_s17 + $0xa8] sm:$0xff]  }
 0x372   : > { %v3359_v39 = vsel %vm11049_vm10, %v3054_v54, 0.0  ;;  %v2865_v1 = vadd.f32 1e-05, %v2849_v50  ;;  %v8727_v54 = vld [vmem:[%s11034_s17 + $0xe0] sm:$0xff]   ;;  %7802 = vmatpush3.bf16.msra.mxu0 %v8726_v30 }
 0x373   : > { %v9232_v51 = vpop.eup %9231  ;;  %3379 = vst.msk [vmem:[#allocation3 + $0x6a] sm:$0xff] %vm933_vm2, %v3359_v39  ;;  %v2825_v19 = vpop.xlane.xlu1 %2824  ;;  %7782 = vmatpush3.bf16.msra.mxu1 %v8718_v3  ;;  %7803 = vmatprep.subr.bf16.mxu0 %v8727_v54  ;;  %v8732_v3 = vld [vmem:[%s11034_s17 + $0x90] sm:$0xff]  }
 0x374   : > { %v2822_v24 = vpop.xlane.xlu0 %2821  ;;  %v3052_v33 = vmul.f32 %v9232_v51, %v11024_v27  ;;  %9233 = vrsqrt.f32 %v2865_v1  ;;  %v2851_v35 = vmul.f32 0.03125, %v2825_v19  ;;  %7783 = vmatprep.subr.bf16.mxu1 %v8719_v46  ;;  %v8728_v51 = vld [vmem:[%s11034_s17 + $0xa0] sm:$0xff]  }
 0x375   : > { %v2850_v49 = vmul.f32 0.03125, %v2822_v24  ;;  %v8729_v24 = vld [vmem:[%s11034_s17 + $0xd8] sm:$0xff]  }
 0x376   : > { %v3357_v58 = vsel %vm11065_vm11, %v3052_v33, 0.0  ;;  %v2867_v0 = vadd.f32 1e-05, %v2851_v35  ;;  %7804 = vmatpush3.bf16.msra.mxu0 %v8728_v51 }
 0x377   : > { %v2866_v2 = vadd.f32 1e-05, %v2850_v49  ;;  %3376 = vst.msk [vmem:[#allocation3 + $0x52] sm:$0xff] %vm933_vm2, %v3357_v58  ;;  %7784 = vmatpush3.bf16.msra.mxu1 %v8720_v26  ;;  %7805 = vmatprep.subr.bf16.mxu0 %v8729_v24 }
 0x378   : > { %v2828_v34 = vpop.xlane.xlu0 %2827  ;;  %9235 = vrsqrt.f32 %v2867_v0  ;;  %v8731_v0 = vld [vmem:[%s11034_s17 + $0xd0] sm:$0xff]  }
 0x379   : > { %v2852_v27 = vmul.f32 0.03125, %v2828_v34  ;;  %9237 = vrsqrt.f32 %v2866_v2 }
 0x37a   : > { %7806 = vmatpush3.bf16.msra.mxu0 %v8730_v25 }
 0x37b   : > { %v2868_v5 = vadd.f32 1e-05, %v2852_v27  ;;  %7807 = vmatprep.subr.bf16.mxu0 %v8731_v0  ;;  %v8733_v0 = vld [vmem:[%s11034_s17 + $0xc8] sm:$0xff]  }
 0x37d   : > { %9239 = vrsqrt.f32 %v2868_v5 }
 0x37e   : > { %v3418_v61 = vld [vmem:[#allocation3 + $0x49] ss:$2 sm:$0xff]  ;;  %v3438_v8 = vld [vmem:[#allocation3 + $0x4a] ss:$2 sm:$0xff]  ;;  %7808 = vmatpush3.bf16.msra.mxu0 %v8732_v3 }
 0x37f   : > { %v8611_v52 = vpack.i.bf16 %v3418_v61, %v3414_v31  ;;  %v8616_v18 = vpack.i.bf16 %v3438_v8, %v3434_v21  ;;  %v3458_v4 = vld [vmem:[#allocation3 + $0x4b] ss:$2 sm:$0xff]  ;;  %7809 = vmatprep.subr.bf16.mxu0 %v8733_v0  ;;  %v3440_v3 = vld [vmem:[#allocation3 + $0x62] ss:$2 sm:$0xff]  ;;  %v3470_v0 = vld [vmem:[#allocation3 + $0xdb] ss:$2 sm:$0xff] }
 0x380   : > { %v8621_v12 = vpack.i.bf16 %v3458_v4, %v3454_v60  ;;  %v3074_v4 = vadd.s32 80, %v10982_v28 }
 0x381   : > { %v9234_v11 = vpop.eup %9233  ;;  %8612 = vrot.lane.b32.xlu1 %v8611_v52, %s11817_s22 }
 0x382   : > { %v2897_v53 = vmul.f32 %v9234_v11, %v10910_v32 }
 0x384   : > { %v2920_v48 = vmul.f32 %v10965_v55, %v2897_v53  ;;  %v3072_v53 = vadd.s32 64, %v10982_v28 }
 0x385   : > { %v9236_v59 = vpop.eup %9235  ;;  %8617 = vrot.lane.b32.xlu1 %v8616_v18, %s9391_s20 }
 0x386   : > { %v9238_v45 = vpop.eup %9237  ;;  %v11089_v56 = vadd.f32 %v10968_v23, %v2920_v48  ;;  %v2899_v32 = vmul.f32 %v9236_v59, %v10915_v7  ;;  %v3140_v48 = vand.u32 15, %v3072_v53  ;;  %v3460_v53 = vld [vmem:[#allocation3 + $0x63] ss:$2 sm:$0xff] }
 0x387   : > { %v2898_v16 = vmul.f32 %v9238_v45, %v10918_v41  ;;  %v3073_v45 = vadd.s32 72, %v10982_v28 }
 0x388   : > { %v7377_v9 = vmul.f32 -1.442695, %v11089_v56  ;;  %v2922_v17 = vmul.f32 %v10965_v55, %v2899_v32  ;;  %vm11128_vm12 = vcmp.ge.s32.totalorder %v3140_v48, 1 }
 0x389   : > { %v2921_v29 = vmul.f32 %v10965_v55, %v2898_v16  ;;  %8622 = vrot.lane.b32.xlu1 %v8621_v12, %s9392_s18  ;;  %v3147_v54 = vand.u32 15, %v3073_v45 }
 0x38a   : > { %v9240_v22 = vpop.eup %9239  ;;  %9241 = vpow2.f32 %v7377_v9  ;;  %v11100_v7 = vadd.f32 %v10968_v23, %v2922_v17  ;;  %v3154_v9 = vand.u32 15, %v3074_v4  ;;  %v3075_v17 = vadd.s32 88, %v10982_v28 }
 0x38b   : > { %v2900_v41 = vmul.f32 %v9240_v22, %v10926_v36  ;;  %v11105_v50 = vadd.f32 %v10968_v23, %v2921_v29  ;;  %vm3297_vm14 = vcmp.le.s32.totalorder %v3147_v54, 8 }
 0x38c   : > { %v7379_v39 = vmul.f32 -1.442695, %v11100_v7  ;;  %vm3282_vm13 = vcmp.ge.s32.totalorder %v3154_v9, 1 }
 0x38d   : > { %v2923_v6 = vmul.f32 %v10965_v55, %v2900_v41  ;;  %v7378_v1 = vmul.f32 -1.442695, %v11105_v50 }
 0x38e   : > { %9243 = vpow2.f32 %v7379_v39  ;;  %v2831_v36 = vpop.xlane.xlu1 %2830 }
 0x38f   : > { %v11112_v19 = vadd.f32 %v10968_v23, %v2923_v6  ;;  %9245 = vpow2.f32 %v7378_v1  ;;  %v2853_v33 = vmul.f32 0.03125, %v2831_v36 }
 0x391   : > { %v7380_v35 = vmul.f32 -1.442695, %v11112_v19  ;;  %v2869_v49 = vadd.f32 1e-05, %v2853_v33 }
 0x392   : > { %v2837_v44 = vpop.xlane.xlu1 %2836  ;;  %v2834_v58 = vpop.xlane.xlu0 %2833 }
 0x393   : > { %9247 = vpow2.f32 %v7380_v35  ;;  %v2855_v2 = vmul.f32 0.03125, %v2837_v44  ;;  %v2854_v34 = vmul.f32 0.03125, %v2834_v58 }
 0x394   : > { %9249 = vrsqrt.f32 %v2869_v49 }
 0x395   : > { %v2871_v27 = vadd.f32 1e-05, %v2855_v2  ;;  %v2870_v57 = vadd.f32 1e-05, %v2854_v34  ;;  %v8734_v2 = vld [vmem:[%s11034_s17 + $0x88] sm:$0xff]   ;;  %v8735_v34 = vld [vmem:[%s11034_s17 + $0xc0] sm:$0xff]  }
 0x396   : > { %v2840_v5 = vpop.xlane.xlu0 %2839  ;;  %7810 = vmatpush3.bf16.msra.mxu0 %v8734_v2 }
 0x397   : > { %v9242_v46 = vpop.eup %9241  ;;  %9251 = vrsqrt.f32 %v2871_v27  ;;  %v2856_v26 = vmul.f32 0.03125, %v2840_v5  ;;  %v8736_v27 = vld [vmem:[%s11034_s17 + $0x80] sm:$0xff]   ;;  %7811 = vmatprep.subr.bf16.mxu0 %v8735_v34  ;;  %v3420_v5 = vld [vmem:[#allocation3 + $0x61] ss:$2 sm:$0xff]  ;;  %s823_s17 = scalar_lea.vmem %s11762_s14, %s7317_s0 }
 0x398   : > { %v3007_v31 = vadd.f32 1.0, %v9242_v46  ;;  %9253 = vrsqrt.f32 %v2870_v57 }
 0x399   : > { %v2872_v61 = vadd.f32 1e-05, %v2856_v26 }
 0x39a   : > { %9255 = vrcp.f32 %v3007_v31  ;;  %7812 = vmatpush3.bf16.msra.mxu0 %v8736_v27 }
 0x39b   : > { %v9244_v52 = vpop.eup %9243  ;;  %9257 = vrsqrt.f32 %v2872_v61 }
 0x39c   : > { %v9246_v8 = vpop.eup %9245  ;;  %v3009_v21 = vadd.f32 1.0, %v9244_v52 }
 0x39d   : > { %v3008_v11 = vadd.f32 1.0, %v9246_v8 }
 0x39e   : > { %9259 = vrcp.f32 %v3009_v21 }
 0x39f   : > { %9261 = vrcp.f32 %v3008_v11 }
 0x3a0   : > { %v9248_v42 = vpop.eup %9247 }
 0x3a1   : > { %v9250_v47 = vpop.eup %9249  ;;  %v3010_v13 = vadd.f32 1.0, %v9248_v42 }
 0x3a2   : > { %v2901_v18 = vmul.f32 %v9250_v47, %v10934_v63 }
 0x3a3   : > { %9263 = vrcp.f32 %v3010_v13 }
 0x3a4   : > { %v2924_v59 = vmul.f32 %v10965_v55, %v2901_v18  ;;  %v9252_v20 = vpop.eup %9251  ;;  %v3076_v18 = vadd.s32 96, %v10982_v28 }
 0x3a5   : > { %v9254_v32 = vpop.eup %9253  ;;  %v2903_v62 = vmul.f32 %v9252_v20, %v10939_v38  ;;  %v3077_v20 = vadd.s32 104, %v10982_v28 }
 0x3a6   : > { %v11125_v60 = vadd.f32 %v10968_v23, %v2924_v59  ;;  %v2902_v63 = vmul.f32 %v9254_v32, %v10942_v10  ;;  %v3168_v4 = vand.u32 15, %v3076_v18  ;;  %v3078_v59 = vadd.s32 112, %v10982_v28  ;;  %v3394_v18 = vld [vmem:[#allocation3 + $0x18] ss:$2 sm:$0xff] }
 0x3a7   : > { %v9256_v12 = vpop.eup %9255  ;;  %v2926_v29 = vmul.f32 %v10965_v55, %v2903_v62  ;;  %v3079_v62 = vadd.s32 120, %v10982_v28 }
 0x3a8   : > { %v7381_v22 = vmul.f32 -1.442695, %v11125_v60  ;;  %v9258_v30 = vpop.eup %9257  ;;  %v3055_v41 = vmul.f32 %v9256_v12, %v11089_v56  ;;  %v2925_v38 = vmul.f32 %v10965_v55, %v2902_v63  ;;  %v3161_v56 = vand.u32 15, %v3075_v17 }
 0x3a9   : > { %v11139_v39 = vadd.f32 %v10968_v23, %v2926_v29  ;;  %v2904_v10 = vmul.f32 %v9258_v30, %v10950_v15  ;;  %vm3284_vm1 = vcmp.ge.s32.totalorder %v3168_v4, 1  ;;  %v3182_v32 = vand.u32 15, %v3078_v59 }
 0x3aa   : > { %9265 = vpow2.f32 %v7381_v22  ;;  %v3360_v6 = vsel %vm11128_vm12, %v3055_v41, 0.0  ;;  %v11145_v1 = vadd.f32 %v10968_v23, %v2925_v38  ;;  %vm3299_vm15 = vcmp.le.s32.totalorder %v3161_v56, 8 }
 0x3ab   : > { %v9260_v51 = vpop.eup %9259  ;;  %3381 = vst.msk [vmem:[#allocation3 + $0x7a] sm:$0xff] %vm933_vm2, %v3360_v6  ;;  %v7383_v36 = vmul.f32 -1.442695, %v11139_v39  ;;  %v2927_v24 = vmul.f32 %v10965_v55, %v2904_v10  ;;  %v3175_v63 = vand.u32 15, %v3077_v20  ;;  %vm3286_vm0 = vcmp.ge.s32.totalorder %v3182_v32, 1 }
 0x3ac   : > { %v9262_v33 = vpop.eup %9261  ;;  %v3057_v15 = vmul.f32 %v9260_v51, %v11100_v7  ;;  %v7382_v35 = vmul.f32 -1.442695, %v11145_v1  ;;  %v3189_v17 = vand.u32 15, %v3079_v62 }
 0x3ad   : > { %v3056_v49 = vmul.f32 %v9262_v33, %v11105_v50  ;;  %9267 = vpow2.f32 %v7383_v36  ;;  %v11154_v25 = vadd.f32 %v10968_v23, %v2927_v24  ;;  %vm3301_vm4 = vcmp.le.s32.totalorder %v3175_v63, 8 }
 0x3ae   : > { %v3362_v44 = vsel %vm3282_vm13, %v3057_v15, 0.0  ;;  %9269 = vpow2.f32 %v7382_v35  ;;  %vm3303_vm5 = vcmp.le.s32.totalorder %v3189_v17, 8 }
 0x3af   : > { %3384 = vst.msk [vmem:[#allocation3 + $0x92] sm:$0xff] %vm933_vm2, %v3362_v44  ;;  %v3361_v55 = vsel %vm3297_vm14, %v3056_v49, 0.0  ;;  %v7384_v7 = vmul.f32 -1.442695, %v11154_v25  ;;  %v3450_v44 = vld [vmem:[#allocation3 + $0xda] ss:$2 sm:$0xff] }
 0x3b0   : > { %v9264_v58 = vpop.eup %9263  ;;  %3382 = vst.msk [vmem:[#allocation3 + $0x82] sm:$0xff] %vm933_vm2, %v3361_v55 }
 0x3b1   : > { %v3058_v50 = vmul.f32 %v9264_v58, %v11112_v19  ;;  %9271 = vpow2.f32 %v7384_v7 }
 0x3b3   : > { %v3363_v23 = vsel %vm3299_vm15, %v3058_v50, 0.0 }
 0x3b4   : > { %3385 = vst.msk [vmem:[#allocation3 + $0x9a] sm:$0xff] %vm933_vm2, %v3363_v23 }
 0x3b7   : > { %v9266_v57 = vpop.eup %9265  ;;  %v3442_v26 = vld [vmem:[#allocation3 + $0x7a] ss:$2 sm:$0xff]  ;;  %v3422_v31 = vld [vmem:[#allocation3 + $0x79] ss:$2 sm:$0xff] }
 0x3b8   : > { %v3011_v46 = vadd.f32 1.0, %v9266_v57  ;;  %v8631_v61 = vpack.i.bf16 %v3440_v3, %v3442_v26  ;;  %v8626_v52 = vpack.i.bf16 %v3420_v5, %v3422_v31  ;;  %v3462_v19 = vld [vmem:[#allocation3 + $0x7b] ss:$2 sm:$0xff]  ;;  %v3392_v3 = vld [vmem:[#allocation3] ss:$2 sm:$0xff] }
 0x3b9   : > { %v8636_v47 = vpack.i.bf16 %v3460_v53, %v3462_v19  ;;  %v3396_v31 = vld [vmem:[#allocation3 + $0x30] ss:$2 sm:$0xff] }
 0x3ba   : > { %9273 = vrcp.f32 %v3011_v46  ;;  %v9268_v8 = vpop.eup %9267  ;;  %8632 = vrot.lane.b32.xlu1 %v8631_v61, %s9391_s20  ;;  %8627 = vrot.lane.b32.xlu0 %v8626_v52, %s11817_s22 }
 0x3bb   : > { %v9270_v21 = vpop.eup %9269  ;;  %v3013_v11 = vadd.f32 1.0, %v9268_v8  ;;  %v3424_v6 = vld [vmem:[#allocation3 + $0x91] ss:$2 sm:$0xff] }
 0x3bc   : > { %v3012_v42 = vadd.f32 1.0, %v9270_v21  ;;  %v3464_v24 = vld [vmem:[#allocation3 + $0x93] ss:$2 sm:$0xff] }
 0x3bd   : > { %9275 = vrcp.f32 %v3013_v11 }
 0x3be   : > { %v9272_v13 = vpop.eup %9271  ;;  %9277 = vrcp.f32 %v3012_v42  ;;  %8637 = vrot.lane.b32.xlu0 %v8636_v47, %s9392_s18 }
 0x3bf   : > { %v3014_v48 = vadd.f32 1.0, %v9272_v13 }
 0x3c1   : > { %9279 = vrcp.f32 %v3014_v48  ;;  %v3398_v48 = vld [vmem:[#allocation3 + $0x48] ss:$2 sm:$0xff] }
 0x3c2   : > { %v8603_v50 = vpop.permute.xlu1 %8602 }
 0x3c3   : > { %v8598_v23 = vpop.permute.xlu0 %8597  ;;  %v8605_v46 = vunpack.i.h.bf16 %v8603_v50  ;;  %v8604_v26 = vunpack.i.l.bf16 %v8603_v50 }
 0x3c4   : > { %v8600_v27 = vunpack.i.h.bf16 %v8598_v23  ;;  %v8599_v57 = vunpack.i.l.bf16 %v8598_v23  ;;  %v3404_v23 = vld [vmem:[#allocation3 + $0x90] ss:$2 sm:$0xff] }
 0x3c6   : > { %v3592_v52 = vsel %vm933_vm2, %v3396_v31, %v8600_v27  ;;  %v3591_v19 = vsel %vm933_vm2, %v3392_v3, %v8599_v57 }
 0x3c7   : > { %v9274_v45 = vpop.eup %9273  ;;  %v8608_v5 = vpop.permute.xlu0 %8607  ;;  %v3595_v4 = vsel %vm965_vm3, %v3591_v19, %v8604_v26  ;;  %v3596_v59 = vsel %vm965_vm3, %v3592_v52, %v8605_v46  ;;  %v3410_v26 = vld [vmem:[#allocation3 + $0xd8] ss:$2 sm:$0xff] }
 0x3c8   : > { %v3059_v16 = vmul.f32 %v9274_v45, %v11125_v60  ;;  %v8610_v11 = vunpack.i.h.bf16 %v8608_v5  ;;  %v8609_v53 = vunpack.i.l.bf16 %v8608_v5 }
 0x3ca   : > { %v3364_v12 = vsel %vm3284_vm1, %v3059_v16, 0.0  ;;  %v9276_v9 = vpop.eup %9275 }
 0x3cb   : > { %3387 = vst.msk [vmem:[#allocation3 + $0xaa] sm:$0xff] %vm933_vm2, %v3364_v12  ;;  %v9278_v22 = vpop.eup %9277  ;;  %v3061_v29 = vmul.f32 %v9276_v9, %v11139_v39  ;;  %v3430_v39 = vld [vmem:[#allocation3 + $0xd9] ss:$2 sm:$0xff]  ;;  %v3600_v12 = vsel %vm3599_vm6, %v3595_v4, %v8609_v53  ;;  %v3601_v9 = vsel %vm3599_vm6, %v3596_v59, %v8610_v11 }
 0x3cc   : > { %v3060_v30 = vmul.f32 %v9278_v22, %v11145_v1 }
 0x3cd   : > { %v3366_v41 = vsel %vm3286_vm0, %v3061_v29, 0.0 }
 0x3ce   : > { %v9280_v54 = vpop.eup %9279  ;;  %3390 = vst.msk [vmem:[#allocation3 + $0xc2] sm:$0xff] %vm933_vm2, %v3366_v41  ;;  %v3365_v38 = vsel %vm3301_vm4, %v3060_v30, 0.0  ;;  %v3622_v30 = vpack.c.bf16 %v3601_v9, %v3600_v12 }
 0x3cf   : > { %3388 = vst.msk [vmem:[#allocation3 + $0xb2] sm:$0xff] %vm933_vm2, %v3365_v38  ;;  %v3062_v60 = vmul.f32 %v9280_v54, %v11154_v25  ;;  %v3444_v25 = vld [vmem:[#allocation3 + $0x92] ss:$2 sm:$0xff] }
 0x3d1   : > { %v3367_v10 = vsel %vm3303_vm5, %v3062_v60, 0.0 }
 0x3d2   : > { %3391 = vst.msk [vmem:[#allocation3 + $0xca] sm:$0xff] %vm933_vm2, %v3367_v10 }
 0x3d6   : > { %v3426_v51 = vld [vmem:[#allocation3 + $0xa9] ss:$2 sm:$0xff]  ;;  %v3446_v35 = vld [vmem:[#allocation3 + $0xaa] ss:$2 sm:$0xff] }
 0x3d7   : > { %v8646_v56 = vpack.i.bf16 %v3424_v6, %v3426_v51  ;;  %v3466_v36 = vld [vmem:[#allocation3 + $0xab] ss:$2 sm:$0xff]  ;;  %v8651_v58 = vpack.i.bf16 %v3444_v25, %v3446_v35  ;;  %v3400_v51 = vld [vmem:[#allocation3 + $0x60] ss:$2 sm:$0xff] }
 0x3d8   : > { %v8656_v15 = vpack.i.bf16 %v3464_v24, %v3466_v36 }
 0x3d9   : > { %8647 = vrot.lane.b32.xlu1 %v8646_v56, %s11817_s22  ;;  %v3428_v1 = vld [vmem:[#allocation3 + $0xc1] ss:$2 sm:$0xff]  ;;  %v3448_v49 = vld [vmem:[#allocation3 + $0xc2] ss:$2 sm:$0xff] }
 0x3da   : > { %v8641_v33 = vpack.i.bf16 %v3428_v1, %v3430_v39  ;;  %v8661_v55 = vpack.i.bf16 %v3448_v49, %v3450_v44  ;;  %v3468_v7 = vld [vmem:[#allocation3 + $0xc3] ss:$2 sm:$0xff]  ;;  %v3402_v56 = vld [vmem:[#allocation3 + $0x78] ss:$2 sm:$0xff] }
 0x3db   : > { %v8666_v2 = vpack.i.bf16 %v3468_v7, %v3470_v0  ;;  %v3408_v53 = vld [vmem:[#allocation3 + $0xc0] ss:$2 sm:$0xff] }
 0x3dc   : > { %8642 = vrot.lane.b32.xlu0 %v8641_v33, %s11817_s22  ;;  %s808_s22 = scalar_lea.vmem %s11758_s10, %s11857_s25 }
 0x3dd   : > { %8657 = vrot.lane.b32.xlu1 %v8656_v15, %s9392_s18 }
 0x3e0   : > { %8652 = vrot.lane.b32.xlu0 %v8651_v58, %s9391_s20 }
 0x3e1   : > { %8662 = vrot.lane.b32.xlu1 %v8661_v55, %s9391_s20 }
 0x3e4   : > { %8667 = vrot.lane.b32.xlu0 %v8666_v2, %s9392_s18  ;;  %s797_s18 = scalar_lea.vmem %s11755_s7, %s11857_s25 }
 0x3f3   : > { %v8613_v34 = vpop.permute.xlu1 %8612 }
 0x3f4   : > { %v8615_v8 = vunpack.i.h.bf16 %v8613_v34  ;;  %v8614_v21 = vunpack.i.l.bf16 %v8613_v34  ;;  %v3406_v34 = vld [vmem:[#allocation3 + $0xa8] ss:$2 sm:$0xff] }
 0x3f6   : > { %v3604_v32 = vsel %vm933_vm2, %v3394_v18, %v8614_v21  ;;  %v3605_v62 = vsel %vm933_vm2, %v3398_v48, %v8615_v8 }
 0x3f7   : > { %v8618_v61 = vpop.permute.xlu1 %8617 }
 0x3f8   : > { %v8620_v42 = vunpack.i.h.bf16 %v8618_v61  ;;  %v8619_v47 = vunpack.i.l.bf16 %v8618_v61 }
 0x3fa   : > { %v3608_v16 = vsel %vm965_vm3, %v3604_v32, %v8619_v47  ;;  %v3609_v63 = vsel %vm965_vm3, %v3605_v62, %v8620_v42 }
 0x3fb   : > { %v8623_v13 = vpop.permute.xlu1 %8622 }
 0x3fc   : > { %v8625_v20 = vunpack.i.h.bf16 %v8623_v13  ;;  %v8624_v45 = vunpack.i.l.bf16 %v8623_v13 }
 0x3fe   : > { %v3612_v17 = vsel %vm3599_vm6, %v3608_v16, %v8624_v45  ;;  %v3613_v22 = vsel %vm3599_vm6, %v3609_v63, %v8625_v20 }
 0x3ff   : > { %v3623_v29 = vpack.c.bf16 %v3613_v22, %v3612_v17 }
 0x401   : > { %3925 = vmatprep.mubr.bf16.mxu1 %v3623_v29 }
 0x402   : > { %3926 = vmatmul.mubr.bf16.vlgmr.msra.gmra.mxu1 %v3622_v30 }
 0x42c   : > { %v8633_v41 = vpop.permute.xlu1 %8632  ;;  %v8628_v54 = vpop.permute.xlu0 %8627 }
 0x42d   : > { %v8630_v38 = vunpack.i.h.bf16 %v8628_v54  ;;  %v8629_v60 = vunpack.i.l.bf16 %v8628_v54  ;;  %v8635_v10 = vunpack.i.h.bf16 %v8633_v41  ;;  %v8634_v6 = vunpack.i.l.bf16 %v8633_v41 }
 0x42f   : > { %v3593_v39 = vsel %vm933_vm2, %v3400_v51, %v8630_v38  ;;  %v3606_v36 = vsel %vm933_vm2, %v3402_v56, %v8629_v60  ;;  %v7385_v38 = vld [vmem:[%s794_s26] ss:$0 sm:$0xff]  ;;  %s827_s26 = scalar_lea.vmem %s11763_s15, %s7317_s0 }
 0x430   : > { %v8638_v1 = vpop.permute.xlu0 %8637  ;;  %v3597_v15 = vsel %vm965_vm3, %v3593_v39, %v8635_v10  ;;  %v3610_v35 = vsel %vm965_vm3, %v3606_v36, %v8634_v6 }
 0x431   : > { %v8640_v24 = vunpack.i.h.bf16 %v8638_v1  ;;  %v8639_v33 = vunpack.i.l.bf16 %v8638_v1 }
 0x433   : > { %v3602_v49 = vsel %vm3599_vm6, %v3597_v15, %v8640_v24  ;;  %v3614_v44 = vsel %vm3599_vm6, %v3610_v35, %v8639_v33 }
 0x434   : > { %v3624_v25 = vpack.c.bf16 %v3602_v49, %v3601_v9  ;;  %v3625_v58 = vpack.c.bf16 %v3614_v44, %v3613_v22 }
 0x436   : > { %3974 = vmatprep.mubr.bf16.mxu0 %v3625_v58 }
 0x437   : > { %3975 = vmatmul.mubr.bf16.vlgmr.msra.gmra.mxu0 %v3624_v25 }
 0x44b   : > { %v8648_v55 = vpop.permute.xlu1 %8647 }
 0x44c   : > { %v8650_v0 = vunpack.i.h.bf16 %v8648_v55  ;;  %v8649_v2 = vunpack.i.l.bf16 %v8648_v55 }
 0x44e   : > { %v8643_v7 = vpop.permute.xlu0 %8642  ;;  %v3594_v5 = vsel %vm933_vm2, %v3404_v23, %v8650_v0  ;;  %v3607_v46 = vsel %vm933_vm2, %v3406_v34, %v8649_v2 }
 0x44f   : > { %v8658_v50 = vpop.permute.xlu1 %8657  ;;  %v8645_v27 = vunpack.i.h.bf16 %v8643_v7  ;;  %v8644_v57 = vunpack.i.l.bf16 %v8643_v7 }
 0x450   : > { %v8660_v19 = vunpack.i.h.bf16 %v8658_v50  ;;  %v8659_v8 = vunpack.i.l.bf16 %v8658_v50 }
 0x451   : > { %v3616_v13 = vsel %vm933_vm2, %v3408_v53, %v8645_v27  ;;  %v3619_v18 = vsel %vm933_vm2, %v3410_v26, %v8644_v57  ;;  %vm968_vm2 = vcmask 517120  }
 0x452   : > { %v8653_v3 = vpop.permute.xlu0 %8652 }
 0x453   : > { %v8663_v31 = vpop.permute.xlu1 %8662  ;;  %v8655_v61 = vunpack.i.h.bf16 %v8653_v3  ;;  %v8654_v52 = vunpack.i.l.bf16 %v8653_v3 }
 0x454   : > { %v8665_v21 = vunpack.i.h.bf16 %v8663_v31  ;;  %v8664_v11 = vunpack.i.l.bf16 %v8663_v31 }
 0x455   : > { %v3598_v42 = vsel %vm965_vm3, %v3594_v5, %v8655_v61  ;;  %v3611_v47 = vsel %vm965_vm3, %v3607_v46, %v8654_v52 }
 0x456   : > { %v8668_v48 = vpop.permute.xlu0 %8667  ;;  %v3615_v4 = vsel %vm3599_vm6, %v3611_v47, %v8659_v8  ;;  %v3603_v59 = vsel %vm3599_vm6, %v3598_v42, %v8660_v19  ;;  %v3617_v16 = vsel %vm965_vm3, %v3616_v13, %v8665_v21  ;;  %v3620_v63 = vsel %vm965_vm3, %v3619_v18, %v8664_v11 }
 0x457   : > { %v8670_v20 = vunpack.i.h.bf16 %v8668_v48  ;;  %v8669_v45 = vunpack.i.l.bf16 %v8668_v48  ;;  %v3627_v32 = vpack.c.bf16 %v3615_v4, %v3614_v44  ;;  %v3626_v62 = vpack.c.bf16 %v3603_v59, %v3602_v49 }
 0x459   : > { %3933 = vmatprep.mubr.bf16.mxu1 %v3627_v32  ;;  %v3621_v12 = vsel %vm3599_vm6, %v3620_v63, %v8669_v45  ;;  %v3618_v9 = vsel %vm3599_vm6, %v3617_v16, %v8670_v20 }
 0x45a   : > { %3934 = vmatmul.mubr.bf16.gmra.mxu1 %v3626_v62  ;;  %v3629_v17 = vpack.c.bf16 %v3621_v12, %v3615_v4  ;;  %v3628_v22 = vpack.c.bf16 %v3618_v9, %v3603_v59 }
 0x45c   : > { %3982 = vmatprep.mubr.bf16.mxu0 %v3629_v17  ;;  %v9334_v17 = vld [vmem:[#allocation5] sm:$0xff] }
 0x45d   : > { %3983 = vmatmul.mubr.bf16.gmra.mxu0 %v3628_v22  ;;  %969 = vst.msk [vmem:[#allocation4 + $0x10] sm:$0x3] %vm968_vm2, %v9334_v17  ;;  %975 = vst.msk [vmem:[#allocation4 + $0x40] sm:$0x3] %vm968_vm2, %v9334_v17  ;;  %v8737_v22 = vld [vmem:[%s11248_s30 + $0x78] sm:$0xff]  }
 0x45e   : > { %972 = vst.msk [vmem:[#allocation4 + $0x28] sm:$0x3] %vm968_vm2, %v9334_v17  ;;  %978 = vst.msk [vmem:[#allocation4 + $0x58] sm:$0x3] %vm968_vm2, %v9334_v17  ;;  %7825 = vmatprep.subr.bf16.mxu1 %v8737_v22  ;;  %v8752_v22 = vld [vmem:[%s11248_s30] sm:$0xff]  }
 0x45f   : > { %981 = vst.msk [vmem:[#allocation4 + $0x70] sm:$0x3] %vm968_vm2, %v9334_v17  ;;  %984 = vst.msk [vmem:[#allocation4 + $0x88] sm:$0x3] %vm968_vm2, %v9334_v17 }
 0x4c2   : > { %v7785_v29 = vpop.f32.mrf.mxu1 }
 0x4c4   : > { %v7786_v30 = vpop.f32.mrf.mxu1 }
 0x4c5   : > { %v7787_v54 = vadd.f32 %v7786_v30, %v7785_v29  ;;  %v8738_v29 = vld [vmem:[%s11248_s30 + $0x38] sm:$0xff]   ;;  %v8739_v30 = vld [vmem:[%s11248_s30 + $0x70] sm:$0xff]  }
 0x4c6   : > { %v7788_v41 = vpop.f32.mrf.mxu1  ;;  %7826 = vmatpush3.bf16.msra.mxu1 %v8738_v29 }
 0x4c7   : > { %v3928_v51 = vadd.f32 %v7787_v54, %v7385_v38  ;;  %7827 = vmatprep.subr.bf16.mxu1 %v8739_v30  ;;  %v8741_v54 = vld [vmem:[%s11248_s30 + $0x68] sm:$0xff]   ;;  %v8753_v30 = vld [vmem:[%s11248_s30 + $0xf8] sm:$0xff]  }
 0x4c8   : > { %v7789_v60 = vpop.f32.mrf.mxu1  ;;  %7847 = vmatprep.subr.bf16.mxu0 %v8753_v30 }
 0x4c9   : > { %v7790_v56 = vadd.f32 %v7789_v60, %v7788_v41  ;;  %v8740_v41 = vld [vmem:[%s11248_s30 + $0x30] sm:$0xff]   ;;  %v8743_v60 = vld [vmem:[%s11248_s30 + $0x60] sm:$0xff]  }
 0x4ca   : > { %7828 = vmatpush3.bf16.msra.mxu1 %v8740_v41 }
 0x4cb   : > { %v3931_v33 = vadd.f32 %v7790_v56, %v7385_v38  ;;  %7829 = vmatprep.subr.bf16.mxu1 %v8741_v54  ;;  %v8746_v56 = vld [vmem:[%s11248_s30 + $0x18] sm:$0xff]   ;;  %v8755_v54 = vld [vmem:[%s11248_s30 + $0xf0] sm:$0xff]  }
 0x4f7   : > { %v7813_v10 = vpop.f32.mrf.mxu0 }
 0x4f9   : > { %v7814_v6 = vpop.f32.mrf.mxu0 }
 0x4fa   : > { %v7815_v39 = vadd.f32 %v7814_v6, %v7813_v10  ;;  %v8744_v10 = vld [vmem:[%s11248_s30 + $0x20] sm:$0xff]   ;;  %v8745_v6 = vld [vmem:[%s11248_s30 + $0x58] sm:$0xff]  }
 0x4fb   : > { %v7816_v36 = vpop.f32.mrf.mxu0 }
 0x4fc   : > { %v3977_v1 = vadd.f32 %v7815_v39, %v3928_v51 }
 0x4fd   : > { %v7817_v24 = vpop.f32.mrf.mxu0 }
 0x4fe   : > { %v7818_v15 = vadd.f32 %v7817_v24, %v7816_v36  ;;  %v3991_v35 = vsel %vm965_vm3, %v3977_v1, 0.0  ;;  %v8747_v36 = vld [vmem:[%s11248_s30 + $0x50] sm:$0xff]  }
 0x4ff   : > { %3992 = vadd.xlane.f32.xlu0 %v3991_v35  ;;  %v8749_v35 = vld [vmem:[%s11248_s30 + $0x48] sm:$0xff]  }
 0x500   : > { %v3980_v49 = vadd.f32 %v7818_v15, %v3931_v33  ;;  %v8748_v33 = vld [vmem:[%s11248_s30 + $0x10] sm:$0xff]  }
 0x502   : > { %v3994_v44 = vsel %vm965_vm3, %v3980_v49, 0.0 }
 0x503   : > { %3995 = vadd.xlane.f32.xlu1 %v3994_v44  ;;  %v8750_v44 = vld [vmem:[%s11248_s30 + $0x8] sm:$0xff]  }
 0x51a   : > { %v7791_v25 = vpop.f32.mrf.mxu1 }
 0x51c   : > { %v7792_v58 = vpop.f32.mrf.mxu1 }
 0x51d   : > { %v7793_v55 = vadd.f32 %v7792_v58, %v7791_v25  ;;  %v7819_v7 = vpop.f32.mrf.mxu0  ;;  %v7418_v25 = vld [vmem:[%s797_s18] ss:$0 sm:$0xff] }
 0x51e   : > { %v7794_v0 = vpop.f32.mrf.mxu1 }
 0x51f   : > { %v3936_v2 = vadd.f32 %v7793_v55, %v7385_v38  ;;  %v7820_v50 = vpop.f32.mrf.mxu0  ;;  %v7419_v55 = vld [vmem:[%s800_s1] ss:$0 sm:$0xff]  ;;  %s11844_s1 = sld [smem:[#allocation17_spill]] }
 0x520   : > { %v7821_v23 = vadd.f32 %v7820_v50, %v7819_v7  ;;  %v7795_v34 = vpop.f32.mrf.mxu1 }
 0x521   : > { %v7796_v27 = vadd.f32 %v7795_v34, %v7794_v0  ;;  %v7822_v57 = vpop.f32.mrf.mxu0 }
 0x522   : > { %v3985_v3 = vadd.f32 %v7821_v23, %v3936_v2 }
 0x523   : > { %v3939_v5 = vadd.f32 %v7796_v27, %v7385_v38  ;;  %v7823_v46 = vpop.f32.mrf.mxu0  ;;  %v8742_v38 = vld [vmem:[%s11248_s30 + $0x28] sm:$0xff]  }
 0x524   : > { %v7824_v26 = vadd.f32 %v7823_v46, %v7822_v57  ;;  %v3997_v31 = vsel %vm965_vm3, %v3985_v3, 0.0  ;;  %7830 = vmatpush3.bf16.msra.mxu1 %v8742_v38  ;;  %v4210_v38 = vld [vmem:[#allocation4 + $0x3] ss:$2 sm:$0xff] }
 0x525   : > { %3998 = vadd.xlane.f32.xlu0 %v3997_v31  ;;  %7831 = vmatprep.subr.bf16.mxu1 %v8743_v60  ;;  %v4186_v60 = vld [vmem:[#allocation4 + $0x1] ss:$2 sm:$0xff] }
 0x526   : > { %v3988_v61 = vadd.f32 %v7824_v26, %v3939_v5 }
 0x528   : > { %v4000_v52 = vsel %vm965_vm3, %v3988_v61, 0.0  ;;  %7832 = vmatpush3.bf16.msra.mxu1 %v8744_v10  ;;  %v8757_v10 = vld [vmem:[%s11248_s30 + $0x178] sm:$0xff]  }
 0x529   : > { %4001 = vadd.xlane.f32.xlu1 %v4000_v52  ;;  %7833 = vmatprep.subr.bf16.mxu1 %v8745_v6 }
 0x52c   : > { %7834 = vmatpush3.bf16.msra.mxu1 %v8746_v56  ;;  %v8756_v56 = vld [vmem:[%s11248_s30 + $0xb0] sm:$0xff]  }
 0x52d   : > { %7835 = vmatprep.subr.bf16.mxu1 %v8747_v36 }
 0x530   : > { %7836 = vmatpush3.bf16.msra.mxu1 %v8748_v33  ;;  %v8763_v33 = vld [vmem:[%s11248_s30 + $0xe0] sm:$0xff]  }
 0x531   : > { %7837 = vmatprep.subr.bf16.mxu1 %v8749_v35  ;;  %v8764_v35 = vld [vmem:[%s11248_s30 + $0xa0] sm:$0xff]  }
 0x534   : > { %7838 = vmatpush3.bf16.msra.mxu1 %v8750_v44  ;;  %v8767_v44 = vld [vmem:[%s11248_s30 + $0xd8] sm:$0xff]  }
 0x588   : > { %v3993_v19 = vpop.xlane.xlu0 %3992 }
 0x589   : > { %v4004_v8 = vmul.f32 0.015625, %v3993_v19 }
 0x58b   : > { %v11224_v21 = vsub.f32 %v3977_v1, %v4004_v8 }
 0x58c   : > { %v3996_v11 = vpop.xlane.xlu1 %3995 }
 0x58d   : > { %v4005_v53 = vmul.f32 0.015625, %v3996_v11  ;;  %v4012_v42 = vmul.f32 %v11224_v21, %v11224_v21 }
 0x58f   : > { %v11228_v47 = vsub.f32 %v3980_v49, %v4005_v53  ;;  %v4016_v13 = vsel %vm965_vm3, %v4012_v42, 0.0  ;;  %v11275_v53 = vand.u32 7, %v10982_v28  ;;  %v11278_v42 = vand.u32 7, %v10993_v14 }
 0x590   : > { %4017 = vadd.xlane.f32.xlu1 %v4016_v13 }
 0x591   : > { %v4013_v18 = vmul.f32 %v11228_v47, %v11228_v47  ;;  %vm4142_vm7 = vcmp.ge.s32.totalorder %v11275_v53, 1  ;;  %vm4146_vm8 = vcmp.le.s32.totalorder %v11275_v53, 4  ;;  %vm4143_vm10 = vcmp.ge.s32.totalorder %v11278_v42, 1 }
 0x592   : > { %vm4150_vm9 = vmand %vm4142_vm7, %vm4146_vm8  ;;  %vm4147_vm11 = vcmp.le.s32.totalorder %v11278_v42, 4  ;;  %vm5028_vm6 = vcmp.le.s32.totalorder %v11278_v42, 2  ;;  %v8993_v42 = vld [vmem:[%s11394_s28 + $0x470] ss:$8 sps:$4 sm:$0xff]  }
 0x593   : > { %v4019_v48 = vsel %vm965_vm3, %v4013_v18, 0.0  ;;  %vm4151_vm12 = vmand %vm4143_vm10, %vm4147_vm11 }
 0x594   : > { %4020 = vadd.xlane.f32.xlu0 %v4019_v48  ;;  %vm5030_vm2 = vmand %vm4143_vm10, %vm5028_vm6 }
 0x5ae   : > { %v3999_v4 = vpop.xlane.xlu0 %3998 }
 0x5af   : > { %v4006_v59 = vmul.f32 0.015625, %v3999_v4 }
 0x5b1   : > { %v11234_v20 = vsub.f32 %v3985_v3, %v4006_v59 }
 0x5b2   : > { %v4002_v45 = vpop.xlane.xlu1 %4001 }
 0x5b3   : > { %v4007_v32 = vmul.f32 0.015625, %v4002_v45  ;;  %v4014_v62 = vmul.f32 %v11234_v20, %v11234_v20 }
 0x5b5   : > { %v11238_v16 = vsub.f32 %v3988_v61, %v4007_v32  ;;  %v4022_v63 = vsel %vm965_vm3, %v4014_v62, 0.0 }
 0x5b6   : > { %4023 = vadd.xlane.f32.xlu0 %v4022_v63 }
 0x5b7   : > { %v4015_v12 = vmul.f32 %v11238_v16, %v11238_v16 }
 0x5b9   : > { %v4025_v9 = vsel %vm965_vm3, %v4015_v12, 0.0 }
 0x5ba   : > { %4026 = vadd.xlane.f32.xlu1 %v4025_v9  ;;  %v8751_v9 = vld [vmem:[%s11248_s30 + $0x40] sm:$0xff]  }
 0x5bb   : > { %7839 = vmatprep.subr.bf16.mxu1 %v8751_v9 }
 0x5bc   : > { %7840 = vmatpush3.bf16.msra.mxu1 %v8752_v22 }
 0x5bd   : > { %7869 = vmatprep.subr.bf16.mxu1 %v8757_v10  ;;  %v8761_v10 = vld [vmem:[%s11248_s30 + $0x170] sm:$0xff]  }
 0x619   : > { %v4018_v51 = vpop.xlane.xlu1 %4017 }
 0x61a   : > { %v4028_v39 = vmul.f32 0.015625, %v4018_v51 }
 0x61c   : > { %v4032_v1 = vadd.f32 1e-05, %v4028_v39 }
 0x61d   : > { %v4021_v24 = vpop.xlane.xlu0 %4020 }
 0x61e   : > { %9281 = vrsqrt.f32 %v4032_v1  ;;  %v4029_v15 = vmul.f32 0.015625, %v4021_v24  ;;  %v8759_v1 = vld [vmem:[%s11248_s30 + $0xe8] sm:$0xff]  }
 0x61f   : > { %v8760_v24 = vld [vmem:[%s11248_s30 + $0xa8] sm:$0xff]  }
 0x620   : > { %v4033_v49 = vadd.f32 1e-05, %v4029_v15 }
 0x622   : > { %9283 = vrsqrt.f32 %v4033_v49 }
 0x62b   : > { %v9282_v58 = vpop.eup %9281 }
 0x62c   : > { %v4040_v7 = vmul.f32 %v9282_v58, %v11224_v21  ;;  %v8768_v58 = vld [vmem:[%s11248_s30 + $0x98] sm:$0xff]  }
 0x62e   : > { %v4051_v0 = vmul.f32 %v7418_v25, %v4040_v7  ;;  %v8771_v7 = vld [vmem:[%s11248_s30 + $0xd0] sm:$0xff]  }
 0x62f   : > { %v9284_v2 = vpop.eup %9283 }
 0x630   : > { %v4062_v50 = vadd.f32 %v7419_v55, %v4051_v0  ;;  %v4041_v23 = vmul.f32 %v9284_v2, %v11228_v47  ;;  %v8772_v0 = vld [vmem:[%s11248_s30 + $0x90] sm:$0xff]   ;;  %v4112_v2 = vand.u32 7, %v10985_v37 }
 0x632   : > { %v7420_v34 = vmul.f32 -1.442695, %v4062_v50  ;;  %v4052_v27 = vmul.f32 %v7418_v25, %v4041_v23  ;;  %v8776_v23 = vld [vmem:[%s11248_s30 + $0x88] sm:$0xff]   ;;  %vm4144_vm13 = vcmp.ge.s32.totalorder %v4112_v2, 1  ;;  %vm4148_vm14 = vcmp.le.s32.totalorder %v4112_v2, 4 }
 0x633   : > { %vm4152_vm15 = vmand %vm4144_vm13, %vm4148_vm14 }
 0x634   : > { %9285 = vpow2.f32 %v7420_v34  ;;  %v4063_v57 = vadd.f32 %v7419_v55, %v4052_v27  ;;  %v4119_v34 = vand.u32 7, %v10989_v40 }
 0x636   : > { %v7421_v3 = vmul.f32 -1.442695, %v4063_v57  ;;  %vm4145_vm1 = vcmp.ge.s32.totalorder %v4119_v34, 1  ;;  %vm4149_vm0 = vcmp.le.s32.totalorder %v4119_v34, 4 }
 0x637   : > { %vm4153_vm4 = vmand %vm4145_vm1, %vm4149_vm0 }
 0x638   : > { %9287 = vpow2.f32 %v7421_v3 }
 0x63f   : > { %v4024_v5 = vpop.xlane.xlu0 %4023 }
 0x640   : > { %v4030_v46 = vmul.f32 0.015625, %v4024_v5  ;;  %v8779_v5 = vld [vmem:[%s11248_s30 + $0xc0] sm:$0xff]  }
 0x641   : > { %v9286_v26 = vpop.eup %9285 }
 0x642   : > { %v4078_v31 = vadd.f32 1.0, %v9286_v26  ;;  %v4034_v61 = vadd.f32 1e-05, %v4030_v46  ;;  %v8780_v46 = vld [vmem:[%s11248_s30 + $0x80] sm:$0xff]  }
 0x643   : > { %v4027_v52 = vpop.xlane.xlu1 %4026 }
 0x644   : > { %9289 = vrcp.f32 %v4078_v31  ;;  %v4031_v19 = vmul.f32 0.015625, %v4027_v52  ;;  %v8783_v31 = vld [vmem:[%s11248_s30 + $0x1f8] sm:$0xff]  }
 0x645   : > { %v9288_v8 = vpop.eup %9287  ;;  %9291 = vrsqrt.f32 %v4034_v61  ;;  %v4196_v52 = vld [vmem:[#allocation4 + $0x79] ss:$2 sm:$0xff] }
 0x646   : > { %v4079_v21 = vadd.f32 1.0, %v9288_v8  ;;  %v4035_v11 = vadd.f32 1e-05, %v4031_v19  ;;  %v4220_v19 = vld [vmem:[#allocation4 + $0x7b] ss:$2 sm:$0xff] }
 0x648   : > { %9293 = vrcp.f32 %v4079_v21 }
 0x649   : > { %9295 = vrsqrt.f32 %v4035_v11 }
 0x651   : > { %v9290_v47 = vpop.eup %9289 }
 0x652   : > { %v9292_v13 = vpop.eup %9291  ;;  %v4090_v18 = vmul.f32 %v9290_v47, %v4062_v50  ;;  %v8775_v50 = vld [vmem:[%s11248_s30 + $0xc8] sm:$0xff]  }
 0x653   : > { %v4042_v48 = vmul.f32 %v9292_v13, %v11234_v20 }
 0x654   : > { %v4162_v14 = vsel %vm4150_vm9, %v4090_v18, 0.0  ;;  %v8696_v18 = vpack.i.bf16 %v4196_v52, %v4220_v19  ;;  %v8785_v52 = vld [vmem:[%s11248_s30 + $0x1b8] sm:$0xff]  }
 0x655   : > { %v9294_v4 = vpop.eup %9293  ;;  %4167 = vst.msk [vmem:[#allocation4 + $0x1a] sm:$0xff] %vm965_vm3, %v4162_v14  ;;  %v4053_v59 = vmul.f32 %v7418_v25, %v4042_v48  ;;  %v4208_v19 = vld [vmem:[#allocation4 + $0x7a] ss:$2 sm:$0xff] }
 0x656   : > { %v9296_v45 = vpop.eup %9295  ;;  %v4091_v32 = vmul.f32 %v9294_v4, %v4063_v57 }
 0x657   : > { %v11290_v62 = vadd.f32 %v7419_v55, %v4053_v59  ;;  %v4043_v63 = vmul.f32 %v9296_v45, %v11238_v16  ;;  %v8754_v16 = vld [vmem:[%s11248_s30 + $0xb8] sm:$0xff]   ;;  %v4174_v59 = vld [vmem:[#allocation4] ss:$2 sm:$0xff] }
 0x658   : > { %v4163_v12 = vsel %vm4151_vm12, %v4091_v32, 0.0  ;;  %7848 = vmatpush3.bf16.msra.mxu0 %v8754_v16 }
 0x659   : > { %4169 = vst.msk [vmem:[#allocation4 + $0x32] sm:$0xff] %vm965_vm3, %v4163_v12  ;;  %v7422_v20 = vmul.f32 -1.442695, %v11290_v62  ;;  %v4054_v17 = vmul.f32 %v7418_v25, %v4043_v63  ;;  %7849 = vmatprep.subr.bf16.mxu0 %v8755_v54 }
 0x65b   : > { %9297 = vpow2.f32 %v7422_v20  ;;  %v11297_v29 = vadd.f32 %v7419_v55, %v4054_v17 }
 0x65c   : > { %7850 = vmatpush3.bf16.msra.mxu0 %v8756_v56  ;;  %v4212_v61 = vld [vmem:[#allocation4 + $0x1b] ss:$2 sm:$0xff]  ;;  %v4176_v2 = vld [vmem:[#allocation4 + $0x18] ss:$2 sm:$0xff] }
 0x65d   : > { %v7423_v41 = vmul.f32 -1.442695, %v11297_v29  ;;  %7851 = vmatprep.subr.bf16.mxu0 %v8759_v1  ;;  %v4188_v21 = vld [vmem:[#allocation4 + $0x19] ss:$2 sm:$0xff]  ;;  %v8766_v56 = vld [vmem:[%s11248_s30 + $0x128] sm:$0xff]  }
 0x65e   : > { %v8773_v1 = vld [vmem:[%s11248_s30 + $0x158] sm:$0xff]  }
 0x65f   : > { %9299 = vpow2.f32 %v7423_v41 }
 0x660   : > { %v4214_v6 = vld [vmem:[#allocation4 + $0x33] ss:$2 sm:$0xff]  ;;  %7852 = vmatpush3.bf16.msra.mxu0 %v8760_v24  ;;  %v4178_v17 = vld [vmem:[#allocation4 + $0x30] ss:$2 sm:$0xff] }
 0x661   : > { %v4190_v51 = vld [vmem:[#allocation4 + $0x31] ss:$2 sm:$0xff]  ;;  %v8671_v39 = vpack.i.bf16 %v4214_v6, %v4210_v38  ;;  %7853 = vmatprep.subr.bf16.mxu0 %v8763_v33  ;;  %v4202_v22 = vld [vmem:[#allocation4 + $0x32] ss:$2 sm:$0xff] }
 0x662   : > { %v8676_v36 = vpack.i.bf16 %v4190_v51, %v4186_v60  ;;  %v8758_v60 = vld [vmem:[%s11248_s30 + $0x138] sm:$0xff]   ;;  %v8762_v6 = vld [vmem:[%s11248_s30 + $0x130] sm:$0xff]   ;;  %v8765_v51 = vld [vmem:[%s11248_s30 + $0x168] sm:$0xff]  }
 0x663   : > { %8672 = vrot.lane.b32.xlu0 %v8671_v39, %s9391_s20  ;;  %v8769_v39 = vld [vmem:[%s11248_s30 + $0x160] sm:$0xff]   ;;  %v8774_v24 = vld [vmem:[%s11248_s30 + $0x118] sm:$0xff]   ;;  %v8777_v33 = vld [vmem:[%s11248_s30 + $0x150] sm:$0xff]  }
 0x664   : > { %8677 = vrot.lane.b32.xlu1 %v8676_v36, %s9391_s20  ;;  %7854 = vmatpush3.bf16.msra.mxu0 %v8764_v35  ;;  %v8770_v36 = vld [vmem:[%s11248_s30 + $0x120] sm:$0xff]   ;;  %v8781_v35 = vld [vmem:[%s11248_s30 + $0x148] sm:$0xff]  }
 0x665   : > { %7855 = vmatprep.subr.bf16.mxu0 %v8767_v44  ;;  %v8784_v44 = vld [vmem:[%s11248_s30 + $0x140] sm:$0xff]  }
 0x668   : > { %v9298_v15 = vpop.eup %9297  ;;  %7856 = vmatpush3.bf16.msra.mxu0 %v8768_v58 }
 0x669   : > { %v4080_v49 = vadd.f32 1.0, %v9298_v15  ;;  %7857 = vmatprep.subr.bf16.mxu0 %v8771_v7  ;;  %v8778_v15 = vld [vmem:[%s11248_s30 + $0x110] sm:$0xff]  }
 0x66b   : > { %9301 = vrcp.f32 %v4080_v49  ;;  %v8782_v49 = vld [vmem:[%s11248_s30 + $0x108] sm:$0xff]  }
 0x66c   : > { %v9300_v25 = vpop.eup %9299  ;;  %7858 = vmatpush3.bf16.msra.mxu0 %v8772_v0 }
 0x66d   : > { %v4081_v55 = vadd.f32 1.0, %v9300_v25  ;;  %7859 = vmatprep.subr.bf16.mxu0 %v8775_v50  ;;  %v8786_v25 = vld [vmem:[%s11248_s30 + $0x100] sm:$0xff]  }
 0x66f   : > { %9303 = vrcp.f32 %v4081_v55 }
 0x670   : > { %7860 = vmatpush3.bf16.msra.mxu0 %v8776_v23 }
 0x671   : > { %7861 = vmatprep.subr.bf16.mxu0 %v8779_v5 }
 0x674   : > { %7862 = vmatpush3.bf16.msra.mxu0 %v8780_v46 }
 0x675   : > { %7891 = vmatprep.subr.bf16.mxu0 %v8783_v31 }
 0x678   : > { %v9302_v27 = vpop.eup %9301 }
 0x679   : > { %v4092_v57 = vmul.f32 %v9302_v27, %v11290_v62  ;;  %v4198_v62 = vld [vmem:[#allocation4 + $0x2] ss:$2 sm:$0xff] }
 0x67a   : > { %v4200_v27 = vld [vmem:[#allocation4 + $0x1a] ss:$2 sm:$0xff] }
 0x67b   : > { %v4164_v37 = vsel %vm4152_vm15, %v4092_v57, 0.0 }
 0x67c   : > { %v9304_v3 = vpop.eup %9303  ;;  %4171 = vst.msk [vmem:[#allocation4 + $0x4a] sm:$0xff] %vm965_vm3, %v4164_v37 }
 0x67d   : > { %v4093_v26 = vmul.f32 %v9304_v3, %v11297_v29 }
 0x67f   : > { %v4165_v40 = vsel %vm4153_vm4, %v4093_v26, 0.0 }
 0x680   : > { %4173 = vst.msk [vmem:[#allocation4 + $0x62] sm:$0xff] %vm965_vm3, %v4165_v40 }
 0x683   : > { %v4216_v8 = vld [vmem:[#allocation4 + $0x4b] ss:$2 sm:$0xff]  ;;  %v4180_v34 = vld [vmem:[#allocation4 + $0x48] ss:$2 sm:$0xff] }
 0x684   : > { %v4192_v11 = vld [vmem:[#allocation4 + $0x49] ss:$2 sm:$0xff]  ;;  %v8681_v47 = vpack.i.bf16 %v4216_v8, %v4212_v61  ;;  %v4204_v57 = vld [vmem:[#allocation4 + $0x4a] ss:$2 sm:$0xff] }
 0x685   : > { %v8686_v13 = vpack.i.bf16 %v4192_v11, %v4188_v21 }
 0x686   : > { %8682 = vrot.lane.b32.xlu1 %v8681_v47, %s9391_s20  ;;  %v8787_v47 = vld [vmem:[%s11248_s30 + $0x1f0] sm:$0xff]  }
 0x687   : > { %8687 = vrot.lane.b32.xlu0 %v8686_v13, %s9391_s20  ;;  %v4194_v48 = vld [vmem:[#allocation4 + $0x61] ss:$2 sm:$0xff]  ;;  %v4182_v13 = vld [vmem:[#allocation4 + $0x60] ss:$2 sm:$0xff] }
 0x688   : > { %v4218_v14 = vld [vmem:[#allocation4 + $0x63] ss:$2 sm:$0xff] }
 0x689   : > { %v8691_v4 = vpack.i.bf16 %v4194_v48, %v4218_v14 }
 0x68b   : > { %8692 = vrot.lane.b32.xlu1 %v8691_v4, %s9391_s20  ;;  %8697 = vrot.lane.b32.xlu0 %v8696_v18, %s9391_s20  ;;  %v4206_v18 = vld [vmem:[#allocation4 + $0x62] ss:$2 sm:$0xff] }
 0x6d5   : > { %v8673_v32 = vpop.permute.xlu0 %8672 }
 0x6d6   : > { %v8678_v45 = vpop.permute.xlu1 %8677  ;;  %v8675_v9 = vunpack.i.h.bf16 %v8673_v32  ;;  %v8674_v20 = vunpack.i.l.bf16 %v8673_v32 }
 0x6d7   : > { %v8680_v63 = vunpack.i.h.bf16 %v8678_v45  ;;  %v8679_v12 = vunpack.i.l.bf16 %v8678_v45 }
 0x6d8   : > { %v4271_v41 = vsel %vm965_vm3, %v4198_v62, %v8674_v20  ;;  %v11336_v16 = vsel %vm965_vm3, %v4202_v22, %v8675_v9  ;;  %v8788_v62 = vld [vmem:[%s11248_s30 + $0x1b0] sm:$0xff]   ;;  %v8791_v9 = vld [vmem:[%s11248_s30 + $0x1e0] sm:$0xff]   ;;  %v8794_v22 = vld [vmem:[%s11248_s30 + $0x198] sm:$0xff]  }
 0x6d9   : > { %v4269_v29 = vsel %vm965_vm3, %v4174_v59, %v8679_v12  ;;  %v11332_v30 = vsel %vm965_vm3, %v4178_v17, %v8680_v63  ;;  %v4282_v38 = vpack.c.bf16 %v11336_v16, %v4271_v41  ;;  %v8789_v63 = vld [vmem:[%s11248_s30 + $0x1e8] sm:$0xff]   ;;  %v8792_v20 = vld [vmem:[%s11248_s30 + $0x1a0] sm:$0xff]   ;;  %v8793_v17 = vld [vmem:[%s11248_s30 + $0x1d8] sm:$0xff]  }
 0x6da   : > { %v4281_v54 = vpack.c.bf16 %v11332_v30, %v4269_v29  ;;  %v8790_v12 = vld [vmem:[%s11248_s30 + $0x1a8] sm:$0xff]   ;;  %v8795_v29 = vld [vmem:[%s11248_s30 + $0x1d0] sm:$0xff]  }
 0x6db   : > { %4840 = vmatprep.mubr.bf16.mxu1 %v4282_v38  ;;  %v8797_v41 = vld [vmem:[%s11248_s30 + $0x1c8] sm:$0xff]  }
 0x6dc   : > { %4841 = vmatmul.mubr.bf16.vlgmr.msra.gmra.mxu1 %v4281_v54  ;;  %v8799_v54 = vld [vmem:[%s11248_s30 + $0x1c0] sm:$0xff]  }
 0x6dd   : > { %7870 = vmatpush3.bf16.msra.mxu1 %v8758_v60  ;;  %v4184_v60 = vld [vmem:[#allocation4 + $0x78] ss:$2 sm:$0xff] }
 0x6de   : > { %7871 = vmatprep.subr.bf16.mxu1 %v8761_v10  ;;  %v8800_v10 = vld [vmem:[%s11248_s30 + $0x180] sm:$0xff]  }
 0x6e1   : > { %7872 = vmatpush3.bf16.msra.mxu1 %v8762_v6 }
 0x6e2   : > { %7873 = vmatprep.subr.bf16.mxu1 %v8765_v51 }
 0x6e5   : > { %7874 = vmatpush3.bf16.msra.mxu1 %v8766_v56 }
 0x6e6   : > { %7875 = vmatprep.subr.bf16.mxu1 %v8769_v39 }
 0x6e9   : > { %7876 = vmatpush3.bf16.msra.mxu1 %v8770_v36 }
 0x6ea   : > { %7877 = vmatprep.subr.bf16.mxu1 %v8773_v1 }
 0x6ed   : > { %7878 = vmatpush3.bf16.msra.mxu1 %v8774_v24 }
 0x6ee   : > { %7879 = vmatprep.subr.bf16.mxu1 %v8777_v33 }
 0x6f1   : > { %7880 = vmatpush3.bf16.msra.mxu1 %v8778_v15 }
 0x6f2   : > { %7881 = vmatprep.subr.bf16.mxu1 %v8781_v35 }
 0x6f5   : > { %7882 = vmatpush3.bf16.msra.mxu1 %v8782_v49 }
 0x6f6   : > { %7883 = vmatprep.subr.bf16.mxu1 %v8784_v44 }
 0x6f8   : > { %v8683_v58 = vpop.permute.xlu1 %8682 }
 0x6f9   : > { %v8688_v55 = vpop.permute.xlu0 %8687  ;;  %v8685_v7 = vunpack.i.h.bf16 %v8683_v58  ;;  %v8684_v0 = vunpack.i.l.bf16 %v8683_v58  ;;  %7884 = vmatpush3.bf16.msra.mxu1 %v8786_v25  ;;  %v7424_v25 = vld [vmem:[%s808_s22] ss:$0 sm:$0xff] }
 0x6fa   : > { %v8690_v50 = vunpack.i.h.bf16 %v8688_v55  ;;  %v8689_v23 = vunpack.i.l.bf16 %v8688_v55 }
 0x6fb   : > { %v4275_v5 = vsel %vm965_vm3, %v4200_v27, %v8684_v0  ;;  %v4276_v46 = vsel %vm965_vm3, %v4204_v57, %v8685_v7 }
 0x6fc   : > { %v4274_v37 = vsel %vm965_vm3, %v4180_v34, %v8690_v50  ;;  %v4273_v3 = vsel %vm965_vm3, %v4176_v2, %v8689_v23  ;;  %v4284_v61 = vpack.c.bf16 %v4276_v46, %v4275_v5 }
 0x6fd   : > { %v4283_v26 = vpack.c.bf16 %v4274_v37, %v4273_v3  ;;  %v8693_v40 = vpop.permute.xlu1 %8692  ;;  %v8698_v31 = vpop.permute.xlu0 %8697 }
 0x6fe   : > { %v8695_v8 = vunpack.i.h.bf16 %v8693_v40  ;;  %v8694_v21 = vunpack.i.l.bf16 %v8693_v40  ;;  %v8699_v11 = vunpack.i.l.bf16 %v8698_v31  ;;  %4881 = vmatprep.mubr.bf16.mxu0 %v4284_v61  ;;  %v8700_v38 = vunpack.i.h.bf16 %v8698_v31 }
 0x6ff   : > { %4882 = vmatmul.mubr.bf16.vlgmr.msra.gmra.mxu0 %v4283_v26 }
 0x700   : > { %v4277_v48 = vsel %vm965_vm3, %v4182_v13, %v8695_v8  ;;  %v4278_v14 = vsel %vm965_vm3, %v4206_v18, %v8694_v21  ;;  %v4280_v4 = vsel %vm965_vm3, %v4208_v19, %v8699_v11  ;;  %7892 = vmatpush3.bf16.msra.mxu0 %v8785_v52  ;;  %v4279_v6 = vsel %vm965_vm3, %v4184_v60, %v8700_v38  ;;  %v5049_v11 = vld [vmem:[#allocation5 + $0x1] ss:$2 sm:$0xff]  ;;  %v8833_v38 = vld [vmem:[%s11394_s28 + $0x24] ss:$8 sps:$4 sm:$0xff]  }
 0x701   : > { %v4285_v59 = vpack.c.bf16 %v4277_v48, %v11332_v30  ;;  %v4286_v45 = vpack.c.bf16 %v4278_v14, %v11336_v16  ;;  %v4288_v32 = vpack.c.bf16 %v4280_v4, %v4276_v46  ;;  %7893 = vmatprep.subr.bf16.mxu0 %v8787_v47  ;;  %v8796_v30 = vld [vmem:[%s11248_s30 + $0x190] sm:$0xff]   ;;  %v8798_v16 = vld [vmem:[%s11248_s30 + $0x188] sm:$0xff]   ;;  %v4287_v51 = vpack.c.bf16 %v4279_v6, %v4274_v37  ;;  %s831_s30 = scalar_lea.vmem %s11764_s16, %s7317_s0 }
 0x702   : > { %v5073_v47 = vpack.c.bf16 %v5049_v11, %v5049_v11  ;;  %v8801_v13 = vld [vmem:[%s11394_s28 + $0x70] ss:$8 sps:$4 sm:$0xff]   ;;  %v8803_v18 = vld [vmem:[%s11394_s28 + $0x74] ss:$8 sps:$4 sm:$0xff]   ;;  %v8807_v4 = vld [vmem:[%s11394_s28 + $0x60] ss:$8 sps:$4 sm:$0xff]  }
 0x703   : > { %4922 = vmatprep.mubr.bf16.mxu1 %v4286_v45  ;;  %4963 = vmatprep.mubr.bf16.mxu0 %v4288_v32  ;;  %v8804_v48 = vld [vmem:[%s11394_s28 + $0x170] ss:$8 sps:$4 sm:$0xff]   ;;  %v8806_v14 = vld [vmem:[%s11394_s28 + $0x174] ss:$8 sps:$4 sm:$0xff]   ;;  %v8810_v45 = vld [vmem:[%s11394_s28 + $0x160] ss:$8 sps:$4 sm:$0xff]  }
 0x704   : > { %4923 = vmatmul.mubr.bf16.vlgmr.msra.gmra.mxu1 %v4285_v59  ;;  %7894 = vmatpush3.bf16.msra.mxu0 %v8788_v62  ;;  %v8809_v59 = vld [vmem:[%s11394_s28 + $0x64] ss:$8 sps:$4 sm:$0xff]   ;;  %v8815_v62 = vld [vmem:[%s11394_s28 + $0x54] ss:$8 sps:$4 sm:$0xff]   ;;  %v8834_v6 = vld [vmem:[%s11394_s28 + $0x120] ss:$8 sps:$4 sm:$0xff]  }
 0x705   : > { %7895 = vmatprep.subr.bf16.mxu0 %v8789_v63  ;;  %6668 = vmatprep.mubr.bf16.mxu1 %v5073_v47  ;;  %v8812_v32 = vld [vmem:[%s11394_s28 + $0x164] ss:$8 sps:$4 sm:$0xff]   ;;  %v8813_v63 = vld [vmem:[%s11394_s28 + $0x50] ss:$8 sps:$4 sm:$0xff]   ;;  %v8887_v11 = vld [vmem:[%s11394_s28 + $0x94] ss:$8 sps:$4 sm:$0xff]  }
 0x706   : > { %6636 = vmatprep.subr.bf16.mxu1 %v8803_v18  ;;  %v8836_v60 = vld [vmem:[%s11394_s28 + $0x124] ss:$8 sps:$4 sm:$0xff]   ;;  %v8890_v47 = vld [vmem:[%s11394_s28 + $0x194] ss:$8 sps:$4 sm:$0xff]   ;;  %v8888_v18 = vld [vmem:[%s11394_s28 + $0x190] ss:$8 sps:$4 sm:$0xff]  }
 0x707   : > { %6637 = vmatpush1.bf16.msra.mxu1 %v8801_v13  ;;  %v8885_v13 = vld [vmem:[%s11394_s28 + $0x90] ss:$8 sps:$4 sm:$0xff]   ;;  %vm5027_vm3 = vcmp.le.s32.totalorder %v11275_v53, 2  ;;  %v11560_v53 = vsub.s32 0, %v10982_v28 }
 0x708   : > { %7896 = vmatpush3.bf16.msra.mxu0 %v8790_v12  ;;  %6638 = vmatprep.subr.bf16.mxu1 %v8809_v59  ;;  %v8818_v12 = vld [vmem:[%s11394_s28 + $0x154] ss:$8 sps:$4 sm:$0xff]   ;;  %v8894_v59 = vld [vmem:[%s11394_s28 + $0x180] ss:$8 sps:$4 sm:$0xff]   ;;  %vm5029_vm5 = vmand %vm4142_vm7, %vm5027_vm3  ;;  %vm7044_vm7 = vcmp.lt.s32.totalorder %v3063_v43, 256 }
 0x709   : > { %7897 = vmatprep.subr.bf16.mxu0 %v8791_v9  ;;  %v8816_v9 = vld [vmem:[%s11394_s28 + $0x150] ss:$8 sps:$4 sm:$0xff]  }
 0x70b   : > { %6639 = vmatpush1.bf16.msra.mxu1 %v8807_v4  ;;  %v8891_v4 = vld [vmem:[%s11394_s28 + $0x80] ss:$8 sps:$4 sm:$0xff]  }
 0x70c   : > { %7898 = vmatpush3.bf16.msra.mxu0 %v8792_v20  ;;  %6640 = vmatprep.subr.bf16.mxu1 %v8815_v62  ;;  %v8821_v20 = vld [vmem:[%s11394_s28 + $0x44] ss:$8 sps:$4 sm:$0xff]  }
 0x70d   : > { %7899 = vmatprep.subr.bf16.mxu0 %v8793_v17  ;;  %v8824_v17 = vld [vmem:[%s11394_s28 + $0x144] ss:$8 sps:$4 sm:$0xff]  }
 0x70f   : > { %6641 = vmatpush1.bf16.msra.mxu1 %v8813_v63 }
 0x710   : > { %7900 = vmatpush3.bf16.msra.mxu0 %v8794_v22  ;;  %v8819_v22 = vld [vmem:[%s11394_s28 + $0x40] ss:$8 sps:$4 sm:$0xff]   ;;  %6642 = vmatprep.subr.bf16.mxu1 %v8821_v20 }
 0x711   : > { %7901 = vmatprep.subr.bf16.mxu0 %v8795_v29  ;;  %v8822_v29 = vld [vmem:[%s11394_s28 + $0x140] ss:$8 sps:$4 sm:$0xff]  }
 0x713   : > { %6643 = vmatpush1.bf16.msra.mxu1 %v8819_v22  ;;  %v5041_v22 = vld [vmem:[#allocation5] ss:$2 sm:$0xff] }
 0x714   : > { %7902 = vmatpush3.bf16.msra.mxu0 %v8796_v30  ;;  %v8827_v30 = vld [vmem:[%s11394_s28 + $0x34] ss:$8 sps:$4 sm:$0xff]  }
 0x715   : > { %7903 = vmatprep.subr.bf16.mxu0 %v8797_v41  ;;  %v8830_v41 = vld [vmem:[%s11394_s28 + $0x134] ss:$8 sps:$4 sm:$0xff]   ;;  %6644 = vmatprep.subr.bf16.mxu1 %v8827_v30 }
 0x718   : > { %7904 = vmatpush3.bf16.msra.mxu0 %v8798_v16  ;;  %v8825_v16 = vld [vmem:[%s11394_s28 + $0x30] ss:$8 sps:$4 sm:$0xff]  }
 0x719   : > { %7905 = vmatprep.subr.bf16.mxu0 %v8799_v54  ;;  %v8828_v54 = vld [vmem:[%s11394_s28 + $0x130] ss:$8 sps:$4 sm:$0xff]   ;;  %6645 = vmatpush1.bf16.msra.mxu1 %v8825_v16 }
 0x71a   : > { %6646 = vmatprep.subr.bf16.mxu1 %v8833_v38  ;;  %v8897_v38 = vld [vmem:[%s11394_s28 + $0x270] ss:$8 sps:$4 sm:$0xff]  }
 0x71c   : > { %7906 = vmatpush3.bf16.msra.mxu0 %v8800_v10  ;;  %v8831_v10 = vld [vmem:[%s11394_s28 + $0x20] ss:$8 sps:$4 sm:$0xff]  }
 0x71d   : > { %6677 = vmatprep.subr.bf16.mxu0 %v8806_v14  ;;  %6647 = vmatpush1.bf16.msra.mxu1 %v8831_v10  ;;  %v8896_v14 = vld [vmem:[%s11394_s28 + $0x184] ss:$8 sps:$4 sm:$0xff]  }
 0x71e   : > { %v8905_v10 = vld [vmem:[%s11394_s28 + $0x264] ss:$8 sps:$4 sm:$0xff]  }
 0x71f   : > { %4964 = vmatmul.mubr.bf16.vlgmr.msra.gmra.mxu0 %v4287_v51  ;;  %v8839_v51 = vld [vmem:[%s11394_s28 + $0x14] ss:$8 sps:$4 sm:$0xff]  }
 0x720   : > { %6678 = vmatpush1.bf16.msra.mxu0 %v8804_v48  ;;  %6648 = vmatprep.subr.bf16.mxu1 %v8839_v51  ;;  %v8893_v48 = vld [vmem:[%s11394_s28 + $0x84] ss:$8 sps:$4 sm:$0xff]   ;;  %v8903_v51 = vld [vmem:[%s11394_s28 + $0x260] ss:$8 sps:$4 sm:$0xff]  }
 0x721   : > { %6679 = vmatprep.subr.bf16.mxu0 %v8812_v32 }
 0x724   : > { %6680 = vmatpush1.bf16.msra.mxu0 %v8810_v45 }
 0x725   : > { %6681 = vmatprep.subr.bf16.mxu0 %v8818_v12 }
 0x728   : > { %6682 = vmatpush1.bf16.msra.mxu0 %v8816_v9 }
 0x729   : > { %6683 = vmatprep.subr.bf16.mxu0 %v8824_v17 }
 0x72c   : > { %6684 = vmatpush1.bf16.msra.mxu0 %v8822_v29  ;;  %v5065_v29 = vld [vmem:[#allocation5 + $0x3] ss:$2 sm:$0xff] }
 0x72d   : > { %6685 = vmatprep.subr.bf16.mxu0 %v8830_v41  ;;  %v5075_v30 = vpack.c.bf16 %v5065_v29, %v5065_v29  ;;  %v5057_v41 = vld [vmem:[#allocation5 + $0x2] ss:$2 sm:$0xff] }
 0x72e   : > { %v5074_v16 = vpack.c.bf16 %v5057_v41, %v5057_v41  ;;  %v8975_v29 = vld [vmem:[%s11394_s28 + $0x2a0] ss:$8 sps:$4 sm:$0xff]   ;;  %v8983_v41 = vld [vmem:[%s11394_s28 + $0x294] ss:$8 sps:$4 sm:$0xff]  }
 0x72f   : > { %6709 = vmatprep.mubr.bf16.mxu0 %v5075_v30  ;;  %v8978_v30 = vld [vmem:[%s11394_s28 + $0x3a0] ss:$8 sps:$4 sm:$0xff]  }
 0x730   : > { %6686 = vmatpush1.bf16.msra.mxu0 %v8828_v54  ;;  %v8902_v54 = vld [vmem:[%s11394_s28 + $0x374] ss:$8 sps:$4 sm:$0xff]  }
 0x731   : > { %6687 = vmatprep.subr.bf16.mxu0 %v8836_v60  ;;  %v8900_v60 = vld [vmem:[%s11394_s28 + $0x370] ss:$8 sps:$4 sm:$0xff]  }
 0x734   : > { %6688 = vmatpush1.bf16.msra.mxu0 %v8834_v6  ;;  %v8908_v6 = vld [vmem:[%s11394_s28 + $0x364] ss:$8 sps:$4 sm:$0xff]  }
 0x79c   : > { %v7841_v56 = vpop.f32.mrf.mxu1 }
 0x79e   : > { %v7842_v39 = vpop.f32.mrf.mxu1 }
 0x79f   : > { %v7843_v44 = vadd.f32 %v7842_v39, %v7841_v56  ;;  %v8842_v56 = vld [vmem:[%s11394_s28 + $0x114] ss:$8 sps:$4 sm:$0xff]   ;;  %v8837_v39 = vld [vmem:[%s11394_s28 + $0x10] ss:$8 sps:$4 sm:$0xff]  }
 0x7a0   : > { %v7844_v36 = vpop.f32.mrf.mxu1  ;;  %6689 = vmatprep.subr.bf16.mxu0 %v8842_v56  ;;  %6649 = vmatpush1.bf16.msra.mxu1 %v8837_v39  ;;  %v8906_v56 = vld [vmem:[%s11394_s28 + $0x360] ss:$8 sps:$4 sm:$0xff]   ;;  %v8911_v39 = vld [vmem:[%s11394_s28 + $0x254] ss:$8 sps:$4 sm:$0xff]  }
 0x7a1   : > { %v4843_v0 = vadd.f32 %v7843_v44, %v7424_v25  ;;  %v8849_v44 = vld [vmem:[%s11394_s28 + $0xf0] ss:$8 sps:$4 sm:$0xff]  }
 0x7a2   : > { %v7845_v1 = vpop.f32.mrf.mxu1 }
 0x7a3   : > { %v7846_v2 = vadd.f32 %v7845_v1, %v7844_v36  ;;  %v8840_v36 = vld [vmem:[%s11394_s28 + $0x110] ss:$8 sps:$4 sm:$0xff]   ;;  %v8845_v1 = vld [vmem:[%s11394_s28 + $0x4] ss:$8 sps:$4 sm:$0xff]  }
 0x7a4   : > { %6690 = vmatpush1.bf16.msra.mxu0 %v8840_v36  ;;  %6650 = vmatprep.subr.bf16.mxu1 %v8845_v1  ;;  %v8914_v36 = vld [vmem:[%s11394_s28 + $0x354] ss:$8 sps:$4 sm:$0xff]   ;;  %v8909_v1 = vld [vmem:[%s11394_s28 + $0x250] ss:$8 sps:$4 sm:$0xff]  }
 0x7a5   : > { %v4846_v3 = vadd.f32 %v7846_v2, %v7424_v25  ;;  %v8852_v25 = vld [vmem:[%s11394_s28 + $0x1f0] ss:$8 sps:$4 sm:$0xff]   ;;  %v8863_v2 = vld [vmem:[%s11394_s28 + $0xd4] ss:$8 sps:$4 sm:$0xff]  }
 0x7bf   : > { %v7863_v24 = vpop.f32.mrf.mxu0 }
 0x7c1   : > { %v7864_v15 = vpop.f32.mrf.mxu0 }
 0x7c2   : > { %v7865_v55 = vadd.f32 %v7864_v15, %v7863_v24  ;;  %v8848_v24 = vld [vmem:[%s11394_s28 + $0x104] ss:$8 sps:$4 sm:$0xff]   ;;  %v8846_v15 = vld [vmem:[%s11394_s28 + $0x100] ss:$8 sps:$4 sm:$0xff]  }
 0x7c3   : > { %v7866_v49 = vpop.f32.mrf.mxu0  ;;  %6691 = vmatprep.subr.bf16.mxu0 %v8848_v24  ;;  %v8912_v24 = vld [vmem:[%s11394_s28 + $0x350] ss:$8 sps:$4 sm:$0xff]  }
 0x7c4   : > { %v7885_v33 = vpop.f32.mrf.mxu1  ;;  %v4884_v27 = vadd.f32 %v7865_v55, %v4843_v0  ;;  %6692 = vmatpush1.bf16.msra.mxu0 %v8846_v15  ;;  %v8860_v55 = vld [vmem:[%s11394_s28 + $0x1e4] ss:$8 sps:$4 sm:$0xff]   ;;  %v8858_v0 = vld [vmem:[%s11394_s28 + $0x1e0] ss:$8 sps:$4 sm:$0xff]  }
 0x7c5   : > { %v7867_v7 = vpop.f32.mrf.mxu0  ;;  %v8920_v15 = vld [vmem:[%s11394_s28 + $0x344] ss:$8 sps:$4 sm:$0xff]  }
 0x7c6   : > { %v7886_v35 = vpop.f32.mrf.mxu1  ;;  %v7868_v57 = vadd.f32 %v7867_v7, %v7866_v49  ;;  %v8854_v49 = vld [vmem:[%s11394_s28 + $0x1f4] ss:$8 sps:$4 sm:$0xff]   ;;  %v8855_v7 = vld [vmem:[%s11394_s28 + $0xe0] ss:$8 sps:$4 sm:$0xff]  }
 0x7c7   : > { %v7887_v50 = vadd.f32 %v7886_v35, %v7885_v33  ;;  %v8843_v33 = vld [vmem:[%s11394_s28] ss:$8 sps:$4 sm:$0xff]   ;;  %v8851_v35 = vld [vmem:[%s11394_s28 + $0xf4] ss:$8 sps:$4 sm:$0xff]   ;;  %6693 = vmatprep.subr.bf16.mxu0 %v8854_v49 }
 0x7c8   : > { %v7888_v58 = vpop.f32.mrf.mxu1  ;;  %v4887_v31 = vadd.f32 %v7868_v57, %v4846_v3  ;;  %6651 = vmatpush1.bf16.msra.mxu1 %v8843_v33  ;;  %6694 = vmatpush2.bf16.msra.mxu0 %v8852_v25  ;;  %v8867_v57 = vld [vmem:[%s11394_s28 + $0xc0] ss:$8 sps:$4 sm:$0xff]   ;;  %v8917_v33 = vld [vmem:[%s11394_s28 + $0x244] ss:$8 sps:$4 sm:$0xff]   ;;  %v8926_v25 = vld [vmem:[%s11394_s28 + $0x334] ss:$8 sps:$4 sm:$0xff]  }
 0x7c9   : > { %v4925_v5 = vadd.f32 %v7887_v50, %v4884_v27  ;;  %6652 = vmatprep.subr.bf16.mxu1 %v8851_v35  ;;  %6695 = vmatprep.subr.bf16.mxu0 %v8860_v55  ;;  %v8866_v50 = vld [vmem:[%s11394_s28 + $0x1d4] ss:$8 sps:$4 sm:$0xff]   ;;  %v8869_v27 = vld [vmem:[%s11394_s28 + $0xc4] ss:$8 sps:$4 sm:$0xff]   ;;  %v8870_v3 = vld [vmem:[%s11394_s28 + $0x1c0] ss:$8 sps:$4 sm:$0xff]  }
 0x7ca   : > { %v7889_v23 = vpop.f32.mrf.mxu1  ;;  %v8915_v35 = vld [vmem:[%s11394_s28 + $0x240] ss:$8 sps:$4 sm:$0xff]   ;;  %v8924_v55 = vld [vmem:[%s11394_s28 + $0x330] ss:$8 sps:$4 sm:$0xff]  }
 0x7cb   : > { %v7890_v46 = vadd.f32 %v7889_v23, %v7888_v58  ;;  %v8857_v58 = vld [vmem:[%s11394_s28 + $0xe4] ss:$8 sps:$4 sm:$0xff]   ;;  %v8861_v23 = vld [vmem:[%s11394_s28 + $0xd0] ss:$8 sps:$4 sm:$0xff]   ;;  %v8918_v49 = vld [vmem:[%s11394_s28 + $0x340] ss:$8 sps:$4 sm:$0xff]  }
 0x7cc   : > { %6653 = vmatpush2.bf16.msra.mxu1 %v8849_v44  ;;  %6696 = vmatpush2.bf16.msra.mxu0 %v8858_v0  ;;  %v8923_v44 = vld [vmem:[%s11394_s28 + $0x234] ss:$8 sps:$4 sm:$0xff]   ;;  %v8932_v0 = vld [vmem:[%s11394_s28 + $0x324] ss:$8 sps:$4 sm:$0xff]  }
 0x7cd   : > { %v4928_v19 = vadd.f32 %v7890_v46, %v4887_v31  ;;  %6654 = vmatprep.subr.bf16.mxu1 %v8857_v58  ;;  %6697 = vmatprep.subr.bf16.mxu0 %v8866_v50  ;;  %v8878_v46 = vld [vmem:[%s11394_s28 + $0x1b4] ss:$8 sps:$4 sm:$0xff]   ;;  %v8881_v31 = vld [vmem:[%s11394_s28 + $0xa4] ss:$8 sps:$4 sm:$0xff]   ;;  %v8921_v58 = vld [vmem:[%s11394_s28 + $0x230] ss:$8 sps:$4 sm:$0xff]  }
 0x7ce   : > { %v8930_v50 = vld [vmem:[%s11394_s28 + $0x320] ss:$8 sps:$4 sm:$0xff]  }
 0x7d0   : > { %6655 = vmatpush2.bf16.msra.mxu1 %v8855_v7  ;;  %v8929_v7 = vld [vmem:[%s11394_s28 + $0x224] ss:$8 sps:$4 sm:$0xff]  }
 0x7d1   : > { %6656 = vmatprep.subr.bf16.mxu1 %v8863_v2  ;;  %v8927_v2 = vld [vmem:[%s11394_s28 + $0x220] ss:$8 sps:$4 sm:$0xff]  }
 0x7d4   : > { %6657 = vmatpush2.bf16.msra.mxu1 %v8861_v23  ;;  %v8935_v23 = vld [vmem:[%s11394_s28 + $0x214] ss:$8 sps:$4 sm:$0xff]  }
 0x7d5   : > { %6658 = vmatprep.subr.bf16.mxu1 %v8869_v27  ;;  %v8933_v27 = vld [vmem:[%s11394_s28 + $0x210] ss:$8 sps:$4 sm:$0xff]  }
 0x7d8   : > { %6659 = vmatpush2.bf16.msra.mxu1 %v8867_v57  ;;  %v8936_v57 = vld [vmem:[%s11394_s28 + $0x310] ss:$8 sps:$4 sm:$0xff]  }
 0x7df   : > { %v7907_v34 = vpop.f32.mrf.mxu0 }
 0x7e1   : > { %v7908_v37 = vpop.f32.mrf.mxu0 }
 0x7e2   : > { %v7909_v26 = vadd.f32 %v7908_v37, %v7907_v34  ;;  %v8864_v34 = vld [vmem:[%s11394_s28 + $0x1d0] ss:$8 sps:$4 sm:$0xff]   ;;  %v8872_v37 = vld [vmem:[%s11394_s28 + $0x1c4] ss:$8 sps:$4 sm:$0xff]  }
 0x7e3   : > { %v7910_v40 = vpop.f32.mrf.mxu0  ;;  %6698 = vmatpush2.bf16.msra.mxu0 %v8864_v34  ;;  %v8938_v34 = vld [vmem:[%s11394_s28 + $0x314] ss:$8 sps:$4 sm:$0xff]  }
 0x7e4   : > { %v11384_v61 = vadd.f32 %v7909_v26, %v4925_v5  ;;  %v8875_v5 = vld [vmem:[%s11394_s28 + $0xb4] ss:$8 sps:$4 sm:$0xff]   ;;  %6699 = vmatprep.subr.bf16.mxu0 %v8872_v37  ;;  %v8873_v26 = vld [vmem:[%s11394_s28 + $0xb0] ss:$8 sps:$4 sm:$0xff]   ;;  %v8941_v37 = vld [vmem:[%s11394_s28 + $0x204] ss:$8 sps:$4 sm:$0xff]  }
 0x7e5   : > { %v7911_v52 = vpop.f32.mrf.mxu0  ;;  %6660 = vmatprep.subr.bf16.mxu1 %v8875_v5  ;;  %v8939_v5 = vld [vmem:[%s11394_s28 + $0x200] ss:$8 sps:$4 sm:$0xff]  }
 0x7e6   : > { %v7912_v8 = vadd.f32 %v7911_v52, %v7910_v40  ;;  %4972 = vadd.xlane.f32.xlu1 %v11384_v61  ;;  %v8876_v40 = vld [vmem:[%s11394_s28 + $0x1b0] ss:$8 sps:$4 sm:$0xff]   ;;  %v8884_v52 = vld [vmem:[%s11394_s28 + $0x1a4] ss:$8 sps:$4 sm:$0xff]   ;;  %6661 = vmatpush2.bf16.msra.mxu1 %v8873_v26  ;;  %v8947_v26 = vld [vmem:[%s11394_s28 + $0x2f4] ss:$8 sps:$4 sm:$0xff]  }
 0x7e7   : > { %6700 = vmatpush2.bf16.msra.mxu0 %v8870_v3  ;;  %6662 = vmatprep.subr.bf16.mxu1 %v8881_v31  ;;  %v8944_v3 = vld [vmem:[%s11394_s28 + $0x304] ss:$8 sps:$4 sm:$0xff]   ;;  %v8945_v31 = vld [vmem:[%s11394_s28 + $0x2f0] ss:$8 sps:$4 sm:$0xff]  }
 0x7e8   : > { %v11387_v21 = vadd.f32 %v7912_v8, %v4928_v19  ;;  %6701 = vmatprep.subr.bf16.mxu0 %v8878_v46  ;;  %v8879_v19 = vld [vmem:[%s11394_s28 + $0xa0] ss:$8 sps:$4 sm:$0xff]  }
 0x7e9   : > { %v8882_v8 = vld [vmem:[%s11394_s28 + $0x1a0] ss:$8 sps:$4 sm:$0xff]  }
 0x7ea   : > { %4974 = vadd.xlane.f32.xlu0 %v11387_v21  ;;  %6663 = vmatpush2.bf16.msra.mxu1 %v8879_v19  ;;  %v8942_v46 = vld [vmem:[%s11394_s28 + $0x300] ss:$8 sps:$4 sm:$0xff]   ;;  %v8953_v19 = vld [vmem:[%s11394_s28 + $0x2e4] ss:$8 sps:$4 sm:$0xff]  }
 0x7eb   : > { %6702 = vmatpush2.bf16.msra.mxu0 %v8876_v40  ;;  %6664 = vmatprep.subr.bf16.mxu1 %v8887_v11  ;;  %v8950_v40 = vld [vmem:[%s11394_s28 + $0x3f4] ss:$8 sps:$4 sm:$0xff]   ;;  %v8951_v11 = vld [vmem:[%s11394_s28 + $0x2e0] ss:$8 sps:$4 sm:$0xff]  }
 0x7ec   : > { %6703 = vmatprep.subr.bf16.mxu0 %v8884_v52  ;;  %v8948_v52 = vld [vmem:[%s11394_s28 + $0x3f0] ss:$8 sps:$4 sm:$0xff]  }
 0x7ee   : > { %6665 = vmatpush2.bf16.msra.mxu1 %v8885_v13  ;;  %v8959_v13 = vld [vmem:[%s11394_s28 + $0x2d4] ss:$8 sps:$4 sm:$0xff]  }
 0x7ef   : > { %6704 = vmatpush2.bf16.msra.mxu0 %v8882_v8  ;;  %6666 = vmatprep.subr.bf16.mxu1 %v8893_v48  ;;  %v8956_v8 = vld [vmem:[%s11394_s28 + $0x3e4] ss:$8 sps:$4 sm:$0xff]   ;;  %v8957_v48 = vld [vmem:[%s11394_s28 + $0x2d0] ss:$8 sps:$4 sm:$0xff]  }
 0x7f0   : > { %6705 = vmatprep.subr.bf16.mxu0 %v8890_v47  ;;  %v8954_v47 = vld [vmem:[%s11394_s28 + $0x3e0] ss:$8 sps:$4 sm:$0xff]  }
 0x7f2   : > { %6667 = vmatpush2.bf16.msra.mxu1 %v8891_v4  ;;  %v8965_v4 = vld [vmem:[%s11394_s28 + $0x2c4] ss:$8 sps:$4 sm:$0xff]  }
 0x7f3   : > { %6706 = vmatpush2.bf16.msra.mxu0 %v8888_v18  ;;  %v8962_v18 = vld [vmem:[%s11394_s28 + $0x3d4] ss:$8 sps:$4 sm:$0xff]  }
 0x7f4   : > { %6707 = vmatprep.subr.bf16.mxu0 %v8896_v14  ;;  %v8960_v14 = vld [vmem:[%s11394_s28 + $0x3d0] ss:$8 sps:$4 sm:$0xff]  }
 0x7f7   : > { %6708 = vmatpush2.bf16.msra.mxu0 %v8894_v59  ;;  %v8968_v59 = vld [vmem:[%s11394_s28 + $0x3c4] ss:$8 sps:$4 sm:$0xff]  }
 0x7f8   : > { %6759 = vmatprep.subr.bf16.mxu0 %v8902_v54  ;;  %v8984_v54 = vld [vmem:[%s11394_s28 + $0x390] ss:$8 sps:$4 sm:$0xff]  }
 0x7fa   : > { %6710 = vmatmul.mubr.bf16.vlgmr.msra.gmra.mxu0 %v5074_v16  ;;  %v8986_v16 = vld [vmem:[%s11394_s28 + $0x394] ss:$8 sps:$4 sm:$0xff]  }
 0x7fb   : > { %6760 = vmatpush1.bf16.msra.mxu0 %v8900_v60  ;;  %v8992_v60 = vld [vmem:[%s11394_s28 + $0x384] ss:$8 sps:$4 sm:$0xff]  }
 0x7fc   : > { %6761 = vmatprep.subr.bf16.mxu0 %v8908_v6  ;;  %v8990_v6 = vld [vmem:[%s11394_s28 + $0x380] ss:$8 sps:$4 sm:$0xff]  }
 0x7ff   : > { %6762 = vmatpush1.bf16.msra.mxu0 %v8906_v56  ;;  %v8998_v56 = vld [vmem:[%s11394_s28 + $0x574] ss:$8 sps:$4 sm:$0xff]  }
 0x800   : > { %6763 = vmatprep.subr.bf16.mxu0 %v8914_v36 }
 0x803   : > { %6764 = vmatpush1.bf16.msra.mxu0 %v8912_v24 }
 0x804   : > { %6765 = vmatprep.subr.bf16.mxu0 %v8920_v15 }
 0x807   : > { %6766 = vmatpush1.bf16.msra.mxu0 %v8918_v49  ;;  %v7489_v49 = vld [vmem:[%s811_s19] ss:$0 sm:$0xff] }
 0x808   : > { %6767 = vmatprep.subr.bf16.mxu0 %v8926_v25  ;;  %v7490_v25 = vld [vmem:[%s814_s21] ss:$0 sm:$0xff] }
 0x80b   : > { %6768 = vmatpush1.bf16.msra.mxu0 %v8924_v55 }
 0x80c   : > { %6769 = vmatprep.subr.bf16.mxu0 %v8932_v0 }
 0x80f   : > { %6770 = vmatpush1.bf16.msra.mxu0 %v8930_v50 }
 0x810   : > { %6771 = vmatprep.subr.bf16.mxu0 %v8938_v34 }
 0x813   : > { %6772 = vmatpush1.bf16.msra.mxu0 %v8936_v57 }
 0x814   : > { %6773 = vmatprep.subr.bf16.mxu0 %v8944_v3 }
 0x817   : > { %6774 = vmatpush1.bf16.msra.mxu0 %v8942_v46 }
 0x818   : > { %6775 = vmatprep.subr.bf16.mxu0 %v8950_v40 }
 0x81b   : > { %6776 = vmatpush2.bf16.msra.mxu0 %v8948_v52  ;;  %v5344_v52 = vld [vmem:[%s823_s17] sm:$0x3] }
 0x81c   : > { %6777 = vmatprep.subr.bf16.mxu0 %v8956_v8 }
 0x81f   : > { %6778 = vmatpush2.bf16.msra.mxu0 %v8954_v47 }
 0x820   : > { %6779 = vmatprep.subr.bf16.mxu0 %v8962_v18 }
 0x823   : > { %6780 = vmatpush2.bf16.msra.mxu0 %v8960_v14 }
 0x824   : > { %6781 = vmatprep.subr.bf16.mxu0 %v8968_v59 }
 0x86f   : > { %v4973_v45 = vpop.xlane.xlu1 %4972 }
 0x870   : > { %v4977_v32 = vmul.f32 0.0078125, %v4973_v45  ;;  %v8963_v45 = vld [vmem:[%s11394_s28 + $0x2c0] ss:$8 sps:$4 sm:$0xff]  }
 0x872   : > { %v11461_v62 = vsub.f32 %v11384_v61, %v4977_v32  ;;  %v5072_v61 = vpack.c.bf16 %v5041_v22, %v5041_v22  ;;  %v8966_v32 = vld [vmem:[%s11394_s28 + $0x3c0] ss:$8 sps:$4 sm:$0xff]   ;;  %v8977_v22 = vld [vmem:[%s11394_s28 + $0x2a4] ss:$8 sps:$4 sm:$0xff]  }
 0x873   : > { %v4975_v63 = vpop.xlane.xlu0 %4974  ;;  %6782 = vmatpush2.bf16.msra.mxu0 %v8966_v32  ;;  %v11576_v32 = vld [vmem:[%s831_s30] sm:$0x3] }
 0x874   : > { %v4978_v12 = vmul.f32 0.0078125, %v4975_v63  ;;  %v4981_v9 = vmul.f32 %v11461_v62, %v11461_v62  ;;  %6669 = vmatmul.mubr.bf16.vlgmr.msra.gmra.mxu1 %v5072_v61  ;;  %v8971_v63 = vld [vmem:[%s11394_s28 + $0x2b4] ss:$8 sps:$4 sm:$0xff]   ;;  %v8980_v61 = vld [vmem:[%s11394_s28 + $0x3a4] ss:$8 sps:$4 sm:$0xff]  }
 0x876   : > { %v11466_v20 = vsub.f32 %v11387_v21, %v4978_v12  ;;  %4983 = vadd.xlane.f32.xlu0 %v4981_v9  ;;  %v8899_v21 = vld [vmem:[%s11394_s28 + $0x274] ss:$8 sps:$4 sm:$0xff]   ;;  %v8969_v9 = vld [vmem:[%s11394_s28 + $0x2b0] ss:$8 sps:$4 sm:$0xff]  }
 0x877   : > { %6718 = vmatprep.subr.bf16.mxu1 %v8899_v21  ;;  %v8974_v12 = vld [vmem:[%s11394_s28 + $0x3b4] ss:$8 sps:$4 sm:$0xff]   ;;  %v8981_v21 = vld [vmem:[%s11394_s28 + $0x290] ss:$8 sps:$4 sm:$0xff]  }
 0x878   : > { %v4982_v17 = vmul.f32 %v11466_v20, %v11466_v20  ;;  %6719 = vmatpush1.bf16.msra.mxu1 %v8897_v38  ;;  %6783 = vmatprep.subr.bf16.mxu0 %v8974_v12  ;;  %v8989_v38 = vld [vmem:[%s11394_s28 + $0x284] ss:$8 sps:$4 sm:$0xff]  }
 0x879   : > { %6720 = vmatprep.subr.bf16.mxu1 %v8905_v10  ;;  %v8987_v10 = vld [vmem:[%s11394_s28 + $0x280] ss:$8 sps:$4 sm:$0xff]   ;;  %v9001_v12 = vld [vmem:[%s11394_s28 + $0x464] ss:$8 sps:$4 sm:$0xff]  }
 0x87a   : > { %4985 = vadd.xlane.f32.xlu1 %v4982_v17  ;;  %v8972_v17 = vld [vmem:[%s11394_s28 + $0x3b0] ss:$8 sps:$4 sm:$0xff]  }
 0x87b   : > { %6784 = vmatpush2.bf16.msra.mxu0 %v8972_v17  ;;  %v5349_v17 = vrot.slane %v5344_v52, %v11560_v53 }
 0x87c   : > { %6721 = vmatpush1.bf16.msra.mxu1 %v8903_v51  ;;  %6785 = vmatprep.subr.bf16.mxu0 %v8980_v61  ;;  %v8995_v51 = vld [vmem:[%s11394_s28 + $0x474] ss:$8 sps:$4 sm:$0xff]  }
 0x87d   : > { %6722 = vmatprep.subr.bf16.mxu1 %v8911_v39 }
 0x87f   : > { %6786 = vmatpush2.bf16.msra.mxu0 %v8978_v30 }
 0x880   : > { %6723 = vmatpush1.bf16.msra.mxu1 %v8909_v1  ;;  %6787 = vmatprep.subr.bf16.mxu0 %v8986_v16  ;;  %v8999_v16 = vld [vmem:[%s11394_s28 + $0x460] ss:$8 sps:$4 sm:$0xff]  }
 0x881   : > { %6724 = vmatprep.subr.bf16.mxu1 %v8917_v33 }
 0x883   : > { %6788 = vmatpush2.bf16.msra.mxu0 %v8984_v54  ;;  %v9002_v54 = vld [vmem:[%s11394_s28 + $0x560] ss:$8 sps:$4 sm:$0xff]  }
 0x884   : > { %6725 = vmatpush1.bf16.msra.mxu1 %v8915_v35  ;;  %6789 = vmatprep.subr.bf16.mxu0 %v8992_v60 }
 0x885   : > { %6726 = vmatprep.subr.bf16.mxu1 %v8923_v44 }
 0x887   : > { %6790 = vmatpush2.bf16.msra.mxu0 %v8990_v6  ;;  %v9010_v6 = vld [vmem:[%s11394_s28 + $0x554] ss:$8 sps:$4 sm:$0xff]  }
 0x888   : > { %6727 = vmatpush1.bf16.msra.mxu1 %v8921_v58  ;;  %6841 = vmatprep.subr.bf16.mxu0 %v8998_v56 }
 0x889   : > { %6728 = vmatprep.subr.bf16.mxu1 %v8929_v7 }
 0x88c   : > { %6729 = vmatpush1.bf16.msra.mxu1 %v8927_v2 }
 0x88d   : > { %6730 = vmatprep.subr.bf16.mxu1 %v8935_v23 }
 0x890   : > { %6731 = vmatpush1.bf16.msra.mxu1 %v8933_v27 }
 0x891   : > { %6732 = vmatprep.subr.bf16.mxu1 %v8941_v37 }
 0x894   : > { %6733 = vmatpush1.bf16.msra.mxu1 %v8939_v5 }
 0x895   : > { %6734 = vmatprep.subr.bf16.mxu1 %v8947_v26 }
 0x898   : > { %6735 = vmatpush2.bf16.msra.mxu1 %v8945_v31  ;;  %v11563_v31 = vsub.s32 1, %v10982_v28 }
 0x899   : > { %6736 = vmatprep.subr.bf16.mxu1 %v8953_v19  ;;  %v11569_v19 = vld [vmem:[%s827_s26] sm:$0x3] }
 0x89a   : > { %v6990_v18 = vrot.slane %v11569_v19, %v11563_v31  ;;  %v7004_v61 = vrot.slane %v11576_v32, %v11563_v31 }
 0x89c   : > { %6737 = vmatpush2.bf16.msra.mxu1 %v8951_v11 }
 0x89d   : > { %6738 = vmatprep.subr.bf16.mxu1 %v8959_v13  ;;  %v6986_v13 = vrot.slane %v11569_v19, %v11560_v53  ;;  %v9393_v19 = vmov 1966171168  }
 0x8a0   : > { %6739 = vmatpush2.bf16.msra.mxu1 %v8957_v48 }
 0x8a1   : > { %6740 = vmatprep.subr.bf16.mxu1 %v8965_v4  ;;  %v8996_v4 = vld [vmem:[%s11394_s28 + $0x570] ss:$8 sps:$4 sm:$0xff]  }
 0x8a4   : > { %6741 = vmatpush2.bf16.msra.mxu1 %v8963_v45 }
 0x8a5   : > { %6742 = vmatprep.subr.bf16.mxu1 %v8971_v63 }
 0x8a8   : > { %6743 = vmatpush2.bf16.msra.mxu1 %v8969_v9  ;;  %v9004_v9 = vld [vmem:[%s11394_s28 + $0x564] ss:$8 sps:$4 sm:$0xff]  }
 0x8a9   : > { %6744 = vmatprep.subr.bf16.mxu1 %v8977_v22  ;;  %v7000_v22 = vrot.slane %v11576_v32, %v11560_v53 }
 0x8ac   : > { %6745 = vmatpush2.bf16.msra.mxu1 %v8975_v29 }
 0x8ad   : > { %6746 = vmatprep.subr.bf16.mxu1 %v8983_v41  ;;  %v5353_v41 = vrot.slane %v5344_v52, %v11563_v31  ;;  %v9035_v52 = vld [vmem:[%s11394_s28 + $0x400] ss:$8 sps:$4 sm:$0xff]  }
 0x8b0   : > { %6747 = vmatpush2.bf16.msra.mxu1 %v8981_v21 }
 0x8b1   : > { %6748 = vmatprep.subr.bf16.mxu1 %v8989_v38 }
 0x8b4   : > { %6749 = vmatpush2.bf16.msra.mxu1 %v8987_v10  ;;  %v9007_v10 = vld [vmem:[%s11394_s28 + $0x454] ss:$8 sps:$4 sm:$0xff]  }
 0x8b5   : > { %6800 = vmatprep.subr.bf16.mxu1 %v8995_v51 }
 0x8ff   : > { %v4984_v39 = vpop.xlane.xlu0 %4983 }
 0x900   : > { %v4987_v36 = vmul.f32 0.0078125, %v4984_v39  ;;  %v6711_v39 = vpop.f32.mrf.mxu0 }
 0x902   : > { %v4989_v1 = vadd.f32 1e-05, %v4987_v36 }
 0x903   : > { %v4986_v24 = vpop.xlane.xlu1 %4985 }
 0x904   : > { %9305 = vrsqrt.f32 %v4989_v1  ;;  %v4988_v33 = vmul.f32 0.0078125, %v4986_v24  ;;  %v9005_v24 = vld [vmem:[%s11394_s28 + $0x450] ss:$8 sps:$4 sm:$0xff]  }
 0x906   : > { %v4990_v15 = vadd.f32 1e-05, %v4988_v33  ;;  %v9008_v33 = vld [vmem:[%s11394_s28 + $0x550] ss:$8 sps:$4 sm:$0xff]  }
 0x908   : > { %9307 = vrsqrt.f32 %v4990_v15 }
 0x911   : > { %v9306_v35 = vpop.eup %9305 }
 0x912   : > { %v4993_v44 = vmul.f32 %v9306_v35, %v11461_v62  ;;  %v6713_v35 = vpop.f32.mrf.mxu0 }
 0x914   : > { %v5002_v58 = vmul.f32 %v7489_v49, %v4993_v44  ;;  %v9016_v44 = vld [vmem:[%s11394_s28 + $0x544] ss:$8 sps:$4 sm:$0xff]  }
 0x915   : > { %v9308_v55 = vpop.eup %9307 }
 0x916   : > { %v5011_v7 = vadd.f32 %v7490_v25, %v5002_v58  ;;  %v4994_v0 = vmul.f32 %v9308_v55, %v11466_v20  ;;  %v6715_v55 = vpop.f32.mrf.mxu0 }
 0x917   : > { %v9091_v55 = vld [vmem:[%s11394_s28 + $0x674] ss:$8 sps:$4 sm:$0xff]  }
 0x918   : > { %v7491_v2 = vmul.f32 -1.442695, %v5011_v7  ;;  %v5003_v50 = vmul.f32 %v7489_v49, %v4994_v0  ;;  %v9013_v49 = vld [vmem:[%s11394_s28 + $0x444] ss:$8 sps:$4 sm:$0xff]   ;;  %v9014_v0 = vld [vmem:[%s11394_s28 + $0x540] ss:$8 sps:$4 sm:$0xff]  }
 0x91a   : > { %9309 = vpow2.f32 %v7491_v2  ;;  %v5012_v23 = vadd.f32 %v7490_v25, %v5003_v50  ;;  %v6716_v2 = vpop.f32.mrf.mxu0  ;;  %v9019_v50 = vld [vmem:[%s11394_s28 + $0x434] ss:$8 sps:$4 sm:$0xff]  }
 0x91c   : > { %v7492_v34 = vmul.f32 -1.442695, %v5012_v23 }
 0x91e   : > { %9311 = vpow2.f32 %v7492_v34  ;;  %v9017_v34 = vld [vmem:[%s11394_s28 + $0x430] ss:$8 sps:$4 sm:$0xff]  }
 0x927   : > { %v9310_v27 = vpop.eup %9309 }
 0x928   : > { %v5019_v57 = vadd.f32 1.0, %v9310_v27  ;;  %v9020_v27 = vld [vmem:[%s11394_s28 + $0x530] ss:$8 sps:$4 sm:$0xff]  }
 0x92a   : > { %9313 = vrcp.f32 %v5019_v57  ;;  %v9025_v57 = vld [vmem:[%s11394_s28 + $0x424] ss:$8 sps:$4 sm:$0xff]  }
 0x92b   : > { %v9312_v37 = vpop.eup %9311 }
 0x92c   : > { %v5020_v3 = vadd.f32 1.0, %v9312_v37  ;;  %v9028_v37 = vld [vmem:[%s11394_s28 + $0x524] ss:$8 sps:$4 sm:$0xff]  }
 0x92e   : > { %9315 = vrcp.f32 %v5020_v3  ;;  %v9023_v3 = vld [vmem:[%s11394_s28 + $0x420] ss:$8 sps:$4 sm:$0xff]  }
 0x934   : > { %v6670_v60 = vpop.f32.mrf.mxu1 }
 0x935   : > { %v6671_v51 = vadd.f32 %v6670_v60, %v5349_v17  ;;  %v9053_v17 = vld [vmem:[%s11394_s28 + $0x4d0] ss:$8 sps:$4 sm:$0xff]  }
 0x936   : > { %v6672_v56 = vpop.f32.mrf.mxu1  ;;  %v9065_v60 = vld [vmem:[%s11394_s28 + $0x4b0] ss:$8 sps:$4 sm:$0xff]  }
 0x937   : > { %v9314_v62 = vpop.eup %9313  ;;  %v6673_v36 = vadd.f32 %v6672_v56, %v5353_v41  ;;  %v11590_v1 = vadd.f32 %v6711_v39, %v6671_v51  ;;  %v9064_v41 = vld [vmem:[%s11394_s28 + $0x5c4] ss:$8 sps:$4 sm:$0xff]   ;;  %v9071_v56 = vld [vmem:[%s11394_s28 + $0x4a0] ss:$8 sps:$4 sm:$0xff]  }
 0x938   : > { %v5025_v20 = vmul.f32 %v9314_v62, %v5011_v7  ;;  %v6674_v15 = vpop.f32.mrf.mxu1  ;;  %v9011_v7 = vld [vmem:[%s11394_s28 + $0x440] ss:$8 sps:$4 sm:$0xff]   ;;  %v9076_v51 = vld [vmem:[%s11394_s28 + $0x5a4] ss:$8 sps:$4 sm:$0xff]  }
 0x939   : > { %v11596_v25 = vadd.f32 %v6713_v35, %v6673_v36  ;;  %v9026_v62 = vld [vmem:[%s11394_s28 + $0x520] ss:$8 sps:$4 sm:$0xff]   ;;  %v9079_v36 = vld [vmem:[%s11394_s28 + $0x494] ss:$8 sps:$4 sm:$0xff]   ;;  %v9080_v15 = vld [vmem:[%s11394_s28 + $0x590] ss:$8 sps:$4 sm:$0xff]  }
 0x93a   : > { %v5035_v5 = vsel %vm5029_vm5, %v5025_v20, 0.0  ;;  %v6675_v58 = vpop.f32.mrf.mxu1  ;;  %v9031_v20 = vld [vmem:[%s11394_s28 + $0x414] ss:$8 sps:$4 sm:$0xff]   ;;  %v9074_v39 = vld [vmem:[%s11394_s28 + $0x5a0] ss:$8 sps:$4 sm:$0xff]  }
 0x93b   : > { %v9316_v46 = vpop.eup %9315  ;;  %5038 = vst [vmem:[#allocation5 + $0x1a] sm:$0xff] %v5035_v5  ;;  %v9034_v5 = vld [vmem:[%s11394_s28 + $0x514] ss:$8 sps:$4 sm:$0xff]   ;;  %v9085_v35 = vld [vmem:[%s11394_s28 + $0x484] ss:$8 sps:$4 sm:$0xff]  }
 0x93c   : > { %v5026_v26 = vmul.f32 %v9316_v46, %v5012_v23  ;;  %v9022_v23 = vld [vmem:[%s11394_s28 + $0x534] ss:$8 sps:$4 sm:$0xff]   ;;  %v9029_v46 = vld [vmem:[%s11394_s28 + $0x410] ss:$8 sps:$4 sm:$0xff]   ;;  %v9086_v58 = vld [vmem:[%s11394_s28 + $0x580] ss:$8 sps:$4 sm:$0xff]  }
 0x93e   : > { %v5036_v40 = vsel %vm5030_vm2, %v5026_v26, 0.0  ;;  %v9032_v26 = vld [vmem:[%s11394_s28 + $0x510] ss:$8 sps:$4 sm:$0xff]  }
 0x93f   : > { %5040 = vst [vmem:[#allocation5 + $0x32] sm:$0xff] %v5036_v40  ;;  %v9037_v40 = vld [vmem:[%s11394_s28 + $0x404] ss:$8 sps:$4 sm:$0xff]  }
 0x942   : > { %v5051_v8 = vld [vmem:[#allocation5 + $0x19] ss:$2 sm:$0xff]  ;;  %v5043_v47 = vld [vmem:[#allocation5 + $0x18] ss:$2 sm:$0xff] }
 0x943   : > { %v5067_v11 = vld [vmem:[#allocation5 + $0x1b] ss:$2 sm:$0xff]  ;;  %v5077_v48 = vpack.c.bf16 %v5051_v8, %v5051_v8  ;;  %v5076_v59 = vpack.c.bf16 %v5043_v47, %v5043_v47  ;;  %v5059_v45 = vld [vmem:[#allocation5 + $0x1a] ss:$2 sm:$0xff] }
 0x944   : > { %v5079_v14 = vpack.c.bf16 %v5067_v11, %v5067_v11  ;;  %v5078_v63 = vpack.c.bf16 %v5059_v45, %v5059_v45  ;;  %v9038_v8 = vld [vmem:[%s11394_s28 + $0x500] ss:$8 sps:$4 sm:$0xff]   ;;  %v9043_v11 = vld [vmem:[%s11394_s28 + $0x4f4] ss:$8 sps:$4 sm:$0xff]  }
 0x945   : > { %6750 = vmatprep.mubr.bf16.mxu1 %v5077_v48  ;;  %v9046_v47 = vld [vmem:[%s11394_s28 + $0x5f4] ss:$8 sps:$4 sm:$0xff]   ;;  %v9041_v48 = vld [vmem:[%s11394_s28 + $0x4f0] ss:$8 sps:$4 sm:$0xff]   ;;  %v9047_v45 = vld [vmem:[%s11394_s28 + $0x4e0] ss:$8 sps:$4 sm:$0xff]  }
 0x946   : > { %6791 = vmatprep.mubr.bf16.mxu0 %v5079_v14  ;;  %6751 = vmatmul.mubr.bf16.vlgmr.msra.gmra.mxu1 %v5076_v59  ;;  %v5053_v29 = vld [vmem:[#allocation5 + $0x31] ss:$2 sm:$0xff]  ;;  %v9044_v14 = vld [vmem:[%s11394_s28 + $0x5f0] ss:$8 sps:$4 sm:$0xff]  }
 0x947   : > { %6792 = vmatmul.mubr.bf16.vlgmr.msra.gmra.mxu0 %v5078_v63  ;;  %v5069_v30 = vld [vmem:[#allocation5 + $0x33] ss:$2 sm:$0xff]  ;;  %6801 = vmatpush1.bf16.msra.mxu1 %v8993_v42  ;;  %v5081_v21 = vpack.c.bf16 %v5053_v29, %v5053_v29  ;;  %v5061_v2 = vld [vmem:[#allocation5 + $0x32] ss:$2 sm:$0xff] }
 0x948   : > { %6842 = vmatpush1.bf16.msra.mxu0 %v8996_v4  ;;  %v5083_v38 = vpack.c.bf16 %v5069_v30, %v5069_v30  ;;  %6802 = vmatprep.subr.bf16.mxu1 %v9001_v12  ;;  %v9040_v42 = vld [vmem:[%s11394_s28 + $0x504] ss:$8 sps:$4 sm:$0xff]   ;;  %v9050_v63 = vld [vmem:[%s11394_s28 + $0x5e0] ss:$8 sps:$4 sm:$0xff]   ;;  %v9055_v12 = vld [vmem:[%s11394_s28 + $0x4d4] ss:$8 sps:$4 sm:$0xff]  }
 0x949   : > { %6843 = vmatprep.subr.bf16.mxu0 %v9004_v9  ;;  %6832 = vmatprep.mubr.bf16.mxu1 %v5081_v21  ;;  %v9049_v4 = vld [vmem:[%s11394_s28 + $0x4e4] ss:$8 sps:$4 sm:$0xff]   ;;  %v9058_v9 = vld [vmem:[%s11394_s28 + $0x5d4] ss:$8 sps:$4 sm:$0xff]   ;;  %v9056_v29 = vld [vmem:[%s11394_s28 + $0x5d0] ss:$8 sps:$4 sm:$0xff]  }
 0x94a   : > { %6873 = vmatprep.mubr.bf16.mxu0 %v5083_v38  ;;  %v9052_v59 = vld [vmem:[%s11394_s28 + $0x5e4] ss:$8 sps:$4 sm:$0xff]   ;;  %v9062_v21 = vld [vmem:[%s11394_s28 + $0x5c0] ss:$8 sps:$4 sm:$0xff]   ;;  %v9070_v38 = vld [vmem:[%s11394_s28 + $0x5b4] ss:$8 sps:$4 sm:$0xff]  }
 0x94b   : > { %6803 = vmatpush1.bf16.msra.mxu1 %v8999_v16  ;;  %v9061_v30 = vld [vmem:[%s11394_s28 + $0x4c4] ss:$8 sps:$4 sm:$0xff]   ;;  %v9059_v16 = vld [vmem:[%s11394_s28 + $0x4c0] ss:$8 sps:$4 sm:$0xff]  }
 0x94c   : > { %6844 = vmatpush1.bf16.msra.mxu0 %v9002_v54  ;;  %6804 = vmatprep.subr.bf16.mxu1 %v9007_v10  ;;  %v9067_v54 = vld [vmem:[%s11394_s28 + $0x4b4] ss:$8 sps:$4 sm:$0xff]   ;;  %v9068_v10 = vld [vmem:[%s11394_s28 + $0x5b0] ss:$8 sps:$4 sm:$0xff]  }
 0x94d   : > { %6845 = vmatprep.subr.bf16.mxu0 %v9010_v6  ;;  %v9073_v6 = vld [vmem:[%s11394_s28 + $0x4a4] ss:$8 sps:$4 sm:$0xff]  }
 0x94f   : > { %6805 = vmatpush1.bf16.msra.mxu1 %v9005_v24  ;;  %v9082_v24 = vld [vmem:[%s11394_s28 + $0x594] ss:$8 sps:$4 sm:$0xff]  }
 0x950   : > { %6846 = vmatpush1.bf16.msra.mxu0 %v9008_v33  ;;  %6806 = vmatprep.subr.bf16.mxu1 %v9013_v49  ;;  %v9077_v33 = vld [vmem:[%s11394_s28 + $0x490] ss:$8 sps:$4 sm:$0xff]   ;;  %v9088_v49 = vld [vmem:[%s11394_s28 + $0x584] ss:$8 sps:$4 sm:$0xff]  }
 0x951   : > { %6847 = vmatprep.subr.bf16.mxu0 %v9016_v44  ;;  %v9083_v44 = vld [vmem:[%s11394_s28 + $0x480] ss:$8 sps:$4 sm:$0xff]  }
 0x953   : > { %6807 = vmatpush1.bf16.msra.mxu1 %v9011_v7  ;;  %v9094_v7 = vld [vmem:[%s11394_s28 + $0x774] ss:$8 sps:$4 sm:$0xff]  }
 0x954   : > { %6848 = vmatpush1.bf16.msra.mxu0 %v9014_v0  ;;  %6808 = vmatprep.subr.bf16.mxu1 %v9019_v50  ;;  %v5045_v0 = vld [vmem:[#allocation5 + $0x30] ss:$2 sm:$0xff]  ;;  %v5055_v50 = vld [vmem:[#allocation5 + $0x49] ss:$2 sm:$0xff] }
 0x955   : > { %6849 = vmatprep.subr.bf16.mxu0 %v9022_v23  ;;  %v5071_v23 = vld [vmem:[#allocation5 + $0x4b] ss:$2 sm:$0xff] }
 0x957   : > { %6809 = vmatpush1.bf16.msra.mxu1 %v9017_v34  ;;  %v9089_v34 = vld [vmem:[%s11394_s28 + $0x670] ss:$8 sps:$4 sm:$0xff]  }
 0x958   : > { %6850 = vmatpush1.bf16.msra.mxu0 %v9020_v27  ;;  %6810 = vmatprep.subr.bf16.mxu1 %v9025_v57  ;;  %v9092_v27 = vld [vmem:[%s11394_s28 + $0x770] ss:$8 sps:$4 sm:$0xff]   ;;  %v5080_v57 = vpack.c.bf16 %v5045_v0, %v5045_v0  ;;  %v9155_v0 = vld [vmem:[%s11394_s28 + $0x6c0] ss:$8 sps:$4 sm:$0xff]  }
 0x959   : > { %6851 = vmatprep.subr.bf16.mxu0 %v9028_v37  ;;  %v5082_v37 = vpack.c.bf16 %v5061_v2, %v5061_v2  ;;  %v9158_v2 = vld [vmem:[%s11394_s28 + $0x7c0] ss:$8 sps:$4 sm:$0xff]  }
 0x95b   : > { %6811 = vmatpush1.bf16.msra.mxu1 %v9023_v3  ;;  %v9097_v3 = vld [vmem:[%s11394_s28 + $0x664] ss:$8 sps:$4 sm:$0xff]  }
 0x95c   : > { %6852 = vmatpush1.bf16.msra.mxu0 %v9026_v62  ;;  %6812 = vmatprep.subr.bf16.mxu1 %v9031_v20  ;;  %v9100_v62 = vld [vmem:[%s11394_s28 + $0x764] ss:$8 sps:$4 sm:$0xff]   ;;  %v5085_v20 = vpack.c.bf16 %v5055_v50, %v5055_v50  ;;  %v9163_v50 = vld [vmem:[%s11394_s28 + $0x6b4] ss:$8 sps:$4 sm:$0xff]  }
 0x95d   : > { %6853 = vmatprep.subr.bf16.mxu0 %v9034_v5  ;;  %v5087_v5 = vpack.c.bf16 %v5071_v23, %v5071_v23  ;;  %v9166_v23 = vld [vmem:[%s11394_s28 + $0x7b4] ss:$8 sps:$4 sm:$0xff]  }
 0x95f   : > { %6813 = vmatpush1.bf16.msra.mxu1 %v9029_v46  ;;  %v9095_v46 = vld [vmem:[%s11394_s28 + $0x660] ss:$8 sps:$4 sm:$0xff]  }
 0x960   : > { %6854 = vmatpush1.bf16.msra.mxu0 %v9032_v26  ;;  %6814 = vmatprep.subr.bf16.mxu1 %v9037_v40  ;;  %v9098_v26 = vld [vmem:[%s11394_s28 + $0x760] ss:$8 sps:$4 sm:$0xff]   ;;  %v9103_v40 = vld [vmem:[%s11394_s28 + $0x654] ss:$8 sps:$4 sm:$0xff]  }
 0x961   : > { %6855 = vmatprep.subr.bf16.mxu0 %v9040_v42  ;;  %v9106_v42 = vld [vmem:[%s11394_s28 + $0x754] ss:$8 sps:$4 sm:$0xff]  }
 0x963   : > { %6815 = vmatpush1.bf16.msra.mxu1 %v9035_v52  ;;  %v9101_v52 = vld [vmem:[%s11394_s28 + $0x650] ss:$8 sps:$4 sm:$0xff]  }
 0x964   : > { %6856 = vmatpush1.bf16.msra.mxu0 %v9038_v8  ;;  %6816 = vmatprep.subr.bf16.mxu1 %v9043_v11  ;;  %v9104_v8 = vld [vmem:[%s11394_s28 + $0x750] ss:$8 sps:$4 sm:$0xff]   ;;  %v9109_v11 = vld [vmem:[%s11394_s28 + $0x644] ss:$8 sps:$4 sm:$0xff]  }
 0x965   : > { %6857 = vmatprep.subr.bf16.mxu0 %v9046_v47  ;;  %v9112_v47 = vld [vmem:[%s11394_s28 + $0x744] ss:$8 sps:$4 sm:$0xff]  }
 0x967   : > { %6817 = vmatpush2.bf16.msra.mxu1 %v9041_v48  ;;  %v9107_v48 = vld [vmem:[%s11394_s28 + $0x640] ss:$8 sps:$4 sm:$0xff]  }
 0x968   : > { %6858 = vmatpush2.bf16.msra.mxu0 %v9044_v14  ;;  %6818 = vmatprep.subr.bf16.mxu1 %v9049_v4  ;;  %v9110_v14 = vld [vmem:[%s11394_s28 + $0x740] ss:$8 sps:$4 sm:$0xff]   ;;  %v9115_v4 = vld [vmem:[%s11394_s28 + $0x634] ss:$8 sps:$4 sm:$0xff]  }
 0x969   : > { %6859 = vmatprep.subr.bf16.mxu0 %v9052_v59  ;;  %v9118_v59 = vld [vmem:[%s11394_s28 + $0x734] ss:$8 sps:$4 sm:$0xff]  }
 0x96b   : > { %6819 = vmatpush2.bf16.msra.mxu1 %v9047_v45  ;;  %v9113_v45 = vld [vmem:[%s11394_s28 + $0x630] ss:$8 sps:$4 sm:$0xff]  }
 0x96c   : > { %6860 = vmatpush2.bf16.msra.mxu0 %v9050_v63  ;;  %6820 = vmatprep.subr.bf16.mxu1 %v9055_v12  ;;  %v9116_v63 = vld [vmem:[%s11394_s28 + $0x730] ss:$8 sps:$4 sm:$0xff]   ;;  %v9121_v12 = vld [vmem:[%s11394_s28 + $0x624] ss:$8 sps:$4 sm:$0xff]  }
 0x96d   : > { %6861 = vmatprep.subr.bf16.mxu0 %v9058_v9  ;;  %v9124_v9 = vld [vmem:[%s11394_s28 + $0x724] ss:$8 sps:$4 sm:$0xff]  }
 0x96f   : > { %6821 = vmatpush2.bf16.msra.mxu1 %v9053_v17  ;;  %v9119_v17 = vld [vmem:[%s11394_s28 + $0x620] ss:$8 sps:$4 sm:$0xff]  }
 0x970   : > { %6862 = vmatpush2.bf16.msra.mxu0 %v9056_v29  ;;  %6822 = vmatprep.subr.bf16.mxu1 %v9061_v30  ;;  %v9122_v29 = vld [vmem:[%s11394_s28 + $0x720] ss:$8 sps:$4 sm:$0xff]   ;;  %v9127_v30 = vld [vmem:[%s11394_s28 + $0x614] ss:$8 sps:$4 sm:$0xff]  }
 0x971   : > { %6863 = vmatprep.subr.bf16.mxu0 %v9064_v41  ;;  %v9130_v41 = vld [vmem:[%s11394_s28 + $0x714] ss:$8 sps:$4 sm:$0xff]  }
 0x973   : > { %6823 = vmatpush2.bf16.msra.mxu1 %v9059_v16  ;;  %v9125_v16 = vld [vmem:[%s11394_s28 + $0x610] ss:$8 sps:$4 sm:$0xff]  }
 0x974   : > { %6864 = vmatpush2.bf16.msra.mxu0 %v9062_v21  ;;  %6824 = vmatprep.subr.bf16.mxu1 %v9067_v54  ;;  %v9128_v21 = vld [vmem:[%s11394_s28 + $0x710] ss:$8 sps:$4 sm:$0xff]   ;;  %v9133_v54 = vld [vmem:[%s11394_s28 + $0x604] ss:$8 sps:$4 sm:$0xff]  }
 0x975   : > { %6865 = vmatprep.subr.bf16.mxu0 %v9070_v38  ;;  %v9136_v38 = vld [vmem:[%s11394_s28 + $0x704] ss:$8 sps:$4 sm:$0xff]  }
 0x977   : > { %6825 = vmatpush2.bf16.msra.mxu1 %v9065_v60  ;;  %v9131_v60 = vld [vmem:[%s11394_s28 + $0x600] ss:$8 sps:$4 sm:$0xff]  }
 0x978   : > { %6866 = vmatpush2.bf16.msra.mxu0 %v9068_v10  ;;  %6826 = vmatprep.subr.bf16.mxu1 %v9073_v6  ;;  %v9134_v10 = vld [vmem:[%s11394_s28 + $0x700] ss:$8 sps:$4 sm:$0xff]   ;;  %v9139_v6 = vld [vmem:[%s11394_s28 + $0x6f4] ss:$8 sps:$4 sm:$0xff]  }
 0x979   : > { %6867 = vmatprep.subr.bf16.mxu0 %v9076_v51  ;;  %v9142_v51 = vld [vmem:[%s11394_s28 + $0x7f4] ss:$8 sps:$4 sm:$0xff]  }
 0x97b   : > { %6827 = vmatpush2.bf16.msra.mxu1 %v9071_v56  ;;  %v9137_v56 = vld [vmem:[%s11394_s28 + $0x6f0] ss:$8 sps:$4 sm:$0xff]  }
 0x97c   : > { %6868 = vmatpush2.bf16.msra.mxu0 %v9074_v39  ;;  %6828 = vmatprep.subr.bf16.mxu1 %v9079_v36  ;;  %v9140_v39 = vld [vmem:[%s11394_s28 + $0x7f0] ss:$8 sps:$4 sm:$0xff]   ;;  %v9145_v36 = vld [vmem:[%s11394_s28 + $0x6e4] ss:$8 sps:$4 sm:$0xff]  }
 0x97d   : > { %6869 = vmatprep.subr.bf16.mxu0 %v9082_v24  ;;  %v9148_v24 = vld [vmem:[%s11394_s28 + $0x7e4] ss:$8 sps:$4 sm:$0xff]  }
 0x97f   : > { %6829 = vmatpush2.bf16.msra.mxu1 %v9077_v33  ;;  %v9143_v33 = vld [vmem:[%s11394_s28 + $0x6e0] ss:$8 sps:$4 sm:$0xff]  }
 0x980   : > { %6870 = vmatpush2.bf16.msra.mxu0 %v9080_v15  ;;  %6830 = vmatprep.subr.bf16.mxu1 %v9085_v35  ;;  %v9146_v15 = vld [vmem:[%s11394_s28 + $0x7e0] ss:$8 sps:$4 sm:$0xff]   ;;  %v9151_v35 = vld [vmem:[%s11394_s28 + $0x6d4] ss:$8 sps:$4 sm:$0xff]  }
 0x981   : > { %6871 = vmatprep.subr.bf16.mxu0 %v9088_v49  ;;  %v9154_v49 = vld [vmem:[%s11394_s28 + $0x7d4] ss:$8 sps:$4 sm:$0xff]  }
 0x983   : > { %6831 = vmatpush2.bf16.msra.mxu1 %v9083_v44  ;;  %v9149_v44 = vld [vmem:[%s11394_s28 + $0x6d0] ss:$8 sps:$4 sm:$0xff]  }
 0x984   : > { %6872 = vmatpush2.bf16.msra.mxu0 %v9086_v58  ;;  %6882 = vmatprep.subr.bf16.mxu1 %v9091_v55  ;;  %v9152_v58 = vld [vmem:[%s11394_s28 + $0x7d0] ss:$8 sps:$4 sm:$0xff]   ;;  %v9157_v55 = vld [vmem:[%s11394_s28 + $0x6c4] ss:$8 sps:$4 sm:$0xff]  }
 0x985   : > { %6923 = vmatprep.subr.bf16.mxu0 %v9094_v7  ;;  %v9160_v7 = vld [vmem:[%s11394_s28 + $0x7c4] ss:$8 sps:$4 sm:$0xff]  }
 0x986   : > { %6833 = vmatmul.mubr.bf16.vlgmr.msra.gmra.mxu1 %v5080_v57  ;;  %v9169_v57 = vld [vmem:[%s11394_s28 + $0x6a4] ss:$8 sps:$4 sm:$0xff]  }
 0x987   : > { %6874 = vmatmul.mubr.bf16.vlgmr.msra.gmra.mxu0 %v5082_v37  ;;  %6883 = vmatpush1.bf16.msra.mxu1 %v9089_v34  ;;  %v9161_v34 = vld [vmem:[%s11394_s28 + $0x6b0] ss:$8 sps:$4 sm:$0xff]   ;;  %v9172_v37 = vld [vmem:[%s11394_s28 + $0x7a4] ss:$8 sps:$4 sm:$0xff]  }
 0x988   : > { %6924 = vmatpush1.bf16.msra.mxu0 %v9092_v27  ;;  %6884 = vmatprep.subr.bf16.mxu1 %v9097_v3  ;;  %v9164_v27 = vld [vmem:[%s11394_s28 + $0x7b0] ss:$8 sps:$4 sm:$0xff]   ;;  %v9167_v3 = vld [vmem:[%s11394_s28 + $0x6a0] ss:$8 sps:$4 sm:$0xff]  }
 0x989   : > { %6925 = vmatprep.subr.bf16.mxu0 %v9100_v62  ;;  %6914 = vmatprep.mubr.bf16.mxu1 %v5085_v20  ;;  %v9170_v62 = vld [vmem:[%s11394_s28 + $0x7a0] ss:$8 sps:$4 sm:$0xff]   ;;  %v9175_v20 = vld [vmem:[%s11394_s28 + $0x694] ss:$8 sps:$4 sm:$0xff]  }
 0x98a   : > { %6955 = vmatprep.mubr.bf16.mxu0 %v5087_v5  ;;  %v9178_v5 = vld [vmem:[%s11394_s28 + $0x794] ss:$8 sps:$4 sm:$0xff]  }
 0x98b   : > { %6885 = vmatpush1.bf16.msra.mxu1 %v9095_v46  ;;  %v9173_v46 = vld [vmem:[%s11394_s28 + $0x690] ss:$8 sps:$4 sm:$0xff]  }
 0x98c   : > { %6926 = vmatpush1.bf16.msra.mxu0 %v9098_v26  ;;  %6886 = vmatprep.subr.bf16.mxu1 %v9103_v40  ;;  %v9176_v26 = vld [vmem:[%s11394_s28 + $0x790] ss:$8 sps:$4 sm:$0xff]   ;;  %v9181_v40 = vld [vmem:[%s11394_s28 + $0x684] ss:$8 sps:$4 sm:$0xff]  }
 0x98d   : > { %6927 = vmatprep.subr.bf16.mxu0 %v9106_v42  ;;  %v9184_v42 = vld [vmem:[%s11394_s28 + $0x784] ss:$8 sps:$4 sm:$0xff]  }
 0x98f   : > { %6887 = vmatpush1.bf16.msra.mxu1 %v9101_v52  ;;  %v9179_v52 = vld [vmem:[%s11394_s28 + $0x680] ss:$8 sps:$4 sm:$0xff]  }
 0x990   : > { %6928 = vmatpush1.bf16.msra.mxu0 %v9104_v8  ;;  %6888 = vmatprep.subr.bf16.mxu1 %v9109_v11  ;;  %v9182_v8 = vld [vmem:[%s11394_s28 + $0x780] ss:$8 sps:$4 sm:$0xff]   ;;  %s11843_s28 = sld [smem:[#allocation11_spill]] }
 0x991   : > { %6929 = vmatprep.subr.bf16.mxu0 %v9112_v47  ;;  %v5047_v11 = vld [vmem:[#allocation5 + $0x48] ss:$2 sm:$0xff] }
 0x992   : > { %v5063_v47 = vld [vmem:[#allocation5 + $0x4a] ss:$2 sm:$0xff] }
 0x993   : > { %6889 = vmatpush1.bf16.msra.mxu1 %v9107_v48  ;;  %v5084_v48 = vpack.c.bf16 %v5047_v11, %v5047_v11 }
 0x994   : > { %6930 = vmatpush1.bf16.msra.mxu0 %v9110_v14  ;;  %6890 = vmatprep.subr.bf16.mxu1 %v9115_v4  ;;  %v5086_v14 = vpack.c.bf16 %v5063_v47, %v5063_v47 }
 0x995   : > { %6931 = vmatprep.subr.bf16.mxu0 %v9118_v59 }
 0x996   : > { %s7320_s19 = sshll.u32 %s11843_s28, 1 }
 0x997   : > { %6891 = vmatpush1.bf16.msra.mxu1 %v9113_v45  ;;  %s838_s18 = sadd.s32 %s7321_s23, %s7320_s19 }
 0x998   : > { %6932 = vmatpush1.bf16.msra.mxu0 %v9116_v63  ;;  %6892 = vmatprep.subr.bf16.mxu1 %v9121_v12  ;;  %s839_s20 = scalar_lea.vmem %s11844_s1, %s838_s18 }
 0x999   : > { %6933 = vmatprep.subr.bf16.mxu0 %v9124_v9 }
 0x99b   : > { %6893 = vmatpush1.bf16.msra.mxu1 %v9119_v17 }
 0x99c   : > { %6934 = vmatpush1.bf16.msra.mxu0 %v9122_v29  ;;  %6894 = vmatprep.subr.bf16.mxu1 %v9127_v30 }
 0x99d   : > { %6935 = vmatprep.subr.bf16.mxu0 %v9130_v41 }
 0x99f   : > { %6895 = vmatpush1.bf16.msra.mxu1 %v9125_v16 }
 0x9a0   : > { %6936 = vmatpush1.bf16.msra.mxu0 %v9128_v21  ;;  %6896 = vmatprep.subr.bf16.mxu1 %v9133_v54 }
 0x9a1   : > { %6937 = vmatprep.subr.bf16.mxu0 %v9136_v38 }
 0x9a3   : > { %6897 = vmatpush1.bf16.msra.mxu1 %v9131_v60 }
 0x9a4   : > { %6938 = vmatpush1.bf16.msra.mxu0 %v9134_v10  ;;  %6898 = vmatprep.subr.bf16.mxu1 %v9139_v6 }
 0x9a5   : > { %6939 = vmatprep.subr.bf16.mxu0 %v9142_v51 }
 0x9a7   : > { %6899 = vmatpush2.bf16.msra.mxu1 %v9137_v56 }
 0x9a8   : > { %6940 = vmatpush2.bf16.msra.mxu0 %v9140_v39  ;;  %6900 = vmatprep.subr.bf16.mxu1 %v9145_v36 }
 0x9a9   : > { %6941 = vmatprep.subr.bf16.mxu0 %v9148_v24 }
 0x9ab   : > { %6901 = vmatpush2.bf16.msra.mxu1 %v9143_v33 }
 0x9ac   : > { %6942 = vmatpush2.bf16.msra.mxu0 %v9146_v15  ;;  %6902 = vmatprep.subr.bf16.mxu1 %v9151_v35 }
 0x9ad   : > { %6943 = vmatprep.subr.bf16.mxu0 %v9154_v49 }
 0x9af   : > { %6903 = vmatpush2.bf16.msra.mxu1 %v9149_v44 }
 0x9b0   : > { %6944 = vmatpush2.bf16.msra.mxu0 %v9152_v58  ;;  %6904 = vmatprep.subr.bf16.mxu1 %v9157_v55 }
 0x9b1   : > { %6945 = vmatprep.subr.bf16.mxu0 %v9160_v7 }
 0x9b3   : > { %6905 = vmatpush2.bf16.msra.mxu1 %v9155_v0 }
 0x9b4   : > { %6946 = vmatpush2.bf16.msra.mxu0 %v9158_v2  ;;  %6906 = vmatprep.subr.bf16.mxu1 %v9163_v50 }
 0x9b5   : > { %6947 = vmatprep.subr.bf16.mxu0 %v9166_v23 }
 0x9b7   : > { %6907 = vmatpush2.bf16.msra.mxu1 %v9161_v34 }
 0x9b8   : > { %6948 = vmatpush2.bf16.msra.mxu0 %v9164_v27  ;;  %6908 = vmatprep.subr.bf16.mxu1 %v9169_v57 }
 0x9b9   : > { %6949 = vmatprep.subr.bf16.mxu0 %v9172_v37 }
 0x9bb   : > { %6909 = vmatpush2.bf16.msra.mxu1 %v9167_v3 }
 0x9bc   : > { %6950 = vmatpush2.bf16.msra.mxu0 %v9170_v62  ;;  %6910 = vmatprep.subr.bf16.mxu1 %v9175_v20 }
 0x9bd   : > { %6951 = vmatprep.subr.bf16.mxu0 %v9178_v5 }
 0x9bf   : > { %6911 = vmatpush2.bf16.msra.mxu1 %v9173_v46 }
 0x9c0   : > { %6952 = vmatpush2.bf16.msra.mxu0 %v9176_v26  ;;  %6912 = vmatprep.subr.bf16.mxu1 %v9181_v40 }
 0x9c1   : > { %6953 = vmatprep.subr.bf16.mxu0 %v9184_v42 }
 0x9c3   : > { %6913 = vmatpush2.bf16.msra.mxu1 %v9179_v52 }
 0x9c4   : > { %6954 = vmatpush2.bf16.msra.mxu0 %v9182_v8 }
 0x9c6   : > { %6915 = vmatmul.mubr.bf16.vlgmr.msra.gmra.mxu1 %v5084_v48 }
 0x9c7   : > { %6956 = vmatmul.mubr.bf16.vlgmr.msra.gmra.mxu0 %v5086_v14 }
 0xa06   : > { %v6752_v4 = vpop.f32.mrf.mxu1 }
 0xa07   : > { %v6793_v59 = vpop.f32.mrf.mxu0  ;;  %v6753_v45 = vadd.f32 %v6752_v4, %v11590_v1 }
 0xa08   : > { %v6754_v63 = vpop.f32.mrf.mxu1 }
 0xa09   : > { %v6795_v12 = vpop.f32.mrf.mxu0  ;;  %v6794_v9 = vadd.f32 %v6793_v59, %v6753_v45  ;;  %v6755_v17 = vadd.f32 %v6754_v63, %v11596_v25 }
 0xa0a   : > { %v6756_v29 = vpop.f32.mrf.mxu1 }
 0xa0b   : > { %v6797_v30 = vpop.f32.mrf.mxu0  ;;  %v6796_v41 = vadd.f32 %v6795_v12, %v6755_v17 }
 0xa0c   : > { %v6757_v16 = vpop.f32.mrf.mxu1 }
 0xa0d   : > { %v6798_v21 = vpop.f32.mrf.mxu0 }
 0xa46   : > { %v6834_v54 = vpop.f32.mrf.mxu1 }
 0xa47   : > { %v6875_v38 = vpop.f32.mrf.mxu0  ;;  %v6835_v60 = vadd.f32 %v6834_v54, %v6794_v9 }
 0xa48   : > { %v6836_v10 = vpop.f32.mrf.mxu1 }
 0xa49   : > { %v6877_v6 = vpop.f32.mrf.mxu0  ;;  %v6876_v51 = vadd.f32 %v6875_v38, %v6835_v60  ;;  %v6837_v24 = vadd.f32 %v6836_v10, %v6796_v41 }
 0xa4a   : > { %v6838_v56 = vpop.f32.mrf.mxu1 }
 0xa4b   : > { %v6879_v39 = vpop.f32.mrf.mxu0  ;;  %v6878_v35 = vadd.f32 %v6877_v6, %v6837_v24 }
 0xa4c   : > { %v6839_v36 = vpop.f32.mrf.mxu1 }
 0xa4d   : > { %v6880_v1 = vpop.f32.mrf.mxu0 }
 0xa86   : > { %v6916_v33 = vpop.f32.mrf.mxu1 }
 0xa87   : > { %v6957_v15 = vpop.f32.mrf.mxu0  ;;  %v6917_v25 = vadd.f32 %v6916_v33, %v6876_v51 }
 0xa88   : > { %v6918_v49 = vpop.f32.mrf.mxu1 }
 0xa89   : > { %v6959_v44 = vpop.f32.mrf.mxu0  ;;  %v6919_v58 = vadd.f32 %v6918_v49, %v6878_v35  ;;  %v6958_v0 = vadd.f32 %v6957_v15, %v6917_v25 }
 0xa8a   : > { %v6920_v55 = vpop.f32.mrf.mxu1 }
 0xa8b   : > { %v6961_v7 = vpop.f32.mrf.mxu0  ;;  %v6960_v2 = vadd.f32 %v6959_v44, %v6919_v58 }
 0xa8c   : > { %v6921_v50 = vpop.f32.mrf.mxu1 }
 0xa8d   : > { %v6962_v23 = vpop.f32.mrf.mxu0  ;;  %v6964_v34 = vadd.f32 %v6960_v2, %v6958_v0 }
 0xa8f   : > { %6965 = vadd.xlane.f32.xlu0 %v6964_v34 }
 0xb18   : > { %v6966_v27 = vpop.xlane.xlu0 %6965 }
 0xb19   : > { %v6968_v57 = vmul.f32 0.00390625, %v6966_v27 }
 0xb1b   : > { %v6969_v37 = vsub.f32 %v6958_v0, %v6968_v57  ;;  %v6970_v3 = vsub.f32 %v6960_v2, %v6968_v57 }
 0xb1d   : > { %v6971_v62 = vmul.f32 %v6969_v37, %v6969_v37  ;;  %v6972_v20 = vmul.f32 %v6970_v3, %v6970_v3 }
 0xb1f   : > { %v6973_v5 = vadd.f32 %v6972_v20, %v6971_v62 }
 0xb21   : > { %6974 = vadd.xlane.f32.xlu1 %v6973_v5 }
 0xbaa   : > { %v6975_v46 = vpop.xlane.xlu1 %6974 }
 0xbab   : > { %v6976_v26 = vmul.f32 0.00390625, %v6975_v46 }
 0xbad   : > { %v6977_v40 = vadd.f32 1e-05, %v6976_v26 }
 0xbaf   : > { %9317 = vrsqrt.f32 %v6977_v40 }
 0xbbc   : > { %v9318_v42 = vpop.eup %9317 }
 0xbbd   : > { %v6979_v52 = vmul.f32 %v9318_v42, %v6969_v37  ;;  %v6980_v8 = vmul.f32 %v9318_v42, %v6970_v3 }
 0xbbf   : > { %v6993_v11 = vmul.f32 %v6986_v13, %v6979_v52  ;;  %v6994_v47 = vmul.f32 %v6990_v18, %v6980_v8  ;;  %v7027_v18 = vunpack.c.l.s4 %v9393_v19 }
 0xbc1   : > { %v7007_v48 = vadd.f32 %v7000_v22, %v6993_v11  ;;  %v7008_v14 = vadd.f32 %v7004_v61, %v6994_v47  ;;  %v7028_v53 = vunpack.c.0.s8 %v7027_v18 }
 0xbc3   : > { %v7749_v4 = vmul.f32 -1.442695, %v7007_v48  ;;  %v7750_v59 = vmul.f32 -1.442695, %v7008_v14  ;;  %v7031_v31 = vsub.s32 %v7028_v53, %v10982_v28 }
 0xbc5   : > { %9319 = vpow2.f32 %v7749_v4 }
 0xbc6   : > { %9321 = vpow2.f32 %v7750_v59 }
 0xbd2   : > { %v9320_v45 = vpop.eup %9319 }
 0xbd3   : > { %v9322_v13 = vpop.eup %9321  ;;  %v7015_v63 = vadd.f32 1.0, %v9320_v45 }
 0xbd4   : > { %v7016_v12 = vadd.f32 1.0, %v9322_v13 }
 0xbd5   : > { %9323 = vrcp.f32 %v7015_v63 }
 0xbd6   : > { %9325 = vrcp.f32 %v7016_v12 }
 0xbe2   : > { %v9324_v22 = vpop.eup %9323 }
 0xbe3   : > { %v9326_v9 = vpop.eup %9325  ;;  %v7021_v17 = vmul.f32 %v9324_v22, %v7007_v48 }
 0xbe4   : > { %v7022_v32 = vmul.f32 %v9326_v9, %v7008_v14 }
 0xbe6   : > { %v7025_v61 = vcombine.low %v7021_v17, %v7022_v32 }
 0xbe8   : > { %v7032_v29 = vrot.slane %v7025_v61, %v7031_v31 }
 0xbea   : > { %v7033_v30 = vcombine.high %v7032_v29, %v7032_v29 }
 0xbec   : > { %v7040_v41 = vrot.slane %v7033_v30, %v7031_v31 }
 0xbee   : > { %7046 = vst.msk [vmem:[%s839_s20] sm:$0x3] %vm7044_vm7, %v7040_v41 }
 0xbef PF: > { %s11845_s17 = sld [smem:[#allocation8_spill]] }
 0xbf0   : > { %s11846_s24 = sld [smem:[#allocation6_spill]] }
 0xbf1   : > { %s11847_s25 = sld [smem:[#allocation7_spill]] }
 0xbf2   : > { %s11848_s26 = sld [smem:[#allocation9_spill]] }
 0xbf3   : > { %s11849_s27 = sld [smem:[#allocation10_spill]] }
 0xbf5   : > { %s27_s28 = sadd.s32 1, %s11845_s17  }
 0xbf6   : > { %p24_p7 = scmp.ge.s32.totalorder %s27_s28, 6  }
 0xbf8   :  { %26 = sbr.rel (!%p24_p7) target bundleno = 4 (0x4), region = 401 }

</bundles_post_ra>
